<compile_context>
chip_gen: v7x
topology: tpu7x:2x2x1
jax: 0.10.0
libtpu: 0.0.40
codegen_flags: <defaults>
</compile_context>

<pallas_src>
import functools

import jax
import jax.numpy as jnp
from jax.experimental import pallas as pl
from jax.experimental.pallas import tpu as pltpu

INPUT_DIM = 436            # per-timestep history feature size
HIST_PAD = 448             # 436 padded up to a multiple of 16 (bf16 sublane tile)
HIDDEN = 256               # LSTM hidden size
X_DIM = 1197 - 3 * 108     # 873, non-oracle observation size
X_PAD = 896                # 873 padded up to a multiple of 128
FC1_OUT = 768
FC2_OUT = 512
FC_REST = 512
OUT_DIM = 1


def _pad_batch(n):
    return max(8, ((n + 7) // 8) * 8)


def mainmodel_kernel(
    # ---- inputs (auto-DMA'd to VMEM) ----
    x_ref,        # (Bp, 896)       f32   zero-padded observation
    hist_ref,     # (T*Bp, 448)     bf16  time-major flattened, padded history
    w_ih_ref,     # (448, 1024)     bf16  LSTM input weights (transposed, i,f,o,g)
    w_hh_ref,     # (256, 1024)     bf16  LSTM recurrent weights (transposed, i,f,o,g)
    b_lstm_ref,   # (1, 1024)       f32   b_ih + b_hh (permuted to i,f,o,g)
    b1_ref,       # (1, 768)        f32
    b2_ref,       # (1, 512)        f32
    b3_ref,       # (1, 512)        f32
    b4_ref,       # (1, 512)        f32
    b5_ref,       # (1, 512)        f32
    wf_ref,       # (1, 512)        f32   fc_final weight as a row vector
    bf_ref,       # (1, 1)          f32
    # ---- inputs left in HBM (pl.ANY), copied manually ----
    w1x_hbm,      # (896, 768)      bf16
    w1h_hbm,      # (256, 768)      bf16
    w2_hbm,       # (768, 512)      bf16
    w345_hbm,     # (3, 512, 512)   bf16  stacked fc_rest weights
    # ---- output ----
    o_ref,        # (Bp, 1)         f32
    # ---- scratch ----
    w1x_vmem, w1h_vmem, w2_vmem, w345_vmem,   # VMEM landing buffers
    dma_sem,                                  # DMA semaphores, shape (4,)
):
    Bp = x_ref.shape[0]
    T = hist_ref.shape[0] // Bp

    # Kick off the MLP-head weight DMA (HBM -> VMEM) right away so it overlaps
    # with the LSTM recurrence; waits are staggered per consumer below.
    # TODO(synk): use DMA priority (w1x/w1h high, w345 low) once exposed on start().
    cp_w1x = pltpu.make_async_copy(w1x_hbm, w1x_vmem, dma_sem.at[0])
    cp_w1h = pltpu.make_async_copy(w1h_hbm, w1h_vmem, dma_sem.at[1])
    cp_w2 = pltpu.make_async_copy(w2_hbm, w2_vmem, dma_sem.at[2])
    cp_w345 = pltpu.make_async_copy(w345_hbm, w345_vmem, dma_sem.at[3])
    cp_w1x.start()
    cp_w1h.start()
    cp_w2.start()
    cp_w345.start()

    # ---- LSTM ----
    # Hoisted input projection: one MXU-friendly matmul for all timesteps,
    # bias folded in.  gx rows [t*Bp:(t+1)*Bp] correspond to timestep t and
    # start on an 8-sublane boundary (Bp is a multiple of 8).
    gx = (
        jnp.dot(hist_ref[...], w_ih_ref[...], preferred_element_type=jnp.float32)
        + b_lstm_ref[...]
    )                                                                 # (T*Bp, 1024)

    w_hh = w_hh_ref[...]                                              # (256, 1024) bf16

    h = jnp.zeros((Bp, HIDDEN), jnp.float32)
    c = jnp.zeros((Bp, HIDDEN), jnp.float32)

    # Fully unrolled recurrence (T is static and small): only the h @ W_hh
    # matmul + gate math sit on the serial dependency chain.  Gate columns
    # are pre-permuted to (i, f, o, g): one sigmoid over [0:768], one tanh
    # over [768:1024].
    # TODO(synk): switch to lax.fori_loop with partial unroll for T > ~32.
    for t in range(T):
        gates = gx[t * Bp:(t + 1) * Bp, :] + jnp.dot(
            h.astype(jnp.bfloat16), w_hh, preferred_element_type=jnp.float32
        )                                                             # (Bp, 1024)
        sig = jax.nn.sigmoid(gates[:, : 3 * HIDDEN])                  # (Bp, 768)
        g = jnp.tanh(gates[:, 3 * HIDDEN:])                           # (Bp, 256)
        i = sig[:, 0 * HIDDEN:1 * HIDDEN]
        f = sig[:, 1 * HIDDEN:2 * HIDDEN]
        o = sig[:, 2 * HIDDEN:3 * HIDDEN]
        c = f * c + i * g
        h = o * jnp.tanh(c)

    # ---- MLP head (all matmuls bf16 x bf16 -> f32 accumulate) ----
    x_bf = x_ref[...].astype(jnp.bfloat16)                            # (Bp, 896)
    h_bf = h.astype(jnp.bfloat16)                                     # (Bp, 256)

    # fc1: Linear(873+256 -> 768) on hstack([x, h]) == x@W1x + h@W1h + b1
    cp_w1x.wait()
    cp_w1h.wait()
    z = (
        jnp.dot(x_bf, w1x_vmem[...], preferred_element_type=jnp.float32)
        + jnp.dot(h_bf, w1h_vmem[...], preferred_element_type=jnp.float32)
        + b1_ref[...]
    )
    z = jnp.maximum(z, 0.0)

    # fc2 + ReLU
    cp_w2.wait()
    z = jnp.dot(z.astype(jnp.bfloat16), w2_vmem[...],
                preferred_element_type=jnp.float32) + b2_ref[...]
    z = jnp.maximum(z, 0.0)

    # fc_rest: 3 x (Linear(512,512) + ReLU)
    cp_w345.wait()
    z = jnp.dot(z.astype(jnp.bfloat16), w345_vmem[0],
                preferred_element_type=jnp.float32) + b3_ref[...]
    z = jnp.maximum(z, 0.0)
    z = jnp.dot(z.astype(jnp.bfloat16), w345_vmem[1],
                preferred_element_type=jnp.float32) + b4_ref[...]
    z = jnp.maximum(z, 0.0)
    z = jnp.dot(z.astype(jnp.bfloat16), w345_vmem[2],
                preferred_element_type=jnp.float32) + b5_ref[...]
    z = jnp.maximum(z, 0.0)

    # fc_final: Linear(512, 1) as a VPU multiply + lane reduction (avoids an
    # N=1 MXU push).  Kept in f32.
    out = jnp.sum(z * wf_ref[...], axis=-1, keepdims=True) + bf_ref[...]
    o_ref[...] = out.astype(o_ref.dtype)


def init_params(key):
    """Deterministic synthetic f32 parameters matching MainModel(use_oracle=False)."""
    keys = jax.random.split(key, 16)

    def dense(k, fan_in, shape):
        return (jax.random.normal(k, shape, jnp.float32) / jnp.sqrt(fan_in)).astype(
            jnp.float32
        )

    p = {}
    # LSTM(436, 256): stored pre-transposed for right-multiplication,
    # gate column order = PyTorch (i, f, g, o).
    p["w_ih"] = dense(keys[0], INPUT_DIM, (INPUT_DIM, 4 * HIDDEN))
    p["w_hh"] = dense(keys[1], HIDDEN, (HIDDEN, 4 * HIDDEN))
    b_ih = dense(keys[2], HIDDEN, (4 * HIDDEN,))
    b_hh = dense(keys[3], HIDDEN, (4 * HIDDEN,))
    p["b_lstm"] = (b_ih + b_hh).reshape(1, 4 * HIDDEN)

    # fc1: Linear(873 + 256, 768), stored split + transposed.
    p["w1x"] = dense(keys[4], X_DIM + HIDDEN, (X_DIM, FC1_OUT))
    p["w1h"] = dense(keys[5], X_DIM + HIDDEN, (HIDDEN, FC1_OUT))
    p["b1"] = dense(keys[6], X_DIM + HIDDEN, (1, FC1_OUT))

    p["w2"] = dense(keys[7], FC1_OUT, (FC1_OUT, FC2_OUT))
    p["b2"] = dense(keys[8], FC1_OUT, (1, FC2_OUT))

    p["w3"] = dense(keys[9], FC2_OUT, (FC2_OUT, FC_REST))
    p["b3"] = dense(keys[10], FC2_OUT, (1, FC_REST))
    p["w4"] = dense(keys[11], FC_REST, (FC_REST, FC_REST))
    p["b4"] = dense(keys[12], FC_REST, (1, FC_REST))
    p["w5"] = dense(keys[13], FC_REST, (FC_REST, FC_REST))
    p["b5"] = dense(keys[14], FC_REST, (1, FC_REST))

    p["wf"] = dense(keys[15], FC_REST, (FC_REST, OUT_DIM))
    p["bf"] = jnp.zeros((1, OUT_DIM), jnp.float32)
    return p


# Gate permutation: PyTorch order (i, f, g, o) -> kernel order (i, f, o, g)
# so the three sigmoid gates are contiguous [0:768] and tanh gate is [768:1024].
_GATE_PERM = jnp.concatenate([
    jnp.arange(0, 2 * HIDDEN),            # i, f
    jnp.arange(3 * HIDDEN, 4 * HIDDEN),   # o
    jnp.arange(2 * HIDDEN, 3 * HIDDEN),   # g
])


def prepare_kernel_params(p):
    """One-time (load-time) packing: bf16 weights, padding, gate permutation."""
    # LSTM weights: pad the input-feature rows 436 -> 448, permute gate columns.
    w_ih_pad = (
        jnp.zeros((HIST_PAD, 4 * HIDDEN), jnp.float32).at[:INPUT_DIM, :].set(p["w_ih"])
    )
    w_ih_perm = w_ih_pad[:, _GATE_PERM]
    w_hh_perm = p["w_hh"][:, _GATE_PERM]
    b_lstm_perm = p["b_lstm"][:, _GATE_PERM]

    # fc1 x-path padded 873 -> 896.
    w1x_pad = jnp.zeros((X_PAD, FC1_OUT), jnp.float32).at[:X_DIM, :].set(p["w1x"])

    return {
        "w_ih": w_ih_perm.astype(jnp.bfloat16),        # (448, 1024)
        "w_hh": w_hh_perm.astype(jnp.bfloat16),        # (256, 1024)
        "b_lstm": b_lstm_perm,                         # (1, 1024) f32
        "w1x": w1x_pad.astype(jnp.bfloat16),           # (896, 768)
        "w1h": p["w1h"].astype(jnp.bfloat16),          # (256, 768)
        "b1": p["b1"],
        "w2": p["w2"].astype(jnp.bfloat16),            # (768, 512)
        "b2": p["b2"],
        "w345": jnp.stack([p["w3"], p["w4"], p["w5"]], axis=0).astype(jnp.bfloat16),
        "b3": p["b3"], "b4": p["b4"], "b5": p["b5"],
        "wf_row": p["wf"].T,                           # (1, 512) f32 (VPU reduce)
        "bf": p["bf"],                                 # (1, 1)   f32
    }


@functools.partial(jax.jit, static_argnames=())
def mainmodel_forward(x, history, kp):
    """x: (B, 873) f32; history: (B, T, 436) f32 (batch_first, like PyTorch)."""
    B, T, F = history.shape
    assert F == INPUT_DIM and x.shape == (B, X_DIM)
    Bp = _pad_batch(B)

    # ---- VMEM footprint guard for the fully-resident / fully-unrolled path ----
    hist_bytes = T * Bp * HIST_PAD * 2                 # bf16 history in VMEM
    gx_bytes = T * Bp * 4 * HIDDEN * 4                 # hoisted f32 gate projection
    weight_bytes = (
        (HIST_PAD + HIDDEN) * 4 * HIDDEN * 2           # LSTM weights (bf16)
        + (X_PAD * FC1_OUT + HIDDEN * FC1_OUT
           + FC1_OUT * FC2_OUT + 3 * FC_REST * FC_REST) * 2   # head weights (bf16)
    )
    total_vmem_est = hist_bytes + gx_bytes + weight_bytes + 2 * 1024 * 1024
    assert total_vmem_est <= 24 * 1024 * 1024, (
        "history/gx too large for the VMEM-resident path; use a streamed variant"
    )
    assert T <= 32, "recurrence is fully unrolled; large T needs a fori_loop variant"
    # TODO(synk): for large B*T, keep history in HBM (pl.ANY) and stream it with a
    # double-buffered per-chunk DMA; for v7x multi-core, add a parallel grid axis
    # over batch chunks with constant-index weight specs.

    # Pad observation: batch -> Bp sublanes, features 873 -> 896.
    x_pad = jnp.pad(x, ((0, Bp - B), (0, X_PAD - X_DIM)))
    # History: pad batch -> Bp, features 436 -> 448, time-major flatten, bf16.
    hist_p = jnp.pad(history, ((0, Bp - B), (0, 0), (0, HIST_PAD - INPUT_DIM)))
    hist_tm = (
        jnp.transpose(hist_p, (1, 0, 2)).reshape(T * Bp, HIST_PAD).astype(jnp.bfloat16)
    )

    args = (
        x_pad, hist_tm,
        kp["w_ih"], kp["w_hh"], kp["b_lstm"],
        kp["b1"], kp["b2"], kp["b3"], kp["b4"], kp["b5"],
        kp["wf_row"], kp["bf"],
        kp["w1x"], kp["w1h"], kp["w2"], kp["w345"],
    )
    vmem = pl.BlockSpec(memory_space=pltpu.MemorySpace.VMEM)
    hbm = pl.BlockSpec(memory_space=pl.ANY)
    in_specs = [vmem] * 12 + [hbm] * 4

    out_pad = pl.pallas_call(
        mainmodel_kernel,
        out_shape=jax.ShapeDtypeStruct((Bp, OUT_DIM), jnp.float32),
        in_specs=in_specs,
        out_specs=vmem,
        scratch_shapes=[
            pltpu.VMEM((X_PAD, FC1_OUT), jnp.bfloat16),
            pltpu.VMEM((HIDDEN, FC1_OUT), jnp.bfloat16),
            pltpu.VMEM((FC1_OUT, FC2_OUT), jnp.bfloat16),
            pltpu.VMEM((3, FC_REST, FC_REST), jnp.bfloat16),
            pltpu.SemaphoreType.DMA((4,)),
        ],
        compiler_params=pltpu.CompilerParams(vmem_limit_bytes=32 * 1024 * 1024),
    )(*args)
    return out_pad[:B]


def mainmodel_reference(x, history, params):
    """Pure-JAX reference of the PyTorch forward with bf16 weights / f32 accumulate
    (mirrors the kernel's mixed precision; uses the original i,f,g,o gate order)."""
    B, T, _ = history.shape

    def bdot(a, w):
        return jnp.dot(a.astype(jnp.bfloat16), w.astype(jnp.bfloat16),
                       preferred_element_type=jnp.float32)

    h = jnp.zeros((B, HIDDEN), jnp.float32)
    c = jnp.zeros((B, HIDDEN), jnp.float32)
    for t in range(T):
        xt = history[:, t, :]
        gates = bdot(xt, params["w_ih"]) + bdot(h, params["w_hh"]) + params["b_lstm"]
        i = jax.nn.sigmoid(gates[:, 0 * HIDDEN:1 * HIDDEN])
        f = jax.nn.sigmoid(gates[:, 1 * HIDDEN:2 * HIDDEN])
        g = jnp.tanh(gates[:, 2 * HIDDEN:3 * HIDDEN])
        o = jax.nn.sigmoid(gates[:, 3 * HIDDEN:4 * HIDDEN])
        c = f * c + i * g
        h = o * jnp.tanh(c)
    z = jax.nn.relu(bdot(x, params["w1x"]) + bdot(h, params["w1h"]) + params["b1"])
    z = jax.nn.relu(bdot(z, params["w2"]) + params["b2"])
    z = jax.nn.relu(bdot(z, params["w3"]) + params["b3"])
    z = jax.nn.relu(bdot(z, params["w4"]) + params["b4"])
    z = jax.nn.relu(bdot(z, params["w5"]) + params["b5"])
    return z @ params["wf"] + params["bf"]


if __name__ == "__main__":
    key = jax.random.PRNGKey(0)
    k_param, k_x, k_h = jax.random.split(key, 3)

    B, T = 2, 8
    params = init_params(k_param)
    kparams = prepare_kernel_params(params)
    x = jax.random.normal(k_x, (B, X_DIM), jnp.float32)
    history = jax.random.normal(k_h, (B, T, INPUT_DIM), jnp.float32)

    out = jax.block_until_ready(mainmodel_forward(x, history, kparams))
    ref = jax.block_until_ready(mainmodel_reference(x, history, params))

    assert out.shape == (B, 1), out.shape
    assert jnp.allclose(out, ref, atol=5e-3, rtol=5e-3), (out, ref)

    print("KERNEL_OK")
</pallas_src>

<mosaic_0001>
module attributes {stable_mosaic.version = 11 : i64} {
  func.func @mainmodel_kernel(%arg0: memref<8x896xf32, #tpu.memory_space<vmem>>, %arg1: memref<64x448xbf16, #tpu.memory_space<vmem>>, %arg2: memref<448x1024xbf16, #tpu.memory_space<vmem>>, %arg3: memref<256x1024xbf16, #tpu.memory_space<vmem>>, %arg4: memref<1x1024xf32, #tpu.memory_space<vmem>>, %arg5: memref<1x768xf32, #tpu.memory_space<vmem>>, %arg6: memref<1x512xf32, #tpu.memory_space<vmem>>, %arg7: memref<1x512xf32, #tpu.memory_space<vmem>>, %arg8: memref<1x512xf32, #tpu.memory_space<vmem>>, %arg9: memref<1x512xf32, #tpu.memory_space<vmem>>, %arg10: memref<1x512xf32, #tpu.memory_space<vmem>>, %arg11: memref<1x1xf32, #tpu.memory_space<vmem>>, %arg12: memref<896x768xbf16, #tpu.memory_space<any>>, %arg13: memref<256x768xbf16, #tpu.memory_space<any>>, %arg14: memref<768x512xbf16, #tpu.memory_space<any>>, %arg15: memref<3x512x512xbf16, #tpu.memory_space<any>>, %arg16: memref<8x1xf32, #tpu.memory_space<vmem>>, %arg17: memref<896x768xbf16, #tpu.memory_space<vmem>>, %arg18: memref<256x768xbf16, #tpu.memory_space<vmem>>, %arg19: memref<768x512xbf16, #tpu.memory_space<vmem>>, %arg20: memref<3x512x512xbf16, #tpu.memory_space<vmem>>, %arg21: memref<4x!tpu.dma_semaphore, #tpu.memory_space<semaphore_mem>>) attributes {dimension_semantics = [], scalar_prefetch = 0 : i64, scratch_operands = 5 : i64, tpu.core_type = #tpu.core_type<tc>} {
    %c0_i32 = arith.constant 0 : i32
    %0 = tpu.memref_slice %arg21[%c0_i32] : memref<4x!tpu.dma_semaphore, #tpu.memory_space<semaphore_mem>> -> memref<1x!tpu.dma_semaphore, #tpu.memory_space<semaphore_mem>>
    %1 = tpu.memref_squeeze %0 : memref<1x!tpu.dma_semaphore, #tpu.memory_space<semaphore_mem>> -> memref<!tpu.dma_semaphore, #tpu.memory_space<semaphore_mem>>
    tpu.enqueue_dma source(%arg12 : memref<896x768xbf16, #tpu.memory_space<any>>) target(%arg17 : memref<896x768xbf16, #tpu.memory_space<vmem>>) target_semaphore(%1 : memref<!tpu.dma_semaphore, #tpu.memory_space<semaphore_mem>>)
    %c1_i32 = arith.constant 1 : i32
    %2 = tpu.memref_slice %arg21[%c1_i32] : memref<4x!tpu.dma_semaphore, #tpu.memory_space<semaphore_mem>> -> memref<1x!tpu.dma_semaphore, #tpu.memory_space<semaphore_mem>>
    %3 = tpu.memref_squeeze %2 : memref<1x!tpu.dma_semaphore, #tpu.memory_space<semaphore_mem>> -> memref<!tpu.dma_semaphore, #tpu.memory_space<semaphore_mem>>
    tpu.enqueue_dma source(%arg13 : memref<256x768xbf16, #tpu.memory_space<any>>) target(%arg18 : memref<256x768xbf16, #tpu.memory_space<vmem>>) target_semaphore(%3 : memref<!tpu.dma_semaphore, #tpu.memory_space<semaphore_mem>>)
    %c2_i32 = arith.constant 2 : i32
    %4 = tpu.memref_slice %arg21[%c2_i32] : memref<4x!tpu.dma_semaphore, #tpu.memory_space<semaphore_mem>> -> memref<1x!tpu.dma_semaphore, #tpu.memory_space<semaphore_mem>>
    %5 = tpu.memref_squeeze %4 : memref<1x!tpu.dma_semaphore, #tpu.memory_space<semaphore_mem>> -> memref<!tpu.dma_semaphore, #tpu.memory_space<semaphore_mem>>
    tpu.enqueue_dma source(%arg14 : memref<768x512xbf16, #tpu.memory_space<any>>) target(%arg19 : memref<768x512xbf16, #tpu.memory_space<vmem>>) target_semaphore(%5 : memref<!tpu.dma_semaphore, #tpu.memory_space<semaphore_mem>>)
    %c3_i32 = arith.constant 3 : i32
    %6 = tpu.memref_slice %arg21[%c3_i32] : memref<4x!tpu.dma_semaphore, #tpu.memory_space<semaphore_mem>> -> memref<1x!tpu.dma_semaphore, #tpu.memory_space<semaphore_mem>>
    %7 = tpu.memref_squeeze %6 : memref<1x!tpu.dma_semaphore, #tpu.memory_space<semaphore_mem>> -> memref<!tpu.dma_semaphore, #tpu.memory_space<semaphore_mem>>
    tpu.enqueue_dma source(%arg15 : memref<3x512x512xbf16, #tpu.memory_space<any>>) target(%arg20 : memref<3x512x512xbf16, #tpu.memory_space<vmem>>) target_semaphore(%7 : memref<!tpu.dma_semaphore, #tpu.memory_space<semaphore_mem>>)
    %c0 = arith.constant 0 : index
    %c0_0 = arith.constant 0 : index
    %8 = vector.load %arg1[%c0, %c0_0] : memref<64x448xbf16, #tpu.memory_space<vmem>>, vector<64x448xbf16>
    %c0_1 = arith.constant 0 : index
    %c0_2 = arith.constant 0 : index
    %9 = vector.load %arg2[%c0_1, %c0_2] : memref<448x1024xbf16, #tpu.memory_space<vmem>>, vector<448x1024xbf16>
    %cst = arith.constant dense<0.000000e+00> : vector<64x1024xf32>
    %10 = tpu.matmul %8, %9, %cst {dimension_numbers = #tpu.dot_dimension_numbers<[1], [0], [0], [1], [0, 0, 1, 1], [], []>} : vector<64x448xbf16>, vector<448x1024xbf16>, vector<64x1024xf32> -> vector<64x1024xf32>
    %c0_3 = arith.constant 0 : index
    %c0_4 = arith.constant 0 : index
    %11 = vector.load %arg4[%c0_3, %c0_4] : memref<1x1024xf32, #tpu.memory_space<vmem>>, vector<1x1024xf32>
    %12 = vector.broadcast %11 : vector<1x1024xf32> to vector<64x1024xf32>
    %13 = arith.addf %10, %12 : vector<64x1024xf32>
    %c0_5 = arith.constant 0 : index
    %c0_6 = arith.constant 0 : index
    %14 = vector.load %arg3[%c0_5, %c0_6] : memref<256x1024xbf16, #tpu.memory_space<vmem>>, vector<256x1024xbf16>
    %cst_7 = arith.constant 0.000000e+00 : f32
    %15 = vector.broadcast %cst_7 : f32 to vector<8x256xf32>
    %cst_8 = arith.constant 0.000000e+00 : f32
    %16 = vector.broadcast %cst_8 : f32 to vector<8x256xf32>
    %17 = vector.extract_strided_slice %13 {offsets = [0, 0], sizes = [8, 1024], strides = [1, 1]} : vector<64x1024xf32> to vector<8x1024xf32>
    %18 = arith.truncf %15 : vector<8x256xf32> to vector<8x256xbf16>
    %cst_9 = arith.constant dense<0.000000e+00> : vector<8x1024xf32>
    %19 = tpu.matmul %18, %14, %cst_9 {dimension_numbers = #tpu.dot_dimension_numbers<[1], [0], [0], [1], [0, 0, 1, 1], [], []>} : vector<8x256xbf16>, vector<256x1024xbf16>, vector<8x1024xf32> -> vector<8x1024xf32>
    %20 = arith.addf %17, %19 : vector<8x1024xf32>
    %21 = vector.extract_strided_slice %20 {offsets = [0, 0], sizes = [8, 768], strides = [1, 1]} : vector<8x1024xf32> to vector<8x768xf32>
    %22 = arith.negf %21 : vector<8x768xf32>
    %23 = math.exp %22 : vector<8x768xf32>
    %cst_10 = arith.constant 1.000000e+00 : f32
    %24 = vector.broadcast %cst_10 : f32 to vector<8x768xf32>
    %25 = arith.addf %24, %23 : vector<8x768xf32>
    %26 = arith.divf %24, %25 : vector<8x768xf32>
    %27 = vector.extract_strided_slice %20 {offsets = [0, 768], sizes = [8, 256], strides = [1, 1]} : vector<8x1024xf32> to vector<8x256xf32>
    %28 = math.tanh %27 : vector<8x256xf32>
    %29 = vector.extract_strided_slice %26 {offsets = [0, 0], sizes = [8, 256], strides = [1, 1]} : vector<8x768xf32> to vector<8x256xf32>
    %30 = vector.extract_strided_slice %26 {offsets = [0, 256], sizes = [8, 256], strides = [1, 1]} : vector<8x768xf32> to vector<8x256xf32>
    %31 = vector.extract_strided_slice %26 {offsets = [0, 512], sizes = [8, 256], strides = [1, 1]} : vector<8x768xf32> to vector<8x256xf32>
    %32 = arith.mulf %30, %16 : vector<8x256xf32>
    %33 = arith.mulf %29, %28 : vector<8x256xf32>
    %34 = arith.addf %32, %33 : vector<8x256xf32>
    %35 = math.tanh %34 : vector<8x256xf32>
    %36 = arith.mulf %31, %35 : vector<8x256xf32>
    %37 = vector.extract_strided_slice %13 {offsets = [8, 0], sizes = [8, 1024], strides = [1, 1]} : vector<64x1024xf32> to vector<8x1024xf32>
    %38 = arith.truncf %36 : vector<8x256xf32> to vector<8x256xbf16>
    %cst_11 = arith.constant dense<0.000000e+00> : vector<8x1024xf32>
    %39 = tpu.matmul %38, %14, %cst_11 {dimension_numbers = #tpu.dot_dimension_numbers<[1], [0], [0], [1], [0, 0, 1, 1], [], []>} : vector<8x256xbf16>, vector<256x1024xbf16>, vector<8x1024xf32> -> vector<8x1024xf32>
    %40 = arith.addf %37, %39 : vector<8x1024xf32>
    %41 = vector.extract_strided_slice %40 {offsets = [0, 0], sizes = [8, 768], strides = [1, 1]} : vector<8x1024xf32> to vector<8x768xf32>
    %42 = arith.negf %41 : vector<8x768xf32>
    %43 = math.exp %42 : vector<8x768xf32>
    %cst_12 = arith.constant 1.000000e+00 : f32
    %44 = vector.broadcast %cst_12 : f32 to vector<8x768xf32>
    %45 = arith.addf %44, %43 : vector<8x768xf32>
    %46 = arith.divf %44, %45 : vector<8x768xf32>
    %47 = vector.extract_strided_slice %40 {offsets = [0, 768], sizes = [8, 256], strides = [1, 1]} : vector<8x1024xf32> to vector<8x256xf32>
    %48 = math.tanh %47 : vector<8x256xf32>
    %49 = vector.extract_strided_slice %46 {offsets = [0, 0], sizes = [8, 256], strides = [1, 1]} : vector<8x768xf32> to vector<8x256xf32>
    %50 = vector.extract_strided_slice %46 {offsets = [0, 256], sizes = [8, 256], strides = [1, 1]} : vector<8x768xf32> to vector<8x256xf32>
    %51 = vector.extract_strided_slice %46 {offsets = [0, 512], sizes = [8, 256], strides = [1, 1]} : vector<8x768xf32> to vector<8x256xf32>
    %52 = arith.mulf %50, %34 : vector<8x256xf32>
    %53 = arith.mulf %49, %48 : vector<8x256xf32>
    %54 = arith.addf %52, %53 : vector<8x256xf32>
    %55 = math.tanh %54 : vector<8x256xf32>
    %56 = arith.mulf %51, %55 : vector<8x256xf32>
    %57 = vector.extract_strided_slice %13 {offsets = [16, 0], sizes = [8, 1024], strides = [1, 1]} : vector<64x1024xf32> to vector<8x1024xf32>
    %58 = arith.truncf %56 : vector<8x256xf32> to vector<8x256xbf16>
    %cst_13 = arith.constant dense<0.000000e+00> : vector<8x1024xf32>
    %59 = tpu.matmul %58, %14, %cst_13 {dimension_numbers = #tpu.dot_dimension_numbers<[1], [0], [0], [1], [0, 0, 1, 1], [], []>} : vector<8x256xbf16>, vector<256x1024xbf16>, vector<8x1024xf32> -> vector<8x1024xf32>
    %60 = arith.addf %57, %59 : vector<8x1024xf32>
    %61 = vector.extract_strided_slice %60 {offsets = [0, 0], sizes = [8, 768], strides = [1, 1]} : vector<8x1024xf32> to vector<8x768xf32>
    %62 = arith.negf %61 : vector<8x768xf32>
    %63 = math.exp %62 : vector<8x768xf32>
    %cst_14 = arith.constant 1.000000e+00 : f32
    %64 = vector.broadcast %cst_14 : f32 to vector<8x768xf32>
    %65 = arith.addf %64, %63 : vector<8x768xf32>
    %66 = arith.divf %64, %65 : vector<8x768xf32>
    %67 = vector.extract_strided_slice %60 {offsets = [0, 768], sizes = [8, 256], strides = [1, 1]} : vector<8x1024xf32> to vector<8x256xf32>
    %68 = math.tanh %67 : vector<8x256xf32>
    %69 = vector.extract_strided_slice %66 {offsets = [0, 0], sizes = [8, 256], strides = [1, 1]} : vector<8x768xf32> to vector<8x256xf32>
    %70 = vector.extract_strided_slice %66 {offsets = [0, 256], sizes = [8, 256], strides = [1, 1]} : vector<8x768xf32> to vector<8x256xf32>
    %71 = vector.extract_strided_slice %66 {offsets = [0, 512], sizes = [8, 256], strides = [1, 1]} : vector<8x768xf32> to vector<8x256xf32>
    %72 = arith.mulf %70, %54 : vector<8x256xf32>
    %73 = arith.mulf %69, %68 : vector<8x256xf32>
    %74 = arith.addf %72, %73 : vector<8x256xf32>
    %75 = math.tanh %74 : vector<8x256xf32>
    %76 = arith.mulf %71, %75 : vector<8x256xf32>
    %77 = vector.extract_strided_slice %13 {offsets = [24, 0], sizes = [8, 1024], strides = [1, 1]} : vector<64x1024xf32> to vector<8x1024xf32>
    %78 = arith.truncf %76 : vector<8x256xf32> to vector<8x256xbf16>
    %cst_15 = arith.constant dense<0.000000e+00> : vector<8x1024xf32>
    %79 = tpu.matmul %78, %14, %cst_15 {dimension_numbers = #tpu.dot_dimension_numbers<[1], [0], [0], [1], [0, 0, 1, 1], [], []>} : vector<8x256xbf16>, vector<256x1024xbf16>, vector<8x1024xf32> -> vector<8x1024xf32>
    %80 = arith.addf %77, %79 : vector<8x1024xf32>
    %81 = vector.extract_strided_slice %80 {offsets = [0, 0], sizes = [8, 768], strides = [1, 1]} : vector<8x1024xf32> to vector<8x768xf32>
    %82 = arith.negf %81 : vector<8x768xf32>
    %83 = math.exp %82 : vector<8x768xf32>
    %cst_16 = arith.constant 1.000000e+00 : f32
    %84 = vector.broadcast %cst_16 : f32 to vector<8x768xf32>
    %85 = arith.addf %84, %83 : vector<8x768xf32>
    %86 = arith.divf %84, %85 : vector<8x768xf32>
    %87 = vector.extract_strided_slice %80 {offsets = [0, 768], sizes = [8, 256], strides = [1, 1]} : vector<8x1024xf32> to vector<8x256xf32>
    %88 = math.tanh %87 : vector<8x256xf32>
    %89 = vector.extract_strided_slice %86 {offsets = [0, 0], sizes = [8, 256], strides = [1, 1]} : vector<8x768xf32> to vector<8x256xf32>
    %90 = vector.extract_strided_slice %86 {offsets = [0, 256], sizes = [8, 256], strides = [1, 1]} : vector<8x768xf32> to vector<8x256xf32>
    %91 = vector.extract_strided_slice %86 {offsets = [0, 512], sizes = [8, 256], strides = [1, 1]} : vector<8x768xf32> to vector<8x256xf32>
    %92 = arith.mulf %90, %74 : vector<8x256xf32>
    %93 = arith.mulf %89, %88 : vector<8x256xf32>
    %94 = arith.addf %92, %93 : vector<8x256xf32>
    %95 = math.tanh %94 : vector<8x256xf32>
    %96 = arith.mulf %91, %95 : vector<8x256xf32>
    %97 = vector.extract_strided_slice %13 {offsets = [32, 0], sizes = [8, 1024], strides = [1, 1]} : vector<64x1024xf32> to vector<8x1024xf32>
    %98 = arith.truncf %96 : vector<8x256xf32> to vector<8x256xbf16>
    %cst_17 = arith.constant dense<0.000000e+00> : vector<8x1024xf32>
    %99 = tpu.matmul %98, %14, %cst_17 {dimension_numbers = #tpu.dot_dimension_numbers<[1], [0], [0], [1], [0, 0, 1, 1], [], []>} : vector<8x256xbf16>, vector<256x1024xbf16>, vector<8x1024xf32> -> vector<8x1024xf32>
    %100 = arith.addf %97, %99 : vector<8x1024xf32>
    %101 = vector.extract_strided_slice %100 {offsets = [0, 0], sizes = [8, 768], strides = [1, 1]} : vector<8x1024xf32> to vector<8x768xf32>
    %102 = arith.negf %101 : vector<8x768xf32>
    %103 = math.exp %102 : vector<8x768xf32>
    %cst_18 = arith.constant 1.000000e+00 : f32
    %104 = vector.broadcast %cst_18 : f32 to vector<8x768xf32>
    %105 = arith.addf %104, %103 : vector<8x768xf32>
    %106 = arith.divf %104, %105 : vector<8x768xf32>
    %107 = vector.extract_strided_slice %100 {offsets = [0, 768], sizes = [8, 256], strides = [1, 1]} : vector<8x1024xf32> to vector<8x256xf32>
    %108 = math.tanh %107 : vector<8x256xf32>
    %109 = vector.extract_strided_slice %106 {offsets = [0, 0], sizes = [8, 256], strides = [1, 1]} : vector<8x768xf32> to vector<8x256xf32>
    %110 = vector.extract_strided_slice %106 {offsets = [0, 256], sizes = [8, 256], strides = [1, 1]} : vector<8x768xf32> to vector<8x256xf32>
    %111 = vector.extract_strided_slice %106 {offsets = [0, 512], sizes = [8, 256], strides = [1, 1]} : vector<8x768xf32> to vector<8x256xf32>
    %112 = arith.mulf %110, %94 : vector<8x256xf32>
    %113 = arith.mulf %109, %108 : vector<8x256xf32>
    %114 = arith.addf %112, %113 : vector<8x256xf32>
    %115 = math.tanh %114 : vector<8x256xf32>
    %116 = arith.mulf %111, %115 : vector<8x256xf32>
    %117 = vector.extract_strided_slice %13 {offsets = [40, 0], sizes = [8, 1024], strides = [1, 1]} : vector<64x1024xf32> to vector<8x1024xf32>
    %118 = arith.truncf %116 : vector<8x256xf32> to vector<8x256xbf16>
    %cst_19 = arith.constant dense<0.000000e+00> : vector<8x1024xf32>
    %119 = tpu.matmul %118, %14, %cst_19 {dimension_numbers = #tpu.dot_dimension_numbers<[1], [0], [0], [1], [0, 0, 1, 1], [], []>} : vector<8x256xbf16>, vector<256x1024xbf16>, vector<8x1024xf32> -> vector<8x1024xf32>
    %120 = arith.addf %117, %119 : vector<8x1024xf32>
    %121 = vector.extract_strided_slice %120 {offsets = [0, 0], sizes = [8, 768], strides = [1, 1]} : vector<8x1024xf32> to vector<8x768xf32>
    %122 = arith.negf %121 : vector<8x768xf32>
    %123 = math.exp %122 : vector<8x768xf32>
    %cst_20 = arith.constant 1.000000e+00 : f32
    %124 = vector.broadcast %cst_20 : f32 to vector<8x768xf32>
    %125 = arith.addf %124, %123 : vector<8x768xf32>
    %126 = arith.divf %124, %125 : vector<8x768xf32>
    %127 = vector.extract_strided_slice %120 {offsets = [0, 768], sizes = [8, 256], strides = [1, 1]} : vector<8x1024xf32> to vector<8x256xf32>
    %128 = math.tanh %127 : vector<8x256xf32>
    %129 = vector.extract_strided_slice %126 {offsets = [0, 0], sizes = [8, 256], strides = [1, 1]} : vector<8x768xf32> to vector<8x256xf32>
    %130 = vector.extract_strided_slice %126 {offsets = [0, 256], sizes = [8, 256], strides = [1, 1]} : vector<8x768xf32> to vector<8x256xf32>
    %131 = vector.extract_strided_slice %126 {offsets = [0, 512], sizes = [8, 256], strides = [1, 1]} : vector<8x768xf32> to vector<8x256xf32>
    %132 = arith.mulf %130, %114 : vector<8x256xf32>
    %133 = arith.mulf %129, %128 : vector<8x256xf32>
    %134 = arith.addf %132, %133 : vector<8x256xf32>
    %135 = math.tanh %134 : vector<8x256xf32>
    %136 = arith.mulf %131, %135 : vector<8x256xf32>
    %137 = vector.extract_strided_slice %13 {offsets = [48, 0], sizes = [8, 1024], strides = [1, 1]} : vector<64x1024xf32> to vector<8x1024xf32>
    %138 = arith.truncf %136 : vector<8x256xf32> to vector<8x256xbf16>
    %cst_21 = arith.constant dense<0.000000e+00> : vector<8x1024xf32>
    %139 = tpu.matmul %138, %14, %cst_21 {dimension_numbers = #tpu.dot_dimension_numbers<[1], [0], [0], [1], [0, 0, 1, 1], [], []>} : vector<8x256xbf16>, vector<256x1024xbf16>, vector<8x1024xf32> -> vector<8x1024xf32>
    %140 = arith.addf %137, %139 : vector<8x1024xf32>
    %141 = vector.extract_strided_slice %140 {offsets = [0, 0], sizes = [8, 768], strides = [1, 1]} : vector<8x1024xf32> to vector<8x768xf32>
    %142 = arith.negf %141 : vector<8x768xf32>
    %143 = math.exp %142 : vector<8x768xf32>
    %cst_22 = arith.constant 1.000000e+00 : f32
    %144 = vector.broadcast %cst_22 : f32 to vector<8x768xf32>
    %145 = arith.addf %144, %143 : vector<8x768xf32>
    %146 = arith.divf %144, %145 : vector<8x768xf32>
    %147 = vector.extract_strided_slice %140 {offsets = [0, 768], sizes = [8, 256], strides = [1, 1]} : vector<8x1024xf32> to vector<8x256xf32>
    %148 = math.tanh %147 : vector<8x256xf32>
    %149 = vector.extract_strided_slice %146 {offsets = [0, 0], sizes = [8, 256], strides = [1, 1]} : vector<8x768xf32> to vector<8x256xf32>
    %150 = vector.extract_strided_slice %146 {offsets = [0, 256], sizes = [8, 256], strides = [1, 1]} : vector<8x768xf32> to vector<8x256xf32>
    %151 = vector.extract_strided_slice %146 {offsets = [0, 512], sizes = [8, 256], strides = [1, 1]} : vector<8x768xf32> to vector<8x256xf32>
    %152 = arith.mulf %150, %134 : vector<8x256xf32>
    %153 = arith.mulf %149, %148 : vector<8x256xf32>
    %154 = arith.addf %152, %153 : vector<8x256xf32>
    %155 = math.tanh %154 : vector<8x256xf32>
    %156 = arith.mulf %151, %155 : vector<8x256xf32>
    %157 = vector.extract_strided_slice %13 {offsets = [56, 0], sizes = [8, 1024], strides = [1, 1]} : vector<64x1024xf32> to vector<8x1024xf32>
    %158 = arith.truncf %156 : vector<8x256xf32> to vector<8x256xbf16>
    %cst_23 = arith.constant dense<0.000000e+00> : vector<8x1024xf32>
    %159 = tpu.matmul %158, %14, %cst_23 {dimension_numbers = #tpu.dot_dimension_numbers<[1], [0], [0], [1], [0, 0, 1, 1], [], []>} : vector<8x256xbf16>, vector<256x1024xbf16>, vector<8x1024xf32> -> vector<8x1024xf32>
    %160 = arith.addf %157, %159 : vector<8x1024xf32>
    %161 = vector.extract_strided_slice %160 {offsets = [0, 0], sizes = [8, 768], strides = [1, 1]} : vector<8x1024xf32> to vector<8x768xf32>
    %162 = arith.negf %161 : vector<8x768xf32>
    %163 = math.exp %162 : vector<8x768xf32>
    %cst_24 = arith.constant 1.000000e+00 : f32
    %164 = vector.broadcast %cst_24 : f32 to vector<8x768xf32>
    %165 = arith.addf %164, %163 : vector<8x768xf32>
    %166 = arith.divf %164, %165 : vector<8x768xf32>
    %167 = vector.extract_strided_slice %160 {offsets = [0, 768], sizes = [8, 256], strides = [1, 1]} : vector<8x1024xf32> to vector<8x256xf32>
    %168 = math.tanh %167 : vector<8x256xf32>
    %169 = vector.extract_strided_slice %166 {offsets = [0, 0], sizes = [8, 256], strides = [1, 1]} : vector<8x768xf32> to vector<8x256xf32>
    %170 = vector.extract_strided_slice %166 {offsets = [0, 256], sizes = [8, 256], strides = [1, 1]} : vector<8x768xf32> to vector<8x256xf32>
    %171 = vector.extract_strided_slice %166 {offsets = [0, 512], sizes = [8, 256], strides = [1, 1]} : vector<8x768xf32> to vector<8x256xf32>
    %172 = arith.mulf %170, %154 : vector<8x256xf32>
    %173 = arith.mulf %169, %168 : vector<8x256xf32>
    %174 = arith.addf %172, %173 : vector<8x256xf32>
    %175 = math.tanh %174 : vector<8x256xf32>
    %176 = arith.mulf %171, %175 : vector<8x256xf32>
    %c0_25 = arith.constant 0 : index
    %c0_26 = arith.constant 0 : index
    %177 = vector.load %arg0[%c0_25, %c0_26] : memref<8x896xf32, #tpu.memory_space<vmem>>, vector<8x896xf32>
    %178 = arith.truncf %177 : vector<8x896xf32> to vector<8x896xbf16>
    %179 = arith.truncf %176 : vector<8x256xf32> to vector<8x256xbf16>
    %c0_i32_27 = arith.constant 0 : i32
    %180 = tpu.memref_slice %arg21[%c0_i32_27] : memref<4x!tpu.dma_semaphore, #tpu.memory_space<semaphore_mem>> -> memref<1x!tpu.dma_semaphore, #tpu.memory_space<semaphore_mem>>
    %181 = tpu.memref_squeeze %180 : memref<1x!tpu.dma_semaphore, #tpu.memory_space<semaphore_mem>> -> memref<!tpu.dma_semaphore, #tpu.memory_space<semaphore_mem>>
    tpu.wait_dma2 semaphore(%181 : memref<!tpu.dma_semaphore, #tpu.memory_space<semaphore_mem>>) src(%arg12 : memref<896x768xbf16, #tpu.memory_space<any>>) dst(%arg17 : memref<896x768xbf16, #tpu.memory_space<vmem>>)
    %c1_i32_28 = arith.constant 1 : i32
    %182 = tpu.memref_slice %arg21[%c1_i32_28] : memref<4x!tpu.dma_semaphore, #tpu.memory_space<semaphore_mem>> -> memref<1x!tpu.dma_semaphore, #tpu.memory_space<semaphore_mem>>
    %183 = tpu.memref_squeeze %182 : memref<1x!tpu.dma_semaphore, #tpu.memory_space<semaphore_mem>> -> memref<!tpu.dma_semaphore, #tpu.memory_space<semaphore_mem>>
    tpu.wait_dma2 semaphore(%183 : memref<!tpu.dma_semaphore, #tpu.memory_space<semaphore_mem>>) src(%arg13 : memref<256x768xbf16, #tpu.memory_space<any>>) dst(%arg18 : memref<256x768xbf16, #tpu.memory_space<vmem>>)
    %c0_29 = arith.constant 0 : index
    %c0_30 = arith.constant 0 : index
    %184 = vector.load %arg17[%c0_29, %c0_30] : memref<896x768xbf16, #tpu.memory_space<vmem>>, vector<896x768xbf16>
    %cst_31 = arith.constant dense<0.000000e+00> : vector<8x768xf32>
    %185 = tpu.matmul %178, %184, %cst_31 {dimension_numbers = #tpu.dot_dimension_numbers<[1], [0], [0], [1], [0, 0, 1, 1], [], []>} : vector<8x896xbf16>, vector<896x768xbf16>, vector<8x768xf32> -> vector<8x768xf32>
    %c0_32 = arith.constant 0 : index
    %c0_33 = arith.constant 0 : index
    %186 = vector.load %arg18[%c0_32, %c0_33] : memref<256x768xbf16, #tpu.memory_space<vmem>>, vector<256x768xbf16>
    %cst_34 = arith.constant dense<0.000000e+00> : vector<8x768xf32>
    %187 = tpu.matmul %179, %186, %cst_34 {dimension_numbers = #tpu.dot_dimension_numbers<[1], [0], [0], [1], [0, 0, 1, 1], [], []>} : vector<8x256xbf16>, vector<256x768xbf16>, vector<8x768xf32> -> vector<8x768xf32>
    %188 = arith.addf %185, %187 : vector<8x768xf32>
    %c0_35 = arith.constant 0 : index
    %c0_36 = arith.constant 0 : index
    %189 = vector.load %arg5[%c0_35, %c0_36] : memref<1x768xf32, #tpu.memory_space<vmem>>, vector<1x768xf32>
    %190 = vector.broadcast %189 : vector<1x768xf32> to vector<8x768xf32>
    %191 = arith.addf %188, %190 : vector<8x768xf32>
    %cst_37 = arith.constant 0.000000e+00 : f32
    %192 = vector.broadcast %cst_37 : f32 to vector<8x768xf32>
    %193 = arith.maximumf %191, %192 : vector<8x768xf32>
    %c2_i32_38 = arith.constant 2 : i32
    %194 = tpu.memref_slice %arg21[%c2_i32_38] : memref<4x!tpu.dma_semaphore, #tpu.memory_space<semaphore_mem>> -> memref<1x!tpu.dma_semaphore, #tpu.memory_space<semaphore_mem>>
    %195 = tpu.memref_squeeze %194 : memref<1x!tpu.dma_semaphore, #tpu.memory_space<semaphore_mem>> -> memref<!tpu.dma_semaphore, #tpu.memory_space<semaphore_mem>>
    tpu.wait_dma2 semaphore(%195 : memref<!tpu.dma_semaphore, #tpu.memory_space<semaphore_mem>>) src(%arg14 : memref<768x512xbf16, #tpu.memory_space<any>>) dst(%arg19 : memref<768x512xbf16, #tpu.memory_space<vmem>>)
    %196 = arith.truncf %193 : vector<8x768xf32> to vector<8x768xbf16>
    %c0_39 = arith.constant 0 : index
    %c0_40 = arith.constant 0 : index
    %197 = vector.load %arg19[%c0_39, %c0_40] : memref<768x512xbf16, #tpu.memory_space<vmem>>, vector<768x512xbf16>
    %cst_41 = arith.constant dense<0.000000e+00> : vector<8x512xf32>
    %198 = tpu.matmul %196, %197, %cst_41 {dimension_numbers = #tpu.dot_dimension_numbers<[1], [0], [0], [1], [0, 0, 1, 1], [], []>} : vector<8x768xbf16>, vector<768x512xbf16>, vector<8x512xf32> -> vector<8x512xf32>
    %c0_42 = arith.constant 0 : index
    %c0_43 = arith.constant 0 : index
    %199 = vector.load %arg6[%c0_42, %c0_43] : memref<1x512xf32, #tpu.memory_space<vmem>>, vector<1x512xf32>
    %200 = vector.broadcast %199 : vector<1x512xf32> to vector<8x512xf32>
    %201 = arith.addf %198, %200 : vector<8x512xf32>
    %cst_44 = arith.constant 0.000000e+00 : f32
    %202 = vector.broadcast %cst_44 : f32 to vector<8x512xf32>
    %203 = arith.maximumf %201, %202 : vector<8x512xf32>
    %c3_i32_45 = arith.constant 3 : i32
    %204 = tpu.memref_slice %arg21[%c3_i32_45] : memref<4x!tpu.dma_semaphore, #tpu.memory_space<semaphore_mem>> -> memref<1x!tpu.dma_semaphore, #tpu.memory_space<semaphore_mem>>
    %205 = tpu.memref_squeeze %204 : memref<1x!tpu.dma_semaphore, #tpu.memory_space<semaphore_mem>> -> memref<!tpu.dma_semaphore, #tpu.memory_space<semaphore_mem>>
    tpu.wait_dma2 semaphore(%205 : memref<!tpu.dma_semaphore, #tpu.memory_space<semaphore_mem>>) src(%arg15 : memref<3x512x512xbf16, #tpu.memory_space<any>>) dst(%arg20 : memref<3x512x512xbf16, #tpu.memory_space<vmem>>)
    %206 = arith.truncf %203 : vector<8x512xf32> to vector<8x512xbf16>
    %c0_46 = arith.constant 0 : index
    %c0_47 = arith.constant 0 : index
    %c0_48 = arith.constant 0 : index
    %207 = vector.load %arg20[%c0_46, %c0_47, %c0_48] : memref<3x512x512xbf16, #tpu.memory_space<vmem>>, vector<1x512x512xbf16>
    %208 = vector.shape_cast %207 : vector<1x512x512xbf16> to vector<512x512xbf16>
    %cst_49 = arith.constant dense<0.000000e+00> : vector<8x512xf32>
    %209 = tpu.matmul %206, %208, %cst_49 {dimension_numbers = #tpu.dot_dimension_numbers<[1], [0], [0], [1], [0, 0, 1, 1], [], []>} : vector<8x512xbf16>, vector<512x512xbf16>, vector<8x512xf32> -> vector<8x512xf32>
    %c0_50 = arith.constant 0 : index
    %c0_51 = arith.constant 0 : index
    %210 = vector.load %arg7[%c0_50, %c0_51] : memref<1x512xf32, #tpu.memory_space<vmem>>, vector<1x512xf32>
    %211 = vector.broadcast %210 : vector<1x512xf32> to vector<8x512xf32>
    %212 = arith.addf %209, %211 : vector<8x512xf32>
    %cst_52 = arith.constant 0.000000e+00 : f32
    %213 = vector.broadcast %cst_52 : f32 to vector<8x512xf32>
    %214 = arith.maximumf %212, %213 : vector<8x512xf32>
    %215 = arith.truncf %214 : vector<8x512xf32> to vector<8x512xbf16>
    %c1 = arith.constant 1 : index
    %c0_53 = arith.constant 0 : index
    %c0_54 = arith.constant 0 : index
    %216 = vector.load %arg20[%c1, %c0_53, %c0_54] : memref<3x512x512xbf16, #tpu.memory_space<vmem>>, vector<1x512x512xbf16>
    %217 = vector.shape_cast %216 : vector<1x512x512xbf16> to vector<512x512xbf16>
    %cst_55 = arith.constant dense<0.000000e+00> : vector<8x512xf32>
    %218 = tpu.matmul %215, %217, %cst_55 {dimension_numbers = #tpu.dot_dimension_numbers<[1], [0], [0], [1], [0, 0, 1, 1], [], []>} : vector<8x512xbf16>, vector<512x512xbf16>, vector<8x512xf32> -> vector<8x512xf32>
    %c0_56 = arith.constant 0 : index
    %c0_57 = arith.constant 0 : index
    %219 = vector.load %arg8[%c0_56, %c0_57] : memref<1x512xf32, #tpu.memory_space<vmem>>, vector<1x512xf32>
    %220 = vector.broadcast %219 : vector<1x512xf32> to vector<8x512xf32>
    %221 = arith.addf %218, %220 : vector<8x512xf32>
    %cst_58 = arith.constant 0.000000e+00 : f32
    %222 = vector.broadcast %cst_58 : f32 to vector<8x512xf32>
    %223 = arith.maximumf %221, %222 : vector<8x512xf32>
    %224 = arith.truncf %223 : vector<8x512xf32> to vector<8x512xbf16>
    %c2 = arith.constant 2 : index
    %c0_59 = arith.constant 0 : index
    %c0_60 = arith.constant 0 : index
    %225 = vector.load %arg20[%c2, %c0_59, %c0_60] : memref<3x512x512xbf16, #tpu.memory_space<vmem>>, vector<1x512x512xbf16>
    %226 = vector.shape_cast %225 : vector<1x512x512xbf16> to vector<512x512xbf16>
    %cst_61 = arith.constant dense<0.000000e+00> : vector<8x512xf32>
    %227 = tpu.matmul %224, %226, %cst_61 {dimension_numbers = #tpu.dot_dimension_numbers<[1], [0], [0], [1], [0, 0, 1, 1], [], []>} : vector<8x512xbf16>, vector<512x512xbf16>, vector<8x512xf32> -> vector<8x512xf32>
    %c0_62 = arith.constant 0 : index
    %c0_63 = arith.constant 0 : index
    %228 = vector.load %arg9[%c0_62, %c0_63] : memref<1x512xf32, #tpu.memory_space<vmem>>, vector<1x512xf32>
    %229 = vector.broadcast %228 : vector<1x512xf32> to vector<8x512xf32>
    %230 = arith.addf %227, %229 : vector<8x512xf32>
    %cst_64 = arith.constant 0.000000e+00 : f32
    %231 = vector.broadcast %cst_64 : f32 to vector<8x512xf32>
    %232 = arith.maximumf %230, %231 : vector<8x512xf32>
    %c0_65 = arith.constant 0 : index
    %c0_66 = arith.constant 0 : index
    %233 = vector.load %arg10[%c0_65, %c0_66] : memref<1x512xf32, #tpu.memory_space<vmem>>, vector<1x512xf32>
    %234 = vector.broadcast %233 : vector<1x512xf32> to vector<8x512xf32>
    %235 = arith.mulf %232, %234 : vector<8x512xf32>
    %cst_67 = arith.constant dense<0.000000e+00> : vector<8xf32>
    %236 = vector.multi_reduction <add>, %235, %cst_67 [1] : vector<8x512xf32> to vector<8xf32>
    %237 = vector.shape_cast %236 : vector<8xf32> to vector<8x1xf32>
    %c0_68 = arith.constant 0 : index
    %c0_69 = arith.constant 0 : index
    %238 = vector.load %arg11[%c0_68, %c0_69] : memref<1x1xf32, #tpu.memory_space<vmem>>, vector<1x1xf32>
    %239 = vector.broadcast %238 : vector<1x1xf32> to vector<8x1xf32>
    %240 = arith.addf %237, %239 : vector<8x1xf32>
    %c0_70 = arith.constant 0 : index
    %c0_71 = arith.constant 0 : index
    %241 = vector.load %arg16[%c0_70, %c0_71] : memref<8x1xf32, #tpu.memory_space<vmem>>, vector<8x1xf32>
    tpu.vector_store %arg16[%c0_70, %c0_71], %240 {strides = array<i32>} : memref<8x1xf32, #tpu.memory_space<vmem>>, vector<8x1xf32>,
    return
  }
}

</mosaic_0001>

<bundles_post_ra>
// kernel: mainmodel_forward.1
= control target key start
LH: loop header
LB: loop body
LE: loop exit
PB: predicated region body
PF: predicated region fallthrough
CT: control target
= control target key end

     0   :  { %s11045_s0 = inlined_call_operand.vmem [shape: f32[8,896], index: 0, kind: input, shape index: {}]   ;;  %s11046_s1 = inlined_call_operand.vmem [shape: bf16[64,448], index: 1, kind: input, shape index: {}]   ;;  %s11047_s2 = inlined_call_operand.hbm [shape: bf16[448,1024], index: 2, kind: input, shape index: {}]   ;;  %s11048_s3 = inlined_call_operand.hbm [shape: bf16[256,1024], index: 3, kind: input, shape index: {}]   ;;  %s11049_s4 = inlined_call_operand.hbm [shape: f32[1,1024], index: 4, kind: input, shape index: {}]   ;;  %s11050_s5 = inlined_call_operand.hbm [shape: f32[1,768], index: 5, kind: input, shape index: {}]   ;;  %s11051_s6 = inlined_call_operand.hbm [shape: f32[1,512], index: 6, kind: input, shape index: {}]   ;;  %s11052_s7 = inlined_call_operand.hbm [shape: f32[1,512], index: 7, kind: input, shape index: {}]   ;;  %s11053_s8 = inlined_call_operand.hbm [shape: f32[1,512], index: 8, kind: input, shape index: {}]   ;;  %s11054_s9 = inlined_call_operand.hbm [shape: f32[1,512], index: 9, kind: input, shape index: {}]   ;;  %s11055_s10 = inlined_call_operand.hbm [shape: f32[1,512], index: 10, kind: input, shape index: {}]   ;;  %s11056_s11 = inlined_call_operand.<no memory space> [shape: f32[1,1], index: 11, kind: input, shape index: {}]   ;;  %s11057_s12 = inlined_call_operand.hbm [shape: bf16[896,768], index: 12, kind: input, shape index: {}]   ;;  %s11058_s13 = inlined_call_operand.hbm [shape: bf16[256,768], index: 13, kind: input, shape index: {}]   ;;  %s11059_s14 = inlined_call_operand.hbm [shape: bf16[768,512], index: 14, kind: input, shape index: {}]   ;;  %s11060_s15 = inlined_call_operand.hbm [shape: bf16[3,512,512], index: 15, kind: input, shape index: {}]   ;;  %s11061_s16 = inlined_call_operand.vmem [shape: f32[8,1], index: 16, kind: output, shape index: {}]  }
   0x1   :  { %11355 = sst [smem:[#allocation239_spill]] %s11045_s0  ;;  %v21_v0 = vstv %s11056_s11 }
   0x2   :  { %22 = vst [vmem:[#allocation7] sm:$0x1] %v21_v0 }
   0x3   :  { %23 = vsyncpa [#allocation9], 0 }
   0x4   :  { %24 = vsyncpa [#allocation11], 0 }
   0x5   :  { %25 = vsyncpa [#allocation14], 0 }
   0x6   :  { %26 = vsyncpa [#allocation17], 0 }
   0x7   :  { %27 = vsyncpa [#allocation20], 0  ;;  %s8709_s23 = smov [#allocation10]   ;;  %s8710_s25 = smov [#allocation13]  }
   0x8   :  { %s49_s24 = sshll.u32 %s8709_s23, 4  ;;  %s72_s26 = sshll.u32 %s8710_s25, 4  ;;  %s50_s24 = int_to_ptr.vmem [resolvable:$true] %s49_s24  ;;  %s73_s26 = int_to_ptr.vmem [resolvable:$true] %s72_s26 }
   0x9   :  { %s8493_s29 = scalar_lea.hbm %s11048_s3, 16384 }
   0xa   :  { %p8494_p0 = scmp.ne.s32.totalorder %s11048_s3, %s8493_s29  ;;  %p8497_p1 = scmp.lt.u32.totalorder %s8493_s29, %s11048_s3 }
   0xc   :  { %p8499_p2 = pnand %p8497_p1, %p8494_p0 }
   0xe   :  { %8502 = shalt.err (!%p8499_p2)
}
   0xf   :  { %s8503_s18 = scalar_lea.vmem %s50_s24, 16384  ;;  %p8508_p4 = scmp.lt.s32.totalorder %s50_s24, %s50_s24 }
  0x10   :  { %p8504_p3 = scmp.ne.s32.totalorder %s50_s24, %s8503_s18  ;;  %p8509_p5 = scmp.lt.s32.totalorder %s8503_s18, %s8503_s18 }
  0x12   :  { %p8510_p6 = por %p8509_p5, %p8508_p4 }
  0x14   :  { %p8511_p7 = pnand %p8510_p6, %p8504_p3 }
  0x16   :  { %8514 = shalt.err (!%p8511_p7)
}
  0x17   :  { %s8711_s19 = smov 512   ;;  %s8712_s20 = smov 32  }
  0x18   :  { %55 = dma.hbm_to_vmem [thread:$0]  %s11048_s3, 16384, %s50_s24, [#allocation11], %s8711_s19, %s8711_s19, %s8712_s20  }
  0x19   :  { %s8515_s27 = scalar_lea.hbm %s11050_s5, 96 }
  0x1a   :  { %p8516_p8 = scmp.ne.s32.totalorder %s11050_s5, %s8515_s27  ;;  %p8519_p9 = scmp.lt.u32.totalorder %s8515_s27, %s11050_s5 }
  0x1c   :  { %p8521_p10 = pnand %p8519_p9, %p8516_p8 }
  0x1e   :  { %8524 = shalt.err (!%p8521_p10)
}
  0x1f   :  { %s8525_s11 = scalar_lea.vmem %s73_s26, 96  ;;  %p8530_p12 = scmp.lt.s32.totalorder %s73_s26, %s73_s26 }
  0x20   :  { %p8526_p11 = scmp.ne.s32.totalorder %s73_s26, %s8525_s11  ;;  %p8531_p13 = scmp.lt.s32.totalorder %s8525_s11, %s8525_s11 }
  0x22   :  { %p8532_p0 = por %p8531_p13, %p8530_p12 }
  0x24   :  { %p8533_p1 = pnand %p8532_p0, %p8526_p11 }
  0x26   :  { %8536 = shalt.err (!%p8533_p1)
}
  0x27   :  { %75 = dma.hbm_to_vmem [thread:$0]  %s11050_s5, 96, %s73_s26, [#allocation14]  }
  0x28   :  { %s8713_s17 = smov [#allocation16]   ;;  %s8714_s21 = smov [#allocation19]  }
  0x29   :  { %s92_s18 = sshll.u32 %s8713_s17, 4  ;;  %s112_s22 = sshll.u32 %s8714_s21, 4  ;;  %s93_s18 = int_to_ptr.vmem [resolvable:$true] %s92_s18  ;;  %s113_s22 = int_to_ptr.vmem [resolvable:$true] %s112_s22 }
  0x2a   :  { %s8537_s27 = scalar_lea.hbm %s11052_s7, 64 }
  0x2b   :  { %p8538_p2 = scmp.ne.s32.totalorder %s11052_s7, %s8537_s27  ;;  %p8541_p3 = scmp.lt.u32.totalorder %s8537_s27, %s11052_s7 }
  0x2d   :  { %p8543_p4 = pnand %p8541_p3, %p8538_p2 }
  0x2f   :  { %8546 = shalt.err (!%p8543_p4)
}
  0x30   :  { %s8547_s5 = scalar_lea.vmem %s93_s18, 64  ;;  %p8552_p6 = scmp.lt.s32.totalorder %s93_s18, %s93_s18 }
  0x31   :  { %p8548_p5 = scmp.ne.s32.totalorder %s93_s18, %s8547_s5  ;;  %p8553_p7 = scmp.lt.s32.totalorder %s8547_s5, %s8547_s5 }
  0x33   :  { %p8554_p8 = por %p8553_p7, %p8552_p6 }
  0x35   :  { %p8555_p9 = pnand %p8554_p8, %p8548_p5 }
  0x37   :  { %8558 = shalt.err (!%p8555_p9)
}
  0x38   :  { %95 = dma.hbm_to_vmem [thread:$0]  %s11052_s7, 64, %s93_s18, [#allocation17]  }
  0x39   :  { %s8559_s17 = scalar_lea.hbm %s11054_s9, 64 }
  0x3a   :  { %p8560_p10 = scmp.ne.s32.totalorder %s11054_s9, %s8559_s17  ;;  %p8563_p11 = scmp.lt.u32.totalorder %s8559_s17, %s11054_s9 }
  0x3c   :  { %p8565_p12 = pnand %p8563_p11, %p8560_p10 }
  0x3e   :  { %8568 = shalt.err (!%p8565_p12)
}
  0x3f   :  { %s8569_s28 = scalar_lea.vmem %s113_s22, 64  ;;  %p8574_p0 = scmp.lt.s32.totalorder %s113_s22, %s113_s22 }
  0x40   :  { %p8570_p13 = scmp.ne.s32.totalorder %s113_s22, %s8569_s28  ;;  %p8575_p1 = scmp.lt.s32.totalorder %s8569_s28, %s8569_s28 }
  0x42   :  { %p8576_p2 = por %p8575_p1, %p8574_p0 }
  0x44   :  { %p8577_p3 = pnand %p8576_p2, %p8570_p13 }
  0x46   :  { %8580 = shalt.err (!%p8577_p3)
}
  0x47   :  { %115 = dma.hbm_to_vmem [thread:$0]  %s11054_s9, 64, %s113_s22, [#allocation20]  }
  0x48   :  { %s8715_s29 = smov [#allocation8]   ;;  %s8716_s0 = smov [#allocation12]  }
  0x49   :  { %s37_s30 = sshll.u32 %s8715_s29, 4  ;;  %s62_s5 = sshll.u32 %s8716_s0, 4  ;;  %s38_s30 = int_to_ptr.vmem [resolvable:$true] %s37_s30  ;;  %s63_s5 = int_to_ptr.vmem [resolvable:$true] %s62_s5 }
  0x4a   :  { %s8581_s3 = scalar_lea.hbm %s11047_s2, 28672 }
  0x4b   :  { %p8582_p4 = scmp.ne.s32.totalorder %s11047_s2, %s8581_s3  ;;  %p8585_p5 = scmp.lt.u32.totalorder %s8581_s3, %s11047_s2 }
  0x4d   :  { %p8587_p6 = pnand %p8585_p5, %p8582_p4 }
  0x4f   :  { %8590 = shalt.err (!%p8587_p6)
}
  0x50   :  { %s8591_s9 = scalar_lea.vmem %s38_s30, 28672  ;;  %p8596_p8 = scmp.lt.s32.totalorder %s38_s30, %s38_s30 }
  0x51   :  { %p8592_p7 = scmp.ne.s32.totalorder %s38_s30, %s8591_s9  ;;  %p8597_p9 = scmp.lt.s32.totalorder %s8591_s9, %s8591_s9 }
  0x53   :  { %p8598_p10 = por %p8597_p9, %p8596_p8 }
  0x55   :  { %p8599_p11 = pnand %p8598_p10, %p8592_p7 }
  0x57   :  { %8602 = shalt.err (!%p8599_p11)
}
  0x58   :  { %43 = dma.hbm_to_vmem [thread:$0]  %s11047_s2, 28672, %s38_s30, [#allocation9], %s8711_s19, %s8711_s19, %s8712_s20  }
  0x59   :  { %s8603_s7 = scalar_lea.hbm %s11049_s4, 128 }
  0x5a   :  { %p8604_p12 = scmp.ne.s32.totalorder %s11049_s4, %s8603_s7  ;;  %p8607_p13 = scmp.lt.u32.totalorder %s8603_s7, %s11049_s4 }
  0x5c   :  { %p8609_p0 = pnand %p8607_p13, %p8604_p12 }
  0x5e   :  { %8612 = shalt.err (!%p8609_p0)
}
  0x5f   :  { %s8613_s11 = scalar_lea.vmem %s63_s5, 128  ;;  %p8618_p2 = scmp.lt.s32.totalorder %s63_s5, %s63_s5 }
  0x60   :  { %p8614_p1 = scmp.ne.s32.totalorder %s63_s5, %s8613_s11  ;;  %p8619_p3 = scmp.lt.s32.totalorder %s8613_s11, %s8613_s11 }
  0x62   :  { %p8620_p4 = por %p8619_p3, %p8618_p2 }
  0x64   :  { %p8621_p5 = pnand %p8620_p4, %p8614_p1 }
  0x66   :  { %8624 = shalt.err (!%p8621_p5)
}
  0x67   :  { %65 = dma.hbm_to_vmem [thread:$0]  %s11049_s4, 128, %s63_s5, [#allocation11]  }
  0x68   :  { %s8717_s30 = smov [#allocation15]   ;;  %s8718_s24 = smov [#allocation18]  }
  0x69   :  { %s82_s3 = sshll.u32 %s8717_s30, 4  ;;  %s102_s17 = sshll.u32 %s8718_s24, 4  ;;  %s83_s3 = int_to_ptr.vmem [resolvable:$true] %s82_s3  ;;  %s103_s17 = int_to_ptr.vmem [resolvable:$true] %s102_s17 }
  0x6a   :  { %s8625_s9 = scalar_lea.hbm %s11051_s6, 64 }
  0x6b   :  { %p8626_p6 = scmp.ne.s32.totalorder %s11051_s6, %s8625_s9  ;;  %p8629_p7 = scmp.lt.u32.totalorder %s8625_s9, %s11051_s6 }
  0x6d   :  { %p8631_p8 = pnand %p8629_p7, %p8626_p6 }
  0x6f   :  { %8634 = shalt.err (!%p8631_p8)
}
  0x70   :  { %s8635_s4 = scalar_lea.vmem %s83_s3, 64  ;;  %p8640_p10 = scmp.lt.s32.totalorder %s83_s3, %s83_s3 }
  0x71   :  { %p8636_p9 = scmp.ne.s32.totalorder %s83_s3, %s8635_s4  ;;  %p8641_p11 = scmp.lt.s32.totalorder %s8635_s4, %s8635_s4 }
  0x73   :  { %p8642_p12 = por %p8641_p11, %p8640_p10 }
  0x75   :  { %p8643_p13 = pnand %p8642_p12, %p8636_p9 }
  0x77   :  { %8646 = shalt.err (!%p8643_p13)
}
  0x78   :  { %85 = dma.hbm_to_vmem [thread:$0]  %s11051_s6, 64, %s83_s3, [#allocation14]  }
  0x79   :  { %s8647_s0 = scalar_lea.hbm %s11053_s8, 64 }
  0x7a   :  { %p8648_p0 = scmp.ne.s32.totalorder %s11053_s8, %s8647_s0  ;;  %p8651_p1 = scmp.lt.u32.totalorder %s8647_s0, %s11053_s8 }
  0x7c   :  { %p8653_p2 = pnand %p8651_p1, %p8648_p0 }
  0x7e   :  { %8656 = shalt.err (!%p8653_p2)
}
  0x7f   :  { %s8657_s30 = scalar_lea.vmem %s103_s17, 64  ;;  %p8662_p4 = scmp.lt.s32.totalorder %s103_s17, %s103_s17 }
  0x80   :  { %p8658_p3 = scmp.ne.s32.totalorder %s103_s17, %s8657_s30  ;;  %p8663_p5 = scmp.lt.s32.totalorder %s8657_s30, %s8657_s30 }
  0x82   :  { %p8664_p6 = por %p8663_p5, %p8662_p4 }
  0x84   :  { %p8665_p7 = pnand %p8664_p6, %p8658_p3 }
  0x86   :  { %8668 = shalt.err (!%p8665_p7)
}
  0x87   :  { %105 = dma.hbm_to_vmem [thread:$0]  %s11053_s8, 64, %s103_s17, [#allocation17]  }
  0x88   :  { %s8719_s24 = smov [#allocation21]   ;;  %s8669_s22 = scalar_lea.hbm %s11055_s10, 64 }
  0x89   :  { %s122_s21 = sshll.u32 %s8719_s24, 4  ;;  %p8670_p8 = scmp.ne.s32.totalorder %s11055_s10, %s8669_s22  ;;  %s123_s21 = int_to_ptr.vmem [resolvable:$true] %s122_s21 }
  0x8a   :  { %p8673_p9 = scmp.lt.u32.totalorder %s8669_s22, %s11055_s10 }
  0x8c   :  { %p8675_p10 = pnand %p8673_p9, %p8670_p8 }
  0x8e   :  { %8678 = shalt.err (!%p8675_p10)
}
  0x8f   :  { %s8679_s5 = scalar_lea.vmem %s123_s21, 64  ;;  %p8684_p12 = scmp.lt.s32.totalorder %s123_s21, %s123_s21 }
  0x90   :  { %p8680_p11 = scmp.ne.s32.totalorder %s123_s21, %s8679_s5  ;;  %p8685_p13 = scmp.lt.s32.totalorder %s8679_s5, %s8679_s5 }
  0x92   :  { %p8686_p0 = por %p8685_p13, %p8684_p12 }
  0x94   :  { %p8687_p1 = pnand %p8686_p0, %p8680_p11 }
  0x96   :  { %8690 = shalt.err (!%p8687_p1)
}
  0x97   :  { %125 = dma.hbm_to_vmem [thread:$0]  %s11055_s10, 64, %s123_s21, [#allocation20]  }
  0x98   :  { %8691 = dma.done.wait [#allocation9], 28672  }
  0x99   :  { %8692 = vsyncadd [#allocation9], 4294938624 }
  0x9a   :  { %8693 = dma.done.wait [#allocation11], 16512  }
  0x9b   :  { %8694 = vsyncadd [#allocation11], 4294950784 }
  0x9c   :  { %8695 = dma.done.wait [#allocation14], 160  }
  0x9d   :  { %8696 = vsyncadd [#allocation14], 4294967136 }
  0x9e   :  { %8697 = dma.done.wait [#allocation17], 128  }
  0x9f   :  { %8698 = vsyncadd [#allocation17], 4294967168 }
  0xa0   :  { %8699 = dma.done.wait [#allocation20], 128  }
  0xa1   :  { %8700 = vsyncadd [#allocation20], 4294967168  ;;  %s160_s7 = sld [smem:[#allocation0]]   ;;  %s8720_s18 = smov 64   ;;  %vm1774_vm0 = vcmask 523264  }
  0xa2   :  { %178 = sst [smem:[#allocation23 + $0x3]] %s8720_s18  ;;  %s8721_s29 = smov 4  }
  0xa3   :  { %186 = sst [smem:[#allocation23 + $0x7]] %s8720_s18  ;;  %s8722_s10 = smov [#allocation2]  }
  0xa4   :  { %188 = sst [smem:[#allocation23 + $0x8]] %s8721_s29  ;;  %s168_s0 = sshll.u32 %s8722_s10, 4  ;;  %s169_s0 = int_to_ptr.vmem [resolvable:$true] %s168_s0 }
  0xa5   :  { %s8723_s26 = smov 768   ;;  %s8724_s2 = smov 6  }
  0xa6   :  { %172 = sst [smem:[#allocation23]] %s8723_s26  ;;  %s8725_s30 = smov 128  }
  0xa7   :  { %174 = sst [smem:[#allocation23 + $0x1]] %s8723_s26  ;;  %s7552_s11 = sshll.u32 %s160_s7, 26 }
  0xa8   :  { %176 = sst [smem:[#allocation23 + $0x2]] %s8724_s2  ;;  %s8946_s20 = sadd.s32 134217728, %s7552_s11 }
  0xa9   :  { %180 = sst [smem:[#allocation23 + $0x4]] %s8725_s30  ;;  %s8726_s6 = smov 2  }
  0xaa   :  { %182 = sst [smem:[#allocation23 + $0x5]] %s8726_s6  ;;  %s8727_s3 = smov 384  }
  0xab   :  { %184 = sst [smem:[#allocation23 + $0x6]] %s8727_s3  ;;  %s8728_s24 = smov [#allocation6]  }
  0xac   :  { %s8729_s21 = smov [#allocation22]   ;;  %s8730_s22 = smov [#allocation3]  }
  0xad   :  { %190 = dma.general %s11057_s12, 43008, %s169_s0, %s8728_s24, %s8729_s21, [#allocation23], %s8946_s20, 0  }
  0xae   :  { %207 = sst [smem:[#allocation25]] %s8723_s26  ;;  %s203_s25 = sshll.u32 %s8730_s22, 4  ;;  %s204_s25 = int_to_ptr.vmem [resolvable:$true] %s203_s25 }
  0xaf   :  { %209 = sst [smem:[#allocation25 + $0x1]] %s8723_s26  ;;  %s8731_s27 = smov [#allocation6 + $0x1]  }
  0xb0   :  { %211 = sst [smem:[#allocation25 + $0x2]] %s8724_s2  ;;  %s8732_s28 = smov [#allocation24]  }
  0xb1   :  { %213 = sst [smem:[#allocation25 + $0x3]] %s8720_s18  ;;  %s8733_s5 = smov [#allocation4]  }
  0xb2   :  { %215 = sst [smem:[#allocation25 + $0x4]] %s8725_s30  ;;  %s238_s8 = sshll.u32 %s8733_s5, 4  ;;  %s239_s8 = int_to_ptr.vmem [resolvable:$true] %s238_s8 }
  0xb3   :  { %217 = sst [smem:[#allocation25 + $0x5]] %s8726_s6  ;;  %s8734_s17 = smov 256  }
  0xb4   :  { %219 = sst [smem:[#allocation25 + $0x6]] %s8727_s3  ;;  %s8736_s7 = smov [#allocation26]  }
  0xb5   :  { %221 = sst [smem:[#allocation25 + $0x7]] %s8720_s18  ;;  %s8737_s26 = smov [#allocation5]  }
  0xb6   :  { %223 = sst [smem:[#allocation25 + $0x8]] %s8721_s29  ;;  %s273_s11 = sshll.u32 %s8737_s26, 4  ;;  %s274_s11 = int_to_ptr.vmem [resolvable:$true] %s273_s11 }
  0xb7   :  { %225 = dma.general %s11058_s13, 12288, %s204_s25, %s8731_s27, %s8732_s28, [#allocation25], %s8946_s20, 0  }
  0xb8   :  { %242 = sst [smem:[#allocation27]] %s8711_s19  ;;  %s8735_s13 = smov [#allocation6 + $0x2]  }
  0xb9   :  { %244 = sst [smem:[#allocation27 + $0x1]] %s8711_s19  ;;  %s8739_s2 = smov [#allocation28]  }
  0xba   :  { %246 = sst [smem:[#allocation27 + $0x2]] %s8721_s29 }
  0xbb   :  { %248 = sst [smem:[#allocation27 + $0x3]] %s8720_s18 }
  0xbc   :  { %250 = sst [smem:[#allocation27 + $0x4]] %s8725_s30 }
  0xbd   :  { %252 = sst [smem:[#allocation27 + $0x5]] %s8726_s6 }
  0xbe   :  { %254 = sst [smem:[#allocation27 + $0x6]] %s8734_s17 }
  0xbf   :  { %256 = sst [smem:[#allocation27 + $0x7]] %s8720_s18 }
  0xc0   :  { %258 = sst [smem:[#allocation27 + $0x8]] %s8721_s29 }
  0xc1   :  { %260 = dma.general %s11059_s14, 24576, %s239_s8, %s8735_s13, %s8736_s7, [#allocation27], %s8946_s20, 0  }
  0xc2   :  { %277 = sst [smem:[#allocation29]] %s8711_s19  ;;  %s8738_s14 = smov [#allocation6 + $0x3]  }
  0xc3   :  { %279 = sst [smem:[#allocation29 + $0x1]] %s8711_s19 }
  0xc4   :  { %281 = sst [smem:[#allocation29 + $0x2]] %s8721_s29 }
  0xc5   :  { %283 = sst [smem:[#allocation29 + $0x3]] %s8720_s18 }
  0xc6   :  { %285 = sst [smem:[#allocation29 + $0x4]] %s8725_s30 }
  0xc7   :  { %287 = sst [smem:[#allocation29 + $0x5]] %s8726_s6 }
  0xc8   :  { %289 = sst [smem:[#allocation29 + $0x6]] %s8734_s17 }
  0xc9   :  { %291 = sst [smem:[#allocation29 + $0x7]] %s8720_s18 }
  0xca   :  { %293 = sst [smem:[#allocation29 + $0x8]] %s8721_s29 }
  0xcb   :  { %295 = dma.general %s11060_s15, 49152, %s274_s11, %s8738_s14, %s8739_s2, [#allocation29], %s8946_s20, 0  }
  0xcc   :  { %s11356_s23 = sld [smem:[#allocation239_spill]]  ;;  %v312_v14 = vld [vmem:[#allocation8] sm:$0xff]  ;;  %v313_v18 = vld [vmem:[#allocation8 + $0x8] sm:$0xff] }
  0xcd   :  { %v316_v15 = vld [vmem:[#allocation8 + $0x20] sm:$0xff]  ;;  %v317_v19 = vld [vmem:[#allocation8 + $0x28] sm:$0xff] }
  0xce   :  { %v7577_v17 = vcombine.high %v312_v14, %v316_v15  ;;  %v7576_v20 = vcombine.low %v312_v14, %v316_v15  ;;  %v320_v21 = vld [vmem:[#allocation8 + $0x40] sm:$0xff]  ;;  %v7579_v22 = vcombine.high %v313_v18, %v317_v19  ;;  %v7578_v23 = vcombine.low %v313_v18, %v317_v19  ;;  %v321_v25 = vld [vmem:[#allocation8 + $0x48] sm:$0xff] }
  0xcf   :  { %v324_v24 = vld [vmem:[#allocation8 + $0x60] sm:$0xff]  ;;  %v325_v26 = vld [vmem:[#allocation8 + $0x68] sm:$0xff] }
  0xd0   :  { %1787 = vmatprep.subr.bf16.mxu0 %v7577_v17  ;;  %v7585_v27 = vcombine.high %v320_v21, %v324_v24  ;;  %v7587_v28 = vcombine.high %v321_v25, %v325_v26  ;;  %v328_v29 = vld [vmem:[#allocation8 + $0x80] sm:$0xff]  ;;  %v329_v31 = vld [vmem:[#allocation8 + $0x88] sm:$0xff]  ;;  %1933 = vmatprep.subr.bf16.mxu1 %v7579_v22  ;;  %v7584_v32 = vcombine.low %v320_v21, %v324_v24 }
  0xd1   :  { %v332_v30 = vld [vmem:[#allocation8 + $0xa0] sm:$0xff]  ;;  %1788 = vmatpush1.bf16.msra.mxu0 %v7576_v20  ;;  %v333_v33 = vld [vmem:[#allocation8 + $0xa8] sm:$0xff]  ;;  %1934 = vmatpush1.bf16.msra.mxu1 %v7578_v23  ;;  %v7586_v34 = vcombine.low %v321_v25, %v325_v26 }
  0xd2   :  { %v4913_v1 = vld [vmem:[%s11356_s23] sm:$0xff]  ;;  %v4914_v2 = vld [vmem:[%s11356_s23 + $0x8] sm:$0xff]  ;;  %v4915_v3 = vld [vmem:[%s11356_s23 + $0x10] sm:$0xff]  ;;  %1789 = vmatprep.subr.bf16.mxu0 %v7585_v27  ;;  %v7593_v35 = vcombine.high %v328_v29, %v332_v30  ;;  %1935 = vmatprep.subr.bf16.mxu1 %v7587_v28  ;;  %v7595_v36 = vcombine.high %v329_v31, %v333_v33  ;;  %v7592_v41 = vcombine.low %v328_v29, %v332_v30 }
  0xd3   :  { %v4916_v4 = vld [vmem:[%s11356_s23 + $0x18] sm:$0xff]  ;;  %v4917_v5 = vld [vmem:[%s11356_s23 + $0x20] sm:$0xff]  ;;  %v4918_v6 = vld [vmem:[%s11356_s23 + $0x28] sm:$0xff]  ;;  %v9005_v7 = vpack.c.bf16 %v4913_v1, %v4913_v1  ;;  %v9007_v8 = vpack.c.bf16 %v4914_v2, %v4914_v2  ;;  %v9009_v9 = vpack.c.bf16 %v4915_v3, %v4915_v3  ;;  %v7594_v42 = vcombine.low %v329_v31, %v333_v33 }
  0xd4   :  { %v4919_v10 = vld [vmem:[%s11356_s23 + $0x30] sm:$0xff]  ;;  %v9014_v11 = vpack.c.bf16 %v4916_v4, %v4916_v4  ;;  %v9016_v12 = vpack.c.bf16 %v4917_v5, %v4917_v5  ;;  %v9018_v13 = vpack.c.bf16 %v4918_v6, %v4918_v6  ;;  %v336_v37 = vld [vmem:[#allocation8 + $0xc0] sm:$0xff] }
  0xd5   :  { %11357 = vst [vmem:[#allocation39_spill] sm:$0xff] %v9005_v7  ;;  %11358 = vst [vmem:[#allocation40_spill] sm:$0xff] %v9007_v8  ;;  %v9020_v16 = vpack.c.bf16 %v4919_v10, %v4919_v10  ;;  %v340_v38 = vld [vmem:[#allocation8 + $0xe0] sm:$0xff]  ;;  %v337_v39 = vld [vmem:[#allocation8 + $0xc8] sm:$0xff]  ;;  %1790 = vmatpush1.bf16.msra.mxu0 %v7584_v32  ;;  %1936 = vmatpush1.bf16.msra.mxu1 %v7586_v34 }
  0xd6   :  { %11359 = vst [vmem:[#allocation41_spill] sm:$0xff] %v9009_v9  ;;  %11360 = vst [vmem:[#allocation42_spill] sm:$0xff] %v9014_v11  ;;  %v341_v40 = vld [vmem:[#allocation8 + $0xe8] sm:$0xff]  ;;  %1791 = vmatprep.subr.bf16.mxu0 %v7593_v35  ;;  %v7601_v43 = vcombine.high %v336_v37, %v340_v38  ;;  %1937 = vmatprep.subr.bf16.mxu1 %v7595_v36  ;;  %v344_v45 = vld [vmem:[#allocation8 + $0x100] sm:$0xff]  ;;  %v7600_v49 = vcombine.low %v336_v37, %v340_v38 }
  0xd7   :  { %11361 = vst [vmem:[#allocation43_spill] sm:$0xff] %v9016_v12  ;;  %11362 = vst [vmem:[#allocation44_spill] sm:$0xff] %v9018_v13  ;;  %v7603_v44 = vcombine.high %v337_v39, %v341_v40  ;;  %v348_v46 = vld [vmem:[#allocation8 + $0x120] sm:$0xff]  ;;  %v345_v47 = vld [vmem:[#allocation8 + $0x108] sm:$0xff]  ;;  %v7602_v50 = vcombine.low %v337_v39, %v341_v40 }
  0xd8   :  { %11363 = vst [vmem:[#allocation45_spill] sm:$0xff] %v9020_v16  ;;  %v349_v48 = vld [vmem:[#allocation8 + $0x128] sm:$0xff]  ;;  %v7609_v51 = vcombine.high %v344_v45, %v348_v46  ;;  %v352_v53 = vld [vmem:[#allocation8 + $0x140] sm:$0xff]  ;;  %v7608_v57 = vcombine.low %v344_v45, %v348_v46 }
  0xd9   :  { %1792 = vmatpush1.bf16.msra.mxu0 %v7592_v41  ;;  %1938 = vmatpush1.bf16.msra.mxu1 %v7594_v42  ;;  %v7611_v52 = vcombine.high %v345_v47, %v349_v48  ;;  %v356_v54 = vld [vmem:[#allocation8 + $0x160] sm:$0xff]  ;;  %v353_v55 = vld [vmem:[#allocation8 + $0x148] sm:$0xff]  ;;  %v7610_v58 = vcombine.low %v345_v47, %v349_v48 }
  0xda   :  { %1793 = vmatprep.subr.bf16.mxu0 %v7601_v43  ;;  %1939 = vmatprep.subr.bf16.mxu1 %v7603_v44  ;;  %v357_v56 = vld [vmem:[#allocation8 + $0x168] sm:$0xff]  ;;  %v7617_v59 = vcombine.high %v352_v53, %v356_v54  ;;  %v360_v61 = vld [vmem:[#allocation8 + $0x180] sm:$0xff]  ;;  %v7616_v1 = vcombine.low %v352_v53, %v356_v54 }
  0xdb   :  { %v7619_v60 = vcombine.high %v353_v55, %v357_v56  ;;  %v364_v62 = vld [vmem:[#allocation8 + $0x1a0] sm:$0xff]  ;;  %v361_v63 = vld [vmem:[#allocation8 + $0x188] sm:$0xff]  ;;  %v7618_v2 = vcombine.low %v353_v55, %v357_v56 }
  0xdc   :  { %v365_v0 = vld [vmem:[#allocation8 + $0x1a8] sm:$0xff]  ;;  %v7625_v3 = vcombine.high %v360_v61, %v364_v62  ;;  %v368_v4 = vld [vmem:[#allocation8 + $0x1c0] sm:$0xff]  ;;  %v7624_v17 = vcombine.low %v360_v61, %v364_v62 }
  0xdd   :  { %1794 = vmatpush1.bf16.msra.mxu0 %v7600_v49  ;;  %1940 = vmatpush1.bf16.msra.mxu1 %v7602_v50  ;;  %v7627_v5 = vcombine.high %v361_v63, %v365_v0  ;;  %v372_v6 = vld [vmem:[#allocation8 + $0x1e0] sm:$0xff]  ;;  %v369_v14 = vld [vmem:[#allocation8 + $0x1c8] sm:$0xff]  ;;  %v7626_v18 = vcombine.low %v361_v63, %v365_v0 }
  0xde   :  { %1795 = vmatprep.subr.bf16.mxu0 %v7609_v51  ;;  %1941 = vmatprep.subr.bf16.mxu1 %v7611_v52  ;;  %v9025_v10 = vld [vmem:[%s11046_s1 + $0x4] ss:$16 sps:$4 sm:$0xff]   ;;  %v373_v15 = vld [vmem:[#allocation8 + $0x1e8] sm:$0xff]  ;;  %v7633_v19 = vcombine.high %v368_v4, %v372_v6  ;;  %v7632_v25 = vcombine.low %v368_v4, %v372_v6 }
  0xdf   :  { %1819 = vmatprep.mubr.bf16.mxu0 %v9025_v10  ;;  %v7635_v20 = vcombine.high %v369_v14, %v373_v15  ;;  %v376_v21 = vld [vmem:[#allocation8 + $0x200] sm:$0xff]  ;;  %1965 = vmatprep.mubr.bf16.mxu1 %v9025_v10  ;;  %v377_v23 = vld [vmem:[#allocation8 + $0x208] sm:$0xff]  ;;  %v7634_v26 = vcombine.low %v369_v14, %v373_v15 }
  0xe0   :  { %v380_v22 = vld [vmem:[#allocation8 + $0x220] sm:$0xff]  ;;  %v381_v24 = vld [vmem:[#allocation8 + $0x228] sm:$0xff] }
  0xe1   :  { %1796 = vmatpush1.bf16.msra.mxu0 %v7608_v57  ;;  %1942 = vmatpush1.bf16.msra.mxu1 %v7610_v58  ;;  %v7641_v27 = vcombine.high %v376_v21, %v380_v22  ;;  %v7643_v28 = vcombine.high %v377_v23, %v381_v24  ;;  %v384_v29 = vld [vmem:[#allocation8 + $0x240] sm:$0xff]  ;;  %v385_v31 = vld [vmem:[#allocation8 + $0x248] sm:$0xff]  ;;  %v7640_v33 = vcombine.low %v376_v21, %v380_v22 }
  0xe2   :  { %1797 = vmatprep.subr.bf16.mxu0 %v7617_v59  ;;  %1943 = vmatprep.subr.bf16.mxu1 %v7619_v60  ;;  %v388_v30 = vld [vmem:[#allocation8 + $0x260] sm:$0xff]  ;;  %v389_v32 = vld [vmem:[#allocation8 + $0x268] sm:$0xff]  ;;  %v7642_v34 = vcombine.low %v377_v23, %v381_v24 }
  0xe3   :  { %v7649_v35 = vcombine.high %v384_v29, %v388_v30  ;;  %v7651_v36 = vcombine.high %v385_v31, %v389_v32  ;;  %v392_v37 = vld [vmem:[#allocation8 + $0x280] sm:$0xff]  ;;  %v393_v39 = vld [vmem:[#allocation8 + $0x288] sm:$0xff]  ;;  %v7648_v41 = vcombine.low %v384_v29, %v388_v30  ;;  %v7650_v42 = vcombine.low %v385_v31, %v389_v32 }
  0xe4   :  { %v396_v38 = vld [vmem:[#allocation8 + $0x2a0] sm:$0xff]  ;;  %v397_v40 = vld [vmem:[#allocation8 + $0x2a8] sm:$0xff] }
  0xe5   :  { %1798 = vmatpush1.bf16.msra.mxu0 %v7616_v1  ;;  %1944 = vmatpush1.bf16.msra.mxu1 %v7618_v2  ;;  %v7657_v43 = vcombine.high %v392_v37, %v396_v38  ;;  %v7659_v44 = vcombine.high %v393_v39, %v397_v40  ;;  %v400_v45 = vld [vmem:[#allocation8 + $0x2c0] sm:$0xff]  ;;  %v401_v47 = vld [vmem:[#allocation8 + $0x2c8] sm:$0xff]  ;;  %v7656_v49 = vcombine.low %v392_v37, %v396_v38 }
  0xe6   :  { %1799 = vmatprep.subr.bf16.mxu0 %v7625_v3  ;;  %1945 = vmatprep.subr.bf16.mxu1 %v7627_v5  ;;  %v404_v46 = vld [vmem:[#allocation8 + $0x2e0] sm:$0xff]  ;;  %v405_v48 = vld [vmem:[#allocation8 + $0x2e8] sm:$0xff]  ;;  %v7658_v50 = vcombine.low %v393_v39, %v397_v40 }
  0xe7   :  { %v7665_v51 = vcombine.high %v400_v45, %v404_v46  ;;  %v7667_v52 = vcombine.high %v401_v47, %v405_v48  ;;  %v408_v53 = vld [vmem:[#allocation8 + $0x300] sm:$0xff]  ;;  %v409_v55 = vld [vmem:[#allocation8 + $0x308] sm:$0xff]  ;;  %v7664_v57 = vcombine.low %v400_v45, %v404_v46  ;;  %v7666_v58 = vcombine.low %v401_v47, %v405_v48 }
  0xe8   :  { %v412_v54 = vld [vmem:[#allocation8 + $0x320] sm:$0xff]  ;;  %v413_v56 = vld [vmem:[#allocation8 + $0x328] sm:$0xff] }
  0xe9   :  { %1800 = vmatpush1.bf16.msra.mxu0 %v7624_v17  ;;  %1946 = vmatpush1.bf16.msra.mxu1 %v7626_v18  ;;  %v7673_v59 = vcombine.high %v408_v53, %v412_v54  ;;  %v7675_v60 = vcombine.high %v409_v55, %v413_v56  ;;  %v416_v61 = vld [vmem:[#allocation8 + $0x340] sm:$0xff]  ;;  %v417_v63 = vld [vmem:[#allocation8 + $0x348] sm:$0xff]  ;;  %v7672_v1 = vcombine.low %v408_v53, %v412_v54 }
  0xea   :  { %1801 = vmatprep.subr.bf16.mxu0 %v7633_v19  ;;  %1947 = vmatprep.subr.bf16.mxu1 %v7635_v20  ;;  %v420_v62 = vld [vmem:[#allocation8 + $0x360] sm:$0xff]  ;;  %v421_v0 = vld [vmem:[#allocation8 + $0x368] sm:$0xff]  ;;  %v7674_v2 = vcombine.low %v409_v55, %v413_v56 }
  0xeb   :  { %v7681_v3 = vcombine.high %v416_v61, %v420_v62  ;;  %v7683_v4 = vcombine.high %v417_v63, %v421_v0  ;;  %v424_v5 = vld [vmem:[#allocation8 + $0x380] sm:$0xff]  ;;  %v425_v14 = vld [vmem:[#allocation8 + $0x388] sm:$0xff]  ;;  %v7680_v17 = vcombine.low %v416_v61, %v420_v62  ;;  %v7682_v18 = vcombine.low %v417_v63, %v421_v0 }
  0xec   :  { %v428_v6 = vld [vmem:[#allocation8 + $0x3a0] sm:$0xff]  ;;  %v429_v15 = vld [vmem:[#allocation8 + $0x3a8] sm:$0xff] }
  0xed   :  { %1802 = vmatpush1.bf16.msra.mxu0 %v7632_v25  ;;  %1948 = vmatpush1.bf16.msra.mxu1 %v7634_v26  ;;  %v7689_v19 = vcombine.high %v424_v5, %v428_v6  ;;  %v7691_v20 = vcombine.high %v425_v14, %v429_v15  ;;  %v432_v21 = vld [vmem:[#allocation8 + $0x3c0] sm:$0xff]  ;;  %v433_v23 = vld [vmem:[#allocation8 + $0x3c8] sm:$0xff]  ;;  %v7688_v25 = vcombine.low %v424_v5, %v428_v6 }
  0xee   :  { %1803 = vmatprep.subr.bf16.mxu0 %v7641_v27  ;;  %1949 = vmatprep.subr.bf16.mxu1 %v7643_v28  ;;  %v436_v22 = vld [vmem:[#allocation8 + $0x3e0] sm:$0xff]  ;;  %v437_v24 = vld [vmem:[#allocation8 + $0x3e8] sm:$0xff]  ;;  %v7690_v26 = vcombine.low %v425_v14, %v429_v15 }
  0xef   :  { %v7697_v27 = vcombine.high %v432_v21, %v436_v22  ;;  %v7699_v28 = vcombine.high %v433_v23, %v437_v24  ;;  %v440_v29 = vld [vmem:[#allocation8 + $0x400] sm:$0xff]  ;;  %v441_v31 = vld [vmem:[#allocation8 + $0x408] sm:$0xff] }
  0xf0   :  { %v444_v30 = vld [vmem:[#allocation8 + $0x420] sm:$0xff]  ;;  %v445_v32 = vld [vmem:[#allocation8 + $0x428] sm:$0xff] }
  0xf1   :  { %1804 = vmatpush1.bf16.msra.mxu0 %v7640_v33  ;;  %1950 = vmatpush1.bf16.msra.mxu1 %v7642_v34  ;;  %v7696_v33 = vcombine.low %v432_v21, %v436_v22  ;;  %v7698_v34 = vcombine.low %v433_v23, %v437_v24  ;;  %v448_v37 = vld [vmem:[#allocation8 + $0x440] sm:$0xff]  ;;  %v449_v40 = vld [vmem:[#allocation8 + $0x448] sm:$0xff] }
  0xf2   :  { %1805 = vmatprep.subr.bf16.mxu0 %v7649_v35  ;;  %1951 = vmatprep.subr.bf16.mxu1 %v7651_v36  ;;  %v7705_v35 = vcombine.high %v440_v29, %v444_v30  ;;  %v7707_v36 = vcombine.high %v441_v31, %v445_v32  ;;  %v452_v38 = vld [vmem:[#allocation8 + $0x460] sm:$0xff]  ;;  %v2472_v16 = vld [vmem:[#allocation10 + $0x328] sm:$0xff] }
  0xf3   :  { %v9032_v39 = vld [vmem:[%s11046_s1] ss:$16 sps:$4 sm:$0xff]   ;;  %v9037_v48 = vld [vmem:[%s11046_s1 + $0x24] ss:$16 sps:$4 sm:$0xff]  }
  0xf4   :  { %v456_v46 = vld [vmem:[#allocation8 + $0x480] sm:$0xff]  ;;  %v2476_v13 = vld [vmem:[#allocation10 + $0x348] sm:$0xff] }
  0xf5   :  { %1806 = vmatpush1.bf16.msra.mxu0 %v7648_v41  ;;  %1952 = vmatpush1.bf16.msra.mxu1 %v7650_v42  ;;  %v453_v41 = vld [vmem:[#allocation8 + $0x468] sm:$0xff]  ;;  %v7704_v42 = vcombine.low %v440_v29, %v444_v30  ;;  %v460_v47 = vld [vmem:[#allocation8 + $0x4a0] sm:$0xff] }
  0xf6   :  { %1807 = vmatprep.subr.bf16.mxu0 %v7657_v43  ;;  %1953 = vmatprep.subr.bf16.mxu1 %v7659_v44  ;;  %v7706_v43 = vcombine.low %v441_v31, %v445_v32  ;;  %v7713_v44 = vcombine.high %v448_v37, %v452_v38  ;;  %v7715_v45 = vcombine.high %v449_v40, %v453_v41  ;;  %v464_v55 = vld [vmem:[#allocation8 + $0x4c0] sm:$0xff]  ;;  %v489_v29 = vld [vmem:[#allocation8 + $0x588] sm:$0xff] }
  0xf7   :  { %v7721_v53 = vcombine.high %v456_v46, %v460_v47  ;;  %v468_v56 = vld [vmem:[#allocation8 + $0x4e0] sm:$0xff]  ;;  %v493_v30 = vld [vmem:[#allocation8 + $0x5a8] sm:$0xff] }
  0xf8   :  { %v7729_v62 = vcombine.high %v464_v55, %v468_v56  ;;  %v472_v0 = vld [vmem:[#allocation8 + $0x500] sm:$0xff]  ;;  %v7728_v5 = vcombine.low %v464_v55, %v468_v56  ;;  %v2480_v11 = vld [vmem:[#allocation10 + $0x368] sm:$0xff] }
  0xf9   :  { %1808 = vmatpush1.bf16.msra.mxu0 %v7656_v49  ;;  %1954 = vmatpush1.bf16.msra.mxu1 %v7658_v50  ;;  %v457_v49 = vld [vmem:[#allocation8 + $0x488] sm:$0xff]  ;;  %v512_v55 = vld [vmem:[#allocation8 + $0x640] sm:$0xff] }
  0xfa   :  { %1809 = vmatprep.subr.bf16.mxu0 %v7665_v51  ;;  %1955 = vmatprep.subr.bf16.mxu1 %v7667_v52  ;;  %v461_v50 = vld [vmem:[#allocation8 + $0x4a8] sm:$0xff]  ;;  %v7712_v51 = vcombine.low %v448_v37, %v452_v38  ;;  %v7714_v52 = vcombine.low %v449_v40, %v453_v41  ;;  %v516_v56 = vld [vmem:[#allocation8 + $0x660] sm:$0xff] }
  0xfb   :  { %v7723_v54 = vcombine.high %v457_v49, %v461_v50  ;;  %v7722_v61 = vcombine.low %v457_v49, %v461_v50  ;;  %v9060_v21 = vld [vmem:[%s11046_s1 + $0x40] ss:$16 sps:$4 sm:$0xff]  }
  0xfc   :  { %v497_v37 = vld [vmem:[#allocation8 + $0x5c8] sm:$0xff]  ;;  %v2475_v12 = vld [vmem:[#allocation10 + $0x340] sm:$0xff] }
  0xfd   :  { %1810 = vmatpush1.bf16.msra.mxu0 %v7664_v57  ;;  %1956 = vmatpush1.bf16.msra.mxu1 %v7666_v58  ;;  %v465_v57 = vld [vmem:[#allocation8 + $0x4c8] sm:$0xff]  ;;  %v2479_v9 = vld [vmem:[#allocation10 + $0x360] sm:$0xff] }
  0xfe   :  { %1811 = vmatprep.subr.bf16.mxu0 %v7673_v59  ;;  %1957 = vmatprep.subr.bf16.mxu1 %v7675_v60  ;;  %v469_v58 = vld [vmem:[#allocation8 + $0x4e8] sm:$0xff]  ;;  %v7720_v60 = vcombine.low %v456_v46, %v460_v47  ;;  %v508_v46 = vld [vmem:[#allocation8 + $0x620] sm:$0xff] }
  0xff   :  { %v9046_v59 = vld [vmem:[%s11046_s1 + $0x20] ss:$16 sps:$4 sm:$0xff]   ;;  %v7731_v63 = vcombine.high %v465_v57, %v469_v58  ;;  %v7730_v6 = vcombine.low %v465_v57, %v469_v58  ;;  %v9079_v47 = vld [vmem:[%s11046_s1 + $0xc] ss:$16 sps:$4 sm:$0xff]  }
 0x100   :  { %v501_v38 = vld [vmem:[#allocation8 + $0x5e8] sm:$0xff]  ;;  %v2483_v7 = vld [vmem:[#allocation10 + $0x380] sm:$0xff] }
 0x101   :  { %1812 = vmatpush1.bf16.msra.mxu0 %v7672_v1  ;;  %1958 = vmatpush1.bf16.msra.mxu1 %v7674_v2  ;;  %v476_v1 = vld [vmem:[#allocation8 + $0x520] sm:$0xff]  ;;  %v505_v49 = vld [vmem:[#allocation8 + $0x608] sm:$0xff] }
 0x102   :  { %1813 = vmatprep.subr.bf16.mxu0 %v7681_v3  ;;  %1959 = vmatprep.subr.bf16.mxu1 %v7683_v4  ;;  %v9051_v2 = vld [vmem:[%s11046_s1 + $0x44] ss:$16 sps:$4 sm:$0xff]   ;;  %v473_v3 = vld [vmem:[#allocation8 + $0x508] sm:$0xff]  ;;  %v7737_v14 = vcombine.high %v472_v0, %v476_v1  ;;  %v7736_v22 = vcombine.low %v472_v0, %v476_v1 }
 0x103   :  { %v477_v4 = vld [vmem:[#allocation8 + $0x528] sm:$0xff]  ;;  %v520_v0 = vld [vmem:[#allocation8 + $0x680] sm:$0xff] }
 0x104   :  { %v7739_v15 = vcombine.high %v473_v3, %v477_v4  ;;  %v7738_v23 = vcombine.low %v473_v3, %v477_v4  ;;  %v9074_v40 = vld [vmem:[%s11046_s1 + $0x60] ss:$16 sps:$4 sm:$0xff]  }
 0x105   :  { %1814 = vmatpush1.bf16.msra.mxu0 %v7680_v17  ;;  %1960 = vmatpush1.bf16.msra.mxu1 %v7682_v18  ;;  %v480_v17 = vld [vmem:[#allocation8 + $0x540] sm:$0xff]  ;;  %v509_v50 = vld [vmem:[#allocation8 + $0x628] sm:$0xff] }
 0x106   :  { %1815 = vmatprep.subr.bf16.mxu0 %v7689_v19  ;;  %1961 = vmatprep.subr.bf16.mxu1 %v7691_v20  ;;  %v484_v18 = vld [vmem:[#allocation8 + $0x560] sm:$0xff]  ;;  %v481_v19 = vld [vmem:[#allocation8 + $0x548] sm:$0xff] }
 0x107   :  { %v485_v20 = vld [vmem:[#allocation8 + $0x568] sm:$0xff]  ;;  %v7745_v24 = vcombine.high %v480_v17, %v484_v18  ;;  %v7744_v31 = vcombine.low %v480_v17, %v484_v18  ;;  %v524_v1 = vld [vmem:[#allocation8 + $0x6a0] sm:$0xff] }
 0x108   :  { %v7746_v32 = vcombine.low %v481_v19, %v485_v20  ;;  %v513_v57 = vld [vmem:[#allocation8 + $0x648] sm:$0xff]  ;;  %v528_v17 = vld [vmem:[#allocation8 + $0x6c0] sm:$0xff] }
 0x109   :  { %1816 = vmatpush1.bf16.msra.mxu0 %v7688_v25  ;;  %1962 = vmatpush1.bf16.msra.mxu1 %v7690_v26  ;;  %v7747_v25 = vcombine.high %v481_v19, %v485_v20  ;;  %v488_v26 = vld [vmem:[#allocation8 + $0x580] sm:$0xff]  ;;  %v517_v58 = vld [vmem:[#allocation8 + $0x668] sm:$0xff] }
 0x10a   :  { %1817 = vmatprep.subr.bf16.mxu0 %v7697_v27  ;;  %1963 = vmatprep.subr.bf16.mxu1 %v7699_v28  ;;  %v492_v27 = vld [vmem:[#allocation8 + $0x5a0] sm:$0xff]  ;;  %v521_v3 = vld [vmem:[#allocation8 + $0x688] sm:$0xff] }
 0x10b   :  { %v9065_v28 = vld [vmem:[%s11046_s1 + $0x64] ss:$16 sps:$4 sm:$0xff]   ;;  %v7752_v41 = vcombine.low %v488_v26, %v492_v27  ;;  %v525_v4 = vld [vmem:[#allocation8 + $0x6a8] sm:$0xff] }
 0x10c   :  { %v532_v18 = vld [vmem:[#allocation8 + $0x6e0] sm:$0xff]  ;;  %v529_v19 = vld [vmem:[#allocation8 + $0x6c8] sm:$0xff] }
 0x10d   :  { %1818 = vmatpush1.bf16.msra.mxu0 %v7696_v33  ;;  %1964 = vmatpush1.bf16.msra.mxu1 %v7698_v34  ;;  %v7753_v33 = vcombine.high %v488_v26, %v492_v27  ;;  %v7755_v34 = vcombine.high %v489_v29, %v493_v30  ;;  %v533_v20 = vld [vmem:[#allocation8 + $0x6e8] sm:$0xff]  ;;  %v314_v26 = vld [vmem:[#allocation8 + $0x10] sm:$0xff]  ;;  %v2487_v8 = vld [vmem:[#allocation10 + $0x3a0] sm:$0xff] }
 0x10e   :  { %1860 = vmatprep.subr.bf16.mxu0 %v7705_v35  ;;  %2006 = vmatprep.subr.bf16.mxu1 %v7707_v36  ;;  %v496_v35 = vld [vmem:[#allocation8 + $0x5c0] sm:$0xff]  ;;  %v318_v27 = vld [vmem:[#allocation8 + $0x30] sm:$0xff] }
 0x10f   :  { %v500_v36 = vld [vmem:[#allocation8 + $0x5e0] sm:$0xff] }
 0x110   :  { %1820 = vmatmul.mubr.bf16.vlgmr.msra.gmra.mrb[0].mxu0 %v9032_v39  ;;  %1966 = vmatmul.mubr.bf16.vlgmr.msra.gmra.mrb[0].mxu1 %v9032_v39 }
 0x111   :  { %1861 = vmatpush1.bf16.msra.mxu0 %v7704_v42  ;;  %2007 = vmatpush1.bf16.msra.mxu1 %v7706_v43  ;;  %v7754_v42 = vcombine.low %v489_v29, %v493_v30  ;;  %v7761_v43 = vcombine.high %v496_v35, %v500_v36  ;;  %v315_v29 = vld [vmem:[#allocation8 + $0x18] sm:$0xff] }
 0x112   :  { %1862 = vmatprep.subr.bf16.mxu0 %v7713_v44  ;;  %2008 = vmatprep.subr.bf16.mxu1 %v7715_v45  ;;  %v7763_v44 = vcombine.high %v497_v37, %v501_v38  ;;  %v504_v45 = vld [vmem:[#allocation8 + $0x600] sm:$0xff]  ;;  %v319_v30 = vld [vmem:[#allocation8 + $0x38] sm:$0xff] }
 0x113   :  { %1829 = vmatprep.mubr.bf16.mxu0 %v9037_v48  ;;  %1975 = vmatprep.mubr.bf16.mxu1 %v9037_v48 }
 0x115   :  { %1863 = vmatpush1.bf16.msra.mxu0 %v7712_v51  ;;  %2009 = vmatpush1.bf16.msra.mxu1 %v7714_v52  ;;  %v7760_v51 = vcombine.low %v496_v35, %v500_v36  ;;  %v7762_v52 = vcombine.low %v497_v37, %v501_v38  ;;  %v322_v35 = vld [vmem:[#allocation8 + $0x50] sm:$0xff]  ;;  %v323_v38 = vld [vmem:[#allocation8 + $0x58] sm:$0xff] }
 0x116   :  { %1864 = vmatprep.subr.bf16.mxu0 %v7721_v53  ;;  %2010 = vmatprep.subr.bf16.mxu1 %v7723_v54  ;;  %v7769_v53 = vcombine.high %v504_v45, %v508_v46  ;;  %v7771_v54 = vcombine.high %v505_v49, %v509_v50  ;;  %v326_v36 = vld [vmem:[#allocation8 + $0x70] sm:$0xff] }
 0x117   :  { %v9090_v37 = vld [vmem:[%s11046_s1 + $0x8] ss:$16 sps:$4 sm:$0xff]  }
 0x118   :  { %1830 = vmatmul.mubr.bf16.gmra.mrb[4].mxu0 %v9046_v59  ;;  %1976 = vmatmul.mubr.bf16.gmra.mrb[4].mxu1 %v9046_v59 }
 0x119   :  { %1865 = vmatpush1.bf16.msra.mxu0 %v7720_v60  ;;  %2011 = vmatpush1.bf16.msra.mxu1 %v7722_v61  ;;  %v7768_v60 = vcombine.low %v504_v45, %v508_v46  ;;  %v7770_v61 = vcombine.low %v505_v49, %v509_v50  ;;  %v9095_v46 = vld [vmem:[%s11046_s1 + $0x2c] ss:$16 sps:$4 sm:$0xff]   ;;  %v330_v49 = vld [vmem:[#allocation8 + $0x90] sm:$0xff] }
 0x11a   :  { %1866 = vmatprep.subr.bf16.mxu0 %v7729_v62  ;;  %2012 = vmatprep.subr.bf16.mxu1 %v7731_v63  ;;  %v7777_v62 = vcombine.high %v512_v55, %v516_v56  ;;  %v7779_v63 = vcombine.high %v513_v57, %v517_v58  ;;  %v334_v50 = vld [vmem:[#allocation8 + $0xb0] sm:$0xff] }
 0x11b   :  { %1839 = vmatprep.mubr.bf16.mxu0 %v9051_v2  ;;  %1985 = vmatprep.mubr.bf16.mxu1 %v9051_v2 }
 0x11d   :  { %1867 = vmatpush1.bf16.msra.mxu0 %v7728_v5  ;;  %2013 = vmatpush1.bf16.msra.mxu1 %v7730_v6  ;;  %v7776_v5 = vcombine.low %v512_v55, %v516_v56  ;;  %v7778_v6 = vcombine.low %v513_v57, %v517_v58  ;;  %v7597_v55 = vcombine.high %v330_v49, %v334_v50  ;;  %v338_v57 = vld [vmem:[#allocation8 + $0xd0] sm:$0xff] }
 0x11e   :  { %1868 = vmatprep.subr.bf16.mxu0 %v7737_v14  ;;  %2014 = vmatprep.subr.bf16.mxu1 %v7739_v15  ;;  %v7785_v14 = vcombine.high %v520_v0, %v524_v1  ;;  %v7787_v15 = vcombine.high %v521_v3, %v525_v4  ;;  %v342_v58 = vld [vmem:[#allocation8 + $0xf0] sm:$0xff] }
 0x120   :  { %1840 = vmatmul.mubr.bf16.gmra.mrb[8].mxu0 %v9060_v21  ;;  %1986 = vmatmul.mubr.bf16.gmra.mrb[8].mxu1 %v9060_v21 }
 0x121   :  { %1869 = vmatpush1.bf16.msra.mxu0 %v7736_v22  ;;  %2015 = vmatpush1.bf16.msra.mxu1 %v7738_v23  ;;  %v7784_v22 = vcombine.low %v520_v0, %v524_v1  ;;  %v7786_v23 = vcombine.low %v521_v3, %v525_v4  ;;  %v7605_v1 = vcombine.high %v338_v57, %v342_v58  ;;  %v9111_v4 = vld [vmem:[%s11046_s1 + $0x4c] ss:$16 sps:$4 sm:$0xff]  }
 0x122   :  { %1870 = vmatprep.subr.bf16.mxu0 %v7745_v24  ;;  %2016 = vmatprep.subr.bf16.mxu1 %v7747_v25  ;;  %v7793_v24 = vcombine.high %v528_v17, %v532_v18  ;;  %v7795_v25 = vcombine.high %v529_v19, %v533_v20 }
 0x123   :  { %1849 = vmatprep.mubr.bf16.mxu0 %v9065_v28  ;;  %1995 = vmatprep.mubr.bf16.mxu1 %v9065_v28 }
 0x125   :  { %1871 = vmatpush1.bf16.msra.mxu0 %v7744_v31  ;;  %2017 = vmatpush1.bf16.msra.mxu1 %v7746_v32  ;;  %v7792_v31 = vcombine.low %v528_v17, %v532_v18  ;;  %v7794_v32 = vcombine.low %v529_v19, %v533_v20  ;;  %v7604_v17 = vcombine.low %v338_v57, %v342_v58  ;;  %v382_v57 = vld [vmem:[#allocation8 + $0x230] sm:$0xff]  ;;  %v379_v58 = vld [vmem:[#allocation8 + $0x218] sm:$0xff] }
 0x126   :  { %1872 = vmatprep.subr.bf16.mxu0 %v7753_v33  ;;  %2018 = vmatprep.subr.bf16.mxu1 %v7755_v34  ;;  %v7581_v33 = vcombine.high %v314_v26, %v318_v27  ;;  %v7583_v34 = vcombine.high %v315_v29, %v319_v30 }
 0x128   :  { %1850 = vmatmul.mubr.bf16.gmra.mrb[12].mxu0 %v9074_v40  ;;  %1996 = vmatmul.mubr.bf16.gmra.mrb[12].mxu1 %v9074_v40 }
 0x129   :  { %1873 = vmatpush1.bf16.msra.mxu0 %v7752_v41  ;;  %2019 = vmatpush1.bf16.msra.mxu1 %v7754_v42  ;;  %v327_v41 = vld [vmem:[#allocation8 + $0x78] sm:$0xff]  ;;  %v7580_v42 = vcombine.low %v314_v26, %v318_v27 }
 0x12a   :  { %1874 = vmatprep.subr.bf16.mxu0 %v7761_v43  ;;  %2020 = vmatprep.subr.bf16.mxu1 %v7763_v44  ;;  %v7582_v43 = vcombine.low %v315_v29, %v319_v30  ;;  %v7589_v44 = vcombine.high %v322_v35, %v326_v36  ;;  %v7591_v45 = vcombine.high %v323_v38, %v327_v41  ;;  %v359_v26 = vld [vmem:[#allocation8 + $0x178] sm:$0xff] }
 0x12b   :  { %7800 = vmatprep.mubr.msk.bf16.mxu0 %vm1774_vm0, %v9079_v47  ;;  %7804 = vmatprep.mubr.msk.bf16.mxu1 %vm1774_vm0, %v9079_v47 }
 0x12d   :  { %1875 = vmatpush1.bf16.msra.mxu0 %v7760_v51  ;;  %2021 = vmatpush1.bf16.msra.mxu1 %v7762_v52  ;;  %v331_v51 = vld [vmem:[#allocation8 + $0x98] sm:$0xff] }
 0x12e   :  { %1876 = vmatprep.subr.bf16.mxu0 %v7769_v53  ;;  %2022 = vmatprep.subr.bf16.mxu1 %v7771_v54  ;;  %v335_v52 = vld [vmem:[#allocation8 + $0xb8] sm:$0xff]  ;;  %v7588_v53 = vcombine.low %v322_v35, %v326_v36  ;;  %v7590_v54 = vcombine.low %v323_v38, %v327_v41 }
 0x12f   :  { %v7599_v56 = vcombine.high %v331_v51, %v335_v52  ;;  %v7598_v0 = vcombine.low %v331_v51, %v335_v52  ;;  %v363_v35 = vld [vmem:[#allocation8 + $0x198] sm:$0xff] }
 0x130   :  { %v367_v36 = vld [vmem:[#allocation8 + $0x1b8] sm:$0xff] }
 0x131   :  { %1877 = vmatpush1.bf16.msra.mxu0 %v7768_v60  ;;  %2023 = vmatpush1.bf16.msra.mxu1 %v7770_v61  ;;  %v9106_v60 = vld [vmem:[%s11046_s1 + $0x28] ss:$16 sps:$4 sm:$0xff]  }
 0x132   :  { %1878 = vmatprep.subr.bf16.mxu0 %v7777_v62  ;;  %2024 = vmatprep.subr.bf16.mxu1 %v7779_v63  ;;  %v339_v61 = vld [vmem:[#allocation8 + $0xd8] sm:$0xff]  ;;  %v7596_v63 = vcombine.low %v330_v49, %v334_v50 }
 0x133   :  { %v343_v62 = vld [vmem:[#allocation8 + $0xf8] sm:$0xff] }
 0x134   :  { %v7607_v3 = vcombine.high %v339_v61, %v343_v62  ;;  %v7606_v18 = vcombine.low %v339_v61, %v343_v62  ;;  %v9138_v49 = vld [vmem:[%s11046_s1 + $0x68] ss:$16 sps:$4 sm:$0xff]  }
 0x135   :  { %1879 = vmatpush1.bf16.msra.mxu0 %v7776_v5  ;;  %2025 = vmatpush1.bf16.msra.mxu1 %v7778_v6  ;;  %v346_v5 = vld [vmem:[#allocation8 + $0x110] sm:$0xff]  ;;  %v371_v50 = vld [vmem:[#allocation8 + $0x1d8] sm:$0xff] }
 0x136   :  { %1880 = vmatprep.subr.bf16.mxu0 %v7785_v14  ;;  %2026 = vmatprep.subr.bf16.mxu1 %v7787_v15  ;;  %v350_v6 = vld [vmem:[#allocation8 + $0x130] sm:$0xff]  ;;  %v347_v14 = vld [vmem:[#allocation8 + $0x118] sm:$0xff] }
 0x137   :  { %v351_v15 = vld [vmem:[#allocation8 + $0x138] sm:$0xff]  ;;  %v7613_v19 = vcombine.high %v346_v5, %v350_v6  ;;  %v7612_v27 = vcombine.low %v346_v5, %v350_v6  ;;  %v390_v5 = vld [vmem:[#allocation8 + $0x270] sm:$0xff] }
 0x138   :  { %v7615_v20 = vcombine.high %v347_v14, %v351_v15  ;;  %v7614_v29 = vcombine.low %v347_v14, %v351_v15  ;;  %v375_v51 = vld [vmem:[#allocation8 + $0x1f8] sm:$0xff] }
 0x139   :  { %1881 = vmatpush1.bf16.msra.mxu0 %v7784_v22  ;;  %2027 = vmatpush1.bf16.msra.mxu1 %v7786_v23  ;;  %v354_v22 = vld [vmem:[#allocation8 + $0x150] sm:$0xff]  ;;  %v383_v61 = vld [vmem:[#allocation8 + $0x238] sm:$0xff] }
 0x13a   :  { %1882 = vmatprep.subr.bf16.mxu0 %v7793_v24  ;;  %2028 = vmatprep.subr.bf16.mxu1 %v7795_v25  ;;  %v358_v23 = vld [vmem:[#allocation8 + $0x170] sm:$0xff]  ;;  %v355_v25 = vld [vmem:[#allocation8 + $0x158] sm:$0xff] }
 0x13b   :  { %v9122_v24 = vld [vmem:[%s11046_s1 + $0x48] ss:$16 sps:$4 sm:$0xff]   ;;  %v7621_v30 = vcombine.high %v354_v22, %v358_v23  ;;  %v7620_v38 = vcombine.low %v354_v22, %v358_v23  ;;  %v7622_v41 = vcombine.low %v355_v25, %v359_v26 }
 0x13c   :  { %v387_v6 = vld [vmem:[#allocation8 + $0x258] sm:$0xff]  ;;  %v398_v22 = vld [vmem:[#allocation8 + $0x2b0] sm:$0xff] }
 0x13d   :  { %1883 = vmatpush1.bf16.msra.mxu0 %v7792_v31  ;;  %2029 = vmatpush1.bf16.msra.mxu1 %v7794_v32  ;;  %v7623_v31 = vcombine.high %v355_v25, %v359_v26  ;;  %v9127_v32 = vld [vmem:[%s11046_s1 + $0x6c] ss:$16 sps:$4 sm:$0xff]  }
 0x13e   :  { %2079 = vmatprep.subr.bf16.mxu0 %v7581_v33  ;;  %2225 = vmatprep.subr.bf16.mxu1 %v7583_v34  ;;  %v362_v33 = vld [vmem:[#allocation8 + $0x190] sm:$0xff]  ;;  %v391_v14 = vld [vmem:[#allocation8 + $0x278] sm:$0xff] }
 0x13f   :  { %v366_v34 = vld [vmem:[#allocation8 + $0x1b0] sm:$0xff]  ;;  %v395_v23 = vld [vmem:[#allocation8 + $0x298] sm:$0xff] }
 0x140   :  { %1893 = vmatmul.mubr.bf16.vlgmr.msra.gmra.mrb[0].mxu0 %v9090_v37  ;;  %2039 = vmatmul.mubr.bf16.vlgmr.msra.gmra.mrb[0].mxu1 %v9090_v37  ;;  %v7628_v52 = vcombine.low %v362_v33, %v366_v34  ;;  %v399_v25 = vld [vmem:[#allocation8 + $0x2b8] sm:$0xff] }
 0x141   :  { %2080 = vmatpush1.bf16.msra.mxu0 %v7580_v42  ;;  %2226 = vmatpush1.bf16.msra.mxu1 %v7582_v43  ;;  %v7629_v42 = vcombine.high %v362_v33, %v366_v34  ;;  %v7631_v43 = vcombine.high %v363_v35, %v367_v36  ;;  %v403_v33 = vld [vmem:[#allocation8 + $0x2d8] sm:$0xff] }
 0x142   :  { %2081 = vmatprep.subr.bf16.mxu0 %v7589_v44  ;;  %2227 = vmatprep.subr.bf16.mxu1 %v7591_v45  ;;  %v370_v44 = vld [vmem:[#allocation8 + $0x1d0] sm:$0xff]  ;;  %v407_v34 = vld [vmem:[#allocation8 + $0x2f8] sm:$0xff] }
 0x143   :  { %7801 = vmatprep.mubr.msk.bf16.mxu0 %vm1774_vm0, %v9095_v46  ;;  %7805 = vmatprep.mubr.msk.bf16.mxu1 %vm1774_vm0, %v9095_v46  ;;  %v374_v45 = vld [vmem:[#allocation8 + $0x1f0] sm:$0xff] }
 0x144   :  { %v7636_v62 = vcombine.low %v370_v44, %v374_v45 }
 0x145   :  { %2082 = vmatpush1.bf16.msra.mxu0 %v7588_v53  ;;  %2228 = vmatpush1.bf16.msra.mxu1 %v7590_v54  ;;  %v7630_v53 = vcombine.low %v363_v35, %v367_v36  ;;  %v7637_v54 = vcombine.high %v370_v44, %v374_v45  ;;  %v7662_v36 = vcombine.low %v395_v23, %v399_v25  ;;  %v411_v44 = vld [vmem:[#allocation8 + $0x318] sm:$0xff] }
 0x146   :  { %2083 = vmatprep.subr.bf16.mxu0 %v7597_v55  ;;  %2229 = vmatprep.subr.bf16.mxu1 %v7599_v56  ;;  %v7639_v55 = vcombine.high %v371_v50, %v375_v51  ;;  %v378_v56 = vld [vmem:[#allocation8 + $0x210] sm:$0xff]  ;;  %v415_v45 = vld [vmem:[#allocation8 + $0x338] sm:$0xff] }
 0x147   :  { %v7644_v15 = vcombine.low %v378_v56, %v382_v57 }
 0x148   :  { %1903 = vmatmul.mubr.bf16.gmra.mrb[4].mxu0 %v9106_v60  ;;  %2049 = vmatmul.mubr.bf16.gmra.mrb[4].mxu1 %v9106_v60 }
 0x149   :  { %2084 = vmatpush1.bf16.msra.mxu0 %v7596_v63  ;;  %2230 = vmatpush1.bf16.msra.mxu1 %v7598_v0  ;;  %v7638_v63 = vcombine.low %v371_v50, %v375_v51  ;;  %v7645_v0 = vcombine.high %v378_v56, %v382_v57  ;;  %v7670_v51 = vcombine.low %v403_v33, %v407_v34  ;;  %v419_v56 = vld [vmem:[#allocation8 + $0x358] sm:$0xff] }
 0x14a   :  { %2085 = vmatprep.subr.bf16.mxu0 %v7605_v1  ;;  %2231 = vmatprep.subr.bf16.mxu1 %v7607_v3  ;;  %v7647_v1 = vcombine.high %v379_v58, %v383_v61  ;;  %v386_v3 = vld [vmem:[#allocation8 + $0x250] sm:$0xff]  ;;  %v423_v57 = vld [vmem:[#allocation8 + $0x378] sm:$0xff] }
 0x14b   :  { %7802 = vmatprep.mubr.msk.bf16.mxu0 %vm1774_vm0, %v9111_v4  ;;  %7806 = vmatprep.mubr.msk.bf16.mxu1 %vm1774_vm0, %v9111_v4  ;;  %v7652_v26 = vcombine.low %v386_v3, %v390_v5 }
 0x14d   :  { %2086 = vmatpush1.bf16.msra.mxu0 %v7604_v17  ;;  %2232 = vmatpush1.bf16.msra.mxu1 %v7606_v18  ;;  %v7646_v17 = vcombine.low %v379_v58, %v383_v61  ;;  %v7653_v18 = vcombine.high %v386_v3, %v390_v5  ;;  %v7678_v61 = vcombine.low %v411_v44, %v415_v45  ;;  %v427_v3 = vld [vmem:[#allocation8 + $0x398] sm:$0xff] }
 0x14e   :  { %2087 = vmatprep.subr.bf16.mxu0 %v7613_v19  ;;  %2233 = vmatprep.subr.bf16.mxu1 %v7615_v20  ;;  %v7655_v19 = vcombine.high %v387_v6, %v391_v14  ;;  %v394_v20 = vld [vmem:[#allocation8 + $0x290] sm:$0xff]  ;;  %v431_v5 = vld [vmem:[#allocation8 + $0x3b8] sm:$0xff] }
 0x14f   :  { %v7660_v35 = vcombine.low %v394_v20, %v398_v22 }
 0x150   :  { %1913 = vmatmul.mubr.bf16.gmra.mrb[8].mxu0 %v9122_v24  ;;  %2059 = vmatmul.mubr.bf16.gmra.mrb[8].mxu1 %v9122_v24 }
 0x151   :  { %2088 = vmatpush1.bf16.msra.mxu0 %v7612_v27  ;;  %2234 = vmatpush1.bf16.msra.mxu1 %v7614_v29  ;;  %v7654_v27 = vcombine.low %v387_v6, %v391_v14  ;;  %v7661_v29 = vcombine.high %v394_v20, %v398_v22  ;;  %v7686_v14 = vcombine.low %v419_v56, %v423_v57  ;;  %v435_v20 = vld [vmem:[#allocation8 + $0x3d8] sm:$0xff] }
 0x152   :  { %2089 = vmatprep.subr.bf16.mxu0 %v7621_v30  ;;  %2235 = vmatprep.subr.bf16.mxu1 %v7623_v31  ;;  %v402_v30 = vld [vmem:[#allocation8 + $0x2d0] sm:$0xff]  ;;  %v439_v22 = vld [vmem:[#allocation8 + $0x3f8] sm:$0xff] }
 0x153   :  { %7803 = vmatprep.mubr.msk.bf16.mxu0 %vm1774_vm0, %v9127_v32  ;;  %7807 = vmatprep.mubr.msk.bf16.mxu1 %vm1774_vm0, %v9127_v32  ;;  %v406_v31 = vld [vmem:[#allocation8 + $0x2f0] sm:$0xff] }
 0x154   :  { %v7668_v50 = vcombine.low %v402_v30, %v406_v31 }
 0x155   :  { %2090 = vmatpush1.bf16.msra.mxu0 %v7620_v38  ;;  %2236 = vmatpush1.bf16.msra.mxu1 %v7622_v41  ;;  %v7669_v38 = vcombine.high %v402_v30, %v406_v31  ;;  %v7671_v41 = vcombine.high %v403_v33, %v407_v34  ;;  %v443_v30 = vld [vmem:[#allocation8 + $0x418] sm:$0xff]  ;;  %v7702_v34 = vcombine.low %v435_v20, %v439_v22 }
 0x156   :  { %2091 = vmatprep.subr.bf16.mxu0 %v7629_v42  ;;  %2237 = vmatprep.subr.bf16.mxu1 %v7631_v43  ;;  %v410_v42 = vld [vmem:[#allocation8 + $0x310] sm:$0xff]  ;;  %v447_v31 = vld [vmem:[#allocation8 + $0x438] sm:$0xff] }
 0x157   :  { %v414_v43 = vld [vmem:[#allocation8 + $0x330] sm:$0xff] }
 0x158   :  { %1923 = vmatmul.mubr.bf16.gmra.mrb[12].mxu0 %v9138_v49  ;;  %2069 = vmatmul.mubr.bf16.gmra.mrb[12].mxu1 %v9138_v49  ;;  %v7676_v58 = vcombine.low %v410_v42, %v414_v43 }
 0x159   :  { %2092 = vmatpush1.bf16.msra.mxu0 %v7628_v52  ;;  %2238 = vmatpush1.bf16.msra.mxu1 %v7630_v53  ;;  %v7677_v52 = vcombine.high %v410_v42, %v414_v43  ;;  %v7679_v53 = vcombine.high %v411_v44, %v415_v45  ;;  %v451_v42 = vld [vmem:[#allocation8 + $0x458] sm:$0xff]  ;;  %v7710_v45 = vcombine.low %v443_v30, %v447_v31 }
 0x15a   :  { %2093 = vmatprep.subr.bf16.mxu0 %v7637_v54  ;;  %2239 = vmatprep.subr.bf16.mxu1 %v7639_v55  ;;  %v418_v54 = vld [vmem:[#allocation8 + $0x350] sm:$0xff]  ;;  %v455_v43 = vld [vmem:[#allocation8 + $0x478] sm:$0xff] }
 0x15b   :  { %2111 = vmatprep.mubr.bf16.mxu0 %v9025_v10  ;;  %2257 = vmatprep.mubr.bf16.mxu1 %v9025_v10  ;;  %v7663_v10 = vcombine.high %v395_v23, %v399_v25  ;;  %v422_v55 = vld [vmem:[#allocation8 + $0x370] sm:$0xff]  ;;  %v7694_v25 = vcombine.low %v427_v3, %v431_v5 }
 0x15c   :  { %v7684_v6 = vcombine.low %v418_v54, %v422_v55 }
 0x15d   :  { %2094 = vmatpush1.bf16.msra.mxu0 %v7636_v62  ;;  %2240 = vmatpush1.bf16.msra.mxu1 %v7638_v63  ;;  %v7685_v62 = vcombine.high %v418_v54, %v422_v55  ;;  %v7687_v63 = vcombine.high %v419_v56, %v423_v57  ;;  %v459_v54 = vld [vmem:[#allocation8 + $0x498] sm:$0xff]  ;;  %v7718_v57 = vcombine.low %v451_v42, %v455_v43 }
 0x15e   :  { %2095 = vmatprep.subr.bf16.mxu0 %v7645_v0  ;;  %2241 = vmatprep.subr.bf16.mxu1 %v7647_v1  ;;  %v426_v0 = vld [vmem:[#allocation8 + $0x390] sm:$0xff]  ;;  %v463_v55 = vld [vmem:[#allocation8 + $0x4b8] sm:$0xff] }
 0x15f   :  { %v430_v1 = vld [vmem:[#allocation8 + $0x3b0] sm:$0xff] }
 0x160   :  { %v7692_v23 = vcombine.low %v426_v0, %v430_v1 }
 0x161   :  { %2096 = vmatpush1.bf16.msra.mxu0 %v7644_v15  ;;  %2242 = vmatpush1.bf16.msra.mxu1 %v7646_v17  ;;  %v7693_v15 = vcombine.high %v426_v0, %v430_v1  ;;  %v7695_v17 = vcombine.high %v427_v3, %v431_v5  ;;  %v467_v0 = vld [vmem:[#allocation8 + $0x4d8] sm:$0xff] }
 0x162   :  { %2097 = vmatprep.subr.bf16.mxu0 %v7653_v18  ;;  %2243 = vmatprep.subr.bf16.mxu1 %v7655_v19  ;;  %v434_v18 = vld [vmem:[#allocation8 + $0x3d0] sm:$0xff]  ;;  %v471_v1 = vld [vmem:[#allocation8 + $0x4f8] sm:$0xff] }
 0x163   :  { %v438_v19 = vld [vmem:[#allocation8 + $0x3f0] sm:$0xff] }
 0x164   :  { %v7700_v33 = vcombine.low %v434_v18, %v438_v19 }
 0x165   :  { %2098 = vmatpush1.bf16.msra.mxu0 %v7652_v26  ;;  %2244 = vmatpush1.bf16.msra.mxu1 %v7654_v27  ;;  %v7701_v26 = vcombine.high %v434_v18, %v438_v19  ;;  %v7703_v27 = vcombine.high %v435_v20, %v439_v22  ;;  %v479_v18 = vld [vmem:[#allocation8 + $0x538] sm:$0xff] }
 0x166   :  { %2099 = vmatprep.subr.bf16.mxu0 %v7661_v29  ;;  %2245 = vmatprep.subr.bf16.mxu1 %v7663_v10  ;;  %v442_v29 = vld [vmem:[#allocation8 + $0x410] sm:$0xff] }
 0x167   :  { %v446_v10 = vld [vmem:[#allocation8 + $0x430] sm:$0xff] }
 0x168   :  { %v7708_v44 = vcombine.low %v442_v29, %v446_v10 }
 0x169   :  { %2100 = vmatpush1.bf16.msra.mxu0 %v7660_v35  ;;  %2246 = vmatpush1.bf16.msra.mxu1 %v7662_v36  ;;  %v7709_v35 = vcombine.high %v442_v29, %v446_v10  ;;  %v7711_v36 = vcombine.high %v443_v30, %v447_v31  ;;  %v490_v31 = vld [vmem:[#allocation8 + $0x590] sm:$0xff] }
 0x16a   :  { %2101 = vmatprep.subr.bf16.mxu0 %v7669_v38  ;;  %2247 = vmatprep.subr.bf16.mxu1 %v7671_v41  ;;  %v450_v38 = vld [vmem:[#allocation8 + $0x450] sm:$0xff] }
 0x16b   :  { %v454_v41 = vld [vmem:[#allocation8 + $0x470] sm:$0xff] }
 0x16c   :  { %v7716_v56 = vcombine.low %v450_v38, %v454_v41 }
 0x16d   :  { %2102 = vmatpush1.bf16.msra.mxu0 %v7668_v50  ;;  %2248 = vmatpush1.bf16.msra.mxu1 %v7670_v51  ;;  %v7717_v50 = vcombine.high %v450_v38, %v454_v41  ;;  %v7719_v51 = vcombine.high %v451_v42, %v455_v43  ;;  %v498_v42 = vld [vmem:[#allocation8 + $0x5d0] sm:$0xff] }
 0x16e   :  { %2103 = vmatprep.subr.bf16.mxu0 %v7677_v52  ;;  %2249 = vmatprep.subr.bf16.mxu1 %v7679_v53  ;;  %v458_v52 = vld [vmem:[#allocation8 + $0x490] sm:$0xff] }
 0x16f   :  { %v462_v53 = vld [vmem:[#allocation8 + $0x4b0] sm:$0xff] }
 0x170   :  { %v7724_v3 = vcombine.low %v458_v52, %v462_v53  ;;  %v502_v43 = vld [vmem:[#allocation8 + $0x5f0] sm:$0xff] }
 0x171   :  { %2104 = vmatpush1.bf16.msra.mxu0 %v7676_v58  ;;  %2250 = vmatpush1.bf16.msra.mxu1 %v7678_v61  ;;  %v7725_v58 = vcombine.high %v458_v52, %v462_v53  ;;  %v7727_v61 = vcombine.high %v459_v54, %v463_v55  ;;  %v506_v53 = vld [vmem:[#allocation8 + $0x610] sm:$0xff] }
 0x172   :  { %2105 = vmatprep.subr.bf16.mxu0 %v7685_v62  ;;  %2251 = vmatprep.subr.bf16.mxu1 %v7687_v63  ;;  %v466_v62 = vld [vmem:[#allocation8 + $0x4d0] sm:$0xff] }
 0x173   :  { %v470_v63 = vld [vmem:[#allocation8 + $0x4f0] sm:$0xff] }
 0x174   :  { %v7733_v5 = vcombine.high %v466_v62, %v470_v63  ;;  %v7732_v19 = vcombine.low %v466_v62, %v470_v63  ;;  %v514_v62 = vld [vmem:[#allocation8 + $0x650] sm:$0xff] }
 0x175   :  { %2106 = vmatpush1.bf16.msra.mxu0 %v7684_v6  ;;  %2252 = vmatpush1.bf16.msra.mxu1 %v7686_v14  ;;  %v7735_v6 = vcombine.high %v467_v0, %v471_v1  ;;  %v474_v14 = vld [vmem:[#allocation8 + $0x510] sm:$0xff] }
 0x176   :  { %2107 = vmatprep.subr.bf16.mxu0 %v7693_v15  ;;  %2253 = vmatprep.subr.bf16.mxu1 %v7695_v17  ;;  %v478_v15 = vld [vmem:[#allocation8 + $0x530] sm:$0xff]  ;;  %v475_v17 = vld [vmem:[#allocation8 + $0x518] sm:$0xff] }
 0x177   :  { %v7741_v20 = vcombine.high %v474_v14, %v478_v15  ;;  %v7743_v22 = vcombine.high %v475_v17, %v479_v18  ;;  %v7740_v29 = vcombine.low %v474_v14, %v478_v15  ;;  %v7742_v10 = vcombine.low %v475_v17, %v479_v18  ;;  %v518_v63 = vld [vmem:[#allocation8 + $0x670] sm:$0xff]  ;;  %v523_v15 = vld [vmem:[#allocation8 + $0x698] sm:$0xff] }
 0x178   :  { %v526_v14 = vld [vmem:[#allocation8 + $0x6b0] sm:$0xff]  ;;  %v527_v17 = vld [vmem:[#allocation8 + $0x6b8] sm:$0xff]  ;;  %v7780_v18 = vcombine.low %v514_v62, %v518_v63 }
 0x179   :  { %2108 = vmatpush1.bf16.msra.mxu0 %v7692_v23  ;;  %2254 = vmatpush1.bf16.msra.mxu1 %v7694_v25  ;;  %v482_v23 = vld [vmem:[#allocation8 + $0x550] sm:$0xff] }
 0x17a   :  { %2109 = vmatprep.subr.bf16.mxu0 %v7701_v26  ;;  %2255 = vmatprep.subr.bf16.mxu1 %v7703_v27  ;;  %v486_v25 = vld [vmem:[#allocation8 + $0x570] sm:$0xff]  ;;  %v483_v26 = vld [vmem:[#allocation8 + $0x558] sm:$0xff] }
 0x17b   :  { %v487_v27 = vld [vmem:[#allocation8 + $0x578] sm:$0xff] }
 0x17c   :  { %v7751_v30 = vcombine.high %v483_v26, %v487_v27 }
 0x17d   :  { %2110 = vmatpush1.bf16.msra.mxu0 %v7700_v33  ;;  %2256 = vmatpush1.bf16.msra.mxu1 %v7702_v34  ;;  %v494_v33 = vld [vmem:[#allocation8 + $0x5b0] sm:$0xff]  ;;  %v491_v34 = vld [vmem:[#allocation8 + $0x598] sm:$0xff] }
 0x17e   :  { %2152 = vmatprep.subr.bf16.mxu0 %v7709_v35  ;;  %2298 = vmatprep.subr.bf16.mxu1 %v7711_v36  ;;  %v495_v35 = vld [vmem:[#allocation8 + $0x5b8] sm:$0xff]  ;;  %v7748_v36 = vcombine.low %v482_v23, %v486_v25  ;;  %v7757_v38 = vcombine.high %v490_v31, %v494_v33 }
 0x17f   :  { %v7759_v41 = vcombine.high %v491_v34, %v495_v35 }
 0x180   :  { %2112 = vmatmul.mubr.bf16.vlgmr.msra.gmra.mrb[16].mxu0 %v9032_v39  ;;  %2258 = vmatmul.mubr.bf16.vlgmr.msra.gmra.mrb[16].mxu1 %v9032_v39  ;;  %v7726_v39 = vcombine.low %v459_v54, %v463_v55  ;;  %v510_v54 = vld [vmem:[#allocation8 + $0x630] sm:$0xff]  ;;  %v507_v55 = vld [vmem:[#allocation8 + $0x618] sm:$0xff] }
 0x181   :  { %2153 = vmatpush1.bf16.msra.mxu0 %v7708_v44  ;;  %2299 = vmatpush1.bf16.msra.mxu1 %v7710_v45  ;;  %v499_v44 = vld [vmem:[#allocation8 + $0x5d8] sm:$0xff] }
 0x182   :  { %2154 = vmatprep.subr.bf16.mxu0 %v7717_v50  ;;  %2300 = vmatprep.subr.bf16.mxu1 %v7719_v51  ;;  %v503_v45 = vld [vmem:[#allocation8 + $0x5f8] sm:$0xff]  ;;  %v7756_v50 = vcombine.low %v490_v31, %v494_v33  ;;  %v7758_v51 = vcombine.low %v491_v34, %v495_v35  ;;  %v2372_v31 = vld [vmem:[#allocation10 + $0x8] sm:$0xff] }
 0x183   :  { %2121 = vmatprep.mubr.bf16.mxu0 %v9037_v48  ;;  %2267 = vmatprep.mubr.bf16.mxu1 %v9037_v48  ;;  %v7734_v48 = vcombine.low %v467_v0, %v471_v1  ;;  %v7767_v52 = vcombine.high %v499_v44, %v503_v45  ;;  %v515_v0 = vld [vmem:[#allocation8 + $0x658] sm:$0xff]  ;;  %v2376_v33 = vld [vmem:[#allocation10 + $0x28] sm:$0xff] }
 0x184   :  { %v519_v1 = vld [vmem:[#allocation8 + $0x678] sm:$0xff] }
 0x185   :  { %2155 = vmatpush1.bf16.msra.mxu0 %v7716_v56  ;;  %2301 = vmatpush1.bf16.msra.mxu1 %v7718_v57  ;;  %v511_v56 = vld [vmem:[#allocation8 + $0x638] sm:$0xff]  ;;  %v7764_v57 = vcombine.low %v498_v42, %v502_v43 }
 0x186   :  { %2156 = vmatprep.subr.bf16.mxu0 %v7725_v58  ;;  %2302 = vmatprep.subr.bf16.mxu1 %v7727_v61  ;;  %v7773_v58 = vcombine.high %v506_v53, %v510_v54  ;;  %v7775_v61 = vcombine.high %v507_v55, %v511_v56 }
 0x188   :  { %2122 = vmatmul.mubr.bf16.gmra.mrb[20].mxu0 %v9046_v59  ;;  %2268 = vmatmul.mubr.bf16.gmra.mrb[20].mxu1 %v9046_v59  ;;  %v7749_v59 = vcombine.high %v482_v23, %v486_v25  ;;  %v531_v23 = vld [vmem:[#allocation8 + $0x6d8] sm:$0xff] }
 0x189   :  { %2157 = vmatpush1.bf16.msra.mxu0 %v7724_v3  ;;  %2303 = vmatpush1.bf16.msra.mxu1 %v7726_v39  ;;  %v7772_v3 = vcombine.low %v506_v53, %v510_v54  ;;  %v7781_v39 = vcombine.high %v514_v62, %v518_v63  ;;  %v535_v25 = vld [vmem:[#allocation8 + $0x6f8] sm:$0xff]  ;;  %v2388_v53 = vld [vmem:[#allocation10 + $0x88] sm:$0xff] }
 0x18a   :  { %2158 = vmatprep.subr.bf16.mxu0 %v7733_v5  ;;  %2304 = vmatprep.subr.bf16.mxu1 %v7735_v6  ;;  %v7783_v5 = vcombine.high %v515_v0, %v519_v1  ;;  %v522_v6 = vld [vmem:[#allocation8 + $0x690] sm:$0xff]  ;;  %v7798_v35 = vcombine.low %v531_v23, %v535_v25  ;;  %v2392_v54 = vld [vmem:[#allocation10 + $0xa8] sm:$0xff] }
 0x18b   :  { %2131 = vmatprep.mubr.bf16.mxu0 %v9051_v2  ;;  %2277 = vmatprep.mubr.bf16.mxu1 %v9051_v2  ;;  %v7750_v2 = vcombine.low %v483_v26, %v487_v27  ;;  %v7788_v26 = vcombine.low %v522_v6, %v526_v14  ;;  %v7790_v27 = vcombine.low %v523_v15, %v527_v17  ;;  %v2400_v62 = vld [vmem:[#allocation10 + $0xe8] sm:$0xff] }
 0x18d   :  { %2159 = vmatpush1.bf16.msra.mxu0 %v7732_v19  ;;  %2305 = vmatpush1.bf16.msra.mxu1 %v7734_v48  ;;  %v7782_v19 = vcombine.low %v515_v0, %v519_v1  ;;  %v7789_v48 = vcombine.high %v522_v6, %v526_v14  ;;  %v9199_v0 = vcombine.low %v2388_v53, %v2392_v54 }
 0x18e   :  { %2160 = vmatprep.subr.bf16.mxu0 %v7741_v20  ;;  %2306 = vmatprep.subr.bf16.mxu1 %v7743_v22  ;;  %v530_v20 = vld [vmem:[#allocation8 + $0x6d0] sm:$0xff] }
 0x18f   :  { %v534_v22 = vld [vmem:[#allocation8 + $0x6f0] sm:$0xff]  ;;  %11375 = vst [vmem:[#allocation57_spill] sm:$0xff] %v9199_v0 }
 0x190   :  { %2132 = vmatmul.mubr.bf16.gmra.mrb[24].mxu0 %v9060_v21  ;;  %2278 = vmatmul.mubr.bf16.gmra.mrb[24].mxu1 %v9060_v21  ;;  %v7765_v21 = vcombine.high %v498_v42, %v502_v43  ;;  %v7796_v34 = vcombine.low %v530_v20, %v534_v22  ;;  %v2380_v42 = vld [vmem:[#allocation10 + $0x48] sm:$0xff] }
 0x191   :  { %2161 = vmatpush1.bf16.msra.mxu0 %v7740_v29  ;;  %2307 = vmatpush1.bf16.msra.mxu1 %v7742_v10  ;;  %v7797_v29 = vcombine.high %v530_v20, %v534_v22  ;;  %v7799_v10 = vcombine.high %v531_v23, %v535_v25  ;;  %v2384_v43 = vld [vmem:[#allocation10 + $0x68] sm:$0xff]  ;;  %v2419_v25 = vld [vmem:[#allocation10 + $0x180] sm:$0xff] }
 0x192   :  { %2162 = vmatprep.subr.bf16.mxu0 %v7749_v59  ;;  %2308 = vmatprep.subr.bf16.mxu1 %v7751_v30  ;;  %v2371_v59 = vld [vmem:[#allocation10] sm:$0xff] }
 0x193   :  { %2141 = vmatprep.mubr.bf16.mxu0 %v9065_v28  ;;  %2287 = vmatprep.mubr.bf16.mxu1 %v9065_v28  ;;  %v7766_v28 = vcombine.low %v499_v44, %v503_v45  ;;  %v2375_v30 = vld [vmem:[#allocation10 + $0x20] sm:$0xff]  ;;  %v9169_v45 = vcombine.low %v2372_v31, %v2376_v33 }
 0x194   :  { %v9166_v44 = vcombine.low %v2371_v59, %v2375_v30 }
 0x195   :  { %2163 = vmatpush1.bf16.msra.mxu0 %v7748_v36  ;;  %2309 = vmatpush1.bf16.msra.mxu1 %v7750_v2  ;;  %v9162_v36 = vcombine.high %v2371_v59, %v2375_v30  ;;  %v9164_v2 = vcombine.high %v2372_v31, %v2376_v33  ;;  %11367 = vst [vmem:[#allocation49_spill] sm:$0xff] %v9169_v45  ;;  %v2431_v31 = vld [vmem:[#allocation10 + $0x1e0] sm:$0xff]  ;;  %v2428_v33 = vld [vmem:[#allocation10 + $0x1c8] sm:$0xff] }
 0x196   :  { %2164 = vmatprep.subr.bf16.mxu0 %v7757_v38  ;;  %2310 = vmatprep.subr.bf16.mxu1 %v7759_v41  ;;  %v2379_v38 = vld [vmem:[#allocation10 + $0x40] sm:$0xff]  ;;  %11366 = vst [vmem:[#allocation48_spill] sm:$0xff] %v9166_v44 }
 0x197   :  { %11364 = vst [vmem:[#allocation46_spill] sm:$0xff] %v9162_v36  ;;  %11365 = vst [vmem:[#allocation47_spill] sm:$0xff] %v9164_v2  ;;  %v2383_v41 = vld [vmem:[#allocation10 + $0x60] sm:$0xff] }
 0x198   :  { %2142 = vmatmul.mubr.bf16.gmra.mrb[28].mxu0 %v9074_v40  ;;  %2288 = vmatmul.mubr.bf16.gmra.mrb[28].mxu1 %v9074_v40  ;;  %v7774_v40 = vcombine.low %v507_v55, %v511_v56  ;;  %v9179_v55 = vcombine.low %v2379_v38, %v2383_v41  ;;  %v9183_v56 = vcombine.low %v2380_v42, %v2384_v43 }
 0x199   :  { %2165 = vmatpush1.bf16.msra.mxu0 %v7756_v50  ;;  %2311 = vmatpush1.bf16.msra.mxu1 %v7758_v51  ;;  %v9171_v50 = vcombine.high %v2379_v38, %v2383_v41  ;;  %v9174_v51 = vcombine.high %v2380_v42, %v2384_v43  ;;  %v2435_v43 = vld [vmem:[#allocation10 + $0x200] sm:$0xff] }
 0x19a   :  { %2166 = vmatprep.subr.bf16.mxu0 %v7765_v21  ;;  %2312 = vmatprep.subr.bf16.mxu1 %v7767_v52  ;;  %v2387_v21 = vld [vmem:[#allocation10 + $0x80] sm:$0xff]  ;;  %11370 = vst [vmem:[#allocation52_spill] sm:$0xff] %v9179_v55  ;;  %11371 = vst [vmem:[#allocation53_spill] sm:$0xff] %v9183_v56 }
 0x19b   :  { %7808 = vmatprep.mubr.msk.bf16.mxu0 %vm1774_vm0, %v9079_v47  ;;  %7812 = vmatprep.mubr.msk.bf16.mxu1 %vm1774_vm0, %v9079_v47  ;;  %v7791_v47 = vcombine.high %v523_v15, %v527_v17  ;;  %11368 = vst [vmem:[#allocation50_spill] sm:$0xff] %v9171_v50  ;;  %11369 = vst [vmem:[#allocation51_spill] sm:$0xff] %v9174_v51  ;;  %v2391_v52 = vld [vmem:[#allocation10 + $0xa0] sm:$0xff] }
 0x19c   :  { %v9195_v63 = vcombine.low %v2387_v21, %v2391_v52 }
 0x19d   :  { %2167 = vmatpush1.bf16.msra.mxu0 %v7764_v57  ;;  %2313 = vmatpush1.bf16.msra.mxu1 %v7766_v28  ;;  %v9185_v57 = vcombine.high %v2387_v21, %v2391_v52  ;;  %v9190_v28 = vcombine.high %v2388_v53, %v2392_v54  ;;  %v2436_v21 = vld [vmem:[#allocation10 + $0x208] sm:$0xff] }
 0x19e   :  { %2168 = vmatprep.subr.bf16.mxu0 %v7773_v58  ;;  %2314 = vmatprep.subr.bf16.mxu1 %v7775_v61  ;;  %v2399_v58 = vld [vmem:[#allocation10 + $0xe0] sm:$0xff]  ;;  %v2396_v61 = vld [vmem:[#allocation10 + $0xc8] sm:$0xff]  ;;  %11374 = vst [vmem:[#allocation56_spill] sm:$0xff] %v9195_v63 }
 0x19f   :  { %11372 = vst [vmem:[#allocation54_spill] sm:$0xff] %v9185_v57  ;;  %11373 = vst [vmem:[#allocation55_spill] sm:$0xff] %v9190_v28  ;;  %v9213_v14 = vcombine.low %v2396_v61, %v2400_v62  ;;  %v2440_v52 = vld [vmem:[#allocation10 + $0x228] sm:$0xff] }
 0x1a1   :  { %2169 = vmatpush1.bf16.msra.mxu0 %v7772_v3  ;;  %2315 = vmatpush1.bf16.msra.mxu1 %v7774_v40  ;;  %v9204_v3 = vcombine.high %v2396_v61, %v2400_v62  ;;  %v2403_v40 = vld [vmem:[#allocation10 + $0x100] sm:$0xff]  ;;  %11379 = vst [vmem:[#allocation61_spill] sm:$0xff] %v9213_v14 }
 0x1a2   :  { %2170 = vmatprep.subr.bf16.mxu0 %v7781_v39  ;;  %2316 = vmatprep.subr.bf16.mxu1 %v7783_v5  ;;  %v2404_v39 = vld [vmem:[#allocation10 + $0x108] sm:$0xff]  ;;  %v2443_v61 = vld [vmem:[#allocation10 + $0x240] sm:$0xff] }
 0x1a3   :  { %11377 = vst [vmem:[#allocation59_spill] sm:$0xff] %v9204_v3  ;;  %v2408_v5 = vld [vmem:[#allocation10 + $0x128] sm:$0xff]  ;;  %v2447_v62 = vld [vmem:[#allocation10 + $0x260] sm:$0xff] }
 0x1a4   :  { %v9220_v17 = vcombine.high %v2404_v39, %v2408_v5  ;;  %v9229_v20 = vcombine.low %v2404_v39, %v2408_v5  ;;  %v9287_v5 = vcombine.low %v2436_v21, %v2440_v52 }
 0x1a5   :  { %2171 = vmatpush1.bf16.msra.mxu0 %v7780_v18  ;;  %2317 = vmatpush1.bf16.msra.mxu1 %v7782_v19  ;;  %v2415_v18 = vld [vmem:[#allocation10 + $0x160] sm:$0xff]  ;;  %v2412_v19 = vld [vmem:[#allocation10 + $0x148] sm:$0xff] }
 0x1a6   :  { %2172 = vmatprep.subr.bf16.mxu0 %v7789_v48  ;;  %2318 = vmatprep.subr.bf16.mxu1 %v7791_v47  ;;  %11381 = vst [vmem:[#allocation63_spill] sm:$0xff] %v9220_v17  ;;  %v2416_v48 = vld [vmem:[#allocation10 + $0x168] sm:$0xff]  ;;  %11383 = vst [vmem:[#allocation65_spill] sm:$0xff] %v9229_v20 }
 0x1a7   :  { %v9234_v23 = vcombine.high %v2412_v19, %v2416_v48  ;;  %11399 = vst [vmem:[#allocation81_spill] sm:$0xff] %v9287_v5 }
 0x1a9   :  { %2173 = vmatpush1.bf16.msra.mxu0 %v7788_v26  ;;  %2319 = vmatpush1.bf16.msra.mxu1 %v7790_v27  ;;  %11385 = vst [vmem:[#allocation67_spill] sm:$0xff] %v9234_v23  ;;  %v2420_v26 = vld [vmem:[#allocation10 + $0x188] sm:$0xff] }
 0x1aa   :  { %2174 = vmatprep.subr.bf16.mxu0 %v7797_v29  ;;  %2320 = vmatprep.subr.bf16.mxu1 %v7799_v10  ;;  %v2424_v27 = vld [vmem:[#allocation10 + $0x1a8] sm:$0xff]  ;;  %v9243_v10 = vcombine.low %v2412_v19, %v2416_v48  ;;  %v2451_v19 = vld [vmem:[#allocation10 + $0x280] sm:$0xff] }
 0x1ab   :  { %v9250_v30 = vcombine.high %v2420_v26, %v2424_v27  ;;  %v9259_v38 = vcombine.low %v2420_v26, %v2424_v27  ;;  %v2455_v48 = vld [vmem:[#allocation10 + $0x2a0] sm:$0xff]  ;;  %v9295_v26 = vcombine.low %v2443_v61, %v2447_v62 }
 0x1ac   :  { %11387 = vst [vmem:[#allocation69_spill] sm:$0xff] %v9243_v10 }
 0x1ad   :  { %2175 = vmatpush1.bf16.msra.mxu0 %v7796_v34  ;;  %2321 = vmatpush1.bf16.msra.mxu1 %v7798_v35  ;;  %11389 = vst [vmem:[#allocation71_spill] sm:$0xff] %v9250_v30  ;;  %v2432_v34 = vld [vmem:[#allocation10 + $0x1e8] sm:$0xff]  ;;  %11391 = vst [vmem:[#allocation73_spill] sm:$0xff] %v9259_v38 }
 0x1ae   :  { %3139 = vmatprep.subr.bf16.mxu0 %v9162_v36  ;;  %3180 = vmatprep.subr.bf16.mxu1 %v9164_v2  ;;  %v9264_v42 = vcombine.high %v2428_v33, %v2432_v34  ;;  %v9273_v54 = vcombine.low %v2428_v33, %v2432_v34  ;;  %11402 = vst [vmem:[#allocation84_spill] sm:$0xff] %v9295_v26  ;;  %v2459_v33 = vld [vmem:[#allocation10 + $0x2c0] sm:$0xff] }
 0x1af   :  { %v2463_v34 = vld [vmem:[#allocation10 + $0x2e0] sm:$0xff] }
 0x1b0   :  { %2185 = vmatmul.mubr.bf16.vlgmr.msra.gmra.mrb[16].mxu0 %v9090_v37  ;;  %2331 = vmatmul.mubr.bf16.vlgmr.msra.gmra.mrb[16].mxu1 %v9090_v37  ;;  %v2395_v37 = vld [vmem:[#allocation10 + $0xc0] sm:$0xff]  ;;  %11393 = vst [vmem:[#allocation75_spill] sm:$0xff] %v9264_v42  ;;  %11395 = vst [vmem:[#allocation77_spill] sm:$0xff] %v9273_v54 }
 0x1b1   :  { %3140 = vmatpush1.bf16.msra.mxu0 %v9166_v44  ;;  %3181 = vmatpush1.bf16.msra.mxu1 %v9169_v45  ;;  %v9201_v1 = vcombine.high %v2395_v37, %v2399_v58  ;;  %v9209_v6 = vcombine.low %v2395_v37, %v2399_v58  ;;  %v9278_v58 = vcombine.high %v2436_v21, %v2440_v52 }
 0x1b2   :  { %3141 = vmatprep.subr.bf16.mxu0 %v9171_v50  ;;  %3182 = vmatprep.subr.bf16.mxu1 %v9174_v51  ;;  %v9307_v21 = vcombine.low %v2451_v19, %v2455_v48 }
 0x1b3   :  { %7809 = vmatprep.mubr.msk.bf16.mxu0 %vm1774_vm0, %v9095_v46  ;;  %7813 = vmatprep.mubr.msk.bf16.mxu1 %vm1774_vm0, %v9095_v46  ;;  %11376 = vst [vmem:[#allocation58_spill] sm:$0xff] %v9201_v1  ;;  %v2407_v46 = vld [vmem:[#allocation10 + $0x120] sm:$0xff]  ;;  %11378 = vst [vmem:[#allocation60_spill] sm:$0xff] %v9209_v6 }
 0x1b4   :  { %v9215_v15 = vcombine.high %v2403_v40, %v2407_v46  ;;  %v9225_v47 = vcombine.low %v2403_v40, %v2407_v46  ;;  %11397 = vst [vmem:[#allocation79_spill] sm:$0xff] %v9278_v58  ;;  %v11063_v40 = vmov 0   ;;  %v2448_v46 = vld [vmem:[#allocation10 + $0x268] sm:$0xff]  ;;  %11406 = vst [vmem:[#allocation88_spill] sm:$0xff] %v9307_v21 }
 0x1b5   :  { %3142 = vmatpush1.bf16.msra.mxu0 %v9179_v55  ;;  %3183 = vmatpush1.bf16.msra.mxu1 %v9183_v56 }
 0x1b6   :  { %3143 = vmatprep.subr.bf16.mxu0 %v9185_v57  ;;  %3184 = vmatprep.subr.bf16.mxu1 %v9190_v28  ;;  %11380 = vst [vmem:[#allocation62_spill] sm:$0xff] %v9215_v15  ;;  %11382 = vst [vmem:[#allocation64_spill] sm:$0xff] %v9225_v47 }
 0x1b8   :  { %2195 = vmatmul.mubr.bf16.gmra.mrb[20].mxu0 %v9106_v60  ;;  %2341 = vmatmul.mubr.bf16.gmra.mrb[20].mxu1 %v9106_v60  ;;  %v2411_v60 = vld [vmem:[#allocation10 + $0x140] sm:$0xff] }
 0x1b9   :  { %3144 = vmatpush1.bf16.msra.mxu0 %v9195_v63  ;;  %3185 = vmatpush1.bf16.msra.mxu1 %v9199_v0  ;;  %v9231_v22 = vcombine.high %v2411_v60, %v2415_v18  ;;  %v9239_v29 = vcombine.low %v2411_v60, %v2415_v18  ;;  %v9289_v60 = vcombine.high %v2443_v61, %v2447_v62 }
 0x1ba   :  { %3145 = vmatprep.subr.bf16.mxu0 %v9201_v1  ;;  %3186 = vmatprep.subr.bf16.mxu1 %v9204_v3  ;;  %v9313_v61 = vcombine.high %v2459_v33, %v2463_v34 }
 0x1bb   :  { %7810 = vmatprep.mubr.msk.bf16.mxu0 %vm1774_vm0, %v9111_v4  ;;  %7814 = vmatprep.mubr.msk.bf16.mxu1 %vm1774_vm0, %v9111_v4  ;;  %11384 = vst [vmem:[#allocation66_spill] sm:$0xff] %v9231_v22  ;;  %v2423_v4 = vld [vmem:[#allocation10 + $0x1a0] sm:$0xff]  ;;  %11386 = vst [vmem:[#allocation68_spill] sm:$0xff] %v9239_v29 }
 0x1bc   :  { %v9245_v59 = vcombine.high %v2419_v25, %v2423_v4  ;;  %v9255_v35 = vcombine.low %v2419_v25, %v2423_v4  ;;  %11400 = vst [vmem:[#allocation82_spill] sm:$0xff] %v9289_v60  ;;  %v2452_v25 = vld [vmem:[#allocation10 + $0x288] sm:$0xff]  ;;  %11408 = vst [vmem:[#allocation90_spill] sm:$0xff] %v9313_v61 }
 0x1bd   :  { %3146 = vmatpush1.bf16.msra.mxu0 %v9209_v6  ;;  %3187 = vmatpush1.bf16.msra.mxu1 %v9213_v14  ;;  %v2456_v4 = vld [vmem:[#allocation10 + $0x2a8] sm:$0xff] }
 0x1be   :  { %3147 = vmatprep.subr.bf16.mxu0 %v9215_v15  ;;  %3188 = vmatprep.subr.bf16.mxu1 %v9220_v17  ;;  %11388 = vst [vmem:[#allocation70_spill] sm:$0xff] %v9245_v59  ;;  %11390 = vst [vmem:[#allocation72_spill] sm:$0xff] %v9255_v35  ;;  %v9311_v52 = vcombine.low %v2452_v25, %v2456_v4 }
 0x1c0   :  { %2205 = vmatmul.mubr.bf16.gmra.mrb[24].mxu0 %v9122_v24  ;;  %2351 = vmatmul.mubr.bf16.gmra.mrb[24].mxu1 %v9122_v24  ;;  %v2427_v24 = vld [vmem:[#allocation10 + $0x1c0] sm:$0xff]  ;;  %11407 = vst [vmem:[#allocation89_spill] sm:$0xff] %v9311_v52 }
 0x1c1   :  { %3148 = vmatpush1.bf16.msra.mxu0 %v9225_v47  ;;  %3189 = vmatpush1.bf16.msra.mxu1 %v9229_v20  ;;  %v9261_v41 = vcombine.high %v2427_v24, %v2431_v31  ;;  %v9269_v53 = vcombine.low %v2427_v24, %v2431_v31  ;;  %v9301_v24 = vcombine.high %v2451_v19, %v2455_v48 }
 0x1c2   :  { %3149 = vmatprep.subr.bf16.mxu0 %v9231_v22  ;;  %3190 = vmatprep.subr.bf16.mxu1 %v9234_v23  ;;  %v9304_v31 = vcombine.high %v2452_v25, %v2456_v4  ;;  %v9319_v19 = vcombine.low %v2459_v33, %v2463_v34 }
 0x1c3   :  { %7811 = vmatprep.mubr.msk.bf16.mxu0 %vm1774_vm0, %v9127_v32  ;;  %7815 = vmatprep.mubr.msk.bf16.mxu1 %vm1774_vm0, %v9127_v32  ;;  %11392 = vst [vmem:[#allocation74_spill] sm:$0xff] %v9261_v41  ;;  %v2439_v32 = vld [vmem:[#allocation10 + $0x220] sm:$0xff]  ;;  %11394 = vst [vmem:[#allocation76_spill] sm:$0xff] %v9269_v53 }
 0x1c4   :  { %v9275_v37 = vcombine.high %v2435_v43, %v2439_v32  ;;  %v9283_v39 = vcombine.low %v2435_v43, %v2439_v32  ;;  %11404 = vst [vmem:[#allocation86_spill] sm:$0xff] %v9301_v24  ;;  %11405 = vst [vmem:[#allocation87_spill] sm:$0xff] %v9304_v31  ;;  %v2460_v43 = vld [vmem:[#allocation10 + $0x2c8] sm:$0xff] }
 0x1c5   :  { %3150 = vmatpush1.bf16.msra.mxu0 %v9239_v29  ;;  %3191 = vmatpush1.bf16.msra.mxu1 %v9243_v10  ;;  %v2464_v32 = vld [vmem:[#allocation10 + $0x2e8] sm:$0xff]  ;;  %11410 = vst [vmem:[#allocation92_spill] sm:$0xff] %v9319_v19 }
 0x1c6   :  { %3151 = vmatprep.subr.bf16.mxu0 %v9245_v59  ;;  %3192 = vmatprep.subr.bf16.mxu1 %v9250_v30  ;;  %11396 = vst [vmem:[#allocation78_spill] sm:$0xff] %v9275_v37  ;;  %11398 = vst [vmem:[#allocation80_spill] sm:$0xff] %v9283_v39  ;;  %v9316_v62 = vcombine.high %v2460_v43, %v2464_v32  ;;  %v9323_v48 = vcombine.low %v2460_v43, %v2464_v32 }
 0x1c7   :  { %v9337_v43 = vcombine.high %v2475_v12, %v2479_v9  ;;  %v9340_v32 = vcombine.high %v2476_v13, %v2480_v11 }
 0x1c8   :  { %2215 = vmatmul.mubr.bf16.gmra.mrb[28].mxu0 %v9138_v49  ;;  %2361 = vmatmul.mubr.bf16.gmra.mrb[28].mxu1 %v9138_v49  ;;  %v2444_v49 = vld [vmem:[#allocation10 + $0x248] sm:$0xff]  ;;  %11409 = vst [vmem:[#allocation91_spill] sm:$0xff] %v9316_v62  ;;  %11411 = vst [vmem:[#allocation93_spill] sm:$0xff] %v9323_v48 }
 0x1c9   :  { %3152 = vmatpush1.bf16.msra.mxu0 %v9255_v35  ;;  %3193 = vmatpush1.bf16.msra.mxu1 %v9259_v38  ;;  %v9292_v18 = vcombine.high %v2444_v49, %v2448_v46  ;;  %v9299_v27 = vcombine.low %v2444_v49, %v2448_v46  ;;  %v2467_v49 = vld [vmem:[#allocation10 + $0x300] sm:$0xff]  ;;  %11416 = vst [vmem:[#allocation98_spill] sm:$0xff] %v9337_v43  ;;  %11417 = vst [vmem:[#allocation99_spill] sm:$0xff] %v9340_v32 }
 0x1ca   :  { %3153 = vmatprep.subr.bf16.mxu0 %v9261_v41  ;;  %3194 = vmatprep.subr.bf16.mxu1 %v9264_v42  ;;  %v2471_v46 = vld [vmem:[#allocation10 + $0x320] sm:$0xff] }
 0x1cb   :  { %3171 = vmatprep.mubr.bf16.mxu0 %v11063_v40  ;;  %3212 = vmatprep.mubr.bf16.mxu1 %v11063_v40  ;;  %11401 = vst [vmem:[#allocation83_spill] sm:$0xff] %v9292_v18  ;;  %11403 = vst [vmem:[#allocation85_spill] sm:$0xff] %v9299_v27  ;;  %v2468_v40 = vld [vmem:[#allocation10 + $0x308] sm:$0xff]  ;;  %v9325_v25 = vcombine.high %v2467_v49, %v2471_v46  ;;  %v9331_v33 = vcombine.low %v2467_v49, %v2471_v46 }
 0x1cc   :  { %v9328_v4 = vcombine.high %v2468_v40, %v2472_v16  ;;  %v9335_v34 = vcombine.low %v2468_v40, %v2472_v16  ;;  %v9343_v49 = vcombine.low %v2475_v12, %v2479_v9  ;;  %v9347_v16 = vcombine.low %v2476_v13, %v2480_v11 }
 0x1cd   :  { %3154 = vmatpush1.bf16.msra.mxu0 %v9269_v53  ;;  %3195 = vmatpush1.bf16.msra.mxu1 %v9273_v54  ;;  %11412 = vst [vmem:[#allocation94_spill] sm:$0xff] %v9325_v25  ;;  %11414 = vst [vmem:[#allocation96_spill] sm:$0xff] %v9331_v33  ;;  %v9349_v40 = vcombine.high %v2483_v7, %v2487_v8  ;;  %v9355_v9 = vcombine.low %v2483_v7, %v2487_v8 }
 0x1ce   :  { %3155 = vmatprep.subr.bf16.mxu0 %v9275_v37  ;;  %3196 = vmatprep.subr.bf16.mxu1 %v9278_v58  ;;  %11413 = vst [vmem:[#allocation95_spill] sm:$0xff] %v9328_v4  ;;  %11415 = vst [vmem:[#allocation97_spill] sm:$0xff] %v9335_v34 }
 0x1cf   :  { %11418 = vst [vmem:[#allocation100_spill] sm:$0xff] %v9343_v49  ;;  %11419 = vst [vmem:[#allocation101_spill] sm:$0xff] %v9347_v16 }
 0x1d0   :  { %11420 = vst [vmem:[#allocation102_spill] sm:$0xff] %v9349_v40  ;;  %11422 = vst [vmem:[#allocation104_spill] sm:$0xff] %v9355_v9 }
 0x1d1   :  { %3156 = vmatpush1.bf16.msra.mxu0 %v9283_v39  ;;  %3197 = vmatpush1.bf16.msra.mxu1 %v9287_v5 }
 0x1d2   :  { %3157 = vmatprep.subr.bf16.mxu0 %v9289_v60  ;;  %3198 = vmatprep.subr.bf16.mxu1 %v9292_v18 }
 0x1d5   :  { %3158 = vmatpush1.bf16.msra.mxu0 %v9295_v26  ;;  %3199 = vmatpush1.bf16.msra.mxu1 %v9299_v27  ;;  %v2465_v27 = vld [vmem:[#allocation10 + $0x2f0] sm:$0xff] }
 0x1d6   :  { %3159 = vmatprep.subr.bf16.mxu0 %v9301_v24  ;;  %3200 = vmatprep.subr.bf16.mxu1 %v9304_v31  ;;  %v2461_v24 = vld [vmem:[#allocation10 + $0x2d0] sm:$0xff] }
 0x1d9   :  { %3160 = vmatpush1.bf16.msra.mxu0 %v9307_v21  ;;  %3201 = vmatpush1.bf16.msra.mxu1 %v9311_v52  ;;  %v2410_v52 = vld [vmem:[#allocation10 + $0x138] sm:$0xff]  ;;  %v538_v21 = vlaneseq }
 0x1da   :  { %3161 = vmatprep.subr.bf16.mxu0 %v9313_v61  ;;  %3202 = vmatprep.subr.bf16.mxu1 %v9316_v62  ;;  %v2484_v62 = vld [vmem:[#allocation10 + $0x388] sm:$0xff] }
 0x1db   :  { %v2488_v61 = vld [vmem:[#allocation10 + $0x3a8] sm:$0xff] }
 0x1dc   :  { %v9352_v46 = vcombine.high %v2484_v62, %v2488_v61  ;;  %v9359_v11 = vcombine.low %v2484_v62, %v2488_v61 }
 0x1dd   :  { %3162 = vmatpush1.bf16.msra.mxu0 %v9319_v19  ;;  %3203 = vmatpush1.bf16.msra.mxu1 %v9323_v48  ;;  %v2492_v48 = vld [vmem:[#allocation10 + $0x3c8] sm:$0xff] }
 0x1de   :  { %3163 = vmatprep.subr.bf16.mxu0 %v9325_v25  ;;  %3204 = vmatprep.subr.bf16.mxu1 %v9328_v4  ;;  %11421 = vst [vmem:[#allocation103_spill] sm:$0xff] %v9352_v46  ;;  %v2491_v4 = vld [vmem:[#allocation10 + $0x3c0] sm:$0xff]  ;;  %v2496_v19 = vld [vmem:[#allocation10 + $0x3e8] sm:$0xff]  ;;  %11423 = vst [vmem:[#allocation105_spill] sm:$0xff] %v9359_v11 }
 0x1df   :  { %v2495_v25 = vld [vmem:[#allocation10 + $0x3e0] sm:$0xff]  ;;  %v9364_v13 = vcombine.high %v2492_v48, %v2496_v19  ;;  %v9371_v8 = vcombine.low %v2492_v48, %v2496_v19 }
 0x1e0   :  { %v9361_v12 = vcombine.high %v2491_v4, %v2495_v25  ;;  %v9367_v7 = vcombine.low %v2491_v4, %v2495_v25 }
 0x1e1   :  { %3164 = vmatpush1.bf16.msra.mxu0 %v9331_v33  ;;  %3205 = vmatpush1.bf16.msra.mxu1 %v9335_v34  ;;  %11425 = vst [vmem:[#allocation107_spill] sm:$0xff] %v9364_v13  ;;  %v2374_v34 = vld [vmem:[#allocation10 + $0x18] sm:$0xff]  ;;  %11427 = vst [vmem:[#allocation109_spill] sm:$0xff] %v9371_v8 }
 0x1e2   :  { %3165 = vmatprep.subr.bf16.mxu0 %v9337_v43  ;;  %3206 = vmatprep.subr.bf16.mxu1 %v9340_v32  ;;  %11424 = vst [vmem:[#allocation106_spill] sm:$0xff] %v9361_v12  ;;  %v2373_v32 = vld [vmem:[#allocation10 + $0x10] sm:$0xff]  ;;  %v2378_v33 = vld [vmem:[#allocation10 + $0x38] sm:$0xff]  ;;  %11426 = vst [vmem:[#allocation108_spill] sm:$0xff] %v9367_v7 }
 0x1e3   :  { %v2377_v43 = vld [vmem:[#allocation10 + $0x30] sm:$0xff]  ;;  %v9376_v62 = vcombine.high %v2374_v34, %v2378_v33  ;;  %v9383_v19 = vcombine.low %v2374_v34, %v2378_v33 }
 0x1e4   :  { %v9373_v61 = vcombine.high %v2373_v32, %v2377_v43  ;;  %v9379_v25 = vcombine.low %v2373_v32, %v2377_v43 }
 0x1e5   :  { %3166 = vmatpush1.bf16.msra.mxu0 %v9343_v49  ;;  %3207 = vmatpush1.bf16.msra.mxu1 %v9347_v16  ;;  %11429 = vst [vmem:[#allocation111_spill] sm:$0xff] %v9376_v62  ;;  %v2382_v16 = vld [vmem:[#allocation10 + $0x58] sm:$0xff]  ;;  %11431 = vst [vmem:[#allocation113_spill] sm:$0xff] %v9383_v19 }
 0x1e6   :  { %3167 = vmatprep.subr.bf16.mxu0 %v9349_v40  ;;  %3208 = vmatprep.subr.bf16.mxu1 %v9352_v46  ;;  %11428 = vst [vmem:[#allocation110_spill] sm:$0xff] %v9373_v61  ;;  %v2381_v46 = vld [vmem:[#allocation10 + $0x50] sm:$0xff]  ;;  %v2386_v49 = vld [vmem:[#allocation10 + $0x78] sm:$0xff]  ;;  %11430 = vst [vmem:[#allocation112_spill] sm:$0xff] %v9379_v25 }
 0x1e7   :  { %v2385_v40 = vld [vmem:[#allocation10 + $0x70] sm:$0xff]  ;;  %v9388_v4 = vcombine.high %v2382_v16, %v2386_v49  ;;  %v9397_v33 = vcombine.low %v2382_v16, %v2386_v49 }
 0x1e8   :  { %v9385_v48 = vcombine.high %v2381_v46, %v2385_v40  ;;  %v9393_v43 = vcombine.low %v2381_v46, %v2385_v40 }
 0x1e9   :  { %3168 = vmatpush1.bf16.msra.mxu0 %v9355_v9  ;;  %3209 = vmatpush1.bf16.msra.mxu1 %v9359_v11  ;;  %11433 = vst [vmem:[#allocation115_spill] sm:$0xff] %v9388_v4  ;;  %v11434_v11 = vmov 0   ;;  %v2390_v9 = vld [vmem:[#allocation10 + $0x98] sm:$0xff]  ;;  %11436 = vst [vmem:[#allocation117_spill] sm:$0xff] %v9397_v33 }
 0x1ea   :  { %3169 = vmatprep.subr.bf16.mxu0 %v9361_v12  ;;  %3210 = vmatprep.subr.bf16.mxu1 %v9364_v13  ;;  %11432 = vst [vmem:[#allocation114_spill] sm:$0xff] %v9385_v48  ;;  %v2389_v13 = vld [vmem:[#allocation10 + $0x90] sm:$0xff]  ;;  %11435 = vst [vmem:[#allocation116_spill] sm:$0xff] %v9393_v43 }
 0x1eb   :  { %v2393_v12 = vld [vmem:[#allocation10 + $0xb0] sm:$0xff] }
 0x1ec   :  { %v9399_v34 = vcombine.high %v2389_v13, %v2393_v12  ;;  %v9407_v40 = vcombine.low %v2389_v13, %v2393_v12 }
 0x1ed   :  { %3170 = vmatpush1.bf16.msra.mxu0 %v9367_v7  ;;  %3211 = vmatpush1.bf16.msra.mxu1 %v9371_v8  ;;  %v2394_v7 = vld [vmem:[#allocation10 + $0xb8] sm:$0xff] }
 0x1ee   :  { %3221 = vmatprep.subr.bf16.mxu0 %v9373_v61  ;;  %3262 = vmatprep.subr.bf16.mxu1 %v9376_v62  ;;  %11437 = vst [vmem:[#allocation118_spill] sm:$0xff] %v9399_v34  ;;  %v9402_v32 = vcombine.high %v2390_v9, %v2394_v7  ;;  %v2397_v62 = vld [vmem:[#allocation10 + $0xd0] sm:$0xff]  ;;  %v2398_v8 = vld [vmem:[#allocation10 + $0xd8] sm:$0xff]  ;;  %11439 = vst [vmem:[#allocation120_spill] sm:$0xff] %v9407_v40  ;;  %v9411_v49 = vcombine.low %v2390_v9, %v2394_v7 }
 0x1ef   :  { %v2401_v61 = vld [vmem:[#allocation10 + $0xf0] sm:$0xff] }
 0x1f0   :  { %3172 = vmatmul.mubr.bf16.vlgmr.msra.gmra.mrb[32].mxu0 %v11434_v11  ;;  %3213 = vmatmul.mubr.bf16.vlgmr.msra.gmra.mrb[32].mxu1 %v11434_v11  ;;  %11438 = vst [vmem:[#allocation119_spill] sm:$0xff] %v9402_v32  ;;  %11440 = vst [vmem:[#allocation121_spill] sm:$0xff] %v9411_v49  ;;  %v9413_v16 = vcombine.high %v2397_v62, %v2401_v61  ;;  %v9419_v12 = vcombine.low %v2397_v62, %v2401_v61 }
 0x1f1   :  { %3222 = vmatpush1.bf16.msra.mxu0 %v9379_v25  ;;  %3263 = vmatpush1.bf16.msra.mxu1 %v9383_v19  ;;  %v2402_v25 = vld [vmem:[#allocation10 + $0xf8] sm:$0xff] }
 0x1f2   :  { %3223 = vmatprep.subr.bf16.mxu0 %v9385_v48  ;;  %3264 = vmatprep.subr.bf16.mxu1 %v9388_v4  ;;  %11441 = vst [vmem:[#allocation122_spill] sm:$0xff] %v9413_v16  ;;  %v9416_v46 = vcombine.high %v2398_v8, %v2402_v25  ;;  %v2405_v4 = vld [vmem:[#allocation10 + $0x110] sm:$0xff]  ;;  %v2406_v19 = vld [vmem:[#allocation10 + $0x118] sm:$0xff]  ;;  %11443 = vst [vmem:[#allocation124_spill] sm:$0xff] %v9419_v12  ;;  %v9423_v9 = vcombine.low %v2398_v8, %v2402_v25 }
 0x1f3   :  { %3253 = vmatprep.mubr.bf16.mxu0 %v11434_v11  ;;  %3294 = vmatprep.mubr.bf16.mxu1 %v11434_v11  ;;  %v2409_v48 = vld [vmem:[#allocation10 + $0x130] sm:$0xff]  ;;  %v9428_v7 = vcombine.high %v2406_v19, %v2410_v52  ;;  %v9435_v8 = vcombine.low %v2406_v19, %v2410_v52 }
 0x1f4   :  { %11442 = vst [vmem:[#allocation123_spill] sm:$0xff] %v9416_v46  ;;  %11444 = vst [vmem:[#allocation125_spill] sm:$0xff] %v9423_v9  ;;  %v9425_v13 = vcombine.high %v2405_v4, %v2409_v48  ;;  %v9431_v61 = vcombine.low %v2405_v4, %v2409_v48 }
 0x1f5   :  { %3224 = vmatpush1.bf16.msra.mxu0 %v9393_v43  ;;  %3265 = vmatpush1.bf16.msra.mxu1 %v9397_v33  ;;  %11446 = vst [vmem:[#allocation127_spill] sm:$0xff] %v9428_v7  ;;  %v2414_v33 = vld [vmem:[#allocation10 + $0x158] sm:$0xff]  ;;  %11448 = vst [vmem:[#allocation129_spill] sm:$0xff] %v9435_v8 }
 0x1f6   :  { %3225 = vmatprep.subr.bf16.mxu0 %v9399_v34  ;;  %3266 = vmatprep.subr.bf16.mxu1 %v9402_v32  ;;  %11445 = vst [vmem:[#allocation126_spill] sm:$0xff] %v9425_v13  ;;  %v2413_v32 = vld [vmem:[#allocation10 + $0x150] sm:$0xff]  ;;  %v2418_v43 = vld [vmem:[#allocation10 + $0x178] sm:$0xff]  ;;  %11447 = vst [vmem:[#allocation128_spill] sm:$0xff] %v9431_v61 }
 0x1f7   :  { %v2417_v34 = vld [vmem:[#allocation10 + $0x170] sm:$0xff]  ;;  %v9440_v25 = vcombine.high %v2414_v33, %v2418_v43  ;;  %v9447_v52 = vcombine.low %v2414_v33, %v2418_v43 }
 0x1f8   :  { %v9437_v62 = vcombine.high %v2413_v32, %v2417_v34  ;;  %v9443_v48 = vcombine.low %v2413_v32, %v2417_v34 }
 0x1f9   :  { %3226 = vmatpush1.bf16.msra.mxu0 %v9407_v40  ;;  %3267 = vmatpush1.bf16.msra.mxu1 %v9411_v49  ;;  %11450 = vst [vmem:[#allocation131_spill] sm:$0xff] %v9440_v25  ;;  %v2422_v49 = vld [vmem:[#allocation10 + $0x198] sm:$0xff]  ;;  %11452 = vst [vmem:[#allocation133_spill] sm:$0xff] %v9447_v52 }
 0x1fa   :  { %3227 = vmatprep.subr.bf16.mxu0 %v9413_v16  ;;  %3268 = vmatprep.subr.bf16.mxu1 %v9416_v46  ;;  %11449 = vst [vmem:[#allocation130_spill] sm:$0xff] %v9437_v62  ;;  %v2421_v46 = vld [vmem:[#allocation10 + $0x190] sm:$0xff]  ;;  %v2426_v40 = vld [vmem:[#allocation10 + $0x1b8] sm:$0xff]  ;;  %11451 = vst [vmem:[#allocation132_spill] sm:$0xff] %v9443_v48 }
 0x1fb   :  { %v2425_v16 = vld [vmem:[#allocation10 + $0x1b0] sm:$0xff]  ;;  %v9452_v4 = vcombine.high %v2422_v49, %v2426_v40  ;;  %v9459_v43 = vcombine.low %v2422_v49, %v2426_v40 }
 0x1fc   :  { %v9449_v19 = vcombine.high %v2421_v46, %v2425_v16  ;;  %v9455_v34 = vcombine.low %v2421_v46, %v2425_v16 }
 0x1fd   :  { %3228 = vmatpush1.bf16.msra.mxu0 %v9419_v12  ;;  %3269 = vmatpush1.bf16.msra.mxu1 %v9423_v9  ;;  %11454 = vst [vmem:[#allocation135_spill] sm:$0xff] %v9452_v4  ;;  %v2430_v9 = vld [vmem:[#allocation10 + $0x1d8] sm:$0xff]  ;;  %11456 = vst [vmem:[#allocation137_spill] sm:$0xff] %v9459_v43 }
 0x1fe   :  { %3229 = vmatprep.subr.bf16.mxu0 %v9425_v13  ;;  %3270 = vmatprep.subr.bf16.mxu1 %v9428_v7  ;;  %11453 = vst [vmem:[#allocation134_spill] sm:$0xff] %v9449_v19  ;;  %v2429_v7 = vld [vmem:[#allocation10 + $0x1d0] sm:$0xff]  ;;  %v2434_v12 = vld [vmem:[#allocation10 + $0x1f8] sm:$0xff]  ;;  %11455 = vst [vmem:[#allocation136_spill] sm:$0xff] %v9455_v34 }
 0x1ff   :  { %v2433_v13 = vld [vmem:[#allocation10 + $0x1f0] sm:$0xff]  ;;  %v9464_v32 = vcombine.high %v2430_v9, %v2434_v12  ;;  %v9471_v40 = vcombine.low %v2430_v9, %v2434_v12 }
 0x200   :  { %v9461_v33 = vcombine.high %v2429_v7, %v2433_v13  ;;  %v9467_v16 = vcombine.low %v2429_v7, %v2433_v13 }
 0x201   :  { %3230 = vmatpush1.bf16.msra.mxu0 %v9431_v61  ;;  %3271 = vmatpush1.bf16.msra.mxu1 %v9435_v8  ;;  %11458 = vst [vmem:[#allocation139_spill] sm:$0xff] %v9464_v32  ;;  %v2438_v8 = vld [vmem:[#allocation10 + $0x218] sm:$0xff]  ;;  %11460 = vst [vmem:[#allocation141_spill] sm:$0xff] %v9471_v40 }
 0x202   :  { %3231 = vmatprep.subr.bf16.mxu0 %v9437_v62  ;;  %3272 = vmatprep.subr.bf16.mxu1 %v9440_v25  ;;  %11457 = vst [vmem:[#allocation138_spill] sm:$0xff] %v9461_v33  ;;  %v2437_v25 = vld [vmem:[#allocation10 + $0x210] sm:$0xff]  ;;  %v2442_v61 = vld [vmem:[#allocation10 + $0x238] sm:$0xff]  ;;  %11459 = vst [vmem:[#allocation140_spill] sm:$0xff] %v9467_v16 }
 0x203   :  { %v2441_v62 = vld [vmem:[#allocation10 + $0x230] sm:$0xff]  ;;  %v9476_v46 = vcombine.high %v2438_v8, %v2442_v61  ;;  %v9485_v12 = vcombine.low %v2438_v8, %v2442_v61 }
 0x204   :  { %v9473_v49 = vcombine.high %v2437_v25, %v2441_v62  ;;  %v9481_v13 = vcombine.low %v2437_v25, %v2441_v62  ;;  %v2458_v62 = vld [vmem:[#allocation10 + $0x2b8] sm:$0xff]  ;;  %v9496_v25 = vld [vmem:[#allocation12] sm:$0xff] }
 0x205   :  { %3232 = vmatpush1.bf16.msra.mxu0 %v9443_v48  ;;  %3273 = vmatpush1.bf16.msra.mxu1 %v9447_v52  ;;  %11462 = vst [vmem:[#allocation143_spill] sm:$0xff] %v9476_v46  ;;  %v9478_v52 = vshrl.u32 %v538_v21, 7  ;;  %v2446_v48 = vld [vmem:[#allocation10 + $0x258] sm:$0xff]  ;;  %11465 = vst [vmem:[#allocation146_spill] sm:$0xff] %v9485_v12  ;;  %v2453_v21 = vld [vmem:[#allocation10 + $0x290] sm:$0xff] }
 0x206   :  { %3233 = vmatprep.subr.bf16.mxu0 %v9449_v19  ;;  %3274 = vmatprep.subr.bf16.mxu1 %v9452_v4  ;;  %11461 = vst [vmem:[#allocation142_spill] sm:$0xff] %v9473_v49  ;;  %v2445_v4 = vld [vmem:[#allocation10 + $0x250] sm:$0xff]  ;;  %11464 = vst [vmem:[#allocation145_spill] sm:$0xff] %v9481_v13 }
 0x207   :  { %v2449_v19 = vld [vmem:[#allocation10 + $0x270] sm:$0xff]  ;;  %11463 = vst [vmem:[#allocation144_spill] sm:$0xff] %v9478_v52  ;;  %11469 = vst [vmem:[#allocation150_spill] sm:$0xff] %v9496_v25  ;;  %v9499_v61 = vsub.s32 2, %v9478_v52  ;;  %v9502_v8 = vsub.s32 1, %v9478_v52 }
 0x208   :  { %v9487_v9 = vcombine.high %v2445_v4, %v2449_v19 }
 0x209   :  { %3234 = vmatpush1.bf16.msra.mxu0 %v9455_v34  ;;  %3275 = vmatpush1.bf16.msra.mxu1 %v9459_v43  ;;  %v2450_v34 = vld [vmem:[#allocation10 + $0x278] sm:$0xff]  ;;  %11470 = vst [vmem:[#allocation151_spill] sm:$0xff] %v9499_v61  ;;  %11471 = vst [vmem:[#allocation152_spill] sm:$0xff] %v9502_v8 }
 0x20a   :  { %3235 = vmatprep.subr.bf16.mxu0 %v9461_v33  ;;  %3276 = vmatprep.subr.bf16.mxu1 %v9464_v32  ;;  %11466 = vst [vmem:[#allocation147_spill] sm:$0xff] %v9487_v9  ;;  %v9490_v7 = vcombine.high %v2446_v48, %v2450_v34  ;;  %v2457_v32 = vld [vmem:[#allocation10 + $0x2b0] sm:$0xff]  ;;  %v9493_v33 = vsub.s32 0, %v9478_v52 }
 0x20c   :  { %11467 = vst [vmem:[#allocation148_spill] sm:$0xff] %v9490_v7  ;;  %11468 = vst [vmem:[#allocation149_spill] sm:$0xff] %v9493_v33 }
 0x20d   :  { %3236 = vmatpush1.bf16.msra.mxu0 %v9467_v16  ;;  %3277 = vmatpush1.bf16.msra.mxu1 %v9471_v40  ;;  %v2454_v16 = vld [vmem:[#allocation10 + $0x298] sm:$0xff]  ;;  %v9511_v40 = vcombine.low %v2446_v48, %v2450_v34 }
 0x20e   :  { %3237 = vmatprep.subr.bf16.mxu0 %v9473_v49  ;;  %3278 = vmatprep.subr.bf16.mxu1 %v9476_v46  ;;  %v9505_v46 = vsub.s32 3, %v9478_v52  ;;  %v9507_v49 = vcombine.low %v2445_v4, %v2449_v19  ;;  %v9518_v31 = vcombine.high %v2454_v16, %v2458_v62  ;;  %v9522_v19 = vrot.slane %v9496_v25, %v9493_v33  ;;  %v2462_v48 = vld [vmem:[#allocation10 + $0x2d8] sm:$0xff] }
 0x20f   :  { %11474 = vst [vmem:[#allocation155_spill] sm:$0xff] %v9511_v40  ;;  %v2466_v34 = vld [vmem:[#allocation10 + $0x2f8] sm:$0xff] }
 0x210   :  { %11472 = vst [vmem:[#allocation153_spill] sm:$0xff] %v9505_v46  ;;  %11473 = vst [vmem:[#allocation154_spill] sm:$0xff] %v9507_v49 }
 0x211   :  { %3238 = vmatpush1.bf16.msra.mxu0 %v9481_v13  ;;  %3279 = vmatpush1.bf16.msra.mxu1 %v9485_v12  ;;  %v9513_v13 = vcombine.high %v2453_v21, %v2457_v32  ;;  %11477 = vst [vmem:[#allocation158_spill] sm:$0xff] %v9518_v31 }
 0x212   :  { %3239 = vmatprep.subr.bf16.mxu0 %v9487_v9  ;;  %3280 = vmatprep.subr.bf16.mxu1 %v9490_v7  ;;  %v9530_v9 = vrot.slane %v9496_v25, %v9499_v61  ;;  %v9534_v7 = vrot.slane %v9496_v25, %v9502_v8  ;;  %v9550_v8 = vcombine.low %v2454_v16, %v2458_v62  ;;  %v2470_v16 = vld [vmem:[#allocation10 + $0x318] sm:$0xff] }
 0x213   :  { %11475 = vst [vmem:[#allocation156_spill] sm:$0xff] %v9513_v13  ;;  %v9515_v43 = vpop.f32.mrb[0].mxu0  ;;  %v9524_v4 = vpop.f32.mrb[0].mxu1  ;;  %v2474_v62 = vld [vmem:[#allocation10 + $0x338] sm:$0xff] }
 0x214   :  { %11476 = vst [vmem:[#allocation157_spill] sm:$0xff] %v9515_v43  ;;  %11478 = vst [vmem:[#allocation159_spill] sm:$0xff] %v9524_v4  ;;  %v9526_v12 = vpop.f32.mrb[1].mxu0  ;;  %v9538_v43 = vrot.slane %v9496_v25, %v9505_v46  ;;  %v9540_v33 = vpop.f32.mrb[1].mxu1  ;;  %v9552_v46 = vcombine.high %v2461_v24, %v2465_v27  ;;  %v9590_v18 = vcombine.low %v2470_v16, %v2474_v62 }
 0x215   :  { %11479 = vst [vmem:[#allocation160_spill] sm:$0xff] %v9526_v12  ;;  %11480 = vst [vmem:[#allocation161_spill] sm:$0xff] %v9540_v33  ;;  %v1898_v52 = vpop.f32.mrb[2].mxu0  ;;  %3240 = vmatpush1.bf16.msra.mxu0 %v9507_v49  ;;  %v9543_v12 = vcombine.low %v2453_v21, %v2457_v32  ;;  %v2044_v61 = vpop.f32.mrb[2].mxu1  ;;  %3281 = vmatpush1.bf16.msra.mxu1 %v9511_v40  ;;  %v2469_v21 = vld [vmem:[#allocation10 + $0x310] sm:$0xff] }
 0x216   :  { %v9546_v4 = vadd.f32 %v1898_v52, %v9522_v19  ;;  %v1900_v26 = vpop.f32.mrb[3].mxu0  ;;  %3241 = vmatprep.subr.bf16.mxu0 %v9513_v13  ;;  %11483 = vst [vmem:[#allocation164_spill] sm:$0xff] %v9550_v8  ;;  %11484 = vst [vmem:[#allocation165_spill] sm:$0xff] %v9552_v46  ;;  %v9555_v33 = vadd.f32 %v2044_v61, %v9530_v9  ;;  %v2046_v32 = vpop.f32.mrb[3].mxu1  ;;  %3282 = vmatprep.subr.bf16.mxu1 %v9518_v31 }
 0x217   :  { %11481 = vst [vmem:[#allocation162_spill] sm:$0xff] %v9543_v12  ;;  %v9558_v49 = vadd.f32 %v1900_v26, %v9534_v7  ;;  %v9561_v52 = vcombine.high %v2462_v48, %v2466_v34  ;;  %v9564_v40 = vadd.f32 %v2046_v32, %v9538_v43  ;;  %v9567_v13 = vcombine.low %v2461_v24, %v2465_v27  ;;  %v2477_v32 = vld [vmem:[#allocation10 + $0x350] sm:$0xff] }
 0x218   :  { %11482 = vst [vmem:[#allocation163_spill] sm:$0xff] %v9546_v4  ;;  %11485 = vst [vmem:[#allocation166_spill] sm:$0xff] %v9555_v33  ;;  %v2473_v4 = vld [vmem:[#allocation10 + $0x330] sm:$0xff]  ;;  %v9571_v26 = vcombine.low %v2462_v48, %v2466_v34  ;;  %v9576_v33 = vcombine.high %v2470_v16, %v2474_v62 }
 0x219   :  { %11486 = vst [vmem:[#allocation167_spill] sm:$0xff] %v9558_v49  ;;  %11487 = vst [vmem:[#allocation168_spill] sm:$0xff] %v9561_v52  ;;  %3242 = vmatpush1.bf16.msra.mxu0 %v9543_v12  ;;  %3283 = vmatpush1.bf16.msra.mxu1 %v9550_v8  ;;  %v9573_v61 = vcombine.high %v2469_v21, %v2473_v4  ;;  %v2478_v12 = vld [vmem:[#allocation10 + $0x358] sm:$0xff]  ;;  %v2489_v62 = vld [vmem:[#allocation10 + $0x3b0] sm:$0xff] }
 0x21a   :  { %11488 = vst [vmem:[#allocation169_spill] sm:$0xff] %v9564_v40  ;;  %11489 = vst [vmem:[#allocation170_spill] sm:$0xff] %v9567_v13  ;;  %3243 = vmatprep.subr.bf16.mxu0 %v9552_v46  ;;  %3284 = vmatprep.subr.bf16.mxu1 %v9561_v52  ;;  %v2481_v40 = vld [vmem:[#allocation10 + $0x370] sm:$0xff]  ;;  %v2482_v8 = vld [vmem:[#allocation10 + $0x378] sm:$0xff]  ;;  %v9588_v52 = vcombine.low %v2469_v21, %v2473_v4 }
 0x21b   :  { %11490 = vst [vmem:[#allocation171_spill] sm:$0xff] %v9571_v26  ;;  %11491 = vst [vmem:[#allocation172_spill] sm:$0xff] %v9573_v61  ;;  %v1904_v49 = vpop.f32.mrb[4].mxu0  ;;  %v2050_v27 = vpop.f32.mrb[4].mxu1  ;;  %v9609_v16 = vcombine.high %v2478_v12, %v2482_v8 }
 0x21c   :  { %11492 = vst [vmem:[#allocation173_spill] sm:$0xff] %v9576_v33  ;;  %v9579_v31 = vadd.f32 %v1904_v49, %v9522_v19  ;;  %v1906_v24 = vpop.f32.mrb[5].mxu0  ;;  %v9582_v46 = vadd.f32 %v2050_v27, %v9530_v9  ;;  %v2052_v34 = vpop.f32.mrb[5].mxu1  ;;  %11496 = vst [vmem:[#allocation177_spill] sm:$0xff] %v9588_v52 }
 0x21d   :  { %v9585_v48 = vadd.f32 %v1906_v24, %v9534_v7  ;;  %v1908_v25 = vpop.f32.mrb[6].mxu0  ;;  %3244 = vmatpush1.bf16.msra.mxu0 %v9567_v13  ;;  %11497 = vst [vmem:[#allocation178_spill] sm:$0xff] %v9590_v18  ;;  %v9593_v49 = vadd.f32 %v2052_v34, %v9538_v43  ;;  %v2054_v60 = vpop.f32.mrb[6].mxu1  ;;  %3285 = vmatpush1.bf16.msra.mxu1 %v9571_v26  ;;  %11503 = vst [vmem:[#allocation184_spill] sm:$0xff] %v9609_v16 }
 0x21e   :  { %11493 = vst [vmem:[#allocation174_spill] sm:$0xff] %v9579_v31  ;;  %11494 = vst [vmem:[#allocation175_spill] sm:$0xff] %v9582_v46  ;;  %v9596_v31 = vadd.f32 %v1908_v25, %v9522_v19  ;;  %v1910_v27 = vpop.f32.mrb[7].mxu0  ;;  %3245 = vmatprep.subr.bf16.mxu0 %v9573_v61  ;;  %v9600_v24 = vcombine.high %v2477_v32, %v2481_v40  ;;  %v2056_v21 = vpop.f32.mrb[7].mxu1  ;;  %3286 = vmatprep.subr.bf16.mxu1 %v9576_v33  ;;  %v2485_v25 = vld [vmem:[#allocation10 + $0x390] sm:$0xff] }
 0x21f   :  { %11495 = vst [vmem:[#allocation176_spill] sm:$0xff] %v9585_v48  ;;  %11498 = vst [vmem:[#allocation179_spill] sm:$0xff] %v9593_v49  ;;  %v9603_v48 = vadd.f32 %v2054_v60, %v9530_v9  ;;  %v9606_v4 = vadd.f32 %v1910_v27, %v9534_v7  ;;  %v9612_v34 = vadd.f32 %v2056_v21, %v9538_v43  ;;  %v2490_v49 = vld [vmem:[#allocation10 + $0x3b8] sm:$0xff]  ;;  %v2493_v21 = vld [vmem:[#allocation10 + $0x3d0] sm:$0xff] }
 0x220   :  { %11499 = vst [vmem:[#allocation180_spill] sm:$0xff] %v9596_v31  ;;  %11500 = vst [vmem:[#allocation181_spill] sm:$0xff] %v9600_v24  ;;  %v2486_v31 = vld [vmem:[#allocation10 + $0x398] sm:$0xff]  ;;  %v9615_v46 = vcombine.low %v2477_v32, %v2481_v40  ;;  %v9619_v60 = vcombine.low %v2478_v12, %v2482_v8  ;;  %v9621_v27 = vcombine.high %v2485_v25, %v2489_v62 }
 0x221   :  { %11501 = vst [vmem:[#allocation182_spill] sm:$0xff] %v9603_v48  ;;  %11502 = vst [vmem:[#allocation183_spill] sm:$0xff] %v9606_v4  ;;  %3246 = vmatpush1.bf16.msra.mxu0 %v9588_v52  ;;  %3287 = vmatpush1.bf16.msra.mxu1 %v9590_v18  ;;  %v9624_v48 = vcombine.high %v2486_v31, %v2490_v49  ;;  %v2494_v52 = vld [vmem:[#allocation10 + $0x3d8] sm:$0xff]  ;;  %v9638_v26 = vcombine.low %v2486_v31, %v2490_v49 }
 0x222   :  { %11504 = vst [vmem:[#allocation185_spill] sm:$0xff] %v9612_v34  ;;  %11505 = vst [vmem:[#allocation186_spill] sm:$0xff] %v9615_v46  ;;  %3247 = vmatprep.subr.bf16.mxu0 %v9600_v24  ;;  %3288 = vmatprep.subr.bf16.mxu1 %v9609_v16  ;;  %v2497_v34 = vld [vmem:[#allocation10 + $0x3f0] sm:$0xff]  ;;  %v2498_v18 = vld [vmem:[#allocation10 + $0x3f8] sm:$0xff]  ;;  %v9636_v16 = vcombine.low %v2485_v25, %v2489_v62 }
 0x223   :  { %11506 = vst [vmem:[#allocation187_spill] sm:$0xff] %v9619_v60  ;;  %11507 = vst [vmem:[#allocation188_spill] sm:$0xff] %v9621_v27  ;;  %v1914_v4 = vpop.f32.mrb[8].mxu0  ;;  %v2060_v40 = vpop.f32.mrb[8].mxu1  ;;  %v9657_v25 = vcombine.high %v2494_v52, %v2498_v18  ;;  %v9663_v62 = vcombine.low %v2493_v21, %v2497_v34 }
 0x224   :  { %11508 = vst [vmem:[#allocation189_spill] sm:$0xff] %v9624_v48  ;;  %v9627_v33 = vadd.f32 %v1914_v4, %v9522_v19  ;;  %v1916_v32 = vpop.f32.mrb[9].mxu0  ;;  %v9630_v24 = vadd.f32 %v2060_v40, %v9530_v9  ;;  %v2062_v8 = vpop.f32.mrb[9].mxu1  ;;  %11512 = vst [vmem:[#allocation193_spill] sm:$0xff] %v9636_v16 }
 0x225   :  { %v9633_v12 = vadd.f32 %v1916_v32, %v9534_v7  ;;  %v1918_v61 = vpop.f32.mrb[10].mxu0  ;;  %3248 = vmatpush1.bf16.msra.mxu0 %v9615_v46  ;;  %11513 = vst [vmem:[#allocation194_spill] sm:$0xff] %v9638_v26  ;;  %v9641_v4 = vadd.f32 %v2062_v8, %v9538_v43  ;;  %v2064_v13 = vpop.f32.mrb[10].mxu1  ;;  %3289 = vmatpush1.bf16.msra.mxu1 %v9619_v60  ;;  %11519 = vst [vmem:[#allocation200_spill] sm:$0xff] %v9657_v25 }
 0x226   :  { %11509 = vst [vmem:[#allocation190_spill] sm:$0xff] %v9627_v33  ;;  %11510 = vst [vmem:[#allocation191_spill] sm:$0xff] %v9630_v24  ;;  %v9644_v33 = vadd.f32 %v1918_v61, %v9522_v19  ;;  %v1920_v40 = vpop.f32.mrb[11].mxu0  ;;  %3249 = vmatprep.subr.bf16.mxu0 %v9621_v27  ;;  %v9648_v32 = vcombine.high %v2493_v21, %v2497_v34  ;;  %v2066_v49 = vpop.f32.mrb[11].mxu1  ;;  %3290 = vmatprep.subr.bf16.mxu1 %v9624_v48  ;;  %v11544_v24 = vld [vmem:[#allocation95_spill] sm:$0xff] }
 0x227   :  { %11511 = vst [vmem:[#allocation192_spill] sm:$0xff] %v9633_v12  ;;  %11514 = vst [vmem:[#allocation195_spill] sm:$0xff] %v9641_v4  ;;  %v9651_v12 = vadd.f32 %v2064_v13, %v9530_v9  ;;  %v9654_v31 = vadd.f32 %v1920_v40, %v9534_v7  ;;  %v9660_v61 = vadd.f32 %v2066_v49, %v9538_v43  ;;  %v11543_v4 = vld [vmem:[#allocation94_spill] sm:$0xff] }
 0x228   :  { %11515 = vst [vmem:[#allocation196_spill] sm:$0xff] %v9644_v33  ;;  %11516 = vst [vmem:[#allocation197_spill] sm:$0xff] %v9648_v32  ;;  %v9667_v13 = vcombine.low %v2494_v52, %v2498_v18  ;;  %v11542_v33 = vld [vmem:[#allocation93_spill] sm:$0xff] }
 0x229   :  { %11517 = vst [vmem:[#allocation198_spill] sm:$0xff] %v9651_v12  ;;  %11518 = vst [vmem:[#allocation199_spill] sm:$0xff] %v9654_v31  ;;  %3250 = vmatpush1.bf16.msra.mxu0 %v9636_v16  ;;  %3291 = vmatpush1.bf16.msra.mxu1 %v9638_v26 }
 0x22a   :  { %11520 = vst [vmem:[#allocation201_spill] sm:$0xff] %v9660_v61  ;;  %11521 = vst [vmem:[#allocation202_spill] sm:$0xff] %v9663_v62  ;;  %3251 = vmatprep.subr.bf16.mxu0 %v9648_v32  ;;  %3292 = vmatprep.subr.bf16.mxu1 %v9657_v25 }
 0x22b   :  { %11522 = vst [vmem:[#allocation203_spill] sm:$0xff] %v9667_v13  ;;  %v1924_v8 = vpop.f32.mrb[12].mxu0  ;;  %v2070_v31 = vpop.f32.mrb[12].mxu1 }
 0x22c   :  { %v9671_v40 = vadd.f32 %v1924_v8, %v9522_v19  ;;  %v1926_v12 = vpop.f32.mrb[13].mxu0  ;;  %v9674_v49 = vadd.f32 %v2070_v31, %v9530_v9  ;;  %v2072_v21 = vpop.f32.mrb[13].mxu1 }
 0x22d   :  { %v9677_v34 = vadd.f32 %v1926_v12, %v9534_v7  ;;  %v1928_v61 = vpop.f32.mrb[14].mxu0  ;;  %3252 = vmatpush1.bf16.msra.mxu0 %v9663_v62  ;;  %v9681_v18 = vadd.f32 %v2072_v21, %v9538_v43  ;;  %v2074_v8 = vpop.f32.mrb[14].mxu1  ;;  %3293 = vmatpush1.bf16.msra.mxu1 %v9667_v13 }
 0x22e   :  { %11523 = vst [vmem:[#allocation204_spill] sm:$0xff] %v9671_v40  ;;  %11524 = vst [vmem:[#allocation205_spill] sm:$0xff] %v9674_v49  ;;  %v9684_v52 = vadd.f32 %v1928_v61, %v9522_v19  ;;  %v1930_v40 = vpop.f32.mrb[15].mxu0  ;;  %3361 = vmatprep.subr.bf16.mxu0 %v9162_v36  ;;  %v9689_v31 = vadd.f32 %v2074_v8, %v9530_v9  ;;  %3402 = vmatprep.subr.bf16.mxu1 %v9164_v2  ;;  %v11531_v61 = vld [vmem:[#allocation82_spill] sm:$0xff]  ;;  %v11534_v8 = vld [vmem:[#allocation85_spill] sm:$0xff] }
 0x22f   :  { %11525 = vst [vmem:[#allocation206_spill] sm:$0xff] %v9677_v34  ;;  %11526 = vst [vmem:[#allocation207_spill] sm:$0xff] %v9681_v18  ;;  %v9692_v12 = vadd.f32 %v1930_v40, %v9534_v7  ;;  %v2076_v34 = vpop.f32.mrb[15].mxu1  ;;  %v11532_v40 = vld [vmem:[#allocation83_spill] sm:$0xff]  ;;  %v11541_v49 = vld [vmem:[#allocation92_spill] sm:$0xff] }
 0x230   :  { %11527 = vst [vmem:[#allocation208_spill] sm:$0xff] %v9684_v52  ;;  %11528 = vst [vmem:[#allocation209_spill] sm:$0xff] %v9689_v31  ;;  %v9696_v21 = vadd.f32 %v2076_v34, %v9538_v43  ;;  %3254 = vmatmul.mubr.bf16.vlgmr.msra.gmra.mrb[36].mxu0 %v11434_v11  ;;  %3295 = vmatmul.mubr.bf16.vlgmr.msra.gmra.mrb[36].mxu1 %v11434_v11  ;;  %v11533_v34 = vld [vmem:[#allocation84_spill] sm:$0xff]  ;;  %v11535_v11 = vld [vmem:[#allocation86_spill] sm:$0xff] }
 0x231   :  { %11529 = vst [vmem:[#allocation210_spill] sm:$0xff] %v9692_v12  ;;  %3362 = vmatpush1.bf16.msra.mxu0 %v9166_v44  ;;  %3403 = vmatpush1.bf16.msra.mxu1 %v9169_v45  ;;  %v11537_v12 = vld [vmem:[#allocation88_spill] sm:$0xff]  ;;  %v11538_v31 = vld [vmem:[#allocation89_spill] sm:$0xff]  ;;  %v11539_v52 = vld [vmem:[#allocation90_spill] sm:$0xff] }
 0x232   :  { %11530 = vst [vmem:[#allocation211_spill] sm:$0xff] %v9696_v21  ;;  %3363 = vmatprep.subr.bf16.mxu0 %v9171_v50  ;;  %3404 = vmatprep.subr.bf16.mxu1 %v9174_v51  ;;  %v11536_v21 = vld [vmem:[#allocation87_spill] sm:$0xff] }
 0x233   :  { %v11540_v18 = vld [vmem:[#allocation91_spill] sm:$0xff] }
 0x235   :  { %3364 = vmatpush1.bf16.msra.mxu0 %v9179_v55  ;;  %3405 = vmatpush1.bf16.msra.mxu1 %v9183_v56 }
 0x236   :  { %3365 = vmatprep.subr.bf16.mxu0 %v9185_v57  ;;  %3406 = vmatprep.subr.bf16.mxu1 %v9190_v28 }
 0x239   :  { %3366 = vmatpush1.bf16.msra.mxu0 %v9195_v63  ;;  %3407 = vmatpush1.bf16.msra.mxu1 %v9199_v0 }
 0x23a   :  { %3367 = vmatprep.subr.bf16.mxu0 %v9201_v1  ;;  %3408 = vmatprep.subr.bf16.mxu1 %v9204_v3 }
 0x23d   :  { %3368 = vmatpush1.bf16.msra.mxu0 %v9209_v6  ;;  %3409 = vmatpush1.bf16.msra.mxu1 %v9213_v14 }
 0x23e   :  { %3369 = vmatprep.subr.bf16.mxu0 %v9215_v15  ;;  %3410 = vmatprep.subr.bf16.mxu1 %v9220_v17 }
 0x241   :  { %3370 = vmatpush1.bf16.msra.mxu0 %v9225_v47  ;;  %3411 = vmatpush1.bf16.msra.mxu1 %v9229_v20 }
 0x242   :  { %3371 = vmatprep.subr.bf16.mxu0 %v9231_v22  ;;  %3412 = vmatprep.subr.bf16.mxu1 %v9234_v23 }
 0x245   :  { %3372 = vmatpush1.bf16.msra.mxu0 %v9239_v29  ;;  %3413 = vmatpush1.bf16.msra.mxu1 %v9243_v10 }
 0x246   :  { %3373 = vmatprep.subr.bf16.mxu0 %v9245_v59  ;;  %3414 = vmatprep.subr.bf16.mxu1 %v9250_v30 }
 0x249   :  { %3374 = vmatpush1.bf16.msra.mxu0 %v9255_v35  ;;  %3415 = vmatpush1.bf16.msra.mxu1 %v9259_v38 }
 0x24a   :  { %3375 = vmatprep.subr.bf16.mxu0 %v9261_v41  ;;  %3416 = vmatprep.subr.bf16.mxu1 %v9264_v42 }
 0x24d   :  { %3376 = vmatpush1.bf16.msra.mxu0 %v9269_v53  ;;  %3417 = vmatpush1.bf16.msra.mxu1 %v9273_v54 }
 0x24e   :  { %3377 = vmatprep.subr.bf16.mxu0 %v9275_v37  ;;  %3418 = vmatprep.subr.bf16.mxu1 %v9278_v58 }
 0x251   :  { %3378 = vmatpush1.bf16.msra.mxu0 %v9283_v39  ;;  %3419 = vmatpush1.bf16.msra.mxu1 %v9287_v5 }
 0x252   :  { %3379 = vmatprep.subr.bf16.mxu0 %v11531_v61  ;;  %3420 = vmatprep.subr.bf16.mxu1 %v11532_v40 }
 0x255   :  { %3380 = vmatpush1.bf16.msra.mxu0 %v11533_v34  ;;  %3421 = vmatpush1.bf16.msra.mxu1 %v11534_v8  ;;  %v11545_v8 = vld [vmem:[#allocation96_spill] sm:$0xff] }
 0x256   :  { %3381 = vmatprep.subr.bf16.mxu0 %v11535_v11  ;;  %3422 = vmatprep.subr.bf16.mxu1 %v11536_v21  ;;  %v11546_v11 = vld [vmem:[#allocation97_spill] sm:$0xff]  ;;  %v11547_v21 = vld [vmem:[#allocation98_spill] sm:$0xff] }
 0x259   :  { %3382 = vmatpush1.bf16.msra.mxu0 %v11537_v12  ;;  %3423 = vmatpush1.bf16.msra.mxu1 %v11538_v31  ;;  %v11548_v12 = vld [vmem:[#allocation99_spill] sm:$0xff]  ;;  %v11549_v31 = vld [vmem:[#allocation100_spill] sm:$0xff] }
 0x25a   :  { %3383 = vmatprep.subr.bf16.mxu0 %v11539_v52  ;;  %3424 = vmatprep.subr.bf16.mxu1 %v11540_v18  ;;  %v11550_v52 = vld [vmem:[#allocation101_spill] sm:$0xff]  ;;  %v11551_v18 = vld [vmem:[#allocation102_spill] sm:$0xff] }
 0x25d   :  { %3384 = vmatpush1.bf16.msra.mxu0 %v11541_v49  ;;  %3425 = vmatpush1.bf16.msra.mxu1 %v11542_v33  ;;  %v11552_v49 = vld [vmem:[#allocation103_spill] sm:$0xff]  ;;  %v11553_v33 = vld [vmem:[#allocation104_spill] sm:$0xff] }
 0x25e   :  { %3385 = vmatprep.subr.bf16.mxu0 %v11543_v4  ;;  %3426 = vmatprep.subr.bf16.mxu1 %v11544_v24  ;;  %v11554_v4 = vld [vmem:[#allocation105_spill] sm:$0xff]  ;;  %v11555_v24 = vld [vmem:[#allocation106_spill] sm:$0xff] }
 0x261   :  { %3386 = vmatpush1.bf16.msra.mxu0 %v11545_v8  ;;  %3427 = vmatpush1.bf16.msra.mxu1 %v11546_v11  ;;  %v11556_v8 = vld [vmem:[#allocation107_spill] sm:$0xff]  ;;  %v11557_v11 = vld [vmem:[#allocation108_spill] sm:$0xff] }
 0x262   :  { %3387 = vmatprep.subr.bf16.mxu0 %v11547_v21  ;;  %3428 = vmatprep.subr.bf16.mxu1 %v11548_v12  ;;  %v11558_v21 = vld [vmem:[#allocation109_spill] sm:$0xff]  ;;  %v11559_v12 = vld [vmem:[#allocation110_spill] sm:$0xff] }
 0x265   :  { %3388 = vmatpush1.bf16.msra.mxu0 %v11549_v31  ;;  %3429 = vmatpush1.bf16.msra.mxu1 %v11550_v52  ;;  %v11560_v31 = vld [vmem:[#allocation111_spill] sm:$0xff]  ;;  %v11561_v52 = vld [vmem:[#allocation144_spill] sm:$0xff] }
 0x266   :  { %3389 = vmatprep.subr.bf16.mxu0 %v11551_v18  ;;  %3430 = vmatprep.subr.bf16.mxu1 %v11552_v49  ;;  %v11251_v18 = vsub.s32 4, %v11561_v52  ;;  %v564_v49 = vsub.s32 6, %v11561_v52 }
 0x269   :  { %3390 = vmatpush1.bf16.msra.mxu0 %v11553_v33  ;;  %3431 = vmatpush1.bf16.msra.mxu1 %v11554_v4  ;;  %v11259_v33 = vsub.s32 5, %v11561_v52  ;;  %v568_v4 = vsub.s32 7, %v11561_v52 }
 0x26a   :  { %3391 = vmatprep.subr.bf16.mxu0 %v11555_v24  ;;  %3432 = vmatprep.subr.bf16.mxu1 %v11556_v8  ;;  %v11562_v8 = vld [vmem:[#allocation150_spill] sm:$0xff] }
 0x26b   :  { %v9785_v24 = vrot.slane %v11562_v8, %v11259_v33  ;;  %v9790_v5 = vrot.slane %v11562_v8, %v568_v4 }
 0x26d   :  { %3392 = vmatpush1.bf16.msra.mxu0 %v11557_v11  ;;  %3433 = vmatpush1.bf16.msra.mxu1 %v11558_v21  ;;  %v9773_v11 = vrot.slane %v11562_v8, %v11251_v18 }
 0x26e   :  { %3443 = vmatprep.subr.bf16.mxu0 %v11559_v12  ;;  %3484 = vmatprep.subr.bf16.mxu1 %v11560_v31  ;;  %v9780_v31 = vrot.slane %v11562_v8, %v564_v49 }
 0x283   :  { %v9768_v34 = vpop.f32.mrb[16].mxu0  ;;  %v9775_v21 = vpop.f32.mrb[16].mxu1 }
 0x284   :  { %v9777_v12 = vpop.f32.mrb[17].mxu0  ;;  %v9787_v40 = vpop.f32.mrb[17].mxu1 }
 0x285   :  { %v2190_v61 = vpop.f32.mrb[18].mxu0  ;;  %v2336_v39 = vpop.f32.mrb[18].mxu1 }
 0x286   :  { %v9793_v18 = vadd.f32 %v2190_v61, %v9773_v11  ;;  %v2192_v58 = vpop.f32.mrb[19].mxu0  ;;  %v9796_v37 = vadd.f32 %v2336_v39, %v9780_v31  ;;  %v2338_v52 = vpop.f32.mrb[19].mxu1 }
 0x287   :  { %v9799_v49 = vadd.f32 %v2192_v58, %v9785_v24  ;;  %v9802_v33 = vadd.f32 %v2338_v52, %v9790_v5 }
 0x288   :  { %11563 = vst [vmem:[#allocation150_spill] sm:$0xff] %v9793_v18  ;;  %11564 = vst [vmem:[#allocation212_spill] sm:$0xff] %v9796_v37 }
 0x289   :  { %11565 = vst [vmem:[#allocation213_spill] sm:$0xff] %v9799_v49  ;;  %11566 = vst [vmem:[#allocation214_spill] sm:$0xff] %v9802_v33 }
 0x28b   :  { %v2196_v54 = vpop.f32.mrb[20].mxu0  ;;  %v2342_v4 = vpop.f32.mrb[20].mxu1 }
 0x28c   :  { %v9805_v53 = vadd.f32 %v2196_v54, %v9773_v11  ;;  %v2198_v8 = vpop.f32.mrb[21].mxu0  ;;  %v9808_v61 = vadd.f32 %v2342_v4, %v9780_v31  ;;  %v2344_v39 = vpop.f32.mrb[21].mxu1 }
 0x28d   :  { %v9811_v18 = vadd.f32 %v2198_v8, %v9785_v24  ;;  %v2200_v37 = vpop.f32.mrb[22].mxu0  ;;  %v9814_v58 = vadd.f32 %v2344_v39, %v9790_v5  ;;  %v2346_v33 = vpop.f32.mrb[22].mxu1 }
 0x28e   :  { %11567 = vst [vmem:[#allocation215_spill] sm:$0xff] %v9805_v53  ;;  %11568 = vst [vmem:[#allocation216_spill] sm:$0xff] %v9808_v61  ;;  %v9817_v52 = vadd.f32 %v2200_v37, %v9773_v11  ;;  %v2202_v49 = vpop.f32.mrb[23].mxu0  ;;  %v9820_v54 = vadd.f32 %v2346_v33, %v9780_v31  ;;  %v2348_v4 = vpop.f32.mrb[23].mxu1 }
 0x28f   :  { %11569 = vst [vmem:[#allocation217_spill] sm:$0xff] %v9811_v18  ;;  %11570 = vst [vmem:[#allocation218_spill] sm:$0xff] %v9814_v58  ;;  %v9823_v53 = vadd.f32 %v2202_v49, %v9785_v24  ;;  %v9826_v8 = vadd.f32 %v2348_v4, %v9790_v5 }
 0x290   :  { %11571 = vst [vmem:[#allocation219_spill] sm:$0xff] %v9817_v52  ;;  %11572 = vst [vmem:[#allocation220_spill] sm:$0xff] %v9820_v54 }
 0x291   :  { %11573 = vst [vmem:[#allocation221_spill] sm:$0xff] %v9823_v53  ;;  %11574 = vst [vmem:[#allocation222_spill] sm:$0xff] %v9826_v8 }
 0x293   :  { %v2206_v18 = vpop.f32.mrb[24].mxu0  ;;  %v2352_v39 = vpop.f32.mrb[24].mxu1 }
 0x294   :  { %v9829_v61 = vadd.f32 %v2206_v18, %v9773_v11  ;;  %v2208_v58 = vpop.f32.mrb[25].mxu0  ;;  %v9832_v37 = vadd.f32 %v2352_v39, %v9780_v31  ;;  %v2354_v33 = vpop.f32.mrb[25].mxu1 }
 0x295   :  { %v9835_v52 = vadd.f32 %v2208_v58, %v9785_v24  ;;  %v2210_v54 = vpop.f32.mrb[26].mxu0  ;;  %v9838_v49 = vadd.f32 %v2354_v33, %v9790_v5  ;;  %v2356_v8 = vpop.f32.mrb[26].mxu1 }
 0x296   :  { %11575 = vst [vmem:[#allocation223_spill] sm:$0xff] %v9829_v61  ;;  %11576 = vst [vmem:[#allocation224_spill] sm:$0xff] %v9832_v37  ;;  %v9841_v4 = vadd.f32 %v2210_v54, %v9773_v11  ;;  %v2212_v53 = vpop.f32.mrb[27].mxu0  ;;  %v9844_v18 = vadd.f32 %v2356_v8, %v9780_v31  ;;  %v2358_v39 = vpop.f32.mrb[27].mxu1 }
 0x297   :  { %11577 = vst [vmem:[#allocation225_spill] sm:$0xff] %v9835_v52  ;;  %11578 = vst [vmem:[#allocation226_spill] sm:$0xff] %v9838_v49  ;;  %v9847_v61 = vadd.f32 %v2212_v53, %v9785_v24  ;;  %v9850_v58 = vadd.f32 %v2358_v39, %v9790_v5 }
 0x298   :  { %11579 = vst [vmem:[#allocation227_spill] sm:$0xff] %v9841_v4  ;;  %11580 = vst [vmem:[#allocation228_spill] sm:$0xff] %v9844_v18 }
 0x299   :  { %11581 = vst [vmem:[#allocation229_spill] sm:$0xff] %v9847_v61  ;;  %11582 = vst [vmem:[#allocation230_spill] sm:$0xff] %v9850_v58 }
 0x29b   :  { %v2216_v52 = vpop.f32.mrb[28].mxu0  ;;  %v2362_v33 = vpop.f32.mrb[28].mxu1 }
 0x29c   :  { %v9853_v37 = vadd.f32 %v2216_v52, %v9773_v11  ;;  %v2218_v49 = vpop.f32.mrb[29].mxu0  ;;  %v9856_v54 = vadd.f32 %v2362_v33, %v9780_v31  ;;  %v2364_v8 = vpop.f32.mrb[29].mxu1 }
 0x29d   :  { %v9859_v4 = vadd.f32 %v2218_v49, %v9785_v24  ;;  %v2220_v18 = vpop.f32.mrb[30].mxu0  ;;  %v9862_v53 = vadd.f32 %v2364_v8, %v9790_v5  ;;  %v2366_v58 = vpop.f32.mrb[30].mxu1  ;;  %v11592_v8 = vld [vmem:[#allocation159_spill] sm:$0xff] }
 0x29e   :  { %11583 = vst [vmem:[#allocation231_spill] sm:$0xff] %v9853_v37  ;;  %11584 = vst [vmem:[#allocation232_spill] sm:$0xff] %v9856_v54  ;;  %v9865_v39 = vadd.f32 %v2220_v18, %v9773_v11  ;;  %v2222_v61 = vpop.f32.mrb[31].mxu0  ;;  %v9868_v52 = vadd.f32 %v2366_v58, %v9780_v31  ;;  %v2368_v33 = vpop.f32.mrb[31].mxu1  ;;  %v11593_v18 = vld [vmem:[#allocation160_spill] sm:$0xff]  ;;  %v11594_v58 = vld [vmem:[#allocation161_spill] sm:$0xff] }
 0x29f   :  { %11585 = vst [vmem:[#allocation233_spill] sm:$0xff] %v9859_v4  ;;  %11586 = vst [vmem:[#allocation234_spill] sm:$0xff] %v9862_v53  ;;  %v9871_v37 = vadd.f32 %v2222_v61, %v9785_v24  ;;  %v9874_v49 = vadd.f32 %v2368_v33, %v9790_v5  ;;  %v11591_v4 = vld [vmem:[#allocation157_spill] sm:$0xff]  ;;  %v8013_v53 = vadd.f32 %v11592_v8, %v9530_v9 }
 0x2a0   :  { %11587 = vst [vmem:[#allocation235_spill] sm:$0xff] %v9865_v39  ;;  %11588 = vst [vmem:[#allocation236_spill] sm:$0xff] %v9868_v52  ;;  %v7997_v54 = vadd.f32 %v11591_v4, %v9522_v19  ;;  %v7998_v39 = vadd.f32 %v11593_v18, %v9534_v7  ;;  %v8014_v52 = vadd.f32 %v11594_v58, %v9538_v43 }
 0x2a1   :  { %11589 = vst [vmem:[#allocation237_spill] sm:$0xff] %v9871_v37  ;;  %11590 = vst [vmem:[#allocation238_spill] sm:$0xff] %v9874_v49 }
 0x2c3   :  { %v3173_v42 = vpop.f32.mrb[32].mxu0  ;;  %v3214_v61 = vpop.f32.mrb[32].mxu1 }
 0x2c4   :  { %v3303_v41 = vadd.f32 %v7997_v54, %v3173_v42  ;;  %v3175_v37 = vpop.f32.mrb[33].mxu0  ;;  %v3305_v38 = vadd.f32 %v8013_v53, %v3214_v61  ;;  %v3216_v33 = vpop.f32.mrb[33].mxu1 }
 0x2c5   :  { %v3304_v35 = vadd.f32 %v7998_v39, %v3175_v37  ;;  %v3177_v49 = vpop.f32.mrb[34].mxu0  ;;  %v3306_v30 = vadd.f32 %v8014_v52, %v3216_v33  ;;  %v3218_v59 = vpop.f32.mrb[34].mxu1 }
 0x2c6   :  { %v3178_v19 = vpop.f32.mrb[35].mxu0  ;;  %v3219_v4 = vpop.f32.mrb[35].mxu1  ;;  %v7944_v10 = vmul.f32 -1.442695, %v3303_v41  ;;  %v7946_v9 = vmul.f32 -1.442695, %v3305_v38  ;;  %v8029_v59 = vadd.f32 %v9768_v34, %v9773_v11  ;;  %v8045_v38 = vadd.f32 %v9775_v21, %v9780_v31 }
 0x2c7   :  { %v7945_v8 = vmul.f32 -1.442695, %v3304_v35  ;;  %v7947_v29 = vmul.f32 -1.442695, %v3306_v30 }
 0x2c8   :  { %8237 = vpow2.f32 %v7944_v10  ;;  %v8030_v10 = vadd.f32 %v9777_v12, %v9785_v24 }
 0x2c9   :  { %8239 = vpow2.f32 %v7946_v9 }
 0x2ca   :  { %8241 = vpow2.f32 %v7945_v8 }
 0x2cb   :  { %8243 = vpow2.f32 %v7947_v29  ;;  %v8046_v29 = vadd.f32 %v9787_v40, %v9790_v5 }
 0x2d2   :  { %v8238_v43 = vpop.eup %8237 }
 0x2d3   :  { %v8240_v42 = vpop.eup %8239  ;;  %v3329_v53 = vadd.f32 1.0, %v8238_v43 }
 0x2d4   :  { %v8242_v7 = vpop.eup %8241  ;;  %v3331_v37 = vadd.f32 1.0, %v8240_v42 }
 0x2d5   :  { %v8244_v54 = vpop.eup %8243  ;;  %v3330_v39 = vadd.f32 1.0, %v8242_v7  ;;  %8245 = vrcp.f32 %v3329_v53 }
 0x2d6   :  { %v3332_v52 = vadd.f32 1.0, %v8244_v54  ;;  %8247 = vrcp.f32 %v3331_v37 }
 0x2d7   :  { %8249 = vrcp.f32 %v3330_v39 }
 0x2d8   :  { %8251 = vrcp.f32 %v3332_v52 }
 0x2df   :  { %v8246_v5 = vpop.eup %8245 }
 0x2e0   :  { %v8248_v40 = vpop.eup %8247 }
 0x2e1   :  { %v8250_v19 = vpop.eup %8249  ;;  %v3349_v43 = vmul.f32 0.0, %v8248_v40  ;;  %v11604_v40 = vld [vmem:[#allocation121_spill] sm:$0xff] }
 0x2e2   :  { %v8252_v4 = vpop.eup %8251 }
 0x303   :  { %v3255_v30 = vpop.f32.mrb[36].mxu0  ;;  %v3296_v41 = vpop.f32.mrb[36].mxu1 }
 0x304   :  { %v3307_v35 = vadd.f32 %v8029_v59, %v3255_v30  ;;  %v3257_v49 = vpop.f32.mrb[37].mxu0  ;;  %v3309_v18 = vadd.f32 %v8045_v38, %v3296_v41  ;;  %v3298_v11 = vpop.f32.mrb[37].mxu1  ;;  %v3350_v59 = vmul.f32 0.0, %v8252_v4  ;;  %v11606_v4 = vld [vmem:[#allocation123_spill] sm:$0xff] }
 0x305   :  { %v3308_v58 = vadd.f32 %v8030_v10, %v3257_v49  ;;  %v3259_v34 = vpop.f32.mrb[38].mxu0  ;;  %v3310_v31 = vadd.f32 %v8046_v29, %v3298_v11  ;;  %v3300_v21 = vpop.f32.mrb[38].mxu1  ;;  %v11595_v11 = vld [vmem:[#allocation112_spill] sm:$0xff] }
 0x306   :  { %v7948_v61 = vmul.f32 -1.442695, %v3307_v35  ;;  %v3260_v33 = vpop.f32.mrb[39].mxu0  ;;  %8253 = vtanh.f32 %v3309_v18  ;;  %v3301_v12 = vpop.f32.mrb[39].mxu1  ;;  %v11596_v34 = vld [vmem:[#allocation113_spill] sm:$0xff]  ;;  %v11599_v21 = vld [vmem:[#allocation116_spill] sm:$0xff] }
 0x307   :  { %v7949_v24 = vmul.f32 -1.442695, %v3308_v58  ;;  %v11600_v33 = vld [vmem:[#allocation117_spill] sm:$0xff]  ;;  %v11602_v12 = vld [vmem:[#allocation119_spill] sm:$0xff] }
 0x308   :  { %8255 = vpow2.f32 %v7948_v61  ;;  %v11597_v61 = vld [vmem:[#allocation114_spill] sm:$0xff] }
 0x309   :  { %8257 = vpow2.f32 %v7949_v24  ;;  %v11601_v24 = vld [vmem:[#allocation118_spill] sm:$0xff] }
 0x30a   :  { %8259 = vtanh.f32 %v3310_v31  ;;  %v11598_v31 = vld [vmem:[#allocation115_spill] sm:$0xff] }
 0x310   :  { %v8254_v9 = vpop.eup %8253 }
 0x311   :  { %v3351_v42 = vmul.f32 %v8254_v9, %v8246_v5  ;;  %v11603_v5 = vld [vmem:[#allocation120_spill] sm:$0xff] }
 0x312   :  { %v8256_v8 = vpop.eup %8255  ;;  %v11607_v9 = vld [vmem:[#allocation124_spill] sm:$0xff] }
 0x313   :  { %v8258_v7 = vpop.eup %8257  ;;  %v3333_v54 = vadd.f32 1.0, %v8256_v8  ;;  %v9892_v37 = vadd.f32 %v3351_v42, %v3349_v43  ;;  %v11608_v8 = vld [vmem:[#allocation125_spill] sm:$0xff]  ;;  %v11609_v43 = vld [vmem:[#allocation126_spill] sm:$0xff]  ;;  %v11610_v42 = vld [vmem:[#allocation127_spill] sm:$0xff] }
 0x314   :  { %v8260_v53 = vpop.eup %8259  ;;  %v3334_v39 = vadd.f32 1.0, %v8258_v7  ;;  %v11611_v7 = vld [vmem:[#allocation128_spill] sm:$0xff] }
 0x315   :  { %8261 = vrcp.f32 %v3333_v54  ;;  %v3352_v52 = vmul.f32 %v8260_v53, %v8250_v19  ;;  %v11605_v19 = vld [vmem:[#allocation122_spill] sm:$0xff]  ;;  %v11612_v54 = vld [vmem:[#allocation129_spill] sm:$0xff] }
 0x316   :  { %8263 = vtanh.f32 %v9892_v37  ;;  %v11613_v53 = vld [vmem:[#allocation130_spill] sm:$0xff] }
 0x317   :  { %8265 = vrcp.f32 %v3334_v39  ;;  %v9895_v38 = vadd.f32 %v3352_v52, %v3350_v59  ;;  %v11614_v39 = vld [vmem:[#allocation131_spill] sm:$0xff]  ;;  %v11615_v59 = vld [vmem:[#allocation132_spill] sm:$0xff]  ;;  %v11616_v52 = vld [vmem:[#allocation133_spill] sm:$0xff] }
 0x319   :  { %8267 = vtanh.f32 %v9895_v38 }
 0x31f   :  { %v8262_v10 = vpop.eup %8261 }
 0x320   :  { %v8264_v30 = vpop.eup %8263 }
 0x321   :  { %v8266_v29 = vpop.eup %8265  ;;  %v3357_v41 = vmul.f32 %v8264_v30, %v8262_v10  ;;  %v11617_v10 = vld [vmem:[#allocation134_spill] sm:$0xff]  ;;  %v11618_v30 = vld [vmem:[#allocation135_spill] sm:$0xff] }
 0x323   :  { %v8268_v35 = vpop.eup %8267  ;;  %v9898_v58 = vpack.c.bf16 %v3357_v41, %v3357_v41  ;;  %v11621_v41 = vld [vmem:[#allocation138_spill] sm:$0xff] }
 0x324   :  { %v3358_v49 = vmul.f32 %v8268_v35, %v8266_v29  ;;  %v11619_v29 = vld [vmem:[#allocation136_spill] sm:$0xff]  ;;  %v11620_v35 = vld [vmem:[#allocation137_spill] sm:$0xff] }
 0x326   :  { %v3360_v18 = vpack.c.bf16 %v3358_v49, %v3358_v49  ;;  %v11622_v49 = vld [vmem:[#allocation139_spill] sm:$0xff] }
 0x328   :  { %3393 = vmatprep.mubr.bf16.mxu0 %v3360_v18  ;;  %3434 = vmatprep.mubr.bf16.mxu1 %v3360_v18 }
 0x329   :  { %3394 = vmatmul.mubr.bf16.vlgmr.msra.gmra.mrb[40].mxu0 %v9898_v58  ;;  %3435 = vmatmul.mubr.bf16.vlgmr.msra.gmra.mrb[40].mxu1 %v9898_v58 }
 0x32a   :  { %3444 = vmatpush1.bf16.msra.mxu0 %v11595_v11  ;;  %3485 = vmatpush1.bf16.msra.mxu1 %v11596_v34 }
 0x32b   :  { %3475 = vmatprep.mubr.bf16.mxu0 %v3360_v18  ;;  %3516 = vmatprep.mubr.bf16.mxu1 %v3360_v18  ;;  %v11623_v18 = vld [vmem:[#allocation140_spill] sm:$0xff] }
 0x32c   :  { %3445 = vmatprep.subr.bf16.mxu0 %v11597_v61  ;;  %3486 = vmatprep.subr.bf16.mxu1 %v11598_v31 }
 0x32e   :  { %3446 = vmatpush1.bf16.msra.mxu0 %v11599_v21  ;;  %3487 = vmatpush1.bf16.msra.mxu1 %v11600_v33 }
 0x32f   :  { %3447 = vmatprep.subr.bf16.mxu0 %v11601_v24  ;;  %3488 = vmatprep.subr.bf16.mxu1 %v11602_v12 }
 0x332   :  { %3448 = vmatpush1.bf16.msra.mxu0 %v11603_v5  ;;  %3489 = vmatpush1.bf16.msra.mxu1 %v11604_v40 }
 0x333   :  { %3449 = vmatprep.subr.bf16.mxu0 %v11605_v19  ;;  %3490 = vmatprep.subr.bf16.mxu1 %v11606_v4 }
 0x336   :  { %3450 = vmatpush1.bf16.msra.mxu0 %v11607_v9  ;;  %3491 = vmatpush1.bf16.msra.mxu1 %v11608_v8 }
 0x337   :  { %3451 = vmatprep.subr.bf16.mxu0 %v11609_v43  ;;  %3492 = vmatprep.subr.bf16.mxu1 %v11610_v42 }
 0x33a   :  { %3452 = vmatpush1.bf16.msra.mxu0 %v11611_v7  ;;  %3493 = vmatpush1.bf16.msra.mxu1 %v11612_v54 }
 0x33b   :  { %3453 = vmatprep.subr.bf16.mxu0 %v11613_v53  ;;  %3494 = vmatprep.subr.bf16.mxu1 %v11614_v39  ;;  %v11624_v53 = vld [vmem:[#allocation141_spill] sm:$0xff]  ;;  %v11625_v39 = vld [vmem:[#allocation142_spill] sm:$0xff] }
 0x33e   :  { %3454 = vmatpush1.bf16.msra.mxu0 %v11615_v59  ;;  %3495 = vmatpush1.bf16.msra.mxu1 %v11616_v52  ;;  %v11626_v59 = vld [vmem:[#allocation143_spill] sm:$0xff]  ;;  %v11627_v52 = vld [vmem:[#allocation145_spill] sm:$0xff] }
 0x33f   :  { %3455 = vmatprep.subr.bf16.mxu0 %v11617_v10  ;;  %3496 = vmatprep.subr.bf16.mxu1 %v11618_v30  ;;  %v11628_v10 = vld [vmem:[#allocation146_spill] sm:$0xff]  ;;  %v11629_v30 = vld [vmem:[#allocation147_spill] sm:$0xff] }
 0x342   :  { %3456 = vmatpush1.bf16.msra.mxu0 %v11619_v29  ;;  %3497 = vmatpush1.bf16.msra.mxu1 %v11620_v35  ;;  %v11630_v29 = vld [vmem:[#allocation148_spill] sm:$0xff]  ;;  %v11631_v35 = vld [vmem:[#allocation154_spill] sm:$0xff] }
 0x343   :  { %3457 = vmatprep.subr.bf16.mxu0 %v11621_v41  ;;  %3498 = vmatprep.subr.bf16.mxu1 %v11622_v49  ;;  %v11632_v41 = vld [vmem:[#allocation155_spill] sm:$0xff]  ;;  %v11633_v49 = vld [vmem:[#allocation156_spill] sm:$0xff] }
 0x346   :  { %3458 = vmatpush1.bf16.msra.mxu0 %v11623_v18  ;;  %3499 = vmatpush1.bf16.msra.mxu1 %v11624_v53  ;;  %v11634_v18 = vld [vmem:[#allocation158_spill] sm:$0xff] }
 0x347   :  { %3459 = vmatprep.subr.bf16.mxu0 %v11625_v39  ;;  %3500 = vmatprep.subr.bf16.mxu1 %v11626_v59  ;;  %v11635_v53 = vld [vmem:[#allocation162_spill] sm:$0xff]  ;;  %v11636_v39 = vld [vmem:[#allocation164_spill] sm:$0xff]  ;;  %v11637_v59 = vld [vmem:[#allocation165_spill] sm:$0xff] }
 0x34a   :  { %3460 = vmatpush1.bf16.msra.mxu0 %v11627_v52  ;;  %3501 = vmatpush1.bf16.msra.mxu1 %v11628_v10  ;;  %v11638_v52 = vld [vmem:[#allocation168_spill] sm:$0xff]  ;;  %v11639_v10 = vld [vmem:[#allocation170_spill] sm:$0xff] }
 0x34b   :  { %3461 = vmatprep.subr.bf16.mxu0 %v11629_v30  ;;  %3502 = vmatprep.subr.bf16.mxu1 %v11630_v29  ;;  %v11640_v30 = vld [vmem:[#allocation171_spill] sm:$0xff]  ;;  %v11641_v29 = vld [vmem:[#allocation172_spill] sm:$0xff] }
 0x34e   :  { %3462 = vmatpush1.bf16.msra.mxu0 %v11631_v35  ;;  %3503 = vmatpush1.bf16.msra.mxu1 %v11632_v41  ;;  %v11642_v35 = vld [vmem:[#allocation173_spill] sm:$0xff] }
 0x34f   :  { %3463 = vmatprep.subr.bf16.mxu0 %v11633_v49  ;;  %3504 = vmatprep.subr.bf16.mxu1 %v11634_v18  ;;  %v11643_v41 = vld [vmem:[#allocation177_spill] sm:$0xff]  ;;  %v11644_v49 = vld [vmem:[#allocation178_spill] sm:$0xff] }
 0x350   :  { %v11645_v18 = vld [vmem:[#allocation181_spill] sm:$0xff] }
 0x352   :  { %3464 = vmatpush1.bf16.msra.mxu0 %v11635_v53  ;;  %3505 = vmatpush1.bf16.msra.mxu1 %v11636_v39  ;;  %v11646_v53 = vld [vmem:[#allocation184_spill] sm:$0xff] }
 0x353   :  { %3465 = vmatprep.subr.bf16.mxu0 %v11637_v59  ;;  %3506 = vmatprep.subr.bf16.mxu1 %v11638_v52 }
 0x356   :  { %3466 = vmatpush1.bf16.msra.mxu0 %v11639_v10  ;;  %3507 = vmatpush1.bf16.msra.mxu1 %v11640_v30 }
 0x357   :  { %3467 = vmatprep.subr.bf16.mxu0 %v11641_v29  ;;  %3508 = vmatprep.subr.bf16.mxu1 %v11642_v35 }
 0x35a   :  { %3468 = vmatpush1.bf16.msra.mxu0 %v11643_v41  ;;  %3509 = vmatpush1.bf16.msra.mxu1 %v11644_v49 }
 0x35b   :  { %3469 = vmatprep.subr.bf16.mxu0 %v11645_v18  ;;  %3510 = vmatprep.subr.bf16.mxu1 %v11646_v53 }
 0x35e   :  { %3470 = vmatpush1.bf16.msra.mxu0 %v9615_v46  ;;  %3511 = vmatpush1.bf16.msra.mxu1 %v9619_v60 }
 0x35f   :  { %3471 = vmatprep.subr.bf16.mxu0 %v9621_v27  ;;  %3512 = vmatprep.subr.bf16.mxu1 %v9624_v48 }
 0x362   :  { %3472 = vmatpush1.bf16.msra.mxu0 %v9636_v16  ;;  %3513 = vmatpush1.bf16.msra.mxu1 %v9638_v26 }
 0x363   :  { %3473 = vmatprep.subr.bf16.mxu0 %v9648_v32  ;;  %3514 = vmatprep.subr.bf16.mxu1 %v9657_v25 }
 0x366   :  { %3474 = vmatpush1.bf16.msra.mxu0 %v9663_v62  ;;  %3515 = vmatpush1.bf16.msra.mxu1 %v9667_v13 }
 0x367   :  { %3583 = vmatprep.subr.bf16.mxu0 %v9162_v36  ;;  %3624 = vmatprep.subr.bf16.mxu1 %v9164_v2 }
 0x369   :  { %3476 = vmatmul.mubr.bf16.vlgmr.msra.gmra.mrb[44].mxu0 %v9898_v58  ;;  %3517 = vmatmul.mubr.bf16.vlgmr.msra.gmra.mrb[44].mxu1 %v9898_v58  ;;  %v11647_v58 = vld [vmem:[#allocation68_spill] sm:$0xff] }
 0x36a   :  { %3584 = vmatpush1.bf16.msra.mxu0 %v9166_v44  ;;  %3625 = vmatpush1.bf16.msra.mxu1 %v9169_v45 }
 0x36b   :  { %3585 = vmatprep.subr.bf16.mxu0 %v9171_v50  ;;  %3626 = vmatprep.subr.bf16.mxu1 %v9174_v51 }
 0x36e   :  { %3586 = vmatpush1.bf16.msra.mxu0 %v9179_v55  ;;  %3627 = vmatpush1.bf16.msra.mxu1 %v9183_v56  ;;  %v11694_v56 = vld [vmem:[#allocation169_spill] sm:$0xff] }
 0x36f   :  { %3587 = vmatprep.subr.bf16.mxu0 %v9185_v57  ;;  %3628 = vmatprep.subr.bf16.mxu1 %v9190_v28  ;;  %v11693_v57 = vld [vmem:[#allocation167_spill] sm:$0xff] }
 0x372   :  { %3588 = vmatpush1.bf16.msra.mxu0 %v9195_v63  ;;  %3629 = vmatpush1.bf16.msra.mxu1 %v9199_v0  ;;  %v11691_v0 = vld [vmem:[#allocation163_spill] sm:$0xff]  ;;  %v11692_v63 = vld [vmem:[#allocation166_spill] sm:$0xff] }
 0x373   :  { %3589 = vmatprep.subr.bf16.mxu0 %v9201_v1  ;;  %3630 = vmatprep.subr.bf16.mxu1 %v9204_v3  ;;  %v11648_v1 = vld [vmem:[#allocation69_spill] sm:$0xff]  ;;  %v11649_v3 = vld [vmem:[#allocation70_spill] sm:$0xff] }
 0x376   :  { %3590 = vmatpush1.bf16.msra.mxu0 %v9209_v6  ;;  %3631 = vmatpush1.bf16.msra.mxu1 %v9213_v14  ;;  %v11650_v6 = vld [vmem:[#allocation71_spill] sm:$0xff]  ;;  %v11651_v14 = vld [vmem:[#allocation72_spill] sm:$0xff] }
 0x377   :  { %3591 = vmatprep.subr.bf16.mxu0 %v9215_v15  ;;  %3632 = vmatprep.subr.bf16.mxu1 %v9220_v17  ;;  %v11652_v15 = vld [vmem:[#allocation73_spill] sm:$0xff]  ;;  %v11653_v17 = vld [vmem:[#allocation74_spill] sm:$0xff] }
 0x37a   :  { %3592 = vmatpush1.bf16.msra.mxu0 %v9225_v47  ;;  %3633 = vmatpush1.bf16.msra.mxu1 %v9229_v20  ;;  %v11654_v47 = vld [vmem:[#allocation75_spill] sm:$0xff]  ;;  %v11655_v20 = vld [vmem:[#allocation76_spill] sm:$0xff] }
 0x37b   :  { %3593 = vmatprep.subr.bf16.mxu0 %v9231_v22  ;;  %3634 = vmatprep.subr.bf16.mxu1 %v9234_v23  ;;  %v11656_v22 = vld [vmem:[#allocation77_spill] sm:$0xff]  ;;  %v11657_v23 = vld [vmem:[#allocation78_spill] sm:$0xff] }
 0x37e   :  { %3594 = vmatpush1.bf16.msra.mxu0 %v11647_v58  ;;  %3635 = vmatpush1.bf16.msra.mxu1 %v11648_v1  ;;  %v11658_v58 = vld [vmem:[#allocation79_spill] sm:$0xff]  ;;  %v11659_v1 = vld [vmem:[#allocation80_spill] sm:$0xff] }
 0x37f   :  { %3595 = vmatprep.subr.bf16.mxu0 %v11649_v3  ;;  %3636 = vmatprep.subr.bf16.mxu1 %v11650_v6  ;;  %v11660_v3 = vld [vmem:[#allocation81_spill] sm:$0xff]  ;;  %v11661_v6 = vld [vmem:[#allocation82_spill] sm:$0xff] }
 0x382   :  { %3596 = vmatpush1.bf16.msra.mxu0 %v11651_v14  ;;  %3637 = vmatpush1.bf16.msra.mxu1 %v11652_v15  ;;  %v11662_v14 = vld [vmem:[#allocation83_spill] sm:$0xff]  ;;  %v11663_v15 = vld [vmem:[#allocation84_spill] sm:$0xff] }
 0x383   :  { %3597 = vmatprep.subr.bf16.mxu0 %v11653_v17  ;;  %3638 = vmatprep.subr.bf16.mxu1 %v11654_v47  ;;  %v11664_v17 = vld [vmem:[#allocation85_spill] sm:$0xff]  ;;  %v11665_v47 = vld [vmem:[#allocation86_spill] sm:$0xff] }
 0x386   :  { %3598 = vmatpush1.bf16.msra.mxu0 %v11655_v20  ;;  %3639 = vmatpush1.bf16.msra.mxu1 %v11656_v22  ;;  %v11666_v20 = vld [vmem:[#allocation87_spill] sm:$0xff]  ;;  %v11667_v22 = vld [vmem:[#allocation88_spill] sm:$0xff] }
 0x387   :  { %3599 = vmatprep.subr.bf16.mxu0 %v11657_v23  ;;  %3640 = vmatprep.subr.bf16.mxu1 %v11658_v58  ;;  %v11668_v23 = vld [vmem:[#allocation89_spill] sm:$0xff]  ;;  %v11669_v58 = vld [vmem:[#allocation90_spill] sm:$0xff] }
 0x38a   :  { %3600 = vmatpush1.bf16.msra.mxu0 %v11659_v1  ;;  %3641 = vmatpush1.bf16.msra.mxu1 %v11660_v3  ;;  %v11670_v1 = vld [vmem:[#allocation91_spill] sm:$0xff]  ;;  %v11671_v3 = vld [vmem:[#allocation92_spill] sm:$0xff] }
 0x38b   :  { %3601 = vmatprep.subr.bf16.mxu0 %v11661_v6  ;;  %3642 = vmatprep.subr.bf16.mxu1 %v11662_v14  ;;  %v11672_v6 = vld [vmem:[#allocation93_spill] sm:$0xff]  ;;  %v11673_v14 = vld [vmem:[#allocation94_spill] sm:$0xff] }
 0x38e   :  { %3602 = vmatpush1.bf16.msra.mxu0 %v11663_v15  ;;  %3643 = vmatpush1.bf16.msra.mxu1 %v11664_v17  ;;  %v11674_v15 = vld [vmem:[#allocation95_spill] sm:$0xff]  ;;  %v11675_v17 = vld [vmem:[#allocation96_spill] sm:$0xff] }
 0x38f   :  { %3603 = vmatprep.subr.bf16.mxu0 %v11665_v47  ;;  %3644 = vmatprep.subr.bf16.mxu1 %v11666_v20  ;;  %v11676_v47 = vld [vmem:[#allocation97_spill] sm:$0xff]  ;;  %v11677_v20 = vld [vmem:[#allocation98_spill] sm:$0xff] }
 0x392   :  { %3604 = vmatpush1.bf16.msra.mxu0 %v11667_v22  ;;  %3645 = vmatpush1.bf16.msra.mxu1 %v11668_v23  ;;  %v11678_v22 = vld [vmem:[#allocation99_spill] sm:$0xff]  ;;  %v11679_v23 = vld [vmem:[#allocation100_spill] sm:$0xff] }
 0x393   :  { %3605 = vmatprep.subr.bf16.mxu0 %v11669_v58  ;;  %3646 = vmatprep.subr.bf16.mxu1 %v11670_v1  ;;  %v11680_v58 = vld [vmem:[#allocation101_spill] sm:$0xff]  ;;  %v11681_v1 = vld [vmem:[#allocation102_spill] sm:$0xff] }
 0x396   :  { %3606 = vmatpush1.bf16.msra.mxu0 %v11671_v3  ;;  %3647 = vmatpush1.bf16.msra.mxu1 %v11672_v6  ;;  %v11682_v3 = vld [vmem:[#allocation103_spill] sm:$0xff]  ;;  %v11683_v6 = vld [vmem:[#allocation104_spill] sm:$0xff] }
 0x397   :  { %3607 = vmatprep.subr.bf16.mxu0 %v11673_v14  ;;  %3648 = vmatprep.subr.bf16.mxu1 %v11674_v15  ;;  %v11684_v14 = vld [vmem:[#allocation105_spill] sm:$0xff]  ;;  %v11685_v15 = vld [vmem:[#allocation106_spill] sm:$0xff] }
 0x39a   :  { %3608 = vmatpush1.bf16.msra.mxu0 %v11675_v17  ;;  %3649 = vmatpush1.bf16.msra.mxu1 %v11676_v47  ;;  %v11686_v17 = vld [vmem:[#allocation107_spill] sm:$0xff]  ;;  %v11687_v47 = vld [vmem:[#allocation108_spill] sm:$0xff] }
 0x39b   :  { %3609 = vmatprep.subr.bf16.mxu0 %v11677_v20  ;;  %3650 = vmatprep.subr.bf16.mxu1 %v11678_v22  ;;  %v11688_v20 = vld [vmem:[#allocation109_spill] sm:$0xff]  ;;  %v11689_v22 = vld [vmem:[#allocation110_spill] sm:$0xff] }
 0x39e   :  { %3610 = vmatpush1.bf16.msra.mxu0 %v11679_v23  ;;  %3651 = vmatpush1.bf16.msra.mxu1 %v11680_v58  ;;  %v11690_v23 = vld [vmem:[#allocation111_spill] sm:$0xff] }
 0x39f   :  { %3611 = vmatprep.subr.bf16.mxu0 %v11681_v1  ;;  %3652 = vmatprep.subr.bf16.mxu1 %v11682_v3 }
 0x3a2   :  { %3612 = vmatpush1.bf16.msra.mxu0 %v11683_v6  ;;  %3653 = vmatpush1.bf16.msra.mxu1 %v11684_v14 }
 0x3a3   :  { %3613 = vmatprep.subr.bf16.mxu0 %v11685_v15  ;;  %3654 = vmatprep.subr.bf16.mxu1 %v11686_v17 }
 0x3a6   :  { %3614 = vmatpush1.bf16.msra.mxu0 %v11687_v47  ;;  %3655 = vmatpush1.bf16.msra.mxu1 %v11688_v20 }
 0x3a7   :  { %3665 = vmatprep.subr.bf16.mxu0 %v11689_v22  ;;  %3706 = vmatprep.subr.bf16.mxu1 %v11690_v23 }
 0x3fc   :  { %v3395_v58 = vpop.f32.mrb[40].mxu0  ;;  %v3436_v1 = vpop.f32.mrb[40].mxu1 }
 0x3fd   :  { %v3525_v3 = vadd.f32 %v11691_v0, %v3395_v58  ;;  %v3527_v6 = vadd.f32 %v11692_v63, %v3436_v1  ;;  %v3397_v28 = vpop.f32.mrb[41].mxu0  ;;  %v3438_v14 = vpop.f32.mrb[41].mxu1 }
 0x3fe   :  { %v3526_v15 = vadd.f32 %v11693_v57, %v3397_v28  ;;  %v3528_v17 = vadd.f32 %v11694_v56, %v3438_v14  ;;  %v3399_v55 = vpop.f32.mrb[42].mxu0  ;;  %v3440_v47 = vpop.f32.mrb[42].mxu1  ;;  %v11696_v14 = vld [vmem:[#allocation212_spill] sm:$0xff] }
 0x3ff   :  { %v3400_v51 = vpop.f32.mrb[43].mxu0  ;;  %v3441_v20 = vpop.f32.mrb[43].mxu1  ;;  %v7950_v50 = vmul.f32 -1.442695, %v3525_v3  ;;  %v7952_v22 = vmul.f32 -1.442695, %v3527_v6 }
 0x400   :  { %v7951_v45 = vmul.f32 -1.442695, %v3526_v15  ;;  %v7953_v23 = vmul.f32 -1.442695, %v3528_v17  ;;  %v11695_v3 = vld [vmem:[#allocation150_spill] sm:$0xff]  ;;  %v11697_v17 = vld [vmem:[#allocation213_spill] sm:$0xff] }
 0x401   :  { %8269 = vpow2.f32 %v7950_v50  ;;  %v11698_v20 = vld [vmem:[#allocation214_spill] sm:$0xff] }
 0x402   :  { %8271 = vpow2.f32 %v7952_v22 }
 0x403   :  { %8273 = vpow2.f32 %v7951_v45 }
 0x404   :  { %8275 = vpow2.f32 %v7953_v23 }
 0x40b   :  { %v8270_v0 = vpop.eup %8269 }
 0x40c   :  { %v8272_v63 = vpop.eup %8271  ;;  %v3551_v44 = vadd.f32 1.0, %v8270_v0 }
 0x40d   :  { %v8274_v1 = vpop.eup %8273  ;;  %v3553_v57 = vadd.f32 1.0, %v8272_v63 }
 0x40e   :  { %v8276_v58 = vpop.eup %8275  ;;  %v3552_v28 = vadd.f32 1.0, %v8274_v1  ;;  %8277 = vrcp.f32 %v3551_v44 }
 0x40f   :  { %v3554_v56 = vadd.f32 1.0, %v8276_v58  ;;  %8279 = vrcp.f32 %v3553_v57 }
 0x410   :  { %8281 = vrcp.f32 %v3552_v28 }
 0x411   :  { %8283 = vrcp.f32 %v3554_v56 }
 0x418   :  { %v8278_v57 = vpop.eup %8277 }
 0x419   :  { %v8280_v28 = vpop.eup %8279 }
 0x43c   :  { %v3477_v51 = vpop.f32.mrb[44].mxu0  ;;  %v3518_v55 = vpop.f32.mrb[44].mxu1 }
 0x43d   :  { %v3529_v6 = vadd.f32 %v11695_v3, %v3477_v51  ;;  %v3531_v50 = vadd.f32 %v11696_v14, %v3518_v55  ;;  %v3479_v15 = vpop.f32.mrb[45].mxu0  ;;  %v3520_v45 = vpop.f32.mrb[45].mxu1  ;;  %v3571_v14 = vmul.f32 %v8280_v28, %v9892_v37  ;;  %v11699_v28 = vld [vmem:[#allocation130_spill] sm:$0xff] }
 0x43e   :  { %v3530_v47 = vadd.f32 %v11697_v17, %v3479_v15  ;;  %v3532_v22 = vadd.f32 %v11698_v20, %v3520_v45  ;;  %v3481_v23 = vpop.f32.mrb[46].mxu0  ;;  %v3522_v0 = vpop.f32.mrb[46].mxu1 }
 0x43f   :  { %v7954_v63 = vmul.f32 -1.442695, %v3529_v6  ;;  %8285 = vtanh.f32 %v3531_v50  ;;  %v3482_v44 = vpop.f32.mrb[47].mxu0  ;;  %v3523_v1 = vpop.f32.mrb[47].mxu1 }
 0x440   :  { %v7955_v58 = vmul.f32 -1.442695, %v3530_v47  ;;  %8287 = vtanh.f32 %v3532_v22  ;;  %v8282_v51 = vpop.eup %8281 }
 0x441   :  { %8289 = vpow2.f32 %v7954_v63  ;;  %v8284_v55 = vpop.eup %8283 }
 0x442   :  { %8291 = vpow2.f32 %v7955_v58  ;;  %v3572_v17 = vmul.f32 %v8284_v55, %v9895_v38  ;;  %v11701_v55 = vld [vmem:[#allocation132_spill] sm:$0xff] }
 0x449   :  { %v8286_v3 = vpop.eup %8285 }
 0x44a   :  { %v8288_v56 = vpop.eup %8287  ;;  %v3573_v15 = vmul.f32 %v8286_v3, %v8278_v57  ;;  %v11702_v3 = vld [vmem:[#allocation133_spill] sm:$0xff] }
 0x44b   :  { %v8290_v45 = vpop.eup %8289  ;;  %v3574_v6 = vmul.f32 %v8288_v56, %v8282_v51  ;;  %v11700_v51 = vld [vmem:[#allocation131_spill] sm:$0xff]  ;;  %v11703_v56 = vld [vmem:[#allocation134_spill] sm:$0xff] }
 0x44c   :  { %v8292_v50 = vpop.eup %8291  ;;  %v3555_v20 = vadd.f32 1.0, %v8290_v45  ;;  %v10042_v23 = vadd.f32 %v3573_v15, %v3571_v14  ;;  %v11704_v14 = vld [vmem:[#allocation135_spill] sm:$0xff]  ;;  %v11705_v15 = vld [vmem:[#allocation136_spill] sm:$0xff]  ;;  %v11706_v45 = vld [vmem:[#allocation137_spill] sm:$0xff] }
 0x44d   :  { %v3556_v47 = vadd.f32 1.0, %v8292_v50  ;;  %v10044_v22 = vadd.f32 %v3574_v6, %v3572_v17  ;;  %v11707_v17 = vld [vmem:[#allocation138_spill] sm:$0xff]  ;;  %v11708_v6 = vld [vmem:[#allocation139_spill] sm:$0xff]  ;;  %v11709_v50 = vld [vmem:[#allocation140_spill] sm:$0xff] }
 0x44e   :  { %8293 = vrcp.f32 %v3555_v20  ;;  %v11710_v20 = vld [vmem:[#allocation141_spill] sm:$0xff] }
 0x44f   :  { %8295 = vtanh.f32 %v10042_v23 }
 0x450   :  { %8297 = vrcp.f32 %v3556_v47  ;;  %v11711_v47 = vld [vmem:[#allocation142_spill] sm:$0xff] }
 0x451   :  { %8299 = vtanh.f32 %v10044_v22 }
 0x458   :  { %v8294_v0 = vpop.eup %8293 }
 0x459   :  { %v8296_v37 = vpop.eup %8295 }
 0x45a   :  { %v8298_v63 = vpop.eup %8297  ;;  %v3579_v1 = vmul.f32 %v8296_v37, %v8294_v0  ;;  %v11712_v0 = vld [vmem:[#allocation143_spill] sm:$0xff]  ;;  %v11713_v37 = vld [vmem:[#allocation145_spill] sm:$0xff] }
 0x45b   :  { %v8300_v44 = vpop.eup %8299 }
 0x45c   :  { %v3580_v38 = vmul.f32 %v8300_v44, %v8298_v63  ;;  %v10048_v57 = vpack.c.bf16 %v3579_v1, %v3579_v1  ;;  %v11714_v63 = vld [vmem:[#allocation146_spill] sm:$0xff]  ;;  %v11715_v44 = vld [vmem:[#allocation147_spill] sm:$0xff]  ;;  %v11716_v1 = vld [vmem:[#allocation148_spill] sm:$0xff] }
 0x45e   :  { %v3582_v58 = vpack.c.bf16 %v3580_v38, %v3580_v38  ;;  %v11717_v38 = vld [vmem:[#allocation154_spill] sm:$0xff] }
 0x460   :  { %3615 = vmatprep.mubr.bf16.mxu0 %v3582_v58  ;;  %3656 = vmatprep.mubr.bf16.mxu1 %v3582_v58 }
 0x461   :  { %3616 = vmatmul.mubr.bf16.vlgmr.msra.gmra.mrb[48].mxu0 %v10048_v57  ;;  %3657 = vmatmul.mubr.bf16.vlgmr.msra.gmra.mrb[48].mxu1 %v10048_v57 }
 0x462   :  { %3666 = vmatpush1.bf16.msra.mxu0 %v11595_v11  ;;  %3707 = vmatpush1.bf16.msra.mxu1 %v11596_v34 }
 0x463   :  { %3697 = vmatprep.mubr.bf16.mxu0 %v3582_v58  ;;  %3738 = vmatprep.mubr.bf16.mxu1 %v3582_v58  ;;  %v11718_v58 = vld [vmem:[#allocation155_spill] sm:$0xff] }
 0x464   :  { %3667 = vmatprep.subr.bf16.mxu0 %v11597_v61  ;;  %3708 = vmatprep.subr.bf16.mxu1 %v11598_v31 }
 0x466   :  { %3668 = vmatpush1.bf16.msra.mxu0 %v11599_v21  ;;  %3709 = vmatpush1.bf16.msra.mxu1 %v11600_v33 }
 0x467   :  { %3669 = vmatprep.subr.bf16.mxu0 %v11601_v24  ;;  %3710 = vmatprep.subr.bf16.mxu1 %v11602_v12 }
 0x46a   :  { %3670 = vmatpush1.bf16.msra.mxu0 %v11603_v5  ;;  %3711 = vmatpush1.bf16.msra.mxu1 %v11604_v40 }
 0x46b   :  { %3671 = vmatprep.subr.bf16.mxu0 %v11605_v19  ;;  %3712 = vmatprep.subr.bf16.mxu1 %v11606_v4 }
 0x46e   :  { %3672 = vmatpush1.bf16.msra.mxu0 %v11607_v9  ;;  %3713 = vmatpush1.bf16.msra.mxu1 %v11608_v8 }
 0x46f   :  { %3673 = vmatprep.subr.bf16.mxu0 %v11609_v43  ;;  %3714 = vmatprep.subr.bf16.mxu1 %v11610_v42 }
 0x472   :  { %3674 = vmatpush1.bf16.msra.mxu0 %v11611_v7  ;;  %3715 = vmatpush1.bf16.msra.mxu1 %v11612_v54 }
 0x473   :  { %3675 = vmatprep.subr.bf16.mxu0 %v11699_v28  ;;  %3716 = vmatprep.subr.bf16.mxu1 %v11700_v51 }
 0x476   :  { %3676 = vmatpush1.bf16.msra.mxu0 %v11701_v55  ;;  %3717 = vmatpush1.bf16.msra.mxu1 %v11702_v3 }
 0x477   :  { %3677 = vmatprep.subr.bf16.mxu0 %v11703_v56  ;;  %3718 = vmatprep.subr.bf16.mxu1 %v11704_v14 }
 0x47a   :  { %3678 = vmatpush1.bf16.msra.mxu0 %v11705_v15  ;;  %3719 = vmatpush1.bf16.msra.mxu1 %v11706_v45 }
 0x47b   :  { %3679 = vmatprep.subr.bf16.mxu0 %v11707_v17  ;;  %3720 = vmatprep.subr.bf16.mxu1 %v11708_v6  ;;  %v11719_v6 = vld [vmem:[#allocation156_spill] sm:$0xff] }
 0x47e   :  { %3680 = vmatpush1.bf16.msra.mxu0 %v11709_v50  ;;  %3721 = vmatpush1.bf16.msra.mxu1 %v11710_v20  ;;  %v11720_v50 = vld [vmem:[#allocation158_spill] sm:$0xff] }
 0x47f   :  { %3681 = vmatprep.subr.bf16.mxu0 %v11711_v47  ;;  %3722 = vmatprep.subr.bf16.mxu1 %v11712_v0  ;;  %v11721_v20 = vld [vmem:[#allocation162_spill] sm:$0xff] }
 0x482   :  { %3682 = vmatpush1.bf16.msra.mxu0 %v11713_v37  ;;  %3723 = vmatpush1.bf16.msra.mxu1 %v11714_v63 }
 0x483   :  { %3683 = vmatprep.subr.bf16.mxu0 %v11715_v44  ;;  %3724 = vmatprep.subr.bf16.mxu1 %v11716_v1 }
 0x486   :  { %3684 = vmatpush1.bf16.msra.mxu0 %v11717_v38  ;;  %3725 = vmatpush1.bf16.msra.mxu1 %v11718_v58 }
 0x487   :  { %3685 = vmatprep.subr.bf16.mxu0 %v11719_v6  ;;  %3726 = vmatprep.subr.bf16.mxu1 %v11720_v50 }
 0x48a   :  { %3686 = vmatpush1.bf16.msra.mxu0 %v11721_v20  ;;  %3727 = vmatpush1.bf16.msra.mxu1 %v11636_v39 }
 0x48b   :  { %3687 = vmatprep.subr.bf16.mxu0 %v11637_v59  ;;  %3728 = vmatprep.subr.bf16.mxu1 %v11638_v52 }
 0x48e   :  { %3688 = vmatpush1.bf16.msra.mxu0 %v11639_v10  ;;  %3729 = vmatpush1.bf16.msra.mxu1 %v11640_v30 }
 0x48f   :  { %3689 = vmatprep.subr.bf16.mxu0 %v11641_v29  ;;  %3730 = vmatprep.subr.bf16.mxu1 %v11642_v35 }
 0x492   :  { %3690 = vmatpush1.bf16.msra.mxu0 %v11643_v41  ;;  %3731 = vmatpush1.bf16.msra.mxu1 %v11644_v49  ;;  %v11789_v49 = vld [vmem:[#allocation179_spill] sm:$0xff] }
 0x493   :  { %3691 = vmatprep.subr.bf16.mxu0 %v11645_v18  ;;  %3732 = vmatprep.subr.bf16.mxu1 %v11646_v53  ;;  %v11788_v18 = vld [vmem:[#allocation176_spill] sm:$0xff] }
 0x496   :  { %3692 = vmatpush1.bf16.msra.mxu0 %v9615_v46  ;;  %3733 = vmatpush1.bf16.msra.mxu1 %v9619_v60  ;;  %v11786_v60 = vld [vmem:[#allocation174_spill] sm:$0xff]  ;;  %v11787_v46 = vld [vmem:[#allocation175_spill] sm:$0xff] }
 0x497   :  { %3693 = vmatprep.subr.bf16.mxu0 %v9621_v27  ;;  %3734 = vmatprep.subr.bf16.mxu1 %v9624_v48  ;;  %v11722_v48 = vld [vmem:[#allocation48_spill] sm:$0xff]  ;;  %v11731_v27 = vld [vmem:[#allocation57_spill] sm:$0xff] }
 0x49a   :  { %3694 = vmatpush1.bf16.msra.mxu0 %v9636_v16  ;;  %3735 = vmatpush1.bf16.msra.mxu1 %v9638_v26  ;;  %v11723_v16 = vld [vmem:[#allocation49_spill] sm:$0xff]  ;;  %v11724_v26 = vld [vmem:[#allocation50_spill] sm:$0xff] }
 0x49b   :  { %3695 = vmatprep.subr.bf16.mxu0 %v9648_v32  ;;  %3736 = vmatprep.subr.bf16.mxu1 %v9657_v25  ;;  %v11725_v32 = vld [vmem:[#allocation51_spill] sm:$0xff]  ;;  %v11726_v25 = vld [vmem:[#allocation52_spill] sm:$0xff] }
 0x49e   :  { %3696 = vmatpush1.bf16.msra.mxu0 %v9663_v62  ;;  %3737 = vmatpush1.bf16.msra.mxu1 %v9667_v13  ;;  %v11727_v62 = vld [vmem:[#allocation53_spill] sm:$0xff]  ;;  %v11728_v13 = vld [vmem:[#allocation54_spill] sm:$0xff] }
 0x49f   :  { %3805 = vmatprep.subr.bf16.mxu0 %v9162_v36  ;;  %3846 = vmatprep.subr.bf16.mxu1 %v9164_v2  ;;  %v11729_v36 = vld [vmem:[#allocation55_spill] sm:$0xff]  ;;  %v11730_v2 = vld [vmem:[#allocation56_spill] sm:$0xff] }
 0x4a1   :  { %3698 = vmatmul.mubr.bf16.vlgmr.msra.gmra.mrb[52].mxu0 %v10048_v57  ;;  %3739 = vmatmul.mubr.bf16.vlgmr.msra.gmra.mrb[52].mxu1 %v10048_v57  ;;  %v11732_v57 = vld [vmem:[#allocation58_spill] sm:$0xff] }
 0x4a2   :  { %3806 = vmatpush1.bf16.msra.mxu0 %v11722_v48  ;;  %3847 = vmatpush1.bf16.msra.mxu1 %v11723_v16  ;;  %v11733_v48 = vld [vmem:[#allocation59_spill] sm:$0xff]  ;;  %v11734_v16 = vld [vmem:[#allocation60_spill] sm:$0xff] }
 0x4a3   :  { %3807 = vmatprep.subr.bf16.mxu0 %v11724_v26  ;;  %3848 = vmatprep.subr.bf16.mxu1 %v11725_v32  ;;  %v11735_v26 = vld [vmem:[#allocation61_spill] sm:$0xff]  ;;  %v11736_v32 = vld [vmem:[#allocation62_spill] sm:$0xff] }
 0x4a6   :  { %3808 = vmatpush1.bf16.msra.mxu0 %v11726_v25  ;;  %3849 = vmatpush1.bf16.msra.mxu1 %v11727_v62  ;;  %v11737_v25 = vld [vmem:[#allocation63_spill] sm:$0xff]  ;;  %v11738_v62 = vld [vmem:[#allocation64_spill] sm:$0xff] }
 0x4a7   :  { %3809 = vmatprep.subr.bf16.mxu0 %v11728_v13  ;;  %3850 = vmatprep.subr.bf16.mxu1 %v11729_v36  ;;  %v11739_v13 = vld [vmem:[#allocation65_spill] sm:$0xff]  ;;  %v11740_v36 = vld [vmem:[#allocation66_spill] sm:$0xff] }
 0x4aa   :  { %3810 = vmatpush1.bf16.msra.mxu0 %v11730_v2  ;;  %3851 = vmatpush1.bf16.msra.mxu1 %v11731_v27  ;;  %v11741_v2 = vld [vmem:[#allocation67_spill] sm:$0xff]  ;;  %v11742_v27 = vld [vmem:[#allocation68_spill] sm:$0xff] }
 0x4ab   :  { %3811 = vmatprep.subr.bf16.mxu0 %v11732_v57  ;;  %3852 = vmatprep.subr.bf16.mxu1 %v11733_v48  ;;  %v11743_v57 = vld [vmem:[#allocation69_spill] sm:$0xff]  ;;  %v11744_v48 = vld [vmem:[#allocation70_spill] sm:$0xff] }
 0x4ae   :  { %3812 = vmatpush1.bf16.msra.mxu0 %v11734_v16  ;;  %3853 = vmatpush1.bf16.msra.mxu1 %v11735_v26  ;;  %v11745_v16 = vld [vmem:[#allocation71_spill] sm:$0xff]  ;;  %v11746_v26 = vld [vmem:[#allocation72_spill] sm:$0xff] }
 0x4af   :  { %3813 = vmatprep.subr.bf16.mxu0 %v11736_v32  ;;  %3854 = vmatprep.subr.bf16.mxu1 %v11737_v25  ;;  %v11747_v32 = vld [vmem:[#allocation73_spill] sm:$0xff]  ;;  %v11748_v25 = vld [vmem:[#allocation74_spill] sm:$0xff] }
 0x4b2   :  { %3814 = vmatpush1.bf16.msra.mxu0 %v11738_v62  ;;  %3855 = vmatpush1.bf16.msra.mxu1 %v11739_v13  ;;  %v11749_v62 = vld [vmem:[#allocation75_spill] sm:$0xff]  ;;  %v11750_v13 = vld [vmem:[#allocation76_spill] sm:$0xff] }
 0x4b3   :  { %3815 = vmatprep.subr.bf16.mxu0 %v11740_v36  ;;  %3856 = vmatprep.subr.bf16.mxu1 %v11741_v2  ;;  %v11751_v36 = vld [vmem:[#allocation77_spill] sm:$0xff]  ;;  %v11752_v2 = vld [vmem:[#allocation78_spill] sm:$0xff] }
 0x4b6   :  { %3816 = vmatpush1.bf16.msra.mxu0 %v11742_v27  ;;  %3857 = vmatpush1.bf16.msra.mxu1 %v11743_v57  ;;  %v11753_v27 = vld [vmem:[#allocation79_spill] sm:$0xff]  ;;  %v11754_v57 = vld [vmem:[#allocation80_spill] sm:$0xff] }
 0x4b7   :  { %3817 = vmatprep.subr.bf16.mxu0 %v11744_v48  ;;  %3858 = vmatprep.subr.bf16.mxu1 %v11745_v16  ;;  %v11755_v48 = vld [vmem:[#allocation81_spill] sm:$0xff]  ;;  %v11756_v16 = vld [vmem:[#allocation82_spill] sm:$0xff] }
 0x4ba   :  { %3818 = vmatpush1.bf16.msra.mxu0 %v11746_v26  ;;  %3859 = vmatpush1.bf16.msra.mxu1 %v11747_v32  ;;  %v11757_v26 = vld [vmem:[#allocation83_spill] sm:$0xff]  ;;  %v11758_v32 = vld [vmem:[#allocation84_spill] sm:$0xff] }
 0x4bb   :  { %3819 = vmatprep.subr.bf16.mxu0 %v11748_v25  ;;  %3860 = vmatprep.subr.bf16.mxu1 %v11749_v62  ;;  %v11759_v25 = vld [vmem:[#allocation85_spill] sm:$0xff]  ;;  %v11760_v62 = vld [vmem:[#allocation86_spill] sm:$0xff] }
 0x4be   :  { %3820 = vmatpush1.bf16.msra.mxu0 %v11750_v13  ;;  %3861 = vmatpush1.bf16.msra.mxu1 %v11751_v36  ;;  %v11761_v13 = vld [vmem:[#allocation87_spill] sm:$0xff]  ;;  %v11762_v36 = vld [vmem:[#allocation88_spill] sm:$0xff] }
 0x4bf   :  { %3821 = vmatprep.subr.bf16.mxu0 %v11752_v2  ;;  %3862 = vmatprep.subr.bf16.mxu1 %v11753_v27  ;;  %v11763_v2 = vld [vmem:[#allocation89_spill] sm:$0xff]  ;;  %v11764_v27 = vld [vmem:[#allocation90_spill] sm:$0xff] }
 0x4c2   :  { %3822 = vmatpush1.bf16.msra.mxu0 %v11754_v57  ;;  %3863 = vmatpush1.bf16.msra.mxu1 %v11755_v48  ;;  %v11765_v57 = vld [vmem:[#allocation91_spill] sm:$0xff]  ;;  %v11766_v48 = vld [vmem:[#allocation92_spill] sm:$0xff] }
 0x4c3   :  { %3823 = vmatprep.subr.bf16.mxu0 %v11756_v16  ;;  %3864 = vmatprep.subr.bf16.mxu1 %v11757_v26  ;;  %v11767_v16 = vld [vmem:[#allocation93_spill] sm:$0xff]  ;;  %v11768_v26 = vld [vmem:[#allocation94_spill] sm:$0xff] }
 0x4c6   :  { %3824 = vmatpush1.bf16.msra.mxu0 %v11758_v32  ;;  %3865 = vmatpush1.bf16.msra.mxu1 %v11759_v25  ;;  %v11769_v32 = vld [vmem:[#allocation95_spill] sm:$0xff]  ;;  %v11770_v25 = vld [vmem:[#allocation96_spill] sm:$0xff] }
 0x4c7   :  { %3825 = vmatprep.subr.bf16.mxu0 %v11760_v62  ;;  %3866 = vmatprep.subr.bf16.mxu1 %v11761_v13  ;;  %v11771_v62 = vld [vmem:[#allocation97_spill] sm:$0xff]  ;;  %v11772_v13 = vld [vmem:[#allocation98_spill] sm:$0xff] }
 0x4ca   :  { %3826 = vmatpush1.bf16.msra.mxu0 %v11762_v36  ;;  %3867 = vmatpush1.bf16.msra.mxu1 %v11763_v2  ;;  %v11773_v36 = vld [vmem:[#allocation99_spill] sm:$0xff]  ;;  %v11774_v2 = vld [vmem:[#allocation100_spill] sm:$0xff] }
 0x4cb   :  { %3827 = vmatprep.subr.bf16.mxu0 %v11764_v27  ;;  %3868 = vmatprep.subr.bf16.mxu1 %v11765_v57  ;;  %v11775_v27 = vld [vmem:[#allocation101_spill] sm:$0xff]  ;;  %v11776_v57 = vld [vmem:[#allocation102_spill] sm:$0xff] }
 0x4ce   :  { %3828 = vmatpush1.bf16.msra.mxu0 %v11766_v48  ;;  %3869 = vmatpush1.bf16.msra.mxu1 %v11767_v16  ;;  %v11777_v48 = vld [vmem:[#allocation103_spill] sm:$0xff]  ;;  %v11778_v16 = vld [vmem:[#allocation104_spill] sm:$0xff] }
 0x4cf   :  { %3829 = vmatprep.subr.bf16.mxu0 %v11768_v26  ;;  %3870 = vmatprep.subr.bf16.mxu1 %v11769_v32  ;;  %v11779_v26 = vld [vmem:[#allocation105_spill] sm:$0xff]  ;;  %v11780_v32 = vld [vmem:[#allocation106_spill] sm:$0xff] }
 0x4d2   :  { %3830 = vmatpush1.bf16.msra.mxu0 %v11770_v25  ;;  %3871 = vmatpush1.bf16.msra.mxu1 %v11771_v62  ;;  %v11781_v25 = vld [vmem:[#allocation107_spill] sm:$0xff]  ;;  %v11782_v62 = vld [vmem:[#allocation108_spill] sm:$0xff] }
 0x4d3   :  { %3831 = vmatprep.subr.bf16.mxu0 %v11772_v13  ;;  %3872 = vmatprep.subr.bf16.mxu1 %v11773_v36  ;;  %v11783_v13 = vld [vmem:[#allocation109_spill] sm:$0xff]  ;;  %v11784_v36 = vld [vmem:[#allocation110_spill] sm:$0xff] }
 0x4d6   :  { %3832 = vmatpush1.bf16.msra.mxu0 %v11774_v2  ;;  %3873 = vmatpush1.bf16.msra.mxu1 %v11775_v27  ;;  %v11785_v2 = vld [vmem:[#allocation111_spill] sm:$0xff] }
 0x4d7   :  { %3833 = vmatprep.subr.bf16.mxu0 %v11776_v57  ;;  %3874 = vmatprep.subr.bf16.mxu1 %v11777_v48 }
 0x4da   :  { %3834 = vmatpush1.bf16.msra.mxu0 %v11778_v16  ;;  %3875 = vmatpush1.bf16.msra.mxu1 %v11779_v26 }
 0x4db   :  { %3835 = vmatprep.subr.bf16.mxu0 %v11780_v32  ;;  %3876 = vmatprep.subr.bf16.mxu1 %v11781_v25 }
 0x4de   :  { %3836 = vmatpush1.bf16.msra.mxu0 %v11782_v62  ;;  %3877 = vmatpush1.bf16.msra.mxu1 %v11783_v13 }
 0x4df   :  { %3887 = vmatprep.subr.bf16.mxu0 %v11784_v36  ;;  %3928 = vmatprep.subr.bf16.mxu1 %v11785_v2 }
 0x534   :  { %v3617_v27 = vpop.f32.mrb[48].mxu0  ;;  %v3658_v57 = vpop.f32.mrb[48].mxu1 }
 0x535   :  { %v3747_v48 = vadd.f32 %v11786_v60, %v3617_v27  ;;  %v3749_v16 = vadd.f32 %v11787_v46, %v3658_v57  ;;  %v3619_v53 = vpop.f32.mrb[49].mxu0  ;;  %v3660_v26 = vpop.f32.mrb[49].mxu1 }
 0x536   :  { %v3748_v32 = vadd.f32 %v11788_v18, %v3619_v53  ;;  %v3750_v25 = vadd.f32 %v11789_v49, %v3660_v26  ;;  %v3621_v41 = vpop.f32.mrb[50].mxu0  ;;  %v3662_v62 = vpop.f32.mrb[50].mxu1 }
 0x537   :  { %v3622_v35 = vpop.f32.mrb[51].mxu0  ;;  %v3663_v13 = vpop.f32.mrb[51].mxu1  ;;  %v7956_v29 = vmul.f32 -1.442695, %v3747_v48  ;;  %v7958_v36 = vmul.f32 -1.442695, %v3749_v16 }
 0x538   :  { %v7957_v30 = vmul.f32 -1.442695, %v3748_v32  ;;  %v7959_v2 = vmul.f32 -1.442695, %v3750_v25  ;;  %v11790_v48 = vld [vmem:[#allocation215_spill] sm:$0xff]  ;;  %v11791_v32 = vld [vmem:[#allocation216_spill] sm:$0xff] }
 0x539   :  { %8301 = vpow2.f32 %v7956_v29  ;;  %v11793_v35 = vld [vmem:[#allocation218_spill] sm:$0xff] }
 0x53a   :  { %8303 = vpow2.f32 %v7958_v36 }
 0x53b   :  { %8305 = vpow2.f32 %v7957_v30 }
 0x53c   :  { %8307 = vpow2.f32 %v7959_v2  ;;  %v11792_v2 = vld [vmem:[#allocation217_spill] sm:$0xff] }
 0x543   :  { %v8302_v60 = vpop.eup %8301 }
 0x544   :  { %v8304_v46 = vpop.eup %8303  ;;  %v3773_v10 = vadd.f32 1.0, %v8302_v60 }
 0x545   :  { %v8306_v27 = vpop.eup %8305  ;;  %v3775_v53 = vadd.f32 1.0, %v8304_v46 }
 0x546   :  { %v8308_v57 = vpop.eup %8307  ;;  %v3774_v18 = vadd.f32 1.0, %v8306_v27  ;;  %8309 = vrcp.f32 %v3773_v10 }
 0x547   :  { %v3776_v26 = vadd.f32 1.0, %v8308_v57  ;;  %8311 = vrcp.f32 %v3775_v53 }
 0x548   :  { %8313 = vrcp.f32 %v3774_v18 }
 0x549   :  { %8315 = vrcp.f32 %v3776_v26 }
 0x550   :  { %v8310_v53 = vpop.eup %8309 }
 0x551   :  { %v8312_v18 = vpop.eup %8311 }
 0x574   :  { %v3699_v62 = vpop.f32.mrb[52].mxu0  ;;  %v3740_v13 = vpop.f32.mrb[52].mxu1 }
 0x575   :  { %v3751_v16 = vadd.f32 %v11790_v48, %v3699_v62  ;;  %v3753_v25 = vadd.f32 %v11791_v32, %v3740_v13  ;;  %v3701_v36 = vpop.f32.mrb[53].mxu0  ;;  %v3742_v30 = vpop.f32.mrb[53].mxu1  ;;  %v3793_v32 = vmul.f32 %v8312_v18, %v10042_v23  ;;  %v11794_v18 = vld [vmem:[#allocation139_spill] sm:$0xff] }
 0x576   :  { %v3752_v29 = vadd.f32 %v11792_v2, %v3701_v36  ;;  %v3754_v41 = vadd.f32 %v11793_v35, %v3742_v30  ;;  %v3703_v49 = vpop.f32.mrb[54].mxu0  ;;  %v3744_v60 = vpop.f32.mrb[54].mxu1 }
 0x577   :  { %v7960_v46 = vmul.f32 -1.442695, %v3751_v16  ;;  %8317 = vtanh.f32 %v3753_v25  ;;  %v3704_v10 = vpop.f32.mrb[55].mxu0  ;;  %v3745_v27 = vpop.f32.mrb[55].mxu1 }
 0x578   :  { %v7961_v57 = vmul.f32 -1.442695, %v3752_v29  ;;  %8319 = vtanh.f32 %v3754_v41  ;;  %v8314_v62 = vpop.eup %8313 }
 0x579   :  { %8321 = vpow2.f32 %v7960_v46  ;;  %v8316_v13 = vpop.eup %8315 }
 0x57a   :  { %8323 = vpow2.f32 %v7961_v57  ;;  %v3794_v2 = vmul.f32 %v8316_v13, %v10044_v22  ;;  %v11796_v13 = vld [vmem:[#allocation141_spill] sm:$0xff] }
 0x581   :  { %v8318_v48 = vpop.eup %8317 }
 0x582   :  { %v8320_v26 = vpop.eup %8319  ;;  %v3795_v36 = vmul.f32 %v8318_v48, %v8310_v53  ;;  %v11797_v48 = vld [vmem:[#allocation170_spill] sm:$0xff] }
 0x583   :  { %v8322_v30 = vpop.eup %8321  ;;  %v3796_v16 = vmul.f32 %v8320_v26, %v8314_v62  ;;  %v11795_v62 = vld [vmem:[#allocation140_spill] sm:$0xff]  ;;  %v11798_v26 = vld [vmem:[#allocation171_spill] sm:$0xff] }
 0x584   :  { %v8324_v25 = vpop.eup %8323  ;;  %v3777_v35 = vadd.f32 1.0, %v8322_v30  ;;  %v10192_v49 = vadd.f32 %v3795_v36, %v3793_v32  ;;  %v11799_v32 = vld [vmem:[#allocation172_spill] sm:$0xff]  ;;  %v11800_v36 = vld [vmem:[#allocation173_spill] sm:$0xff] }
 0x585   :  { %v3778_v29 = vadd.f32 1.0, %v8324_v25  ;;  %v10194_v41 = vadd.f32 %v3796_v16, %v3794_v2  ;;  %v11801_v30 = vld [vmem:[#allocation177_spill] sm:$0xff]  ;;  %v11802_v2 = vld [vmem:[#allocation178_spill] sm:$0xff]  ;;  %v11804_v25 = vld [vmem:[#allocation184_spill] sm:$0xff] }
 0x586   :  { %8325 = vrcp.f32 %v3777_v35  ;;  %v11803_v16 = vld [vmem:[#allocation181_spill] sm:$0xff]  ;;  %v11805_v35 = vld [vmem:[#allocation186_spill] sm:$0xff] }
 0x587   :  { %8327 = vtanh.f32 %v10192_v49 }
 0x588   :  { %8329 = vrcp.f32 %v3778_v29  ;;  %v11806_v29 = vld [vmem:[#allocation187_spill] sm:$0xff] }
 0x589   :  { %8331 = vtanh.f32 %v10194_v41 }
 0x590   :  { %v8326_v60 = vpop.eup %8325 }
 0x591   :  { %v8328_v23 = vpop.eup %8327 }
 0x592   :  { %v8330_v46 = vpop.eup %8329  ;;  %v3801_v27 = vmul.f32 %v8328_v23, %v8326_v60  ;;  %v11807_v60 = vld [vmem:[#allocation188_spill] sm:$0xff]  ;;  %v11808_v23 = vld [vmem:[#allocation189_spill] sm:$0xff] }
 0x593   :  { %v8332_v10 = vpop.eup %8331 }
 0x594   :  { %v3802_v22 = vmul.f32 %v8332_v10, %v8330_v46  ;;  %v10198_v53 = vpack.c.bf16 %v3801_v27, %v3801_v27  ;;  %v11809_v46 = vld [vmem:[#allocation193_spill] sm:$0xff]  ;;  %v11810_v10 = vld [vmem:[#allocation194_spill] sm:$0xff] }
 0x595   :  { %v11811_v27 = vld [vmem:[#allocation197_spill] sm:$0xff] }
 0x596   :  { %v3804_v57 = vpack.c.bf16 %v3802_v22, %v3802_v22  ;;  %v11812_v22 = vld [vmem:[#allocation200_spill] sm:$0xff] }
 0x598   :  { %3837 = vmatprep.mubr.bf16.mxu0 %v3804_v57  ;;  %3878 = vmatprep.mubr.bf16.mxu1 %v3804_v57 }
 0x599   :  { %3838 = vmatmul.mubr.bf16.vlgmr.msra.gmra.mrb[56].mxu0 %v10198_v53  ;;  %3879 = vmatmul.mubr.bf16.vlgmr.msra.gmra.mrb[56].mxu1 %v10198_v53 }
 0x59a   :  { %3888 = vmatpush1.bf16.msra.mxu0 %v11595_v11  ;;  %3929 = vmatpush1.bf16.msra.mxu1 %v11596_v34 }
 0x59b   :  { %3919 = vmatprep.mubr.bf16.mxu0 %v3804_v57  ;;  %3960 = vmatprep.mubr.bf16.mxu1 %v3804_v57  ;;  %v11813_v57 = vld [vmem:[#allocation202_spill] sm:$0xff] }
 0x59c   :  { %3889 = vmatprep.subr.bf16.mxu0 %v11597_v61  ;;  %3930 = vmatprep.subr.bf16.mxu1 %v11598_v31 }
 0x59e   :  { %3890 = vmatpush1.bf16.msra.mxu0 %v11599_v21  ;;  %3931 = vmatpush1.bf16.msra.mxu1 %v11600_v33 }
 0x59f   :  { %3891 = vmatprep.subr.bf16.mxu0 %v11601_v24  ;;  %3932 = vmatprep.subr.bf16.mxu1 %v11602_v12 }
 0x5a2   :  { %3892 = vmatpush1.bf16.msra.mxu0 %v11603_v5  ;;  %3933 = vmatpush1.bf16.msra.mxu1 %v11604_v40 }
 0x5a3   :  { %3893 = vmatprep.subr.bf16.mxu0 %v11605_v19  ;;  %3934 = vmatprep.subr.bf16.mxu1 %v11606_v4 }
 0x5a6   :  { %3894 = vmatpush1.bf16.msra.mxu0 %v11607_v9  ;;  %3935 = vmatpush1.bf16.msra.mxu1 %v11608_v8 }
 0x5a7   :  { %3895 = vmatprep.subr.bf16.mxu0 %v11609_v43  ;;  %3936 = vmatprep.subr.bf16.mxu1 %v11610_v42 }
 0x5aa   :  { %3896 = vmatpush1.bf16.msra.mxu0 %v11611_v7  ;;  %3937 = vmatpush1.bf16.msra.mxu1 %v11612_v54 }
 0x5ab   :  { %3897 = vmatprep.subr.bf16.mxu0 %v11699_v28  ;;  %3938 = vmatprep.subr.bf16.mxu1 %v11700_v51 }
 0x5ae   :  { %3898 = vmatpush1.bf16.msra.mxu0 %v11701_v55  ;;  %3939 = vmatpush1.bf16.msra.mxu1 %v11702_v3 }
 0x5af   :  { %3899 = vmatprep.subr.bf16.mxu0 %v11703_v56  ;;  %3940 = vmatprep.subr.bf16.mxu1 %v11704_v14 }
 0x5b2   :  { %3900 = vmatpush1.bf16.msra.mxu0 %v11705_v15  ;;  %3941 = vmatpush1.bf16.msra.mxu1 %v11706_v45 }
 0x5b3   :  { %3901 = vmatprep.subr.bf16.mxu0 %v11707_v17  ;;  %3942 = vmatprep.subr.bf16.mxu1 %v11794_v18 }
 0x5b6   :  { %3902 = vmatpush1.bf16.msra.mxu0 %v11795_v62  ;;  %3943 = vmatpush1.bf16.msra.mxu1 %v11796_v13 }
 0x5b7   :  { %3903 = vmatprep.subr.bf16.mxu0 %v11711_v47  ;;  %3944 = vmatprep.subr.bf16.mxu1 %v11712_v0 }
 0x5ba   :  { %3904 = vmatpush1.bf16.msra.mxu0 %v11713_v37  ;;  %3945 = vmatpush1.bf16.msra.mxu1 %v11714_v63 }
 0x5bb   :  { %3905 = vmatprep.subr.bf16.mxu0 %v11715_v44  ;;  %3946 = vmatprep.subr.bf16.mxu1 %v11716_v1 }
 0x5be   :  { %3906 = vmatpush1.bf16.msra.mxu0 %v11717_v38  ;;  %3947 = vmatpush1.bf16.msra.mxu1 %v11718_v58 }
 0x5bf   :  { %3907 = vmatprep.subr.bf16.mxu0 %v11719_v6  ;;  %3948 = vmatprep.subr.bf16.mxu1 %v11720_v50 }
 0x5c2   :  { %3908 = vmatpush1.bf16.msra.mxu0 %v11721_v20  ;;  %3949 = vmatpush1.bf16.msra.mxu1 %v11636_v39 }
 0x5c3   :  { %3909 = vmatprep.subr.bf16.mxu0 %v11637_v59  ;;  %3950 = vmatprep.subr.bf16.mxu1 %v11638_v52 }
 0x5c6   :  { %3910 = vmatpush1.bf16.msra.mxu0 %v11797_v48  ;;  %3951 = vmatpush1.bf16.msra.mxu1 %v11798_v26 }
 0x5c7   :  { %3911 = vmatprep.subr.bf16.mxu0 %v11799_v32  ;;  %3952 = vmatprep.subr.bf16.mxu1 %v11800_v36  ;;  %v11883_v36 = vld [vmem:[#allocation183_spill] sm:$0xff]  ;;  %v11884_v32 = vld [vmem:[#allocation185_spill] sm:$0xff] }
 0x5ca   :  { %3912 = vmatpush1.bf16.msra.mxu0 %v11801_v30  ;;  %3953 = vmatpush1.bf16.msra.mxu1 %v11802_v2  ;;  %v11882_v2 = vld [vmem:[#allocation182_spill] sm:$0xff] }
 0x5cb   :  { %3913 = vmatprep.subr.bf16.mxu0 %v11803_v16  ;;  %3954 = vmatprep.subr.bf16.mxu1 %v11804_v25  ;;  %v11814_v16 = vld [vmem:[#allocation203_spill] sm:$0xff]  ;;  %v11815_v25 = vld [vmem:[#allocation46_spill] sm:$0xff] }
 0x5ce   :  { %3914 = vmatpush1.bf16.msra.mxu0 %v11805_v35  ;;  %3955 = vmatpush1.bf16.msra.mxu1 %v11806_v29  ;;  %v11816_v35 = vld [vmem:[#allocation47_spill] sm:$0xff]  ;;  %v11881_v29 = vld [vmem:[#allocation180_spill] sm:$0xff] }
 0x5cf   :  { %3915 = vmatprep.subr.bf16.mxu0 %v11807_v60  ;;  %3956 = vmatprep.subr.bf16.mxu1 %v11808_v23  ;;  %v11817_v23 = vld [vmem:[#allocation48_spill] sm:$0xff]  ;;  %v11826_v60 = vld [vmem:[#allocation57_spill] sm:$0xff] }
 0x5d2   :  { %3916 = vmatpush1.bf16.msra.mxu0 %v11809_v46  ;;  %3957 = vmatpush1.bf16.msra.mxu1 %v11810_v10  ;;  %v11818_v46 = vld [vmem:[#allocation49_spill] sm:$0xff]  ;;  %v11819_v10 = vld [vmem:[#allocation50_spill] sm:$0xff] }
 0x5d3   :  { %3917 = vmatprep.subr.bf16.mxu0 %v11811_v27  ;;  %3958 = vmatprep.subr.bf16.mxu1 %v11812_v22  ;;  %v11820_v27 = vld [vmem:[#allocation51_spill] sm:$0xff]  ;;  %v11821_v22 = vld [vmem:[#allocation52_spill] sm:$0xff] }
 0x5d6   :  { %3918 = vmatpush1.bf16.msra.mxu0 %v11813_v57  ;;  %3959 = vmatpush1.bf16.msra.mxu1 %v11814_v16  ;;  %v11822_v57 = vld [vmem:[#allocation53_spill] sm:$0xff]  ;;  %v11823_v16 = vld [vmem:[#allocation54_spill] sm:$0xff] }
 0x5d7   :  { %4027 = vmatprep.subr.bf16.mxu0 %v11815_v25  ;;  %4068 = vmatprep.subr.bf16.mxu1 %v11816_v35  ;;  %v11824_v25 = vld [vmem:[#allocation55_spill] sm:$0xff]  ;;  %v11825_v35 = vld [vmem:[#allocation56_spill] sm:$0xff] }
 0x5d9   :  { %3920 = vmatmul.mubr.bf16.vlgmr.msra.gmra.mrb[60].mxu0 %v10198_v53  ;;  %3961 = vmatmul.mubr.bf16.vlgmr.msra.gmra.mrb[60].mxu1 %v10198_v53  ;;  %v11827_v53 = vld [vmem:[#allocation58_spill] sm:$0xff] }
 0x5da   :  { %4028 = vmatpush1.bf16.msra.mxu0 %v11817_v23  ;;  %4069 = vmatpush1.bf16.msra.mxu1 %v11818_v46  ;;  %v11828_v23 = vld [vmem:[#allocation59_spill] sm:$0xff]  ;;  %v11829_v46 = vld [vmem:[#allocation60_spill] sm:$0xff] }
 0x5db   :  { %4029 = vmatprep.subr.bf16.mxu0 %v11819_v10  ;;  %4070 = vmatprep.subr.bf16.mxu1 %v11820_v27  ;;  %v11830_v10 = vld [vmem:[#allocation61_spill] sm:$0xff]  ;;  %v11831_v27 = vld [vmem:[#allocation62_spill] sm:$0xff] }
 0x5de   :  { %4030 = vmatpush1.bf16.msra.mxu0 %v11821_v22  ;;  %4071 = vmatpush1.bf16.msra.mxu1 %v11822_v57  ;;  %v11832_v22 = vld [vmem:[#allocation63_spill] sm:$0xff]  ;;  %v11833_v57 = vld [vmem:[#allocation64_spill] sm:$0xff] }
 0x5df   :  { %4031 = vmatprep.subr.bf16.mxu0 %v11823_v16  ;;  %4072 = vmatprep.subr.bf16.mxu1 %v11824_v25  ;;  %v11834_v16 = vld [vmem:[#allocation65_spill] sm:$0xff]  ;;  %v11835_v25 = vld [vmem:[#allocation66_spill] sm:$0xff] }
 0x5e2   :  { %4032 = vmatpush1.bf16.msra.mxu0 %v11825_v35  ;;  %4073 = vmatpush1.bf16.msra.mxu1 %v11826_v60  ;;  %v11836_v35 = vld [vmem:[#allocation67_spill] sm:$0xff]  ;;  %v11837_v60 = vld [vmem:[#allocation68_spill] sm:$0xff] }
 0x5e3   :  { %4033 = vmatprep.subr.bf16.mxu0 %v11827_v53  ;;  %4074 = vmatprep.subr.bf16.mxu1 %v11828_v23  ;;  %v11838_v53 = vld [vmem:[#allocation69_spill] sm:$0xff]  ;;  %v11839_v23 = vld [vmem:[#allocation70_spill] sm:$0xff] }
 0x5e6   :  { %4034 = vmatpush1.bf16.msra.mxu0 %v11829_v46  ;;  %4075 = vmatpush1.bf16.msra.mxu1 %v11830_v10  ;;  %v11840_v46 = vld [vmem:[#allocation71_spill] sm:$0xff]  ;;  %v11841_v10 = vld [vmem:[#allocation72_spill] sm:$0xff] }
 0x5e7   :  { %4035 = vmatprep.subr.bf16.mxu0 %v11831_v27  ;;  %4076 = vmatprep.subr.bf16.mxu1 %v11832_v22  ;;  %v11842_v27 = vld [vmem:[#allocation73_spill] sm:$0xff]  ;;  %v11843_v22 = vld [vmem:[#allocation74_spill] sm:$0xff] }
 0x5ea   :  { %4036 = vmatpush1.bf16.msra.mxu0 %v11833_v57  ;;  %4077 = vmatpush1.bf16.msra.mxu1 %v11834_v16  ;;  %v11844_v57 = vld [vmem:[#allocation75_spill] sm:$0xff]  ;;  %v11845_v16 = vld [vmem:[#allocation76_spill] sm:$0xff] }
 0x5eb   :  { %4037 = vmatprep.subr.bf16.mxu0 %v11835_v25  ;;  %4078 = vmatprep.subr.bf16.mxu1 %v11836_v35  ;;  %v11846_v25 = vld [vmem:[#allocation77_spill] sm:$0xff]  ;;  %v11847_v35 = vld [vmem:[#allocation78_spill] sm:$0xff] }
 0x5ee   :  { %4038 = vmatpush1.bf16.msra.mxu0 %v11837_v60  ;;  %4079 = vmatpush1.bf16.msra.mxu1 %v11838_v53  ;;  %v11848_v60 = vld [vmem:[#allocation79_spill] sm:$0xff]  ;;  %v11849_v53 = vld [vmem:[#allocation80_spill] sm:$0xff] }
 0x5ef   :  { %4039 = vmatprep.subr.bf16.mxu0 %v11839_v23  ;;  %4080 = vmatprep.subr.bf16.mxu1 %v11840_v46  ;;  %v11850_v23 = vld [vmem:[#allocation81_spill] sm:$0xff]  ;;  %v11851_v46 = vld [vmem:[#allocation82_spill] sm:$0xff] }
 0x5f2   :  { %4040 = vmatpush1.bf16.msra.mxu0 %v11841_v10  ;;  %4081 = vmatpush1.bf16.msra.mxu1 %v11842_v27  ;;  %v11852_v10 = vld [vmem:[#allocation83_spill] sm:$0xff]  ;;  %v11853_v27 = vld [vmem:[#allocation84_spill] sm:$0xff] }
 0x5f3   :  { %4041 = vmatprep.subr.bf16.mxu0 %v11843_v22  ;;  %4082 = vmatprep.subr.bf16.mxu1 %v11844_v57  ;;  %v11854_v22 = vld [vmem:[#allocation85_spill] sm:$0xff]  ;;  %v11855_v57 = vld [vmem:[#allocation86_spill] sm:$0xff] }
 0x5f6   :  { %4042 = vmatpush1.bf16.msra.mxu0 %v11845_v16  ;;  %4083 = vmatpush1.bf16.msra.mxu1 %v11846_v25  ;;  %v11856_v16 = vld [vmem:[#allocation87_spill] sm:$0xff]  ;;  %v11857_v25 = vld [vmem:[#allocation88_spill] sm:$0xff] }
 0x5f7   :  { %4043 = vmatprep.subr.bf16.mxu0 %v11847_v35  ;;  %4084 = vmatprep.subr.bf16.mxu1 %v11848_v60  ;;  %v11858_v35 = vld [vmem:[#allocation89_spill] sm:$0xff]  ;;  %v11859_v60 = vld [vmem:[#allocation90_spill] sm:$0xff] }
 0x5fa   :  { %4044 = vmatpush1.bf16.msra.mxu0 %v11849_v53  ;;  %4085 = vmatpush1.bf16.msra.mxu1 %v11850_v23  ;;  %v11860_v53 = vld [vmem:[#allocation91_spill] sm:$0xff]  ;;  %v11861_v23 = vld [vmem:[#allocation92_spill] sm:$0xff] }
 0x5fb   :  { %4045 = vmatprep.subr.bf16.mxu0 %v11851_v46  ;;  %4086 = vmatprep.subr.bf16.mxu1 %v11852_v10  ;;  %v11862_v46 = vld [vmem:[#allocation93_spill] sm:$0xff]  ;;  %v11863_v10 = vld [vmem:[#allocation94_spill] sm:$0xff] }
 0x5fe   :  { %4046 = vmatpush1.bf16.msra.mxu0 %v11853_v27  ;;  %4087 = vmatpush1.bf16.msra.mxu1 %v11854_v22  ;;  %v11864_v27 = vld [vmem:[#allocation95_spill] sm:$0xff]  ;;  %v11865_v22 = vld [vmem:[#allocation96_spill] sm:$0xff] }
 0x5ff   :  { %4047 = vmatprep.subr.bf16.mxu0 %v11855_v57  ;;  %4088 = vmatprep.subr.bf16.mxu1 %v11856_v16  ;;  %v11866_v57 = vld [vmem:[#allocation97_spill] sm:$0xff]  ;;  %v11867_v16 = vld [vmem:[#allocation98_spill] sm:$0xff] }
 0x602   :  { %4048 = vmatpush1.bf16.msra.mxu0 %v11857_v25  ;;  %4089 = vmatpush1.bf16.msra.mxu1 %v11858_v35  ;;  %v11868_v25 = vld [vmem:[#allocation99_spill] sm:$0xff]  ;;  %v11869_v35 = vld [vmem:[#allocation100_spill] sm:$0xff] }
 0x603   :  { %4049 = vmatprep.subr.bf16.mxu0 %v11859_v60  ;;  %4090 = vmatprep.subr.bf16.mxu1 %v11860_v53  ;;  %v11870_v60 = vld [vmem:[#allocation101_spill] sm:$0xff]  ;;  %v11871_v53 = vld [vmem:[#allocation102_spill] sm:$0xff] }
 0x606   :  { %4050 = vmatpush1.bf16.msra.mxu0 %v11861_v23  ;;  %4091 = vmatpush1.bf16.msra.mxu1 %v11862_v46  ;;  %v11872_v23 = vld [vmem:[#allocation103_spill] sm:$0xff]  ;;  %v11873_v46 = vld [vmem:[#allocation104_spill] sm:$0xff] }
 0x607   :  { %4051 = vmatprep.subr.bf16.mxu0 %v11863_v10  ;;  %4092 = vmatprep.subr.bf16.mxu1 %v11864_v27  ;;  %v11874_v10 = vld [vmem:[#allocation105_spill] sm:$0xff]  ;;  %v11875_v27 = vld [vmem:[#allocation106_spill] sm:$0xff] }
 0x60a   :  { %4052 = vmatpush1.bf16.msra.mxu0 %v11865_v22  ;;  %4093 = vmatpush1.bf16.msra.mxu1 %v11866_v57  ;;  %v11876_v22 = vld [vmem:[#allocation107_spill] sm:$0xff]  ;;  %v11877_v57 = vld [vmem:[#allocation108_spill] sm:$0xff] }
 0x60b   :  { %4053 = vmatprep.subr.bf16.mxu0 %v11867_v16  ;;  %4094 = vmatprep.subr.bf16.mxu1 %v11868_v25  ;;  %v11878_v16 = vld [vmem:[#allocation109_spill] sm:$0xff]  ;;  %v11879_v25 = vld [vmem:[#allocation110_spill] sm:$0xff] }
 0x60e   :  { %4054 = vmatpush1.bf16.msra.mxu0 %v11869_v35  ;;  %4095 = vmatpush1.bf16.msra.mxu1 %v11870_v60  ;;  %v11880_v35 = vld [vmem:[#allocation111_spill] sm:$0xff] }
 0x60f   :  { %4055 = vmatprep.subr.bf16.mxu0 %v11871_v53  ;;  %4096 = vmatprep.subr.bf16.mxu1 %v11872_v23 }
 0x612   :  { %4056 = vmatpush1.bf16.msra.mxu0 %v11873_v46  ;;  %4097 = vmatpush1.bf16.msra.mxu1 %v11874_v10 }
 0x613   :  { %4057 = vmatprep.subr.bf16.mxu0 %v11875_v27  ;;  %4098 = vmatprep.subr.bf16.mxu1 %v11876_v22 }
 0x616   :  { %4058 = vmatpush1.bf16.msra.mxu0 %v11877_v57  ;;  %4099 = vmatpush1.bf16.msra.mxu1 %v11878_v16 }
 0x617   :  { %4109 = vmatprep.subr.bf16.mxu0 %v11879_v25  ;;  %4150 = vmatprep.subr.bf16.mxu1 %v11880_v35 }
 0x66c   :  { %v3839_v60 = vpop.f32.mrb[56].mxu0  ;;  %v3880_v53 = vpop.f32.mrb[56].mxu1 }
 0x66d   :  { %v3969_v23 = vadd.f32 %v11881_v29, %v3839_v60  ;;  %v3971_v46 = vadd.f32 %v11882_v2, %v3880_v53  ;;  %v3841_v30 = vpop.f32.mrb[57].mxu0  ;;  %v3882_v10 = vpop.f32.mrb[57].mxu1 }
 0x66e   :  { %v3970_v27 = vadd.f32 %v11883_v36, %v3841_v30  ;;  %v3972_v22 = vadd.f32 %v11884_v32, %v3882_v10  ;;  %v3843_v26 = vpop.f32.mrb[58].mxu0  ;;  %v3884_v57 = vpop.f32.mrb[58].mxu1 }
 0x66f   :  { %v3844_v48 = vpop.f32.mrb[59].mxu0  ;;  %v3885_v16 = vpop.f32.mrb[59].mxu1  ;;  %v7962_v52 = vmul.f32 -1.442695, %v3969_v23  ;;  %v7964_v25 = vmul.f32 -1.442695, %v3971_v46 }
 0x670   :  { %v7963_v59 = vmul.f32 -1.442695, %v3970_v27  ;;  %v7965_v35 = vmul.f32 -1.442695, %v3972_v22  ;;  %v11885_v16 = vld [vmem:[#allocation219_spill] sm:$0xff]  ;;  %v11886_v46 = vld [vmem:[#allocation220_spill] sm:$0xff] }
 0x671   :  { %8333 = vpow2.f32 %v7962_v52  ;;  %v11888_v27 = vld [vmem:[#allocation222_spill] sm:$0xff] }
 0x672   :  { %8335 = vpow2.f32 %v7964_v25 }
 0x673   :  { %8337 = vpow2.f32 %v7963_v59 }
 0x674   :  { %8339 = vpow2.f32 %v7965_v35  ;;  %v11887_v35 = vld [vmem:[#allocation221_spill] sm:$0xff] }
 0x67b   :  { %v8334_v29 = vpop.eup %8333 }
 0x67c   :  { %v8336_v2 = vpop.eup %8335  ;;  %v3995_v39 = vadd.f32 1.0, %v8334_v29 }
 0x67d   :  { %v8338_v60 = vpop.eup %8337  ;;  %v3997_v36 = vadd.f32 1.0, %v8336_v2 }
 0x67e   :  { %v8340_v53 = vpop.eup %8339  ;;  %v3996_v30 = vadd.f32 1.0, %v8338_v60  ;;  %8341 = vrcp.f32 %v3995_v39 }
 0x67f   :  { %v3998_v32 = vadd.f32 1.0, %v8340_v53  ;;  %8343 = vrcp.f32 %v3997_v36 }
 0x680   :  { %8345 = vrcp.f32 %v3996_v30 }
 0x681   :  { %8347 = vrcp.f32 %v3998_v32 }
 0x688   :  { %v8342_v36 = vpop.eup %8341 }
 0x689   :  { %v8344_v30 = vpop.eup %8343 }
 0x6ac   :  { %v3921_v48 = vpop.f32.mrb[60].mxu0  ;;  %v3962_v26 = vpop.f32.mrb[60].mxu1 }
 0x6ad   :  { %v3973_v23 = vadd.f32 %v11885_v16, %v3921_v48  ;;  %v3975_v52 = vadd.f32 %v11886_v46, %v3962_v26  ;;  %v3923_v25 = vpop.f32.mrb[61].mxu0  ;;  %v3964_v59 = vpop.f32.mrb[61].mxu1  ;;  %v4015_v46 = vmul.f32 %v8344_v30, %v10192_v49  ;;  %v11889_v30 = vld [vmem:[#allocation164_spill] sm:$0xff] }
 0x6ae   :  { %v3974_v10 = vadd.f32 %v11887_v35, %v3923_v25  ;;  %v3976_v22 = vadd.f32 %v11888_v27, %v3964_v59  ;;  %v3925_v57 = vpop.f32.mrb[62].mxu0  ;;  %v3966_v29 = vpop.f32.mrb[62].mxu1 }
 0x6af   :  { %v7966_v2 = vmul.f32 -1.442695, %v3973_v23  ;;  %8349 = vtanh.f32 %v3975_v52  ;;  %v3926_v39 = vpop.f32.mrb[63].mxu0  ;;  %v3967_v60 = vpop.f32.mrb[63].mxu1 }
 0x6b0   :  { %v7967_v53 = vmul.f32 -1.442695, %v3974_v10  ;;  %8351 = vtanh.f32 %v3976_v22  ;;  %v8346_v48 = vpop.eup %8345 }
 0x6b1   :  { %8353 = vpow2.f32 %v7966_v2  ;;  %v8348_v26 = vpop.eup %8347 }
 0x6b2   :  { %8355 = vpow2.f32 %v7967_v53  ;;  %v4016_v35 = vmul.f32 %v8348_v26, %v10194_v41  ;;  %v11891_v26 = vld [vmem:[#allocation168_spill] sm:$0xff] }
 0x6b9   :  { %v8350_v16 = vpop.eup %8349 }
 0x6ba   :  { %v8352_v32 = vpop.eup %8351  ;;  %v4017_v25 = vmul.f32 %v8350_v16, %v8342_v36  ;;  %v11892_v16 = vld [vmem:[#allocation170_spill] sm:$0xff] }
 0x6bb   :  { %v8354_v59 = vpop.eup %8353  ;;  %v4018_v23 = vmul.f32 %v8352_v32, %v8346_v48  ;;  %v11890_v48 = vld [vmem:[#allocation165_spill] sm:$0xff]  ;;  %v11893_v32 = vld [vmem:[#allocation171_spill] sm:$0xff] }
 0x6bc   :  { %v8356_v52 = vpop.eup %8355  ;;  %v3999_v27 = vadd.f32 1.0, %v8354_v59  ;;  %v10342_v57 = vadd.f32 %v4017_v25, %v4015_v46  ;;  %v11894_v46 = vld [vmem:[#allocation172_spill] sm:$0xff]  ;;  %v11895_v25 = vld [vmem:[#allocation173_spill] sm:$0xff] }
 0x6bd   :  { %v4000_v10 = vadd.f32 1.0, %v8356_v52  ;;  %v10344_v22 = vadd.f32 %v4018_v23, %v4016_v35  ;;  %v11896_v59 = vld [vmem:[#allocation177_spill] sm:$0xff]  ;;  %v11897_v35 = vld [vmem:[#allocation178_spill] sm:$0xff]  ;;  %v11899_v52 = vld [vmem:[#allocation184_spill] sm:$0xff] }
 0x6be   :  { %8357 = vrcp.f32 %v3999_v27  ;;  %v11898_v23 = vld [vmem:[#allocation181_spill] sm:$0xff]  ;;  %v11900_v27 = vld [vmem:[#allocation186_spill] sm:$0xff] }
 0x6bf   :  { %8359 = vtanh.f32 %v10342_v57 }
 0x6c0   :  { %8361 = vrcp.f32 %v4000_v10  ;;  %v11901_v10 = vld [vmem:[#allocation187_spill] sm:$0xff] }
 0x6c1   :  { %8363 = vtanh.f32 %v10344_v22 }
 0x6c8   :  { %v8358_v29 = vpop.eup %8357 }
 0x6c9   :  { %v8360_v49 = vpop.eup %8359 }
 0x6ca   :  { %v8362_v2 = vpop.eup %8361  ;;  %v4023_v60 = vmul.f32 %v8360_v49, %v8358_v29  ;;  %v11902_v29 = vld [vmem:[#allocation188_spill] sm:$0xff]  ;;  %v11903_v49 = vld [vmem:[#allocation189_spill] sm:$0xff] }
 0x6cb   :  { %v8364_v39 = vpop.eup %8363 }
 0x6cc   :  { %v4024_v41 = vmul.f32 %v8364_v39, %v8362_v2  ;;  %v10348_v36 = vpack.c.bf16 %v4023_v60, %v4023_v60  ;;  %v11904_v2 = vld [vmem:[#allocation193_spill] sm:$0xff]  ;;  %v11905_v39 = vld [vmem:[#allocation194_spill] sm:$0xff] }
 0x6cd   :  { %v11906_v60 = vld [vmem:[#allocation197_spill] sm:$0xff] }
 0x6ce   :  { %v4026_v53 = vpack.c.bf16 %v4024_v41, %v4024_v41  ;;  %v11907_v41 = vld [vmem:[#allocation200_spill] sm:$0xff] }
 0x6d0   :  { %4059 = vmatprep.mubr.bf16.mxu0 %v4026_v53  ;;  %4100 = vmatprep.mubr.bf16.mxu1 %v4026_v53 }
 0x6d1   :  { %4060 = vmatmul.mubr.bf16.vlgmr.msra.gmra.mrb[64].mxu0 %v10348_v36  ;;  %4101 = vmatmul.mubr.bf16.vlgmr.msra.gmra.mrb[64].mxu1 %v10348_v36 }
 0x6d2   :  { %4110 = vmatpush1.bf16.msra.mxu0 %v11595_v11  ;;  %4151 = vmatpush1.bf16.msra.mxu1 %v11596_v34 }
 0x6d3   :  { %4141 = vmatprep.mubr.bf16.mxu0 %v4026_v53  ;;  %4182 = vmatprep.mubr.bf16.mxu1 %v4026_v53  ;;  %v11908_v53 = vld [vmem:[#allocation202_spill] sm:$0xff] }
 0x6d4   :  { %4111 = vmatprep.subr.bf16.mxu0 %v11597_v61  ;;  %4152 = vmatprep.subr.bf16.mxu1 %v11598_v31 }
 0x6d6   :  { %4112 = vmatpush1.bf16.msra.mxu0 %v11599_v21  ;;  %4153 = vmatpush1.bf16.msra.mxu1 %v11600_v33 }
 0x6d7   :  { %4113 = vmatprep.subr.bf16.mxu0 %v11601_v24  ;;  %4154 = vmatprep.subr.bf16.mxu1 %v11602_v12 }
 0x6da   :  { %4114 = vmatpush1.bf16.msra.mxu0 %v11603_v5  ;;  %4155 = vmatpush1.bf16.msra.mxu1 %v11604_v40 }
 0x6db   :  { %4115 = vmatprep.subr.bf16.mxu0 %v11605_v19  ;;  %4156 = vmatprep.subr.bf16.mxu1 %v11606_v4 }
 0x6de   :  { %4116 = vmatpush1.bf16.msra.mxu0 %v11607_v9  ;;  %4157 = vmatpush1.bf16.msra.mxu1 %v11608_v8 }
 0x6df   :  { %4117 = vmatprep.subr.bf16.mxu0 %v11609_v43  ;;  %4158 = vmatprep.subr.bf16.mxu1 %v11610_v42 }
 0x6e2   :  { %4118 = vmatpush1.bf16.msra.mxu0 %v11611_v7  ;;  %4159 = vmatpush1.bf16.msra.mxu1 %v11612_v54 }
 0x6e3   :  { %4119 = vmatprep.subr.bf16.mxu0 %v11699_v28  ;;  %4160 = vmatprep.subr.bf16.mxu1 %v11700_v51 }
 0x6e6   :  { %4120 = vmatpush1.bf16.msra.mxu0 %v11701_v55  ;;  %4161 = vmatpush1.bf16.msra.mxu1 %v11702_v3 }
 0x6e7   :  { %4121 = vmatprep.subr.bf16.mxu0 %v11703_v56  ;;  %4162 = vmatprep.subr.bf16.mxu1 %v11704_v14 }
 0x6ea   :  { %4122 = vmatpush1.bf16.msra.mxu0 %v11705_v15  ;;  %4163 = vmatpush1.bf16.msra.mxu1 %v11706_v45 }
 0x6eb   :  { %4123 = vmatprep.subr.bf16.mxu0 %v11707_v17  ;;  %4164 = vmatprep.subr.bf16.mxu1 %v11794_v18 }
 0x6ee   :  { %4124 = vmatpush1.bf16.msra.mxu0 %v11795_v62  ;;  %4165 = vmatpush1.bf16.msra.mxu1 %v11796_v13 }
 0x6ef   :  { %4125 = vmatprep.subr.bf16.mxu0 %v11711_v47  ;;  %4166 = vmatprep.subr.bf16.mxu1 %v11712_v0 }
 0x6f2   :  { %4126 = vmatpush1.bf16.msra.mxu0 %v11713_v37  ;;  %4167 = vmatpush1.bf16.msra.mxu1 %v11714_v63 }
 0x6f3   :  { %4127 = vmatprep.subr.bf16.mxu0 %v11715_v44  ;;  %4168 = vmatprep.subr.bf16.mxu1 %v11716_v1 }
 0x6f6   :  { %4128 = vmatpush1.bf16.msra.mxu0 %v11717_v38  ;;  %4169 = vmatpush1.bf16.msra.mxu1 %v11718_v58 }
 0x6f7   :  { %4129 = vmatprep.subr.bf16.mxu0 %v11719_v6  ;;  %4170 = vmatprep.subr.bf16.mxu1 %v11720_v50 }
 0x6fa   :  { %4130 = vmatpush1.bf16.msra.mxu0 %v11721_v20  ;;  %4171 = vmatpush1.bf16.msra.mxu1 %v11889_v30 }
 0x6fb   :  { %4131 = vmatprep.subr.bf16.mxu0 %v11890_v48  ;;  %4172 = vmatprep.subr.bf16.mxu1 %v11891_v26 }
 0x6fe   :  { %4132 = vmatpush1.bf16.msra.mxu0 %v11892_v16  ;;  %4173 = vmatpush1.bf16.msra.mxu1 %v11893_v32 }
 0x6ff   :  { %4133 = vmatprep.subr.bf16.mxu0 %v11894_v46  ;;  %4174 = vmatprep.subr.bf16.mxu1 %v11895_v25  ;;  %v11978_v25 = vld [vmem:[#allocation192_spill] sm:$0xff]  ;;  %v11979_v46 = vld [vmem:[#allocation195_spill] sm:$0xff] }
 0x702   :  { %4134 = vmatpush1.bf16.msra.mxu0 %v11896_v59  ;;  %4175 = vmatpush1.bf16.msra.mxu1 %v11897_v35  ;;  %v11977_v35 = vld [vmem:[#allocation191_spill] sm:$0xff] }
 0x703   :  { %4135 = vmatprep.subr.bf16.mxu0 %v11898_v23  ;;  %4176 = vmatprep.subr.bf16.mxu1 %v11899_v52  ;;  %v11909_v23 = vld [vmem:[#allocation203_spill] sm:$0xff]  ;;  %v11910_v52 = vld [vmem:[#allocation46_spill] sm:$0xff] }
 0x706   :  { %4136 = vmatpush1.bf16.msra.mxu0 %v11900_v27  ;;  %4177 = vmatpush1.bf16.msra.mxu1 %v11901_v10  ;;  %v11911_v27 = vld [vmem:[#allocation47_spill] sm:$0xff]  ;;  %v11976_v10 = vld [vmem:[#allocation190_spill] sm:$0xff] }
 0x707   :  { %4137 = vmatprep.subr.bf16.mxu0 %v11902_v29  ;;  %4178 = vmatprep.subr.bf16.mxu1 %v11903_v49  ;;  %v11912_v49 = vld [vmem:[#allocation48_spill] sm:$0xff]  ;;  %v11921_v29 = vld [vmem:[#allocation57_spill] sm:$0xff] }
 0x70a   :  { %4138 = vmatpush1.bf16.msra.mxu0 %v11904_v2  ;;  %4179 = vmatpush1.bf16.msra.mxu1 %v11905_v39  ;;  %v11913_v2 = vld [vmem:[#allocation49_spill] sm:$0xff]  ;;  %v11914_v39 = vld [vmem:[#allocation50_spill] sm:$0xff] }
 0x70b   :  { %4139 = vmatprep.subr.bf16.mxu0 %v11906_v60  ;;  %4180 = vmatprep.subr.bf16.mxu1 %v11907_v41  ;;  %v11915_v60 = vld [vmem:[#allocation51_spill] sm:$0xff]  ;;  %v11916_v41 = vld [vmem:[#allocation52_spill] sm:$0xff] }
 0x70e   :  { %4140 = vmatpush1.bf16.msra.mxu0 %v11908_v53  ;;  %4181 = vmatpush1.bf16.msra.mxu1 %v11909_v23  ;;  %v11917_v53 = vld [vmem:[#allocation53_spill] sm:$0xff]  ;;  %v11918_v23 = vld [vmem:[#allocation54_spill] sm:$0xff] }
 0x70f   :  { %4249 = vmatprep.subr.bf16.mxu0 %v11910_v52  ;;  %4290 = vmatprep.subr.bf16.mxu1 %v11911_v27  ;;  %v11919_v52 = vld [vmem:[#allocation55_spill] sm:$0xff]  ;;  %v11920_v27 = vld [vmem:[#allocation56_spill] sm:$0xff] }
 0x711   :  { %4142 = vmatmul.mubr.bf16.vlgmr.msra.gmra.mrb[68].mxu0 %v10348_v36  ;;  %4183 = vmatmul.mubr.bf16.vlgmr.msra.gmra.mrb[68].mxu1 %v10348_v36  ;;  %v11922_v36 = vld [vmem:[#allocation58_spill] sm:$0xff] }
 0x712   :  { %4250 = vmatpush1.bf16.msra.mxu0 %v11912_v49  ;;  %4291 = vmatpush1.bf16.msra.mxu1 %v11913_v2  ;;  %v11923_v49 = vld [vmem:[#allocation59_spill] sm:$0xff]  ;;  %v11924_v2 = vld [vmem:[#allocation60_spill] sm:$0xff] }
 0x713   :  { %4251 = vmatprep.subr.bf16.mxu0 %v11914_v39  ;;  %4292 = vmatprep.subr.bf16.mxu1 %v11915_v60  ;;  %v11925_v39 = vld [vmem:[#allocation61_spill] sm:$0xff]  ;;  %v11926_v60 = vld [vmem:[#allocation62_spill] sm:$0xff] }
 0x716   :  { %4252 = vmatpush1.bf16.msra.mxu0 %v11916_v41  ;;  %4293 = vmatpush1.bf16.msra.mxu1 %v11917_v53  ;;  %v11927_v41 = vld [vmem:[#allocation63_spill] sm:$0xff]  ;;  %v11928_v53 = vld [vmem:[#allocation64_spill] sm:$0xff] }
 0x717   :  { %4253 = vmatprep.subr.bf16.mxu0 %v11918_v23  ;;  %4294 = vmatprep.subr.bf16.mxu1 %v11919_v52  ;;  %v11929_v23 = vld [vmem:[#allocation65_spill] sm:$0xff]  ;;  %v11930_v52 = vld [vmem:[#allocation66_spill] sm:$0xff] }
 0x71a   :  { %4254 = vmatpush1.bf16.msra.mxu0 %v11920_v27  ;;  %4295 = vmatpush1.bf16.msra.mxu1 %v11921_v29  ;;  %v11931_v27 = vld [vmem:[#allocation67_spill] sm:$0xff]  ;;  %v11932_v29 = vld [vmem:[#allocation68_spill] sm:$0xff] }
 0x71b   :  { %4255 = vmatprep.subr.bf16.mxu0 %v11922_v36  ;;  %4296 = vmatprep.subr.bf16.mxu1 %v11923_v49  ;;  %v11933_v36 = vld [vmem:[#allocation69_spill] sm:$0xff]  ;;  %v11934_v49 = vld [vmem:[#allocation70_spill] sm:$0xff] }
 0x71e   :  { %4256 = vmatpush1.bf16.msra.mxu0 %v11924_v2  ;;  %4297 = vmatpush1.bf16.msra.mxu1 %v11925_v39  ;;  %v11935_v2 = vld [vmem:[#allocation71_spill] sm:$0xff]  ;;  %v11936_v39 = vld [vmem:[#allocation72_spill] sm:$0xff] }
 0x71f   :  { %4257 = vmatprep.subr.bf16.mxu0 %v11926_v60  ;;  %4298 = vmatprep.subr.bf16.mxu1 %v11927_v41  ;;  %v11937_v60 = vld [vmem:[#allocation73_spill] sm:$0xff]  ;;  %v11938_v41 = vld [vmem:[#allocation74_spill] sm:$0xff] }
 0x722   :  { %4258 = vmatpush1.bf16.msra.mxu0 %v11928_v53  ;;  %4299 = vmatpush1.bf16.msra.mxu1 %v11929_v23  ;;  %v11939_v53 = vld [vmem:[#allocation75_spill] sm:$0xff]  ;;  %v11940_v23 = vld [vmem:[#allocation76_spill] sm:$0xff] }
 0x723   :  { %4259 = vmatprep.subr.bf16.mxu0 %v11930_v52  ;;  %4300 = vmatprep.subr.bf16.mxu1 %v11931_v27  ;;  %v11941_v52 = vld [vmem:[#allocation77_spill] sm:$0xff]  ;;  %v11942_v27 = vld [vmem:[#allocation78_spill] sm:$0xff] }
 0x726   :  { %4260 = vmatpush1.bf16.msra.mxu0 %v11932_v29  ;;  %4301 = vmatpush1.bf16.msra.mxu1 %v11933_v36  ;;  %v11943_v29 = vld [vmem:[#allocation79_spill] sm:$0xff]  ;;  %v11944_v36 = vld [vmem:[#allocation80_spill] sm:$0xff] }
 0x727   :  { %4261 = vmatprep.subr.bf16.mxu0 %v11934_v49  ;;  %4302 = vmatprep.subr.bf16.mxu1 %v11935_v2  ;;  %v11945_v49 = vld [vmem:[#allocation81_spill] sm:$0xff]  ;;  %v11946_v2 = vld [vmem:[#allocation82_spill] sm:$0xff] }
 0x72a   :  { %4262 = vmatpush1.bf16.msra.mxu0 %v11936_v39  ;;  %4303 = vmatpush1.bf16.msra.mxu1 %v11937_v60  ;;  %v11947_v39 = vld [vmem:[#allocation83_spill] sm:$0xff]  ;;  %v11948_v60 = vld [vmem:[#allocation84_spill] sm:$0xff] }
 0x72b   :  { %4263 = vmatprep.subr.bf16.mxu0 %v11938_v41  ;;  %4304 = vmatprep.subr.bf16.mxu1 %v11939_v53  ;;  %v11949_v41 = vld [vmem:[#allocation85_spill] sm:$0xff]  ;;  %v11950_v53 = vld [vmem:[#allocation86_spill] sm:$0xff] }
 0x72e   :  { %4264 = vmatpush1.bf16.msra.mxu0 %v11940_v23  ;;  %4305 = vmatpush1.bf16.msra.mxu1 %v11941_v52  ;;  %v11951_v23 = vld [vmem:[#allocation87_spill] sm:$0xff]  ;;  %v11952_v52 = vld [vmem:[#allocation88_spill] sm:$0xff] }
 0x72f   :  { %4265 = vmatprep.subr.bf16.mxu0 %v11942_v27  ;;  %4306 = vmatprep.subr.bf16.mxu1 %v11943_v29  ;;  %v11953_v27 = vld [vmem:[#allocation89_spill] sm:$0xff]  ;;  %v11954_v29 = vld [vmem:[#allocation90_spill] sm:$0xff] }
 0x732   :  { %4266 = vmatpush1.bf16.msra.mxu0 %v11944_v36  ;;  %4307 = vmatpush1.bf16.msra.mxu1 %v11945_v49  ;;  %v11955_v36 = vld [vmem:[#allocation91_spill] sm:$0xff]  ;;  %v11956_v49 = vld [vmem:[#allocation92_spill] sm:$0xff] }
 0x733   :  { %4267 = vmatprep.subr.bf16.mxu0 %v11946_v2  ;;  %4308 = vmatprep.subr.bf16.mxu1 %v11947_v39  ;;  %v11957_v2 = vld [vmem:[#allocation93_spill] sm:$0xff]  ;;  %v11958_v39 = vld [vmem:[#allocation94_spill] sm:$0xff] }
 0x736   :  { %4268 = vmatpush1.bf16.msra.mxu0 %v11948_v60  ;;  %4309 = vmatpush1.bf16.msra.mxu1 %v11949_v41  ;;  %v11959_v60 = vld [vmem:[#allocation95_spill] sm:$0xff]  ;;  %v11960_v41 = vld [vmem:[#allocation96_spill] sm:$0xff] }
 0x737   :  { %4269 = vmatprep.subr.bf16.mxu0 %v11950_v53  ;;  %4310 = vmatprep.subr.bf16.mxu1 %v11951_v23  ;;  %v11961_v53 = vld [vmem:[#allocation97_spill] sm:$0xff]  ;;  %v11962_v23 = vld [vmem:[#allocation98_spill] sm:$0xff] }
 0x73a   :  { %4270 = vmatpush1.bf16.msra.mxu0 %v11952_v52  ;;  %4311 = vmatpush1.bf16.msra.mxu1 %v11953_v27  ;;  %v11963_v52 = vld [vmem:[#allocation99_spill] sm:$0xff]  ;;  %v11964_v27 = vld [vmem:[#allocation100_spill] sm:$0xff] }
 0x73b   :  { %4271 = vmatprep.subr.bf16.mxu0 %v11954_v29  ;;  %4312 = vmatprep.subr.bf16.mxu1 %v11955_v36  ;;  %v11965_v29 = vld [vmem:[#allocation101_spill] sm:$0xff]  ;;  %v11966_v36 = vld [vmem:[#allocation102_spill] sm:$0xff] }
 0x73e   :  { %4272 = vmatpush1.bf16.msra.mxu0 %v11956_v49  ;;  %4313 = vmatpush1.bf16.msra.mxu1 %v11957_v2  ;;  %v11967_v49 = vld [vmem:[#allocation103_spill] sm:$0xff]  ;;  %v11968_v2 = vld [vmem:[#allocation104_spill] sm:$0xff] }
 0x73f   :  { %4273 = vmatprep.subr.bf16.mxu0 %v11958_v39  ;;  %4314 = vmatprep.subr.bf16.mxu1 %v11959_v60  ;;  %v11969_v39 = vld [vmem:[#allocation105_spill] sm:$0xff]  ;;  %v11970_v60 = vld [vmem:[#allocation106_spill] sm:$0xff] }
 0x742   :  { %4274 = vmatpush1.bf16.msra.mxu0 %v11960_v41  ;;  %4315 = vmatpush1.bf16.msra.mxu1 %v11961_v53  ;;  %v11971_v41 = vld [vmem:[#allocation107_spill] sm:$0xff]  ;;  %v11972_v53 = vld [vmem:[#allocation108_spill] sm:$0xff] }
 0x743   :  { %4275 = vmatprep.subr.bf16.mxu0 %v11962_v23  ;;  %4316 = vmatprep.subr.bf16.mxu1 %v11963_v52  ;;  %v11973_v23 = vld [vmem:[#allocation109_spill] sm:$0xff]  ;;  %v11974_v52 = vld [vmem:[#allocation110_spill] sm:$0xff] }
 0x746   :  { %4276 = vmatpush1.bf16.msra.mxu0 %v11964_v27  ;;  %4317 = vmatpush1.bf16.msra.mxu1 %v11965_v29  ;;  %v11975_v27 = vld [vmem:[#allocation111_spill] sm:$0xff] }
 0x747   :  { %4277 = vmatprep.subr.bf16.mxu0 %v11966_v36  ;;  %4318 = vmatprep.subr.bf16.mxu1 %v11967_v49 }
 0x74a   :  { %4278 = vmatpush1.bf16.msra.mxu0 %v11968_v2  ;;  %4319 = vmatpush1.bf16.msra.mxu1 %v11969_v39 }
 0x74b   :  { %4279 = vmatprep.subr.bf16.mxu0 %v11970_v60  ;;  %4320 = vmatprep.subr.bf16.mxu1 %v11971_v41 }
 0x74e   :  { %4280 = vmatpush1.bf16.msra.mxu0 %v11972_v53  ;;  %4321 = vmatpush1.bf16.msra.mxu1 %v11973_v23 }
 0x74f   :  { %4331 = vmatprep.subr.bf16.mxu0 %v11974_v52  ;;  %4372 = vmatprep.subr.bf16.mxu1 %v11975_v27 }
 0x7a4   :  { %v4061_v29 = vpop.f32.mrb[64].mxu0  ;;  %v4102_v36 = vpop.f32.mrb[64].mxu1 }
 0x7a5   :  { %v4191_v49 = vadd.f32 %v11976_v10, %v4061_v29  ;;  %v4193_v2 = vadd.f32 %v11977_v35, %v4102_v36  ;;  %v4063_v59 = vpop.f32.mrb[65].mxu0  ;;  %v4104_v39 = vpop.f32.mrb[65].mxu1 }
 0x7a6   :  { %v4192_v60 = vadd.f32 %v11978_v25, %v4063_v59  ;;  %v4194_v41 = vadd.f32 %v11979_v46, %v4104_v39  ;;  %v4065_v32 = vpop.f32.mrb[66].mxu0  ;;  %v4106_v53 = vpop.f32.mrb[66].mxu1 }
 0x7a7   :  { %v4066_v16 = vpop.f32.mrb[67].mxu0  ;;  %v4107_v23 = vpop.f32.mrb[67].mxu1  ;;  %v7968_v26 = vmul.f32 -1.442695, %v4191_v49  ;;  %v7970_v52 = vmul.f32 -1.442695, %v4193_v2 }
 0x7a8   :  { %v7969_v48 = vmul.f32 -1.442695, %v4192_v60  ;;  %v7971_v27 = vmul.f32 -1.442695, %v4194_v41  ;;  %v11980_v23 = vld [vmem:[#allocation223_spill] sm:$0xff]  ;;  %v11981_v2 = vld [vmem:[#allocation224_spill] sm:$0xff] }
 0x7a9   :  { %8365 = vpow2.f32 %v7968_v26  ;;  %v11983_v60 = vld [vmem:[#allocation226_spill] sm:$0xff] }
 0x7aa   :  { %8367 = vpow2.f32 %v7970_v52 }
 0x7ab   :  { %8369 = vpow2.f32 %v7969_v48 }
 0x7ac   :  { %8371 = vpow2.f32 %v7971_v27  ;;  %v11982_v27 = vld [vmem:[#allocation225_spill] sm:$0xff] }
 0x7b3   :  { %v8366_v10 = vpop.eup %8365 }
 0x7b4   :  { %v8368_v35 = vpop.eup %8367  ;;  %v4217_v30 = vadd.f32 1.0, %v8366_v10 }
 0x7b5   :  { %v8370_v29 = vpop.eup %8369  ;;  %v4219_v25 = vadd.f32 1.0, %v8368_v35 }
 0x7b6   :  { %v8372_v36 = vpop.eup %8371  ;;  %v4218_v59 = vadd.f32 1.0, %v8370_v29  ;;  %8373 = vrcp.f32 %v4217_v30 }
 0x7b7   :  { %v4220_v46 = vadd.f32 1.0, %v8372_v36  ;;  %8375 = vrcp.f32 %v4219_v25 }
 0x7b8   :  { %8377 = vrcp.f32 %v4218_v59 }
 0x7b9   :  { %8379 = vrcp.f32 %v4220_v46 }
 0x7c0   :  { %v8374_v25 = vpop.eup %8373 }
 0x7c1   :  { %v8376_v59 = vpop.eup %8375 }
 0x7e4   :  { %v4143_v16 = vpop.f32.mrb[68].mxu0  ;;  %v4184_v32 = vpop.f32.mrb[68].mxu1 }
 0x7e5   :  { %v4195_v49 = vadd.f32 %v11980_v23, %v4143_v16  ;;  %v4197_v26 = vadd.f32 %v11981_v2, %v4184_v32  ;;  %v4145_v52 = vpop.f32.mrb[69].mxu0  ;;  %v4186_v48 = vpop.f32.mrb[69].mxu1  ;;  %v4237_v2 = vmul.f32 %v8376_v59, %v10342_v57  ;;  %v11984_v59 = vld [vmem:[#allocation164_spill] sm:$0xff] }
 0x7e6   :  { %v4196_v39 = vadd.f32 %v11982_v27, %v4145_v52  ;;  %v4198_v41 = vadd.f32 %v11983_v60, %v4186_v48  ;;  %v4147_v53 = vpop.f32.mrb[70].mxu0  ;;  %v4188_v10 = vpop.f32.mrb[70].mxu1 }
 0x7e7   :  { %v7972_v35 = vmul.f32 -1.442695, %v4195_v49  ;;  %8381 = vtanh.f32 %v4197_v26  ;;  %v4148_v30 = vpop.f32.mrb[71].mxu0  ;;  %v4189_v29 = vpop.f32.mrb[71].mxu1 }
 0x7e8   :  { %v7973_v36 = vmul.f32 -1.442695, %v4196_v39  ;;  %8383 = vtanh.f32 %v4198_v41  ;;  %v8378_v16 = vpop.eup %8377 }
 0x7e9   :  { %8385 = vpow2.f32 %v7972_v35  ;;  %v8380_v32 = vpop.eup %8379 }
 0x7ea   :  { %8387 = vpow2.f32 %v7973_v36  ;;  %v4238_v27 = vmul.f32 %v8380_v32, %v10344_v22  ;;  %v11986_v32 = vld [vmem:[#allocation168_spill] sm:$0xff] }
 0x7f1   :  { %v8382_v23 = vpop.eup %8381 }
 0x7f2   :  { %v8384_v46 = vpop.eup %8383  ;;  %v4239_v52 = vmul.f32 %v8382_v23, %v8374_v25  ;;  %v11987_v23 = vld [vmem:[#allocation170_spill] sm:$0xff] }
 0x7f3   :  { %v8386_v48 = vpop.eup %8385  ;;  %v4240_v49 = vmul.f32 %v8384_v46, %v8378_v16  ;;  %v11985_v16 = vld [vmem:[#allocation165_spill] sm:$0xff]  ;;  %v11988_v46 = vld [vmem:[#allocation171_spill] sm:$0xff] }
 0x7f4   :  { %v8388_v26 = vpop.eup %8387  ;;  %v4221_v60 = vadd.f32 1.0, %v8386_v48  ;;  %v10492_v53 = vadd.f32 %v4239_v52, %v4237_v2  ;;  %v11989_v2 = vld [vmem:[#allocation172_spill] sm:$0xff]  ;;  %v11990_v52 = vld [vmem:[#allocation173_spill] sm:$0xff] }
 0x7f5   :  { %v4222_v39 = vadd.f32 1.0, %v8388_v26  ;;  %v10494_v41 = vadd.f32 %v4240_v49, %v4238_v27  ;;  %v11991_v48 = vld [vmem:[#allocation177_spill] sm:$0xff]  ;;  %v11992_v27 = vld [vmem:[#allocation178_spill] sm:$0xff]  ;;  %v11994_v26 = vld [vmem:[#allocation184_spill] sm:$0xff] }
 0x7f6   :  { %8389 = vrcp.f32 %v4221_v60  ;;  %v11993_v49 = vld [vmem:[#allocation181_spill] sm:$0xff]  ;;  %v11995_v60 = vld [vmem:[#allocation186_spill] sm:$0xff] }
 0x7f7   :  { %8391 = vtanh.f32 %v10492_v53 }
 0x7f8   :  { %8393 = vrcp.f32 %v4222_v39  ;;  %v11996_v39 = vld [vmem:[#allocation187_spill] sm:$0xff] }
 0x7f9   :  { %8395 = vtanh.f32 %v10494_v41 }
 0x800   :  { %v8390_v10 = vpop.eup %8389 }
 0x801   :  { %v8392_v57 = vpop.eup %8391 }
 0x802   :  { %v8394_v35 = vpop.eup %8393  ;;  %v4245_v29 = vmul.f32 %v8392_v57, %v8390_v10  ;;  %v11997_v10 = vld [vmem:[#allocation188_spill] sm:$0xff]  ;;  %v11998_v57 = vld [vmem:[#allocation189_spill] sm:$0xff] }
 0x803   :  { %v8396_v30 = vpop.eup %8395 }
 0x804   :  { %v4246_v22 = vmul.f32 %v8396_v30, %v8394_v35  ;;  %v10498_v25 = vpack.c.bf16 %v4245_v29, %v4245_v29  ;;  %v11999_v35 = vld [vmem:[#allocation193_spill] sm:$0xff]  ;;  %v12000_v30 = vld [vmem:[#allocation194_spill] sm:$0xff] }
 0x805   :  { %v12001_v29 = vld [vmem:[#allocation197_spill] sm:$0xff] }
 0x806   :  { %v4248_v36 = vpack.c.bf16 %v4246_v22, %v4246_v22  ;;  %v12002_v22 = vld [vmem:[#allocation200_spill] sm:$0xff] }
 0x808   :  { %4281 = vmatprep.mubr.bf16.mxu0 %v4248_v36  ;;  %4322 = vmatprep.mubr.bf16.mxu1 %v4248_v36 }
 0x809   :  { %4282 = vmatmul.mubr.bf16.vlgmr.msra.gmra.mrb[72].mxu0 %v10498_v25  ;;  %4323 = vmatmul.mubr.bf16.vlgmr.msra.gmra.mrb[72].mxu1 %v10498_v25 }
 0x80a   :  { %4332 = vmatpush1.bf16.msra.mxu0 %v11595_v11  ;;  %4373 = vmatpush1.bf16.msra.mxu1 %v11596_v34 }
 0x80b   :  { %4363 = vmatprep.mubr.bf16.mxu0 %v4248_v36  ;;  %4404 = vmatprep.mubr.bf16.mxu1 %v4248_v36  ;;  %v12003_v36 = vld [vmem:[#allocation202_spill] sm:$0xff] }
 0x80c   :  { %4333 = vmatprep.subr.bf16.mxu0 %v11597_v61  ;;  %4374 = vmatprep.subr.bf16.mxu1 %v11598_v31 }
 0x80e   :  { %4334 = vmatpush1.bf16.msra.mxu0 %v11599_v21  ;;  %4375 = vmatpush1.bf16.msra.mxu1 %v11600_v33 }
 0x80f   :  { %4335 = vmatprep.subr.bf16.mxu0 %v11601_v24  ;;  %4376 = vmatprep.subr.bf16.mxu1 %v11602_v12 }
 0x812   :  { %4336 = vmatpush1.bf16.msra.mxu0 %v11603_v5  ;;  %4377 = vmatpush1.bf16.msra.mxu1 %v11604_v40 }
 0x813   :  { %4337 = vmatprep.subr.bf16.mxu0 %v11605_v19  ;;  %4378 = vmatprep.subr.bf16.mxu1 %v11606_v4 }
 0x816   :  { %4338 = vmatpush1.bf16.msra.mxu0 %v11607_v9  ;;  %4379 = vmatpush1.bf16.msra.mxu1 %v11608_v8 }
 0x817   :  { %4339 = vmatprep.subr.bf16.mxu0 %v11609_v43  ;;  %4380 = vmatprep.subr.bf16.mxu1 %v11610_v42 }
 0x81a   :  { %4340 = vmatpush1.bf16.msra.mxu0 %v11611_v7  ;;  %4381 = vmatpush1.bf16.msra.mxu1 %v11612_v54 }
 0x81b   :  { %4341 = vmatprep.subr.bf16.mxu0 %v11699_v28  ;;  %4382 = vmatprep.subr.bf16.mxu1 %v11700_v51 }
 0x81e   :  { %4342 = vmatpush1.bf16.msra.mxu0 %v11701_v55  ;;  %4383 = vmatpush1.bf16.msra.mxu1 %v11702_v3 }
 0x81f   :  { %4343 = vmatprep.subr.bf16.mxu0 %v11703_v56  ;;  %4384 = vmatprep.subr.bf16.mxu1 %v11704_v14 }
 0x822   :  { %4344 = vmatpush1.bf16.msra.mxu0 %v11705_v15  ;;  %4385 = vmatpush1.bf16.msra.mxu1 %v11706_v45 }
 0x823   :  { %4345 = vmatprep.subr.bf16.mxu0 %v11707_v17  ;;  %4386 = vmatprep.subr.bf16.mxu1 %v11794_v18 }
 0x826   :  { %4346 = vmatpush1.bf16.msra.mxu0 %v11795_v62  ;;  %4387 = vmatpush1.bf16.msra.mxu1 %v11796_v13 }
 0x827   :  { %4347 = vmatprep.subr.bf16.mxu0 %v11711_v47  ;;  %4388 = vmatprep.subr.bf16.mxu1 %v11712_v0 }
 0x82a   :  { %4348 = vmatpush1.bf16.msra.mxu0 %v11713_v37  ;;  %4389 = vmatpush1.bf16.msra.mxu1 %v11714_v63 }
 0x82b   :  { %4349 = vmatprep.subr.bf16.mxu0 %v11715_v44  ;;  %4390 = vmatprep.subr.bf16.mxu1 %v11716_v1 }
 0x82e   :  { %4350 = vmatpush1.bf16.msra.mxu0 %v11717_v38  ;;  %4391 = vmatpush1.bf16.msra.mxu1 %v11718_v58 }
 0x82f   :  { %4351 = vmatprep.subr.bf16.mxu0 %v11719_v6  ;;  %4392 = vmatprep.subr.bf16.mxu1 %v11720_v50 }
 0x832   :  { %4352 = vmatpush1.bf16.msra.mxu0 %v11721_v20  ;;  %4393 = vmatpush1.bf16.msra.mxu1 %v11984_v59 }
 0x833   :  { %4353 = vmatprep.subr.bf16.mxu0 %v11985_v16  ;;  %4394 = vmatprep.subr.bf16.mxu1 %v11986_v32 }
 0x836   :  { %4354 = vmatpush1.bf16.msra.mxu0 %v11987_v23  ;;  %4395 = vmatpush1.bf16.msra.mxu1 %v11988_v46 }
 0x837   :  { %4355 = vmatprep.subr.bf16.mxu0 %v11989_v2  ;;  %4396 = vmatprep.subr.bf16.mxu1 %v11990_v52  ;;  %v12073_v52 = vld [vmem:[#allocation199_spill] sm:$0xff]  ;;  %v12074_v2 = vld [vmem:[#allocation201_spill] sm:$0xff] }
 0x83a   :  { %4356 = vmatpush1.bf16.msra.mxu0 %v11991_v48  ;;  %4397 = vmatpush1.bf16.msra.mxu1 %v11992_v27  ;;  %v12072_v27 = vld [vmem:[#allocation198_spill] sm:$0xff] }
 0x83b   :  { %4357 = vmatprep.subr.bf16.mxu0 %v11993_v49  ;;  %4398 = vmatprep.subr.bf16.mxu1 %v11994_v26  ;;  %v12004_v49 = vld [vmem:[#allocation203_spill] sm:$0xff]  ;;  %v12005_v26 = vld [vmem:[#allocation46_spill] sm:$0xff] }
 0x83e   :  { %4358 = vmatpush1.bf16.msra.mxu0 %v11995_v60  ;;  %4399 = vmatpush1.bf16.msra.mxu1 %v11996_v39  ;;  %v12006_v60 = vld [vmem:[#allocation47_spill] sm:$0xff]  ;;  %v12071_v39 = vld [vmem:[#allocation196_spill] sm:$0xff] }
 0x83f   :  { %4359 = vmatprep.subr.bf16.mxu0 %v11997_v10  ;;  %4400 = vmatprep.subr.bf16.mxu1 %v11998_v57  ;;  %v12007_v57 = vld [vmem:[#allocation48_spill] sm:$0xff]  ;;  %v12016_v10 = vld [vmem:[#allocation57_spill] sm:$0xff] }
 0x842   :  { %4360 = vmatpush1.bf16.msra.mxu0 %v11999_v35  ;;  %4401 = vmatpush1.bf16.msra.mxu1 %v12000_v30  ;;  %v12008_v35 = vld [vmem:[#allocation49_spill] sm:$0xff]  ;;  %v12009_v30 = vld [vmem:[#allocation50_spill] sm:$0xff] }
 0x843   :  { %4361 = vmatprep.subr.bf16.mxu0 %v12001_v29  ;;  %4402 = vmatprep.subr.bf16.mxu1 %v12002_v22  ;;  %v12010_v29 = vld [vmem:[#allocation51_spill] sm:$0xff]  ;;  %v12011_v22 = vld [vmem:[#allocation52_spill] sm:$0xff] }
 0x846   :  { %4362 = vmatpush1.bf16.msra.mxu0 %v12003_v36  ;;  %4403 = vmatpush1.bf16.msra.mxu1 %v12004_v49  ;;  %v12012_v36 = vld [vmem:[#allocation53_spill] sm:$0xff]  ;;  %v12013_v49 = vld [vmem:[#allocation54_spill] sm:$0xff] }
 0x847   :  { %4471 = vmatprep.subr.bf16.mxu0 %v12005_v26  ;;  %4512 = vmatprep.subr.bf16.mxu1 %v12006_v60  ;;  %v12014_v26 = vld [vmem:[#allocation55_spill] sm:$0xff]  ;;  %v12015_v60 = vld [vmem:[#allocation56_spill] sm:$0xff] }
 0x849   :  { %4364 = vmatmul.mubr.bf16.vlgmr.msra.gmra.mrb[76].mxu0 %v10498_v25  ;;  %4405 = vmatmul.mubr.bf16.vlgmr.msra.gmra.mrb[76].mxu1 %v10498_v25  ;;  %v12017_v25 = vld [vmem:[#allocation58_spill] sm:$0xff] }
 0x84a   :  { %4472 = vmatpush1.bf16.msra.mxu0 %v12007_v57  ;;  %4513 = vmatpush1.bf16.msra.mxu1 %v12008_v35  ;;  %v12018_v57 = vld [vmem:[#allocation59_spill] sm:$0xff]  ;;  %v12019_v35 = vld [vmem:[#allocation60_spill] sm:$0xff] }
 0x84b   :  { %4473 = vmatprep.subr.bf16.mxu0 %v12009_v30  ;;  %4514 = vmatprep.subr.bf16.mxu1 %v12010_v29  ;;  %v12020_v30 = vld [vmem:[#allocation61_spill] sm:$0xff]  ;;  %v12021_v29 = vld [vmem:[#allocation62_spill] sm:$0xff] }
 0x84e   :  { %4474 = vmatpush1.bf16.msra.mxu0 %v12011_v22  ;;  %4515 = vmatpush1.bf16.msra.mxu1 %v12012_v36  ;;  %v12022_v22 = vld [vmem:[#allocation63_spill] sm:$0xff]  ;;  %v12023_v36 = vld [vmem:[#allocation64_spill] sm:$0xff] }
 0x84f   :  { %4475 = vmatprep.subr.bf16.mxu0 %v12013_v49  ;;  %4516 = vmatprep.subr.bf16.mxu1 %v12014_v26  ;;  %v12024_v49 = vld [vmem:[#allocation65_spill] sm:$0xff]  ;;  %v12025_v26 = vld [vmem:[#allocation66_spill] sm:$0xff] }
 0x852   :  { %4476 = vmatpush1.bf16.msra.mxu0 %v12015_v60  ;;  %4517 = vmatpush1.bf16.msra.mxu1 %v12016_v10  ;;  %v12026_v60 = vld [vmem:[#allocation67_spill] sm:$0xff]  ;;  %v12027_v10 = vld [vmem:[#allocation68_spill] sm:$0xff] }
 0x853   :  { %4477 = vmatprep.subr.bf16.mxu0 %v12017_v25  ;;  %4518 = vmatprep.subr.bf16.mxu1 %v12018_v57  ;;  %v12028_v25 = vld [vmem:[#allocation69_spill] sm:$0xff]  ;;  %v12029_v57 = vld [vmem:[#allocation70_spill] sm:$0xff] }
 0x856   :  { %4478 = vmatpush1.bf16.msra.mxu0 %v12019_v35  ;;  %4519 = vmatpush1.bf16.msra.mxu1 %v12020_v30  ;;  %v12030_v35 = vld [vmem:[#allocation71_spill] sm:$0xff]  ;;  %v12031_v30 = vld [vmem:[#allocation72_spill] sm:$0xff] }
 0x857   :  { %4479 = vmatprep.subr.bf16.mxu0 %v12021_v29  ;;  %4520 = vmatprep.subr.bf16.mxu1 %v12022_v22  ;;  %v12032_v29 = vld [vmem:[#allocation73_spill] sm:$0xff]  ;;  %v12033_v22 = vld [vmem:[#allocation74_spill] sm:$0xff] }
 0x85a   :  { %4480 = vmatpush1.bf16.msra.mxu0 %v12023_v36  ;;  %4521 = vmatpush1.bf16.msra.mxu1 %v12024_v49  ;;  %v12034_v36 = vld [vmem:[#allocation75_spill] sm:$0xff]  ;;  %v12035_v49 = vld [vmem:[#allocation76_spill] sm:$0xff] }
 0x85b   :  { %4481 = vmatprep.subr.bf16.mxu0 %v12025_v26  ;;  %4522 = vmatprep.subr.bf16.mxu1 %v12026_v60  ;;  %v12036_v26 = vld [vmem:[#allocation77_spill] sm:$0xff]  ;;  %v12037_v60 = vld [vmem:[#allocation78_spill] sm:$0xff] }
 0x85e   :  { %4482 = vmatpush1.bf16.msra.mxu0 %v12027_v10  ;;  %4523 = vmatpush1.bf16.msra.mxu1 %v12028_v25  ;;  %v12038_v10 = vld [vmem:[#allocation79_spill] sm:$0xff]  ;;  %v12039_v25 = vld [vmem:[#allocation80_spill] sm:$0xff] }
 0x85f   :  { %4483 = vmatprep.subr.bf16.mxu0 %v12029_v57  ;;  %4524 = vmatprep.subr.bf16.mxu1 %v12030_v35  ;;  %v12040_v57 = vld [vmem:[#allocation81_spill] sm:$0xff]  ;;  %v12041_v35 = vld [vmem:[#allocation82_spill] sm:$0xff] }
 0x862   :  { %4484 = vmatpush1.bf16.msra.mxu0 %v12031_v30  ;;  %4525 = vmatpush1.bf16.msra.mxu1 %v12032_v29  ;;  %v12042_v30 = vld [vmem:[#allocation83_spill] sm:$0xff]  ;;  %v12043_v29 = vld [vmem:[#allocation84_spill] sm:$0xff] }
 0x863   :  { %4485 = vmatprep.subr.bf16.mxu0 %v12033_v22  ;;  %4526 = vmatprep.subr.bf16.mxu1 %v12034_v36  ;;  %v12044_v22 = vld [vmem:[#allocation85_spill] sm:$0xff]  ;;  %v12045_v36 = vld [vmem:[#allocation86_spill] sm:$0xff] }
 0x866   :  { %4486 = vmatpush1.bf16.msra.mxu0 %v12035_v49  ;;  %4527 = vmatpush1.bf16.msra.mxu1 %v12036_v26  ;;  %v12046_v49 = vld [vmem:[#allocation87_spill] sm:$0xff]  ;;  %v12047_v26 = vld [vmem:[#allocation88_spill] sm:$0xff] }
 0x867   :  { %4487 = vmatprep.subr.bf16.mxu0 %v12037_v60  ;;  %4528 = vmatprep.subr.bf16.mxu1 %v12038_v10  ;;  %v12048_v60 = vld [vmem:[#allocation89_spill] sm:$0xff]  ;;  %v12049_v10 = vld [vmem:[#allocation90_spill] sm:$0xff] }
 0x86a   :  { %4488 = vmatpush1.bf16.msra.mxu0 %v12039_v25  ;;  %4529 = vmatpush1.bf16.msra.mxu1 %v12040_v57  ;;  %v12050_v25 = vld [vmem:[#allocation91_spill] sm:$0xff]  ;;  %v12051_v57 = vld [vmem:[#allocation92_spill] sm:$0xff] }
 0x86b   :  { %4489 = vmatprep.subr.bf16.mxu0 %v12041_v35  ;;  %4530 = vmatprep.subr.bf16.mxu1 %v12042_v30  ;;  %v12052_v35 = vld [vmem:[#allocation93_spill] sm:$0xff]  ;;  %v12053_v30 = vld [vmem:[#allocation94_spill] sm:$0xff] }
 0x86e   :  { %4490 = vmatpush1.bf16.msra.mxu0 %v12043_v29  ;;  %4531 = vmatpush1.bf16.msra.mxu1 %v12044_v22  ;;  %v12054_v29 = vld [vmem:[#allocation95_spill] sm:$0xff]  ;;  %v12055_v22 = vld [vmem:[#allocation96_spill] sm:$0xff] }
 0x86f   :  { %4491 = vmatprep.subr.bf16.mxu0 %v12045_v36  ;;  %4532 = vmatprep.subr.bf16.mxu1 %v12046_v49  ;;  %v12056_v36 = vld [vmem:[#allocation97_spill] sm:$0xff]  ;;  %v12057_v49 = vld [vmem:[#allocation98_spill] sm:$0xff] }
 0x872   :  { %4492 = vmatpush1.bf16.msra.mxu0 %v12047_v26  ;;  %4533 = vmatpush1.bf16.msra.mxu1 %v12048_v60  ;;  %v12058_v26 = vld [vmem:[#allocation99_spill] sm:$0xff]  ;;  %v12059_v60 = vld [vmem:[#allocation100_spill] sm:$0xff] }
 0x873   :  { %4493 = vmatprep.subr.bf16.mxu0 %v12049_v10  ;;  %4534 = vmatprep.subr.bf16.mxu1 %v12050_v25  ;;  %v12060_v10 = vld [vmem:[#allocation101_spill] sm:$0xff]  ;;  %v12061_v25 = vld [vmem:[#allocation102_spill] sm:$0xff] }
 0x876   :  { %4494 = vmatpush1.bf16.msra.mxu0 %v12051_v57  ;;  %4535 = vmatpush1.bf16.msra.mxu1 %v12052_v35  ;;  %v12062_v57 = vld [vmem:[#allocation103_spill] sm:$0xff]  ;;  %v12063_v35 = vld [vmem:[#allocation104_spill] sm:$0xff] }
 0x877   :  { %4495 = vmatprep.subr.bf16.mxu0 %v12053_v30  ;;  %4536 = vmatprep.subr.bf16.mxu1 %v12054_v29  ;;  %v12064_v30 = vld [vmem:[#allocation105_spill] sm:$0xff]  ;;  %v12065_v29 = vld [vmem:[#allocation106_spill] sm:$0xff] }
 0x87a   :  { %4496 = vmatpush1.bf16.msra.mxu0 %v12055_v22  ;;  %4537 = vmatpush1.bf16.msra.mxu1 %v12056_v36  ;;  %v12066_v22 = vld [vmem:[#allocation107_spill] sm:$0xff]  ;;  %v12067_v36 = vld [vmem:[#allocation108_spill] sm:$0xff] }
 0x87b   :  { %4497 = vmatprep.subr.bf16.mxu0 %v12057_v49  ;;  %4538 = vmatprep.subr.bf16.mxu1 %v12058_v26  ;;  %v12068_v49 = vld [vmem:[#allocation109_spill] sm:$0xff]  ;;  %v12069_v26 = vld [vmem:[#allocation110_spill] sm:$0xff] }
 0x87e   :  { %4498 = vmatpush1.bf16.msra.mxu0 %v12059_v60  ;;  %4539 = vmatpush1.bf16.msra.mxu1 %v12060_v10  ;;  %v12070_v60 = vld [vmem:[#allocation111_spill] sm:$0xff] }
 0x87f   :  { %4499 = vmatprep.subr.bf16.mxu0 %v12061_v25  ;;  %4540 = vmatprep.subr.bf16.mxu1 %v12062_v57 }
 0x882   :  { %4500 = vmatpush1.bf16.msra.mxu0 %v12063_v35  ;;  %4541 = vmatpush1.bf16.msra.mxu1 %v12064_v30 }
 0x883   :  { %4501 = vmatprep.subr.bf16.mxu0 %v12065_v29  ;;  %4542 = vmatprep.subr.bf16.mxu1 %v12066_v22 }
 0x886   :  { %4502 = vmatpush1.bf16.msra.mxu0 %v12067_v36  ;;  %4543 = vmatpush1.bf16.msra.mxu1 %v12068_v49 }
 0x887   :  { %4553 = vmatprep.subr.bf16.mxu0 %v12069_v26  ;;  %4594 = vmatprep.subr.bf16.mxu1 %v12070_v60 }
 0x8dc   :  { %v4283_v10 = vpop.f32.mrb[72].mxu0  ;;  %v4324_v25 = vpop.f32.mrb[72].mxu1 }
 0x8dd   :  { %v4413_v57 = vadd.f32 %v12071_v39, %v4283_v10  ;;  %v4415_v35 = vadd.f32 %v12072_v27, %v4324_v25  ;;  %v4285_v48 = vpop.f32.mrb[73].mxu0  ;;  %v4326_v30 = vpop.f32.mrb[73].mxu1 }
 0x8de   :  { %v4414_v29 = vadd.f32 %v12073_v52, %v4285_v48  ;;  %v4416_v22 = vadd.f32 %v12074_v2, %v4326_v30  ;;  %v4287_v46 = vpop.f32.mrb[74].mxu0  ;;  %v4328_v36 = vpop.f32.mrb[74].mxu1 }
 0x8df   :  { %v4288_v23 = vpop.f32.mrb[75].mxu0  ;;  %v4329_v49 = vpop.f32.mrb[75].mxu1  ;;  %v7974_v32 = vmul.f32 -1.442695, %v4413_v57  ;;  %v7976_v26 = vmul.f32 -1.442695, %v4415_v35 }
 0x8e0   :  { %v7975_v16 = vmul.f32 -1.442695, %v4414_v29  ;;  %v7977_v60 = vmul.f32 -1.442695, %v4416_v22  ;;  %v12075_v49 = vld [vmem:[#allocation227_spill] sm:$0xff]  ;;  %v12076_v35 = vld [vmem:[#allocation228_spill] sm:$0xff] }
 0x8e1   :  { %8397 = vpow2.f32 %v7974_v32  ;;  %v12078_v29 = vld [vmem:[#allocation230_spill] sm:$0xff] }
 0x8e2   :  { %8399 = vpow2.f32 %v7976_v26 }
 0x8e3   :  { %8401 = vpow2.f32 %v7975_v16 }
 0x8e4   :  { %8403 = vpow2.f32 %v7977_v60  ;;  %v12077_v60 = vld [vmem:[#allocation229_spill] sm:$0xff] }
 0x8eb   :  { %v8398_v39 = vpop.eup %8397 }
 0x8ec   :  { %v8400_v27 = vpop.eup %8399  ;;  %v4439_v59 = vadd.f32 1.0, %v8398_v39 }
 0x8ed   :  { %v8402_v10 = vpop.eup %8401  ;;  %v4441_v52 = vadd.f32 1.0, %v8400_v27 }
 0x8ee   :  { %v8404_v25 = vpop.eup %8403  ;;  %v4440_v48 = vadd.f32 1.0, %v8402_v10  ;;  %8405 = vrcp.f32 %v4439_v59 }
 0x8ef   :  { %v4442_v2 = vadd.f32 1.0, %v8404_v25  ;;  %8407 = vrcp.f32 %v4441_v52 }
 0x8f0   :  { %8409 = vrcp.f32 %v4440_v48 }
 0x8f1   :  { %8411 = vrcp.f32 %v4442_v2 }
 0x8f8   :  { %v8406_v52 = vpop.eup %8405 }
 0x8f9   :  { %v8408_v48 = vpop.eup %8407 }
 0x91c   :  { %v4365_v23 = vpop.f32.mrb[76].mxu0  ;;  %v4406_v46 = vpop.f32.mrb[76].mxu1 }
 0x91d   :  { %v4417_v57 = vadd.f32 %v12075_v49, %v4365_v23  ;;  %v4419_v32 = vadd.f32 %v12076_v35, %v4406_v46  ;;  %v4367_v26 = vpop.f32.mrb[77].mxu0  ;;  %v4408_v16 = vpop.f32.mrb[77].mxu1  ;;  %v4459_v35 = vmul.f32 %v8408_v48, %v10492_v53  ;;  %v12079_v48 = vld [vmem:[#allocation164_spill] sm:$0xff] }
 0x91e   :  { %v4418_v30 = vadd.f32 %v12077_v60, %v4367_v26  ;;  %v4420_v22 = vadd.f32 %v12078_v29, %v4408_v16  ;;  %v4369_v36 = vpop.f32.mrb[78].mxu0  ;;  %v4410_v39 = vpop.f32.mrb[78].mxu1 }
 0x91f   :  { %v7978_v27 = vmul.f32 -1.442695, %v4417_v57  ;;  %8413 = vtanh.f32 %v4419_v32  ;;  %v4370_v59 = vpop.f32.mrb[79].mxu0  ;;  %v4411_v10 = vpop.f32.mrb[79].mxu1 }
 0x920   :  { %v7979_v25 = vmul.f32 -1.442695, %v4418_v30  ;;  %8415 = vtanh.f32 %v4420_v22  ;;  %v8410_v23 = vpop.eup %8409 }
 0x921   :  { %8417 = vpow2.f32 %v7978_v27  ;;  %v8412_v46 = vpop.eup %8411 }
 0x922   :  { %8419 = vpow2.f32 %v7979_v25  ;;  %v4460_v60 = vmul.f32 %v8412_v46, %v10494_v41  ;;  %v12081_v46 = vld [vmem:[#allocation168_spill] sm:$0xff] }
 0x929   :  { %v8414_v49 = vpop.eup %8413 }
 0x92a   :  { %v8416_v2 = vpop.eup %8415  ;;  %v4461_v26 = vmul.f32 %v8414_v49, %v8406_v52  ;;  %v12082_v49 = vld [vmem:[#allocation170_spill] sm:$0xff] }
 0x92b   :  { %v8418_v16 = vpop.eup %8417  ;;  %v4462_v57 = vmul.f32 %v8416_v2, %v8410_v23  ;;  %v12080_v23 = vld [vmem:[#allocation165_spill] sm:$0xff]  ;;  %v12083_v2 = vld [vmem:[#allocation171_spill] sm:$0xff] }
 0x92c   :  { %v8420_v32 = vpop.eup %8419  ;;  %v4443_v29 = vadd.f32 1.0, %v8418_v16  ;;  %v10642_v36 = vadd.f32 %v4461_v26, %v4459_v35  ;;  %v12084_v35 = vld [vmem:[#allocation172_spill] sm:$0xff]  ;;  %v12085_v26 = vld [vmem:[#allocation173_spill] sm:$0xff] }
 0x92d   :  { %v4444_v30 = vadd.f32 1.0, %v8420_v32  ;;  %v10644_v22 = vadd.f32 %v4462_v57, %v4460_v60  ;;  %v12086_v16 = vld [vmem:[#allocation177_spill] sm:$0xff]  ;;  %v12087_v60 = vld [vmem:[#allocation178_spill] sm:$0xff]  ;;  %v12089_v32 = vld [vmem:[#allocation184_spill] sm:$0xff] }
 0x92e   :  { %8421 = vrcp.f32 %v4443_v29  ;;  %v12088_v57 = vld [vmem:[#allocation181_spill] sm:$0xff]  ;;  %v12090_v29 = vld [vmem:[#allocation186_spill] sm:$0xff] }
 0x92f   :  { %8423 = vtanh.f32 %v10642_v36 }
 0x930   :  { %8425 = vrcp.f32 %v4444_v30  ;;  %v12091_v30 = vld [vmem:[#allocation187_spill] sm:$0xff] }
 0x931   :  { %8427 = vtanh.f32 %v10644_v22 }
 0x938   :  { %v8422_v39 = vpop.eup %8421 }
 0x939   :  { %v8424_v53 = vpop.eup %8423 }
 0x93a   :  { %v8426_v27 = vpop.eup %8425  ;;  %v4467_v10 = vmul.f32 %v8424_v53, %v8422_v39  ;;  %v12092_v39 = vld [vmem:[#allocation188_spill] sm:$0xff]  ;;  %v12093_v53 = vld [vmem:[#allocation189_spill] sm:$0xff] }
 0x93b   :  { %v8428_v59 = vpop.eup %8427 }
 0x93c   :  { %v4468_v41 = vmul.f32 %v8428_v59, %v8426_v27  ;;  %v10648_v52 = vpack.c.bf16 %v4467_v10, %v4467_v10  ;;  %v12094_v27 = vld [vmem:[#allocation193_spill] sm:$0xff]  ;;  %v12095_v59 = vld [vmem:[#allocation194_spill] sm:$0xff] }
 0x93d   :  { %v12096_v10 = vld [vmem:[#allocation197_spill] sm:$0xff] }
 0x93e   :  { %v4470_v25 = vpack.c.bf16 %v4468_v41, %v4468_v41  ;;  %v12097_v41 = vld [vmem:[#allocation200_spill] sm:$0xff] }
 0x940   :  { %4503 = vmatprep.mubr.bf16.mxu0 %v4470_v25  ;;  %4544 = vmatprep.mubr.bf16.mxu1 %v4470_v25 }
 0x941   :  { %4504 = vmatmul.mubr.bf16.vlgmr.msra.gmra.mrb[80].mxu0 %v10648_v52  ;;  %4545 = vmatmul.mubr.bf16.vlgmr.msra.gmra.mrb[80].mxu1 %v10648_v52 }
 0x942   :  { %4554 = vmatpush1.bf16.msra.mxu0 %v11595_v11  ;;  %4595 = vmatpush1.bf16.msra.mxu1 %v11596_v34 }
 0x943   :  { %4585 = vmatprep.mubr.bf16.mxu0 %v4470_v25  ;;  %4626 = vmatprep.mubr.bf16.mxu1 %v4470_v25  ;;  %v12098_v25 = vld [vmem:[#allocation202_spill] sm:$0xff] }
 0x944   :  { %4555 = vmatprep.subr.bf16.mxu0 %v11597_v61  ;;  %4596 = vmatprep.subr.bf16.mxu1 %v11598_v31 }
 0x946   :  { %4556 = vmatpush1.bf16.msra.mxu0 %v11599_v21  ;;  %4597 = vmatpush1.bf16.msra.mxu1 %v11600_v33 }
 0x947   :  { %4557 = vmatprep.subr.bf16.mxu0 %v11601_v24  ;;  %4598 = vmatprep.subr.bf16.mxu1 %v11602_v12 }
 0x94a   :  { %4558 = vmatpush1.bf16.msra.mxu0 %v11603_v5  ;;  %4599 = vmatpush1.bf16.msra.mxu1 %v11604_v40 }
 0x94b   :  { %4559 = vmatprep.subr.bf16.mxu0 %v11605_v19  ;;  %4600 = vmatprep.subr.bf16.mxu1 %v11606_v4 }
 0x94e   :  { %4560 = vmatpush1.bf16.msra.mxu0 %v11607_v9  ;;  %4601 = vmatpush1.bf16.msra.mxu1 %v11608_v8 }
 0x94f   :  { %4561 = vmatprep.subr.bf16.mxu0 %v11609_v43  ;;  %4602 = vmatprep.subr.bf16.mxu1 %v11610_v42 }
 0x952   :  { %4562 = vmatpush1.bf16.msra.mxu0 %v11611_v7  ;;  %4603 = vmatpush1.bf16.msra.mxu1 %v11612_v54 }
 0x953   :  { %4563 = vmatprep.subr.bf16.mxu0 %v11699_v28  ;;  %4604 = vmatprep.subr.bf16.mxu1 %v11700_v51 }
 0x956   :  { %4564 = vmatpush1.bf16.msra.mxu0 %v11701_v55  ;;  %4605 = vmatpush1.bf16.msra.mxu1 %v11702_v3 }
 0x957   :  { %4565 = vmatprep.subr.bf16.mxu0 %v11703_v56  ;;  %4606 = vmatprep.subr.bf16.mxu1 %v11704_v14 }
 0x95a   :  { %4566 = vmatpush1.bf16.msra.mxu0 %v11705_v15  ;;  %4607 = vmatpush1.bf16.msra.mxu1 %v11706_v45 }
 0x95b   :  { %4567 = vmatprep.subr.bf16.mxu0 %v11707_v17  ;;  %4608 = vmatprep.subr.bf16.mxu1 %v11794_v18 }
 0x95e   :  { %4568 = vmatpush1.bf16.msra.mxu0 %v11795_v62  ;;  %4609 = vmatpush1.bf16.msra.mxu1 %v11796_v13 }
 0x95f   :  { %4569 = vmatprep.subr.bf16.mxu0 %v11711_v47  ;;  %4610 = vmatprep.subr.bf16.mxu1 %v11712_v0 }
 0x962   :  { %4570 = vmatpush1.bf16.msra.mxu0 %v11713_v37  ;;  %4611 = vmatpush1.bf16.msra.mxu1 %v11714_v63 }
 0x963   :  { %4571 = vmatprep.subr.bf16.mxu0 %v11715_v44  ;;  %4612 = vmatprep.subr.bf16.mxu1 %v11716_v1 }
 0x966   :  { %4572 = vmatpush1.bf16.msra.mxu0 %v11717_v38  ;;  %4613 = vmatpush1.bf16.msra.mxu1 %v11718_v58 }
 0x967   :  { %4573 = vmatprep.subr.bf16.mxu0 %v11719_v6  ;;  %4614 = vmatprep.subr.bf16.mxu1 %v11720_v50 }
 0x96a   :  { %4574 = vmatpush1.bf16.msra.mxu0 %v11721_v20  ;;  %4615 = vmatpush1.bf16.msra.mxu1 %v12079_v48 }
 0x96b   :  { %4575 = vmatprep.subr.bf16.mxu0 %v12080_v23  ;;  %4616 = vmatprep.subr.bf16.mxu1 %v12081_v46 }
 0x96e   :  { %4576 = vmatpush1.bf16.msra.mxu0 %v12082_v49  ;;  %4617 = vmatpush1.bf16.msra.mxu1 %v12083_v2 }
 0x96f   :  { %4577 = vmatprep.subr.bf16.mxu0 %v12084_v35  ;;  %4618 = vmatprep.subr.bf16.mxu1 %v12085_v26  ;;  %v12168_v26 = vld [vmem:[#allocation206_spill] sm:$0xff]  ;;  %v12169_v35 = vld [vmem:[#allocation207_spill] sm:$0xff] }
 0x972   :  { %4578 = vmatpush1.bf16.msra.mxu0 %v12086_v16  ;;  %4619 = vmatpush1.bf16.msra.mxu1 %v12087_v60  ;;  %v12167_v60 = vld [vmem:[#allocation205_spill] sm:$0xff] }
 0x973   :  { %4579 = vmatprep.subr.bf16.mxu0 %v12088_v57  ;;  %4620 = vmatprep.subr.bf16.mxu1 %v12089_v32  ;;  %v12099_v57 = vld [vmem:[#allocation203_spill] sm:$0xff]  ;;  %v12100_v32 = vld [vmem:[#allocation46_spill] sm:$0xff] }
 0x976   :  { %4580 = vmatpush1.bf16.msra.mxu0 %v12090_v29  ;;  %4621 = vmatpush1.bf16.msra.mxu1 %v12091_v30  ;;  %v12101_v29 = vld [vmem:[#allocation47_spill] sm:$0xff]  ;;  %v12166_v30 = vld [vmem:[#allocation204_spill] sm:$0xff] }
 0x977   :  { %4581 = vmatprep.subr.bf16.mxu0 %v12092_v39  ;;  %4622 = vmatprep.subr.bf16.mxu1 %v12093_v53  ;;  %v12102_v53 = vld [vmem:[#allocation48_spill] sm:$0xff]  ;;  %v12111_v39 = vld [vmem:[#allocation57_spill] sm:$0xff] }
 0x97a   :  { %4582 = vmatpush1.bf16.msra.mxu0 %v12094_v27  ;;  %4623 = vmatpush1.bf16.msra.mxu1 %v12095_v59  ;;  %v12103_v27 = vld [vmem:[#allocation49_spill] sm:$0xff]  ;;  %v12104_v59 = vld [vmem:[#allocation50_spill] sm:$0xff] }
 0x97b   :  { %4583 = vmatprep.subr.bf16.mxu0 %v12096_v10  ;;  %4624 = vmatprep.subr.bf16.mxu1 %v12097_v41  ;;  %v12105_v10 = vld [vmem:[#allocation51_spill] sm:$0xff]  ;;  %v12106_v41 = vld [vmem:[#allocation52_spill] sm:$0xff] }
 0x97e   :  { %4584 = vmatpush1.bf16.msra.mxu0 %v12098_v25  ;;  %4625 = vmatpush1.bf16.msra.mxu1 %v12099_v57  ;;  %v12107_v25 = vld [vmem:[#allocation53_spill] sm:$0xff]  ;;  %v12108_v57 = vld [vmem:[#allocation54_spill] sm:$0xff] }
 0x97f   :  { %4693 = vmatprep.subr.bf16.mxu0 %v12100_v32  ;;  %4734 = vmatprep.subr.bf16.mxu1 %v12101_v29  ;;  %v12109_v32 = vld [vmem:[#allocation55_spill] sm:$0xff]  ;;  %v12110_v29 = vld [vmem:[#allocation56_spill] sm:$0xff] }
 0x981   :  { %4586 = vmatmul.mubr.bf16.vlgmr.msra.gmra.mrb[84].mxu0 %v10648_v52  ;;  %4627 = vmatmul.mubr.bf16.vlgmr.msra.gmra.mrb[84].mxu1 %v10648_v52  ;;  %v12112_v52 = vld [vmem:[#allocation58_spill] sm:$0xff] }
 0x982   :  { %4694 = vmatpush1.bf16.msra.mxu0 %v12102_v53  ;;  %4735 = vmatpush1.bf16.msra.mxu1 %v12103_v27  ;;  %v12113_v53 = vld [vmem:[#allocation59_spill] sm:$0xff]  ;;  %v12114_v27 = vld [vmem:[#allocation60_spill] sm:$0xff] }
 0x983   :  { %4695 = vmatprep.subr.bf16.mxu0 %v12104_v59  ;;  %4736 = vmatprep.subr.bf16.mxu1 %v12105_v10  ;;  %v12115_v59 = vld [vmem:[#allocation61_spill] sm:$0xff]  ;;  %v12116_v10 = vld [vmem:[#allocation62_spill] sm:$0xff] }
 0x986   :  { %4696 = vmatpush1.bf16.msra.mxu0 %v12106_v41  ;;  %4737 = vmatpush1.bf16.msra.mxu1 %v12107_v25  ;;  %v12117_v41 = vld [vmem:[#allocation63_spill] sm:$0xff]  ;;  %v12118_v25 = vld [vmem:[#allocation64_spill] sm:$0xff] }
 0x987   :  { %4697 = vmatprep.subr.bf16.mxu0 %v12108_v57  ;;  %4738 = vmatprep.subr.bf16.mxu1 %v12109_v32  ;;  %v12119_v57 = vld [vmem:[#allocation65_spill] sm:$0xff]  ;;  %v12120_v32 = vld [vmem:[#allocation66_spill] sm:$0xff] }
 0x98a   :  { %4698 = vmatpush1.bf16.msra.mxu0 %v12110_v29  ;;  %4739 = vmatpush1.bf16.msra.mxu1 %v12111_v39  ;;  %v12121_v29 = vld [vmem:[#allocation67_spill] sm:$0xff]  ;;  %v12122_v39 = vld [vmem:[#allocation68_spill] sm:$0xff] }
 0x98b   :  { %4699 = vmatprep.subr.bf16.mxu0 %v12112_v52  ;;  %4740 = vmatprep.subr.bf16.mxu1 %v12113_v53  ;;  %v12123_v52 = vld [vmem:[#allocation69_spill] sm:$0xff]  ;;  %v12124_v53 = vld [vmem:[#allocation70_spill] sm:$0xff] }
 0x98e   :  { %4700 = vmatpush1.bf16.msra.mxu0 %v12114_v27  ;;  %4741 = vmatpush1.bf16.msra.mxu1 %v12115_v59  ;;  %v12125_v27 = vld [vmem:[#allocation71_spill] sm:$0xff]  ;;  %v12126_v59 = vld [vmem:[#allocation72_spill] sm:$0xff] }
 0x98f   :  { %4701 = vmatprep.subr.bf16.mxu0 %v12116_v10  ;;  %4742 = vmatprep.subr.bf16.mxu1 %v12117_v41  ;;  %v12127_v10 = vld [vmem:[#allocation73_spill] sm:$0xff]  ;;  %v12128_v41 = vld [vmem:[#allocation74_spill] sm:$0xff] }
 0x992   :  { %4702 = vmatpush1.bf16.msra.mxu0 %v12118_v25  ;;  %4743 = vmatpush1.bf16.msra.mxu1 %v12119_v57  ;;  %v12129_v25 = vld [vmem:[#allocation75_spill] sm:$0xff]  ;;  %v12130_v57 = vld [vmem:[#allocation76_spill] sm:$0xff] }
 0x993   :  { %4703 = vmatprep.subr.bf16.mxu0 %v12120_v32  ;;  %4744 = vmatprep.subr.bf16.mxu1 %v12121_v29  ;;  %v12131_v32 = vld [vmem:[#allocation77_spill] sm:$0xff]  ;;  %v12132_v29 = vld [vmem:[#allocation78_spill] sm:$0xff] }
 0x996   :  { %4704 = vmatpush1.bf16.msra.mxu0 %v12122_v39  ;;  %4745 = vmatpush1.bf16.msra.mxu1 %v12123_v52  ;;  %v12133_v39 = vld [vmem:[#allocation79_spill] sm:$0xff]  ;;  %v12134_v52 = vld [vmem:[#allocation80_spill] sm:$0xff] }
 0x997   :  { %4705 = vmatprep.subr.bf16.mxu0 %v12124_v53  ;;  %4746 = vmatprep.subr.bf16.mxu1 %v12125_v27  ;;  %v12135_v53 = vld [vmem:[#allocation81_spill] sm:$0xff]  ;;  %v12136_v27 = vld [vmem:[#allocation82_spill] sm:$0xff] }
 0x99a   :  { %4706 = vmatpush1.bf16.msra.mxu0 %v12126_v59  ;;  %4747 = vmatpush1.bf16.msra.mxu1 %v12127_v10  ;;  %v12137_v59 = vld [vmem:[#allocation83_spill] sm:$0xff]  ;;  %v12138_v10 = vld [vmem:[#allocation84_spill] sm:$0xff] }
 0x99b   :  { %4707 = vmatprep.subr.bf16.mxu0 %v12128_v41  ;;  %4748 = vmatprep.subr.bf16.mxu1 %v12129_v25  ;;  %v12139_v41 = vld [vmem:[#allocation85_spill] sm:$0xff]  ;;  %v12140_v25 = vld [vmem:[#allocation86_spill] sm:$0xff] }
 0x99e   :  { %4708 = vmatpush1.bf16.msra.mxu0 %v12130_v57  ;;  %4749 = vmatpush1.bf16.msra.mxu1 %v12131_v32  ;;  %v12141_v57 = vld [vmem:[#allocation87_spill] sm:$0xff]  ;;  %v12142_v32 = vld [vmem:[#allocation88_spill] sm:$0xff] }
 0x99f   :  { %4709 = vmatprep.subr.bf16.mxu0 %v12132_v29  ;;  %4750 = vmatprep.subr.bf16.mxu1 %v12133_v39  ;;  %v12143_v29 = vld [vmem:[#allocation89_spill] sm:$0xff]  ;;  %v12144_v39 = vld [vmem:[#allocation90_spill] sm:$0xff] }
 0x9a2   :  { %4710 = vmatpush1.bf16.msra.mxu0 %v12134_v52  ;;  %4751 = vmatpush1.bf16.msra.mxu1 %v12135_v53  ;;  %v12145_v52 = vld [vmem:[#allocation91_spill] sm:$0xff]  ;;  %v12146_v53 = vld [vmem:[#allocation92_spill] sm:$0xff] }
 0x9a3   :  { %4711 = vmatprep.subr.bf16.mxu0 %v12136_v27  ;;  %4752 = vmatprep.subr.bf16.mxu1 %v12137_v59  ;;  %v12147_v27 = vld [vmem:[#allocation93_spill] sm:$0xff]  ;;  %v12148_v59 = vld [vmem:[#allocation94_spill] sm:$0xff] }
 0x9a6   :  { %4712 = vmatpush1.bf16.msra.mxu0 %v12138_v10  ;;  %4753 = vmatpush1.bf16.msra.mxu1 %v12139_v41  ;;  %v12149_v10 = vld [vmem:[#allocation95_spill] sm:$0xff]  ;;  %v12150_v41 = vld [vmem:[#allocation96_spill] sm:$0xff] }
 0x9a7   :  { %4713 = vmatprep.subr.bf16.mxu0 %v12140_v25  ;;  %4754 = vmatprep.subr.bf16.mxu1 %v12141_v57  ;;  %v12151_v25 = vld [vmem:[#allocation97_spill] sm:$0xff]  ;;  %v12152_v57 = vld [vmem:[#allocation98_spill] sm:$0xff] }
 0x9aa   :  { %4714 = vmatpush1.bf16.msra.mxu0 %v12142_v32  ;;  %4755 = vmatpush1.bf16.msra.mxu1 %v12143_v29  ;;  %v12153_v32 = vld [vmem:[#allocation99_spill] sm:$0xff]  ;;  %v12154_v29 = vld [vmem:[#allocation100_spill] sm:$0xff] }
 0x9ab   :  { %4715 = vmatprep.subr.bf16.mxu0 %v12144_v39  ;;  %4756 = vmatprep.subr.bf16.mxu1 %v12145_v52  ;;  %v12155_v39 = vld [vmem:[#allocation101_spill] sm:$0xff]  ;;  %v12156_v52 = vld [vmem:[#allocation102_spill] sm:$0xff] }
 0x9ae   :  { %4716 = vmatpush1.bf16.msra.mxu0 %v12146_v53  ;;  %4757 = vmatpush1.bf16.msra.mxu1 %v12147_v27  ;;  %v12157_v53 = vld [vmem:[#allocation103_spill] sm:$0xff]  ;;  %v12158_v27 = vld [vmem:[#allocation104_spill] sm:$0xff] }
 0x9af   :  { %4717 = vmatprep.subr.bf16.mxu0 %v12148_v59  ;;  %4758 = vmatprep.subr.bf16.mxu1 %v12149_v10  ;;  %v12159_v59 = vld [vmem:[#allocation105_spill] sm:$0xff]  ;;  %v12160_v10 = vld [vmem:[#allocation106_spill] sm:$0xff] }
 0x9b2   :  { %4718 = vmatpush1.bf16.msra.mxu0 %v12150_v41  ;;  %4759 = vmatpush1.bf16.msra.mxu1 %v12151_v25  ;;  %v12161_v41 = vld [vmem:[#allocation107_spill] sm:$0xff]  ;;  %v12162_v25 = vld [vmem:[#allocation108_spill] sm:$0xff] }
 0x9b3   :  { %4719 = vmatprep.subr.bf16.mxu0 %v12152_v57  ;;  %4760 = vmatprep.subr.bf16.mxu1 %v12153_v32  ;;  %v12163_v57 = vld [vmem:[#allocation109_spill] sm:$0xff]  ;;  %v12164_v32 = vld [vmem:[#allocation110_spill] sm:$0xff] }
 0x9b6   :  { %4720 = vmatpush1.bf16.msra.mxu0 %v12154_v29  ;;  %4761 = vmatpush1.bf16.msra.mxu1 %v12155_v39  ;;  %v12165_v29 = vld [vmem:[#allocation111_spill] sm:$0xff] }
 0x9b7   :  { %4721 = vmatprep.subr.bf16.mxu0 %v12156_v52  ;;  %4762 = vmatprep.subr.bf16.mxu1 %v12157_v53 }
 0x9ba   :  { %4722 = vmatpush1.bf16.msra.mxu0 %v12158_v27  ;;  %4763 = vmatpush1.bf16.msra.mxu1 %v12159_v59 }
 0x9bb   :  { %4723 = vmatprep.subr.bf16.mxu0 %v12160_v10  ;;  %4764 = vmatprep.subr.bf16.mxu1 %v12161_v41 }
 0x9be   :  { %4724 = vmatpush1.bf16.msra.mxu0 %v12162_v25  ;;  %4765 = vmatpush1.bf16.msra.mxu1 %v12163_v57 }
 0x9bf   :  { %4775 = vmatprep.subr.bf16.mxu0 %v12164_v32  ;;  %4816 = vmatprep.subr.bf16.mxu1 %v12165_v29 }
 0xa14   :  { %v4505_v39 = vpop.f32.mrb[80].mxu0  ;;  %v4546_v52 = vpop.f32.mrb[80].mxu1 }
 0xa15   :  { %v4635_v53 = vadd.f32 %v12166_v30, %v4505_v39  ;;  %v4637_v27 = vadd.f32 %v12167_v60, %v4546_v52  ;;  %v4507_v16 = vpop.f32.mrb[81].mxu0  ;;  %v4548_v59 = vpop.f32.mrb[81].mxu1 }
 0xa16   :  { %v4636_v10 = vadd.f32 %v12168_v26, %v4507_v16  ;;  %v4638_v41 = vadd.f32 %v12169_v35, %v4548_v59  ;;  %v4509_v2 = vpop.f32.mrb[82].mxu0  ;;  %v4550_v25 = vpop.f32.mrb[82].mxu1  ;;  %v12171_v59 = vld [vmem:[#allocation232_spill] sm:$0xff] }
 0xa17   :  { %v4510_v49 = vpop.f32.mrb[83].mxu0  ;;  %v4551_v57 = vpop.f32.mrb[83].mxu1  ;;  %v7980_v46 = vmul.f32 -1.442695, %v4635_v53  ;;  %v7982_v32 = vmul.f32 -1.442695, %v4637_v27 }
 0xa18   :  { %v7981_v23 = vmul.f32 -1.442695, %v4636_v10  ;;  %v7983_v29 = vmul.f32 -1.442695, %v4638_v41  ;;  %v12170_v53 = vld [vmem:[#allocation231_spill] sm:$0xff]  ;;  %v12172_v41 = vld [vmem:[#allocation233_spill] sm:$0xff] }
 0xa19   :  { %8429 = vpow2.f32 %v7980_v46  ;;  %v12173_v57 = vld [vmem:[#allocation234_spill] sm:$0xff] }
 0xa1a   :  { %8431 = vpow2.f32 %v7982_v32 }
 0xa1b   :  { %8433 = vpow2.f32 %v7981_v23 }
 0xa1c   :  { %8435 = vpow2.f32 %v7983_v29 }
 0xa23   :  { %v8430_v30 = vpop.eup %8429 }
 0xa24   :  { %v8432_v60 = vpop.eup %8431  ;;  %v4661_v48 = vadd.f32 1.0, %v8430_v30 }
 0xa25   :  { %v8434_v39 = vpop.eup %8433  ;;  %v4663_v26 = vadd.f32 1.0, %v8432_v60 }
 0xa26   :  { %v8436_v52 = vpop.eup %8435  ;;  %v4662_v16 = vadd.f32 1.0, %v8434_v39  ;;  %8437 = vrcp.f32 %v4661_v48 }
 0xa27   :  { %v4664_v35 = vadd.f32 1.0, %v8436_v52  ;;  %8439 = vrcp.f32 %v4663_v26 }
 0xa28   :  { %8441 = vrcp.f32 %v4662_v16 }
 0xa29   :  { %8443 = vrcp.f32 %v4664_v35 }
 0xa30   :  { %v8438_v26 = vpop.eup %8437 }
 0xa31   :  { %v8440_v16 = vpop.eup %8439 }
 0xa54   :  { %v4587_v49 = vpop.f32.mrb[84].mxu0  ;;  %v4628_v2 = vpop.f32.mrb[84].mxu1 }
 0xa55   :  { %v4639_v27 = vadd.f32 %v12170_v53, %v4587_v49  ;;  %v4641_v46 = vadd.f32 %v12171_v59, %v4628_v2  ;;  %v4589_v10 = vpop.f32.mrb[85].mxu0  ;;  %v4630_v23 = vpop.f32.mrb[85].mxu1  ;;  %v4681_v59 = vmul.f32 %v8440_v16, %v10642_v36 }
 0xa56   :  { %v4640_v25 = vadd.f32 %v12172_v41, %v4589_v10  ;;  %v4642_v32 = vadd.f32 %v12173_v57, %v4630_v23  ;;  %v4591_v29 = vpop.f32.mrb[86].mxu0  ;;  %v4632_v30 = vpop.f32.mrb[86].mxu1 }
 0xa57   :  { %v7984_v60 = vmul.f32 -1.442695, %v4639_v27  ;;  %8445 = vtanh.f32 %v4641_v46  ;;  %v4592_v48 = vpop.f32.mrb[87].mxu0  ;;  %v4633_v39 = vpop.f32.mrb[87].mxu1 }
 0xa58   :  { %v7985_v52 = vmul.f32 -1.442695, %v4640_v25  ;;  %8447 = vtanh.f32 %v4642_v32  ;;  %v8442_v49 = vpop.eup %8441 }
 0xa59   :  { %8449 = vpow2.f32 %v7984_v60  ;;  %v8444_v2 = vpop.eup %8443 }
 0xa5a   :  { %8451 = vpow2.f32 %v7985_v52  ;;  %v4682_v41 = vmul.f32 %v8444_v2, %v10644_v22 }
 0xa61   :  { %v8446_v53 = vpop.eup %8445 }
 0xa62   :  { %v8448_v35 = vpop.eup %8447  ;;  %v4683_v10 = vmul.f32 %v8446_v53, %v8438_v26 }
 0xa63   :  { %v8450_v23 = vpop.eup %8449  ;;  %v4684_v27 = vmul.f32 %v8448_v35, %v8442_v49 }
 0xa64   :  { %v8452_v46 = vpop.eup %8451  ;;  %v4665_v57 = vadd.f32 1.0, %v8450_v23  ;;  %v10792_v29 = vadd.f32 %v4683_v10, %v4681_v59 }
 0xa65   :  { %v4666_v25 = vadd.f32 1.0, %v8452_v46  ;;  %v10794_v32 = vadd.f32 %v4684_v27, %v4682_v41  ;;  %v12199_v46 = vld [vmem:[#allocation235_spill] sm:$0xff] }
 0xa66   :  { %8453 = vrcp.f32 %v4665_v57 }
 0xa67   :  { %8455 = vtanh.f32 %v10792_v29 }
 0xa68   :  { %8457 = vrcp.f32 %v4666_v25  ;;  %v12200_v25 = vld [vmem:[#allocation236_spill] sm:$0xff] }
 0xa69   :  { %8459 = vtanh.f32 %v10794_v32 }
 0xa70   :  { %v8454_v30 = vpop.eup %8453 }
 0xa71   :  { %v8456_v36 = vpop.eup %8455 }
 0xa72   :  { %v8458_v60 = vpop.eup %8457  ;;  %v4689_v39 = vmul.f32 %v8456_v36, %v8454_v30 }
 0xa73   :  { %v8460_v48 = vpop.eup %8459 }
 0xa74   :  { %v4690_v22 = vmul.f32 %v8460_v48, %v8458_v60  ;;  %v10798_v26 = vpack.c.bf16 %v4689_v39, %v4689_v39  ;;  %v12201_v48 = vld [vmem:[#allocation237_spill] sm:$0xff] }
 0xa76   :  { %v4692_v52 = vpack.c.bf16 %v4690_v22, %v4690_v22  ;;  %v12202_v22 = vld [vmem:[#allocation238_spill] sm:$0xff] }
 0xa78   :  { %4725 = vmatprep.mubr.bf16.mxu0 %v4692_v52  ;;  %4766 = vmatprep.mubr.bf16.mxu1 %v4692_v52 }
 0xa79   :  { %4726 = vmatmul.mubr.bf16.vlgmr.msra.gmra.mrb[88].mxu0 %v10798_v26  ;;  %4767 = vmatmul.mubr.bf16.vlgmr.msra.gmra.mrb[88].mxu1 %v10798_v26 }
 0xa7a   :  { %4776 = vmatpush1.bf16.msra.mxu0 %v11595_v11  ;;  %4817 = vmatpush1.bf16.msra.mxu1 %v11596_v34  ;;  %v12174_v11 = vld [vmem:[#allocation164_spill] sm:$0xff]  ;;  %v12175_v34 = vld [vmem:[#allocation165_spill] sm:$0xff] }
 0xa7b   :  { %4807 = vmatprep.mubr.bf16.mxu0 %v4692_v52  ;;  %4848 = vmatprep.mubr.bf16.mxu1 %v4692_v52 }
 0xa7c   :  { %4777 = vmatprep.subr.bf16.mxu0 %v11597_v61  ;;  %4818 = vmatprep.subr.bf16.mxu1 %v11598_v31  ;;  %v12176_v61 = vld [vmem:[#allocation168_spill] sm:$0xff]  ;;  %v12177_v31 = vld [vmem:[#allocation170_spill] sm:$0xff] }
 0xa7e   :  { %4778 = vmatpush1.bf16.msra.mxu0 %v11599_v21  ;;  %4819 = vmatpush1.bf16.msra.mxu1 %v11600_v33  ;;  %v12178_v21 = vld [vmem:[#allocation171_spill] sm:$0xff]  ;;  %v12179_v33 = vld [vmem:[#allocation172_spill] sm:$0xff] }
 0xa7f   :  { %4779 = vmatprep.subr.bf16.mxu0 %v11601_v24  ;;  %4820 = vmatprep.subr.bf16.mxu1 %v11602_v12  ;;  %v12180_v24 = vld [vmem:[#allocation173_spill] sm:$0xff] }
 0xa80   :  { %v12181_v12 = vld [vmem:[#allocation177_spill] sm:$0xff] }
 0xa82   :  { %4780 = vmatpush1.bf16.msra.mxu0 %v11603_v5  ;;  %4821 = vmatpush1.bf16.msra.mxu1 %v11604_v40  ;;  %v12182_v5 = vld [vmem:[#allocation178_spill] sm:$0xff]  ;;  %v12183_v40 = vld [vmem:[#allocation181_spill] sm:$0xff] }
 0xa83   :  { %4781 = vmatprep.subr.bf16.mxu0 %v11605_v19  ;;  %4822 = vmatprep.subr.bf16.mxu1 %v11606_v4  ;;  %v12184_v19 = vld [vmem:[#allocation184_spill] sm:$0xff]  ;;  %v12185_v4 = vld [vmem:[#allocation186_spill] sm:$0xff] }
 0xa86   :  { %4782 = vmatpush1.bf16.msra.mxu0 %v11607_v9  ;;  %4823 = vmatpush1.bf16.msra.mxu1 %v11608_v8  ;;  %v12186_v9 = vld [vmem:[#allocation187_spill] sm:$0xff]  ;;  %v12187_v8 = vld [vmem:[#allocation188_spill] sm:$0xff] }
 0xa87   :  { %4783 = vmatprep.subr.bf16.mxu0 %v11609_v43  ;;  %4824 = vmatprep.subr.bf16.mxu1 %v11610_v42  ;;  %v12188_v43 = vld [vmem:[#allocation189_spill] sm:$0xff] }
 0xa88   :  { %v12189_v42 = vld [vmem:[#allocation193_spill] sm:$0xff] }
 0xa8a   :  { %4784 = vmatpush1.bf16.msra.mxu0 %v11611_v7  ;;  %4825 = vmatpush1.bf16.msra.mxu1 %v11612_v54  ;;  %v12190_v7 = vld [vmem:[#allocation194_spill] sm:$0xff]  ;;  %v12191_v54 = vld [vmem:[#allocation197_spill] sm:$0xff] }
 0xa8b   :  { %4785 = vmatprep.subr.bf16.mxu0 %v11699_v28  ;;  %4826 = vmatprep.subr.bf16.mxu1 %v11700_v51  ;;  %v12192_v28 = vld [vmem:[#allocation200_spill] sm:$0xff]  ;;  %v12193_v51 = vld [vmem:[#allocation202_spill] sm:$0xff] }
 0xa8e   :  { %4786 = vmatpush1.bf16.msra.mxu0 %v11701_v55  ;;  %4827 = vmatpush1.bf16.msra.mxu1 %v11702_v3  ;;  %v12194_v55 = vld [vmem:[#allocation203_spill] sm:$0xff] }
 0xa8f   :  { %4787 = vmatprep.subr.bf16.mxu0 %v11703_v56  ;;  %4828 = vmatprep.subr.bf16.mxu1 %v11704_v14  ;;  %v12195_v14 = vld [vmem:[#allocation208_spill] sm:$0xff] }
 0xa92   :  { %4788 = vmatpush1.bf16.msra.mxu0 %v11705_v15  ;;  %4829 = vmatpush1.bf16.msra.mxu1 %v11706_v45  ;;  %v12196_v45 = vld [vmem:[#allocation209_spill] sm:$0xff] }
 0xa93   :  { %4789 = vmatprep.subr.bf16.mxu0 %v11707_v17  ;;  %4830 = vmatprep.subr.bf16.mxu1 %v11794_v18 }
 0xa96   :  { %4790 = vmatpush1.bf16.msra.mxu0 %v11795_v62  ;;  %4831 = vmatpush1.bf16.msra.mxu1 %v11796_v13 }
 0xa97   :  { %4791 = vmatprep.subr.bf16.mxu0 %v11711_v47  ;;  %4832 = vmatprep.subr.bf16.mxu1 %v11712_v0  ;;  %v12198_v0 = vld [vmem:[#allocation211_spill] sm:$0xff] }
 0xa9a   :  { %4792 = vmatpush1.bf16.msra.mxu0 %v11713_v37  ;;  %4833 = vmatpush1.bf16.msra.mxu1 %v11714_v63 }
 0xa9b   :  { %4793 = vmatprep.subr.bf16.mxu0 %v11715_v44  ;;  %4834 = vmatprep.subr.bf16.mxu1 %v11716_v1 }
 0xa9e   :  { %4794 = vmatpush1.bf16.msra.mxu0 %v11717_v38  ;;  %4835 = vmatpush1.bf16.msra.mxu1 %v11718_v58 }
 0xa9f   :  { %4795 = vmatprep.subr.bf16.mxu0 %v11719_v6  ;;  %4836 = vmatprep.subr.bf16.mxu1 %v11720_v50 }
 0xaa2   :  { %4796 = vmatpush1.bf16.msra.mxu0 %v11721_v20  ;;  %4837 = vmatpush1.bf16.msra.mxu1 %v12174_v11  ;;  %v12197_v20 = vld [vmem:[#allocation210_spill] sm:$0xff] }
 0xaa3   :  { %4797 = vmatprep.subr.bf16.mxu0 %v12175_v34  ;;  %4838 = vmatprep.subr.bf16.mxu1 %v12176_v61 }
 0xaa6   :  { %4798 = vmatpush1.bf16.msra.mxu0 %v12177_v31  ;;  %4839 = vmatpush1.bf16.msra.mxu1 %v12178_v21 }
 0xaa7   :  { %4799 = vmatprep.subr.bf16.mxu0 %v12179_v33  ;;  %4840 = vmatprep.subr.bf16.mxu1 %v12180_v24 }
 0xaaa   :  { %4800 = vmatpush1.bf16.msra.mxu0 %v12181_v12  ;;  %4841 = vmatpush1.bf16.msra.mxu1 %v12182_v5 }
 0xaab   :  { %4801 = vmatprep.subr.bf16.mxu0 %v12183_v40  ;;  %4842 = vmatprep.subr.bf16.mxu1 %v12184_v19 }
 0xaae   :  { %4802 = vmatpush1.bf16.msra.mxu0 %v12185_v4  ;;  %4843 = vmatpush1.bf16.msra.mxu1 %v12186_v9 }
 0xaaf   :  { %4803 = vmatprep.subr.bf16.mxu0 %v12187_v8  ;;  %4844 = vmatprep.subr.bf16.mxu1 %v12188_v43 }
 0xab2   :  { %4804 = vmatpush1.bf16.msra.mxu0 %v12189_v42  ;;  %4845 = vmatpush1.bf16.msra.mxu1 %v12190_v7 }
 0xab3   :  { %4805 = vmatprep.subr.bf16.mxu0 %v12191_v54  ;;  %4846 = vmatprep.subr.bf16.mxu1 %v12192_v28 }
 0xab6   :  { %4806 = vmatpush1.bf16.msra.mxu0 %v12193_v51  ;;  %4847 = vmatpush1.bf16.msra.mxu1 %v12194_v55 }
 0xab9   :  { %4808 = vmatmul.mubr.bf16.vlgmr.msra.gmra.mrb[92].mxu0 %v10798_v26  ;;  %4849 = vmatmul.mubr.bf16.vlgmr.msra.gmra.mrb[92].mxu1 %v10798_v26 }
 0xb4c   :  { %v4727_v3 = vpop.f32.mrb[88].mxu0  ;;  %v4768_v56 = vpop.f32.mrb[88].mxu1 }
 0xb4d   :  { %v4857_v15 = vadd.f32 %v12195_v14, %v4727_v3  ;;  %v4859_v17 = vadd.f32 %v12196_v45, %v4768_v56  ;;  %v4729_v6 = vpop.f32.mrb[89].mxu0  ;;  %v4770_v50 = vpop.f32.mrb[89].mxu1 }
 0xb4e   :  { %v4858_v47 = vadd.f32 %v12197_v20, %v4729_v6  ;;  %v4860_v37 = vadd.f32 %v12198_v0, %v4770_v50  ;;  %v4731_v63 = vpop.f32.mrb[90].mxu0  ;;  %v4772_v44 = vpop.f32.mrb[90].mxu1 }
 0xb4f   :  { %v4732_v1 = vpop.f32.mrb[91].mxu0  ;;  %v4773_v38 = vpop.f32.mrb[91].mxu1  ;;  %v7986_v58 = vmul.f32 -1.442695, %v4857_v15  ;;  %v7988_v18 = vmul.f32 -1.442695, %v4859_v17 }
 0xb50   :  { %v7987_v62 = vmul.f32 -1.442695, %v4858_v47  ;;  %v7989_v13 = vmul.f32 -1.442695, %v4860_v37 }
 0xb51   :  { %8461 = vpow2.f32 %v7986_v58 }
 0xb52   :  { %8463 = vpow2.f32 %v7988_v18 }
 0xb53   :  { %8465 = vpow2.f32 %v7987_v62 }
 0xb54   :  { %8467 = vpow2.f32 %v7989_v13 }
 0xb5b   :  { %v8462_v16 = vpop.eup %8461 }
 0xb5c   :  { %v8464_v49 = vpop.eup %8463  ;;  %v4883_v35 = vadd.f32 1.0, %v8462_v16 }
 0xb5d   :  { %v8466_v2 = vpop.eup %8465  ;;  %v4885_v59 = vadd.f32 1.0, %v8464_v49 }
 0xb5e   :  { %v8468_v53 = vpop.eup %8467  ;;  %v4884_v10 = vadd.f32 1.0, %v8466_v2  ;;  %8469 = vrcp.f32 %v4883_v35 }
 0xb5f   :  { %v4886_v23 = vadd.f32 1.0, %v8468_v53  ;;  %8471 = vrcp.f32 %v4885_v59 }
 0xb60   :  { %8473 = vrcp.f32 %v4884_v10 }
 0xb61   :  { %8475 = vrcp.f32 %v4886_v23 }
 0xb68   :  { %v8470_v33 = vpop.eup %8469 }
 0xb69   :  { %v8472_v24 = vpop.eup %8471 }
 0xb6a   :  { %v8474_v12 = vpop.eup %8473  ;;  %v4903_v4 = vmul.f32 %v8472_v24, %v10792_v29 }
 0xb6b   :  { %v8476_v5 = vpop.eup %8475 }
 0xb6c   :  { %v4904_v43 = vmul.f32 %v8476_v5, %v10794_v32 }
 0xb8c   :  { %v4809_v41 = vpop.f32.mrb[92].mxu0  ;;  %v4850_v27 = vpop.f32.mrb[92].mxu1 }
 0xb8d   :  { %v4861_v57 = vadd.f32 %v12199_v46, %v4809_v41  ;;  %v4863_v30 = vadd.f32 %v12200_v25, %v4850_v27  ;;  %v4811_v36 = vpop.f32.mrb[93].mxu0  ;;  %v4852_v60 = vpop.f32.mrb[93].mxu1 }
 0xb8e   :  { %v4862_v39 = vadd.f32 %v12201_v48, %v4811_v36  ;;  %v4864_v52 = vadd.f32 %v12202_v22, %v4852_v60  ;;  %v4813_v26 = vpop.f32.mrb[94].mxu0  ;;  %v4854_v11 = vpop.f32.mrb[94].mxu1 }
 0xb8f   :  { %v7990_v34 = vmul.f32 -1.442695, %v4861_v57  ;;  %8477 = vtanh.f32 %v4863_v30  ;;  %v4814_v61 = vpop.f32.mrb[95].mxu0  ;;  %v4855_v31 = vpop.f32.mrb[95].mxu1 }
 0xb90   :  { %v7991_v21 = vmul.f32 -1.442695, %v4862_v39  ;;  %8479 = vtanh.f32 %v4864_v52 }
 0xb91   :  { %8481 = vpow2.f32 %v7990_v34 }
 0xb92   :  { %8483 = vpow2.f32 %v7991_v21 }
 0xb99   :  { %v8478_v40 = vpop.eup %8477 }
 0xb9a   :  { %v8480_v19 = vpop.eup %8479  ;;  %v4905_v9 = vmul.f32 %v8478_v40, %v8470_v33 }
 0xb9b   :  { %v8482_v8 = vpop.eup %8481  ;;  %v4906_v42 = vmul.f32 %v8480_v19, %v8474_v12 }
 0xb9c   :  { %v8484_v7 = vpop.eup %8483  ;;  %v4887_v54 = vadd.f32 1.0, %v8482_v8  ;;  %v4907_v28 = vadd.f32 %v4905_v9, %v4903_v4 }
 0xb9d   :  { %v4888_v51 = vadd.f32 1.0, %v8484_v7  ;;  %v4908_v55 = vadd.f32 %v4906_v42, %v4904_v43 }
 0xb9e   :  { %8485 = vrcp.f32 %v4887_v54 }
 0xb9f   :  { %8487 = vtanh.f32 %v4907_v28 }
 0xba0   :  { %8489 = vrcp.f32 %v4888_v51 }
 0xba1   :  { %8491 = vtanh.f32 %v4908_v55 }
 0xba8   :  { %v8486_v3 = vpop.eup %8485 }
 0xba9   :  { %v8488_v56 = vpop.eup %8487 }
 0xbaa   :  { %v8490_v14 = vpop.eup %8489  ;;  %v4911_v15 = vmul.f32 %v8488_v56, %v8486_v3 }
 0xbab   :  { %v8492_v45 = vpop.eup %8491 }
 0xbac   :  { %v10876_v29 = vpack.c.bf16 %v4911_v15, %v4911_v15  ;;  %v4912_v17 = vmul.f32 %v8492_v45, %v8490_v14 }
 0xbae   :  { %v10878_v6 = vpack.c.bf16 %v4912_v17, %v4912_v17 }
 0xbaf   :  { %8701 = dma.done.wait [#allocation6], 43008 }
 0xbb0   :  { %8702 = vsyncadd [#allocation6], 4294924288 }
 0xbb1   :  { %8703 = dma.done.wait [#allocation6 + $0x1], 12288 }
 0xbb2   :  { %8704 = vsyncadd [#allocation6 + $0x1], 4294955008  ;;  %5401 = vmatprep.mubr.bf16.mxu0 %v10878_v6  ;;  %5442 = vmatprep.mubr.bf16.mxu1 %v10878_v6  ;;  %v5274_v32 = vld [vmem:[#allocation3 + $0x8] sm:$0xff]  ;;  %v5276_v50 = vld [vmem:[#allocation3 + $0x18] sm:$0xff] }
 0xbb3   :  { %v5273_v20 = vld [vmem:[#allocation3] sm:$0xff]  ;;  %5369 = vmatprep.subr.bf16.mxu0 %v5274_v32  ;;  %5410 = vmatprep.subr.bf16.mxu1 %v5276_v50  ;;  %v5275_v47 = vld [vmem:[#allocation3 + $0x10] sm:$0xff]  ;;  %v5280_v0 = vld [vmem:[#allocation3 + $0x38] sm:$0xff] }
 0xbb4   :  { %v5282_v37 = vld [vmem:[#allocation3 + $0x48] sm:$0xff]  ;;  %5370 = vmatpush1.bf16.msra.mxu0 %v5273_v20  ;;  %5411 = vmatpush1.bf16.msra.mxu1 %v5275_v47  ;;  %v5279_v63 = vld [vmem:[#allocation3 + $0x30] sm:$0xff]  ;;  %v5281_v44 = vld [vmem:[#allocation3 + $0x40] sm:$0xff] }
 0xbb5   :  { %5371 = vmatprep.subr.bf16.mxu0 %v5280_v0  ;;  %5412 = vmatprep.subr.bf16.mxu1 %v5282_v37  ;;  %v5286_v1 = vld [vmem:[#allocation3 + $0x68] sm:$0xff]  ;;  %v5288_v38 = vld [vmem:[#allocation3 + $0x78] sm:$0xff]  ;;  %v5285_v58 = vld [vmem:[#allocation3 + $0x60] sm:$0xff] }
 0xbb6   :  { %v5287_v18 = vld [vmem:[#allocation3 + $0x70] sm:$0xff]  ;;  %v5292_v62 = vld [vmem:[#allocation3 + $0x98] sm:$0xff]  ;;  %v5294_v13 = vld [vmem:[#allocation3 + $0xa8] sm:$0xff] }
 0xbb7   :  { %v5291_v16 = vld [vmem:[#allocation3 + $0x90] sm:$0xff]  ;;  %v5293_v49 = vld [vmem:[#allocation3 + $0xa0] sm:$0xff]  ;;  %v5298_v2 = vld [vmem:[#allocation3 + $0xc8] sm:$0xff] }
 0xbb8   :  { %5372 = vmatpush1.bf16.msra.mxu0 %v5279_v63  ;;  %5413 = vmatpush1.bf16.msra.mxu1 %v5281_v44  ;;  %v5300_v53 = vld [vmem:[#allocation3 + $0xd8] sm:$0xff]  ;;  %v5297_v35 = vld [vmem:[#allocation3 + $0xc0] sm:$0xff]  ;;  %v5299_v59 = vld [vmem:[#allocation3 + $0xd0] sm:$0xff] }
 0xbb9   :  { %5373 = vmatprep.subr.bf16.mxu0 %v5286_v1  ;;  %5414 = vmatprep.subr.bf16.mxu1 %v5288_v38  ;;  %v5304_v10 = vld [vmem:[#allocation3 + $0xf8] sm:$0xff]  ;;  %v5306_v23 = vld [vmem:[#allocation3 + $0x108] sm:$0xff]  ;;  %v5303_v41 = vld [vmem:[#allocation3 + $0xf0] sm:$0xff] }
 0xbba   :  { %v5305_v27 = vld [vmem:[#allocation3 + $0x100] sm:$0xff]  ;;  %v5310_v46 = vld [vmem:[#allocation3 + $0x128] sm:$0xff]  ;;  %v5312_v57 = vld [vmem:[#allocation3 + $0x138] sm:$0xff] }
 0xbbb   :  { %v5309_v25 = vld [vmem:[#allocation3 + $0x120] sm:$0xff]  ;;  %v5311_v30 = vld [vmem:[#allocation3 + $0x130] sm:$0xff]  ;;  %v5316_v36 = vld [vmem:[#allocation3 + $0x158] sm:$0xff] }
 0xbbc   :  { %5374 = vmatpush1.bf16.msra.mxu0 %v5285_v58  ;;  %5415 = vmatpush1.bf16.msra.mxu1 %v5287_v18  ;;  %v5318_v60 = vld [vmem:[#allocation3 + $0x168] sm:$0xff]  ;;  %v5315_v48 = vld [vmem:[#allocation3 + $0x150] sm:$0xff]  ;;  %v5317_v39 = vld [vmem:[#allocation3 + $0x160] sm:$0xff] }
 0xbbd   :  { %5375 = vmatprep.subr.bf16.mxu0 %v5292_v62  ;;  %5416 = vmatprep.subr.bf16.mxu1 %v5294_v13  ;;  %v5322_v22 = vld [vmem:[#allocation3 + $0x188] sm:$0xff]  ;;  %v5324_v52 = vld [vmem:[#allocation3 + $0x198] sm:$0xff]  ;;  %v5321_v26 = vld [vmem:[#allocation3 + $0x180] sm:$0xff] }
 0xbbe   :  { %v5323_v11 = vld [vmem:[#allocation3 + $0x190] sm:$0xff]  ;;  %v5328_v34 = vld [vmem:[#allocation3 + $0x1b8] sm:$0xff]  ;;  %v5330_v61 = vld [vmem:[#allocation3 + $0x1c8] sm:$0xff] }
 0xbbf   :  { %v5327_v31 = vld [vmem:[#allocation3 + $0x1b0] sm:$0xff]  ;;  %v5329_v21 = vld [vmem:[#allocation3 + $0x1c0] sm:$0xff]  ;;  %v5334_v33 = vld [vmem:[#allocation3 + $0x1e8] sm:$0xff] }
 0xbc0   :  { %5376 = vmatpush1.bf16.msra.mxu0 %v5291_v16  ;;  %5417 = vmatpush1.bf16.msra.mxu1 %v5293_v49  ;;  %v5336_v24 = vld [vmem:[#allocation3 + $0x1f8] sm:$0xff]  ;;  %v5333_v12 = vld [vmem:[#allocation3 + $0x1e0] sm:$0xff]  ;;  %v5335_v5 = vld [vmem:[#allocation3 + $0x1f0] sm:$0xff] }
 0xbc1   :  { %5377 = vmatprep.subr.bf16.mxu0 %v5298_v2  ;;  %5418 = vmatprep.subr.bf16.mxu1 %v5300_v53  ;;  %v5340_v40 = vld [vmem:[#allocation3 + $0x218] sm:$0xff]  ;;  %v5342_v19 = vld [vmem:[#allocation3 + $0x228] sm:$0xff]  ;;  %v5339_v4 = vld [vmem:[#allocation3 + $0x210] sm:$0xff] }
 0xbc2   :  { %v5341_v9 = vld [vmem:[#allocation3 + $0x220] sm:$0xff]  ;;  %v5346_v8 = vld [vmem:[#allocation3 + $0x248] sm:$0xff]  ;;  %v5348_v43 = vld [vmem:[#allocation3 + $0x258] sm:$0xff] }
 0xbc3   :  { %v5345_v42 = vld [vmem:[#allocation3 + $0x240] sm:$0xff]  ;;  %v5347_v7 = vld [vmem:[#allocation3 + $0x250] sm:$0xff]  ;;  %v5352_v54 = vld [vmem:[#allocation3 + $0x278] sm:$0xff] }
 0xbc4   :  { %5378 = vmatpush1.bf16.msra.mxu0 %v5297_v35  ;;  %5419 = vmatpush1.bf16.msra.mxu1 %v5299_v59  ;;  %v5354_v28 = vld [vmem:[#allocation3 + $0x288] sm:$0xff]  ;;  %v5351_v51 = vld [vmem:[#allocation3 + $0x270] sm:$0xff]  ;;  %v5353_v55 = vld [vmem:[#allocation3 + $0x280] sm:$0xff] }
 0xbc5   :  { %5379 = vmatprep.subr.bf16.mxu0 %v5304_v10  ;;  %5420 = vmatprep.subr.bf16.mxu1 %v5306_v23  ;;  %v5358_v3 = vld [vmem:[#allocation3 + $0x2a8] sm:$0xff]  ;;  %v5360_v56 = vld [vmem:[#allocation3 + $0x2b8] sm:$0xff]  ;;  %v5357_v14 = vld [vmem:[#allocation3 + $0x2a0] sm:$0xff] }
 0xbc6   :  { %v5359_v15 = vld [vmem:[#allocation3 + $0x2b0] sm:$0xff]  ;;  %v5364_v45 = vld [vmem:[#allocation3 + $0x2d8] sm:$0xff]  ;;  %v5366_v17 = vld [vmem:[#allocation3 + $0x2e8] sm:$0xff] }
 0xbc7   :  { %v5363_v32 = vld [vmem:[#allocation3 + $0x2d0] sm:$0xff]  ;;  %v5365_v50 = vld [vmem:[#allocation3 + $0x2e0] sm:$0xff]  ;;  %v5278_v20 = vld [vmem:[#allocation3 + $0x28] sm:$0xff] }
 0xbc8   :  { %5380 = vmatpush1.bf16.msra.mxu0 %v5303_v41  ;;  %5421 = vmatpush1.bf16.msra.mxu1 %v5305_v27  ;;  %v4938_v47 = vld [vmem:[#allocation2 + $0x8] sm:$0xff]  ;;  %v5277_v0 = vld [vmem:[#allocation3 + $0x20] sm:$0xff]  ;;  %v5284_v63 = vld [vmem:[#allocation3 + $0x58] sm:$0xff] }
 0xbc9   :  { %5381 = vmatprep.subr.bf16.mxu0 %v5310_v46  ;;  %5422 = vmatprep.subr.bf16.mxu1 %v5312_v57  ;;  %v4937_v37 = vld [vmem:[#allocation2] sm:$0xff]  ;;  %v4944_v44 = vld [vmem:[#allocation2 + $0x38] sm:$0xff]  ;;  %v5283_v1 = vld [vmem:[#allocation3 + $0x50] sm:$0xff] }
 0xbca   :  { %v4943_v38 = vld [vmem:[#allocation2 + $0x30] sm:$0xff]  ;;  %v5290_v58 = vld [vmem:[#allocation3 + $0x88] sm:$0xff]  ;;  %v5289_v13 = vld [vmem:[#allocation3 + $0x80] sm:$0xff] }
 0xbcb   :  { %v4950_v18 = vld [vmem:[#allocation2 + $0x68] sm:$0xff]  ;;  %v4949_v16 = vld [vmem:[#allocation2 + $0x60] sm:$0xff]  ;;  %v5296_v49 = vld [vmem:[#allocation3 + $0xb8] sm:$0xff] }
 0xbcc   :  { %5382 = vmatpush1.bf16.msra.mxu0 %v5309_v25  ;;  %5423 = vmatpush1.bf16.msra.mxu1 %v5311_v30  ;;  %v12203_v62 = vld [vmem:[#allocation40_spill] sm:$0xff]  ;;  %v4956_v2 = vld [vmem:[#allocation2 + $0x98] sm:$0xff]  ;;  %v4961_v23 = vld [vmem:[#allocation2 + $0xc0] sm:$0xff] }
 0xbcd   :  { %5383 = vmatprep.subr.bf16.mxu0 %v5316_v36  ;;  %5424 = vmatprep.subr.bf16.mxu1 %v5318_v60  ;;  %v5295_v53 = vld [vmem:[#allocation3 + $0xb0] sm:$0xff]  ;;  %v5302_v59 = vld [vmem:[#allocation3 + $0xe8] sm:$0xff]  ;;  %v5308_v41 = vld [vmem:[#allocation3 + $0x118] sm:$0xff] }
 0xbce   :  { %v4955_v35 = vld [vmem:[#allocation2 + $0x90] sm:$0xff]  ;;  %v4962_v10 = vld [vmem:[#allocation2 + $0xc8] sm:$0xff]  ;;  %v4968_v27 = vld [vmem:[#allocation2 + $0xf8] sm:$0xff] }
 0xbcf   :  { %v5307_v46 = vld [vmem:[#allocation3 + $0x110] sm:$0xff]  ;;  %v5314_v25 = vld [vmem:[#allocation3 + $0x148] sm:$0xff]  ;;  %v5313_v36 = vld [vmem:[#allocation3 + $0x140] sm:$0xff] }
 0xbd0   :  { %5384 = vmatpush1.bf16.msra.mxu0 %v5315_v48  ;;  %5425 = vmatpush1.bf16.msra.mxu1 %v5317_v39  ;;  %v4967_v57 = vld [vmem:[#allocation2 + $0xf0] sm:$0xff]  ;;  %v4974_v30 = vld [vmem:[#allocation2 + $0x128] sm:$0xff]  ;;  %v4973_v60 = vld [vmem:[#allocation2 + $0x120] sm:$0xff] }
 0xbd1   :  { %5385 = vmatprep.subr.bf16.mxu0 %v5322_v22  ;;  %5426 = vmatprep.subr.bf16.mxu1 %v5324_v52  ;;  %v5320_v48 = vld [vmem:[#allocation3 + $0x178] sm:$0xff]  ;;  %v5319_v22 = vld [vmem:[#allocation3 + $0x170] sm:$0xff] }
 0xbd2   :  { %v4980_v39 = vld [vmem:[#allocation2 + $0x158] sm:$0xff]  ;;  %v4979_v52 = vld [vmem:[#allocation2 + $0x150] sm:$0xff] }
 0xbd4   :  { %5386 = vmatpush1.bf16.msra.mxu0 %v5321_v26  ;;  %5427 = vmatpush1.bf16.msra.mxu1 %v5323_v11  ;;  %v5326_v26 = vld [vmem:[#allocation3 + $0x1a8] sm:$0xff] }
 0xbd5   :  { %5387 = vmatprep.subr.bf16.mxu0 %v5328_v34  ;;  %5428 = vmatprep.subr.bf16.mxu1 %v5330_v61  ;;  %v4986_v11 = vld [vmem:[#allocation2 + $0x188] sm:$0xff]  ;;  %v5325_v34 = vld [vmem:[#allocation3 + $0x1a0] sm:$0xff] }
 0xbd6   :  { %v4985_v61 = vld [vmem:[#allocation2 + $0x180] sm:$0xff] }
 0xbd8   :  { %5388 = vmatpush1.bf16.msra.mxu0 %v5327_v31  ;;  %5429 = vmatpush1.bf16.msra.mxu1 %v5329_v21  ;;  %v5332_v31 = vld [vmem:[#allocation3 + $0x1d8] sm:$0xff] }
 0xbd9   :  { %5389 = vmatprep.subr.bf16.mxu0 %v5334_v33  ;;  %5430 = vmatprep.subr.bf16.mxu1 %v5336_v24  ;;  %v4992_v21 = vld [vmem:[#allocation2 + $0x1b8] sm:$0xff]  ;;  %v5331_v33 = vld [vmem:[#allocation3 + $0x1d0] sm:$0xff] }
 0xbda   :  { %v4991_v24 = vld [vmem:[#allocation2 + $0x1b0] sm:$0xff] }
 0xbdc   :  { %5390 = vmatpush1.bf16.msra.mxu0 %v5333_v12  ;;  %5431 = vmatpush1.bf16.msra.mxu1 %v5335_v5  ;;  %v5338_v12 = vld [vmem:[#allocation3 + $0x208] sm:$0xff] }
 0xbdd   :  { %5391 = vmatprep.subr.bf16.mxu0 %v5340_v40  ;;  %5432 = vmatprep.subr.bf16.mxu1 %v5342_v19  ;;  %v4998_v5 = vld [vmem:[#allocation2 + $0x1e8] sm:$0xff]  ;;  %v5337_v40 = vld [vmem:[#allocation3 + $0x200] sm:$0xff] }
 0xbde   :  { %v4997_v19 = vld [vmem:[#allocation2 + $0x1e0] sm:$0xff] }
 0xbe0   :  { %5392 = vmatpush1.bf16.msra.mxu0 %v5339_v4  ;;  %5433 = vmatpush1.bf16.msra.mxu1 %v5341_v9  ;;  %v5344_v4 = vld [vmem:[#allocation3 + $0x238] sm:$0xff] }
 0xbe1   :  { %5393 = vmatprep.subr.bf16.mxu0 %v5346_v8  ;;  %5434 = vmatprep.subr.bf16.mxu1 %v5348_v43  ;;  %v5004_v9 = vld [vmem:[#allocation2 + $0x218] sm:$0xff]  ;;  %v5343_v8 = vld [vmem:[#allocation3 + $0x230] sm:$0xff] }
 0xbe2   :  { %v5003_v43 = vld [vmem:[#allocation2 + $0x210] sm:$0xff] }
 0xbe4   :  { %5394 = vmatpush1.bf16.msra.mxu0 %v5345_v42  ;;  %5435 = vmatpush1.bf16.msra.mxu1 %v5347_v7  ;;  %v5350_v42 = vld [vmem:[#allocation3 + $0x268] sm:$0xff] }
 0xbe5   :  { %5395 = vmatprep.subr.bf16.mxu0 %v5352_v54  ;;  %5436 = vmatprep.subr.bf16.mxu1 %v5354_v28  ;;  %v5010_v7 = vld [vmem:[#allocation2 + $0x248] sm:$0xff]  ;;  %v5349_v54 = vld [vmem:[#allocation3 + $0x260] sm:$0xff] }
 0xbe6   :  { %v5009_v28 = vld [vmem:[#allocation2 + $0x240] sm:$0xff] }
 0xbe8   :  { %5396 = vmatpush1.bf16.msra.mxu0 %v5351_v51  ;;  %5437 = vmatpush1.bf16.msra.mxu1 %v5353_v55  ;;  %v5356_v51 = vld [vmem:[#allocation3 + $0x298] sm:$0xff] }
 0xbe9   :  { %5397 = vmatprep.subr.bf16.mxu0 %v5358_v3  ;;  %5438 = vmatprep.subr.bf16.mxu1 %v5360_v56  ;;  %v5016_v55 = vld [vmem:[#allocation2 + $0x278] sm:$0xff]  ;;  %v5355_v3 = vld [vmem:[#allocation3 + $0x290] sm:$0xff] }
 0xbea   :  { %v5015_v56 = vld [vmem:[#allocation2 + $0x270] sm:$0xff] }
 0xbec   :  { %5398 = vmatpush1.bf16.msra.mxu0 %v5357_v14  ;;  %5439 = vmatpush1.bf16.msra.mxu1 %v5359_v15  ;;  %v5362_v14 = vld [vmem:[#allocation3 + $0x2c8] sm:$0xff] }
 0xbed   :  { %5399 = vmatprep.subr.bf16.mxu0 %v5364_v45  ;;  %5440 = vmatprep.subr.bf16.mxu1 %v5366_v17  ;;  %v5022_v15 = vld [vmem:[#allocation2 + $0x2a8] sm:$0xff]  ;;  %v5361_v45 = vld [vmem:[#allocation3 + $0x2c0] sm:$0xff] }
 0xbee   :  { %v5021_v17 = vld [vmem:[#allocation2 + $0x2a0] sm:$0xff] }
 0xbf0   :  { %5400 = vmatpush1.bf16.msra.mxu0 %v5363_v32  ;;  %5441 = vmatpush1.bf16.msra.mxu1 %v5365_v50  ;;  %v5368_v32 = vld [vmem:[#allocation3 + $0x2f8] sm:$0xff] }
 0xbf1   :  { %5451 = vmatprep.subr.bf16.mxu0 %v5278_v20  ;;  %5492 = vmatprep.subr.bf16.mxu1 %v4938_v47  ;;  %v5028_v50 = vld [vmem:[#allocation2 + $0x2d8] sm:$0xff]  ;;  %v5367_v20 = vld [vmem:[#allocation3 + $0x2f0] sm:$0xff] }
 0xbf2   :  { %v5027_v47 = vld [vmem:[#allocation2 + $0x2d0] sm:$0xff] }
 0xbf3   :  { %5402 = vmatmul.mubr.bf16.vlgmr.msra.gmra.mrb[96].mxu0 %v10876_v29  ;;  %5443 = vmatmul.mubr.bf16.vlgmr.msra.gmra.mrb[96].mxu1 %v10876_v29 }
 0xbf4   :  { %5452 = vmatpush1.bf16.msra.mxu0 %v5277_v0  ;;  %5493 = vmatpush1.bf16.msra.mxu1 %v4937_v37  ;;  %v5034_v0 = vld [vmem:[#allocation2 + $0x308] sm:$0xff] }
 0xbf5   :  { %5453 = vmatprep.subr.bf16.mxu0 %v5284_v63  ;;  %5494 = vmatprep.subr.bf16.mxu1 %v4944_v44  ;;  %v5130_v37 = vld [vmem:[#allocation2 + $0x608] sm:$0xff]  ;;  %v5033_v63 = vld [vmem:[#allocation2 + $0x300] sm:$0xff] }
 0xbf6   :  { %5483 = vmatprep.mubr.bf16.mxu0 %v10878_v6  ;;  %5524 = vmatprep.mubr.bf16.mxu1 %v12203_v62  ;;  %v5301_v6 = vld [vmem:[#allocation3 + $0xe0] sm:$0xff] }
 0xbf7   :  { %v5129_v44 = vld [vmem:[#allocation2 + $0x600] sm:$0xff] }
 0xbf8   :  { %5454 = vmatpush1.bf16.msra.mxu0 %v5283_v1  ;;  %5495 = vmatpush1.bf16.msra.mxu1 %v4943_v38  ;;  %v5040_v1 = vld [vmem:[#allocation2 + $0x338] sm:$0xff] }
 0xbf9   :  { %5455 = vmatprep.subr.bf16.mxu0 %v5290_v58  ;;  %5496 = vmatprep.subr.bf16.mxu1 %v4950_v18  ;;  %v5136_v38 = vld [vmem:[#allocation2 + $0x638] sm:$0xff]  ;;  %v12204_v58 = vld [vmem:[#allocation39_spill] sm:$0xff]  ;;  %v5039_v18 = vld [vmem:[#allocation2 + $0x330] sm:$0xff] }
 0xbfc   :  { %5456 = vmatpush1.bf16.msra.mxu0 %v5289_v13  ;;  %5497 = vmatpush1.bf16.msra.mxu1 %v4949_v16  ;;  %v5135_v13 = vld [vmem:[#allocation2 + $0x630] sm:$0xff]  ;;  %v5046_v16 = vld [vmem:[#allocation2 + $0x368] sm:$0xff] }
 0xbfd   :  { %5457 = vmatprep.subr.bf16.mxu0 %v5296_v49  ;;  %5498 = vmatprep.subr.bf16.mxu1 %v4956_v2  ;;  %v5142_v49 = vld [vmem:[#allocation2 + $0x668] sm:$0xff]  ;;  %v12205_v2 = vld [vmem:[#allocation42_spill] sm:$0xff] }
 0xc00   :  { %5458 = vmatpush1.bf16.msra.mxu0 %v5295_v53  ;;  %5499 = vmatpush1.bf16.msra.mxu1 %v4955_v35  ;;  %v12206_v53 = vld [vmem:[#allocation44_spill] sm:$0xff]  ;;  %v5045_v35 = vld [vmem:[#allocation2 + $0x360] sm:$0xff] }
 0xc01   :  { %5459 = vmatprep.subr.bf16.mxu0 %v5302_v59  ;;  %5500 = vmatprep.subr.bf16.mxu1 %v4962_v10  ;;  %v5052_v59 = vld [vmem:[#allocation2 + $0x398] sm:$0xff] }
 0xc02   :  { %v5148_v10 = vld [vmem:[#allocation2 + $0x698] sm:$0xff] }
 0xc04   :  { %5460 = vmatpush1.bf16.msra.mxu0 %v5301_v6  ;;  %5501 = vmatpush1.bf16.msra.mxu1 %v4961_v23  ;;  %v5051_v6 = vld [vmem:[#allocation2 + $0x390] sm:$0xff] }
 0xc05   :  { %5461 = vmatprep.subr.bf16.mxu0 %v5308_v41  ;;  %5502 = vmatprep.subr.bf16.mxu1 %v4968_v27  ;;  %v5147_v23 = vld [vmem:[#allocation2 + $0x690] sm:$0xff]  ;;  %v5058_v41 = vld [vmem:[#allocation2 + $0x3c8] sm:$0xff] }
 0xc06   :  { %v5154_v27 = vld [vmem:[#allocation2 + $0x6c8] sm:$0xff] }
 0xc08   :  { %5462 = vmatpush1.bf16.msra.mxu0 %v5307_v46  ;;  %5503 = vmatpush1.bf16.msra.mxu1 %v4967_v57  ;;  %v5057_v46 = vld [vmem:[#allocation2 + $0x3c0] sm:$0xff] }
 0xc09   :  { %5463 = vmatprep.subr.bf16.mxu0 %v5314_v25  ;;  %5504 = vmatprep.subr.bf16.mxu1 %v4974_v30  ;;  %v5153_v57 = vld [vmem:[#allocation2 + $0x6c0] sm:$0xff]  ;;  %v5064_v25 = vld [vmem:[#allocation2 + $0x3f8] sm:$0xff] }
 0xc0a   :  { %v5160_v30 = vld [vmem:[#allocation2 + $0x6f8] sm:$0xff] }
 0xc0c   :  { %5464 = vmatpush1.bf16.msra.mxu0 %v5313_v36  ;;  %5505 = vmatpush1.bf16.msra.mxu1 %v4973_v60  ;;  %v5063_v36 = vld [vmem:[#allocation2 + $0x3f0] sm:$0xff] }
 0xc0d   :  { %5465 = vmatprep.subr.bf16.mxu0 %v5320_v48  ;;  %5506 = vmatprep.subr.bf16.mxu1 %v4980_v39  ;;  %v5159_v60 = vld [vmem:[#allocation2 + $0x6f0] sm:$0xff]  ;;  %v5070_v48 = vld [vmem:[#allocation2 + $0x428] sm:$0xff] }
 0xc0e   :  { %v5166_v39 = vld [vmem:[#allocation2 + $0x728] sm:$0xff] }
 0xc10   :  { %5466 = vmatpush1.bf16.msra.mxu0 %v5319_v22  ;;  %5507 = vmatpush1.bf16.msra.mxu1 %v4979_v52  ;;  %v5069_v22 = vld [vmem:[#allocation2 + $0x420] sm:$0xff] }
 0xc11   :  { %5467 = vmatprep.subr.bf16.mxu0 %v5326_v26  ;;  %5508 = vmatprep.subr.bf16.mxu1 %v4986_v11  ;;  %v5165_v52 = vld [vmem:[#allocation2 + $0x720] sm:$0xff]  ;;  %v5076_v26 = vld [vmem:[#allocation2 + $0x458] sm:$0xff] }
 0xc12   :  { %v5172_v11 = vld [vmem:[#allocation2 + $0x758] sm:$0xff] }
 0xc14   :  { %5468 = vmatpush1.bf16.msra.mxu0 %v5325_v34  ;;  %5509 = vmatpush1.bf16.msra.mxu1 %v4985_v61  ;;  %v5075_v34 = vld [vmem:[#allocation2 + $0x450] sm:$0xff] }
 0xc15   :  { %5469 = vmatprep.subr.bf16.mxu0 %v5332_v31  ;;  %5510 = vmatprep.subr.bf16.mxu1 %v4992_v21  ;;  %v5171_v61 = vld [vmem:[#allocation2 + $0x750] sm:$0xff]  ;;  %v5082_v31 = vld [vmem:[#allocation2 + $0x488] sm:$0xff] }
 0xc16   :  { %v5178_v21 = vld [vmem:[#allocation2 + $0x788] sm:$0xff] }
 0xc18   :  { %5470 = vmatpush1.bf16.msra.mxu0 %v5331_v33  ;;  %5511 = vmatpush1.bf16.msra.mxu1 %v4991_v24  ;;  %v5081_v33 = vld [vmem:[#allocation2 + $0x480] sm:$0xff] }
 0xc19   :  { %5471 = vmatprep.subr.bf16.mxu0 %v5338_v12  ;;  %5512 = vmatprep.subr.bf16.mxu1 %v4998_v5  ;;  %v5177_v24 = vld [vmem:[#allocation2 + $0x780] sm:$0xff]  ;;  %v5088_v12 = vld [vmem:[#allocation2 + $0x4b8] sm:$0xff] }
 0xc1a   :  { %v5184_v5 = vld [vmem:[#allocation2 + $0x7b8] sm:$0xff] }
 0xc1c   :  { %5472 = vmatpush1.bf16.msra.mxu0 %v5337_v40  ;;  %5513 = vmatpush1.bf16.msra.mxu1 %v4997_v19  ;;  %v5087_v40 = vld [vmem:[#allocation2 + $0x4b0] sm:$0xff] }
 0xc1d   :  { %5473 = vmatprep.subr.bf16.mxu0 %v5344_v4  ;;  %5514 = vmatprep.subr.bf16.mxu1 %v5004_v9  ;;  %v5183_v19 = vld [vmem:[#allocation2 + $0x7b0] sm:$0xff]  ;;  %v5094_v4 = vld [vmem:[#allocation2 + $0x4e8] sm:$0xff] }
 0xc1e   :  { %v5190_v9 = vld [vmem:[#allocation2 + $0x7e8] sm:$0xff] }
 0xc20   :  { %5474 = vmatpush1.bf16.msra.mxu0 %v5343_v8  ;;  %5515 = vmatpush1.bf16.msra.mxu1 %v5003_v43  ;;  %v5093_v8 = vld [vmem:[#allocation2 + $0x4e0] sm:$0xff] }
 0xc21   :  { %5475 = vmatprep.subr.bf16.mxu0 %v5350_v42  ;;  %5516 = vmatprep.subr.bf16.mxu1 %v5010_v7  ;;  %v5189_v43 = vld [vmem:[#allocation2 + $0x7e0] sm:$0xff]  ;;  %v5100_v42 = vld [vmem:[#allocation2 + $0x518] sm:$0xff] }
 0xc22   :  { %v5196_v7 = vld [vmem:[#allocation2 + $0x818] sm:$0xff] }
 0xc24   :  { %5476 = vmatpush1.bf16.msra.mxu0 %v5349_v54  ;;  %5517 = vmatpush1.bf16.msra.mxu1 %v5009_v28  ;;  %v5099_v54 = vld [vmem:[#allocation2 + $0x510] sm:$0xff] }
 0xc25   :  { %5477 = vmatprep.subr.bf16.mxu0 %v5356_v51  ;;  %5518 = vmatprep.subr.bf16.mxu1 %v5016_v55  ;;  %v5195_v28 = vld [vmem:[#allocation2 + $0x810] sm:$0xff]  ;;  %v5106_v51 = vld [vmem:[#allocation2 + $0x548] sm:$0xff] }
 0xc26   :  { %v5202_v55 = vld [vmem:[#allocation2 + $0x848] sm:$0xff] }
 0xc28   :  { %5478 = vmatpush1.bf16.msra.mxu0 %v5355_v3  ;;  %5519 = vmatpush1.bf16.msra.mxu1 %v5015_v56  ;;  %v5105_v3 = vld [vmem:[#allocation2 + $0x540] sm:$0xff] }
 0xc29   :  { %5479 = vmatprep.subr.bf16.mxu0 %v5362_v14  ;;  %5520 = vmatprep.subr.bf16.mxu1 %v5022_v15  ;;  %v5201_v56 = vld [vmem:[#allocation2 + $0x840] sm:$0xff]  ;;  %v5112_v14 = vld [vmem:[#allocation2 + $0x578] sm:$0xff] }
 0xc2a   :  { %v5208_v15 = vld [vmem:[#allocation2 + $0x878] sm:$0xff] }
 0xc2c   :  { %5480 = vmatpush1.bf16.msra.mxu0 %v5361_v45  ;;  %5521 = vmatpush1.bf16.msra.mxu1 %v5021_v17  ;;  %v5111_v45 = vld [vmem:[#allocation2 + $0x570] sm:$0xff] }
 0xc2d   :  { %5481 = vmatprep.subr.bf16.mxu0 %v5368_v32  ;;  %5522 = vmatprep.subr.bf16.mxu1 %v5028_v50  ;;  %v5207_v17 = vld [vmem:[#allocation2 + $0x870] sm:$0xff]  ;;  %v5118_v32 = vld [vmem:[#allocation2 + $0x5a8] sm:$0xff] }
 0xc2e   :  { %v5214_v50 = vld [vmem:[#allocation2 + $0x8a8] sm:$0xff] }
 0xc30   :  { %5482 = vmatpush1.bf16.msra.mxu0 %v5367_v20  ;;  %5523 = vmatpush1.bf16.msra.mxu1 %v5027_v47  ;;  %v5117_v20 = vld [vmem:[#allocation2 + $0x5a0] sm:$0xff] }
 0xc31   :  { %5533 = vmatprep.subr.bf16.mxu0 %v5034_v0  ;;  %5574 = vmatprep.subr.bf16.mxu1 %v5130_v37  ;;  %v5213_v47 = vld [vmem:[#allocation2 + $0x8a0] sm:$0xff]  ;;  %v5124_v0 = vld [vmem:[#allocation2 + $0x5d8] sm:$0xff] }
 0xc32   :  { %v5220_v37 = vld [vmem:[#allocation2 + $0x8d8] sm:$0xff] }
 0xc33   :  { %5484 = vmatmul.mubr.bf16.vlgmr.msra.gmra.mrb[100].mxu0 %v10876_v29  ;;  %5525 = vmatmul.mubr.bf16.vlgmr.msra.gmra.mrb[100].mxu1 %v12204_v58  ;;  %v5141_v29 = vld [vmem:[#allocation2 + $0x660] sm:$0xff] }
 0xc34   :  { %5534 = vmatpush1.bf16.msra.mxu0 %v5033_v63  ;;  %5575 = vmatpush1.bf16.msra.mxu1 %v5129_v44  ;;  %v5123_v63 = vld [vmem:[#allocation2 + $0x5d0] sm:$0xff] }
 0xc35   :  { %5535 = vmatprep.subr.bf16.mxu0 %v5040_v1  ;;  %5576 = vmatprep.subr.bf16.mxu1 %v5136_v38  ;;  %v5219_v44 = vld [vmem:[#allocation2 + $0x8d0] sm:$0xff]  ;;  %v5226_v1 = vld [vmem:[#allocation2 + $0x908] sm:$0xff]  ;;  %v4940_v38 = vld [vmem:[#allocation2 + $0x18] sm:$0xff] }
 0xc36   :  { %5565 = vmatprep.mubr.bf16.mxu0 %v12205_v2  ;;  %5606 = vmatprep.mubr.bf16.mxu1 %v12206_v53 }
 0xc38   :  { %5536 = vmatpush1.bf16.msra.mxu0 %v5039_v18  ;;  %5577 = vmatpush1.bf16.msra.mxu1 %v5135_v13  ;;  %v5225_v18 = vld [vmem:[#allocation2 + $0x900] sm:$0xff]  ;;  %v4939_v13 = vld [vmem:[#allocation2 + $0x10] sm:$0xff] }
 0xc39   :  { %5537 = vmatprep.subr.bf16.mxu0 %v5046_v16  ;;  %5578 = vmatprep.subr.bf16.mxu1 %v5142_v49  ;;  %v5232_v16 = vld [vmem:[#allocation2 + $0x938] sm:$0xff]  ;;  %v4946_v49 = vld [vmem:[#allocation2 + $0x48] sm:$0xff] }
 0xc3c   :  { %5538 = vmatpush1.bf16.msra.mxu0 %v5045_v35  ;;  %5579 = vmatpush1.bf16.msra.mxu1 %v5141_v29  ;;  %v12207_v35 = vld [vmem:[#allocation41_spill] sm:$0xff]  ;;  %v12208_v29 = vld [vmem:[#allocation43_spill] sm:$0xff] }
 0xc3d   :  { %5539 = vmatprep.subr.bf16.mxu0 %v5052_v59  ;;  %5580 = vmatprep.subr.bf16.mxu1 %v5148_v10  ;;  %v5231_v59 = vld [vmem:[#allocation2 + $0x930] sm:$0xff]  ;;  %v4945_v10 = vld [vmem:[#allocation2 + $0x40] sm:$0xff] }
 0xc40   :  { %5540 = vmatpush1.bf16.msra.mxu0 %v5051_v6  ;;  %5581 = vmatpush1.bf16.msra.mxu1 %v5147_v23  ;;  %v5238_v6 = vld [vmem:[#allocation2 + $0x968] sm:$0xff]  ;;  %v4952_v23 = vld [vmem:[#allocation2 + $0x78] sm:$0xff] }
 0xc41   :  { %5541 = vmatprep.subr.bf16.mxu0 %v5058_v41  ;;  %5582 = vmatprep.subr.bf16.mxu1 %v5154_v27  ;;  %v12209_v41 = vmov 0   ;;  %v5237_v27 = vld [vmem:[#allocation2 + $0x960] sm:$0xff] }
 0xc44   :  { %5542 = vmatpush1.bf16.msra.mxu0 %v5057_v46  ;;  %5583 = vmatpush1.bf16.msra.mxu1 %v5153_v57  ;;  %v4951_v46 = vld [vmem:[#allocation2 + $0x70] sm:$0xff]  ;;  %v5244_v57 = vld [vmem:[#allocation2 + $0x998] sm:$0xff] }
 0xc45   :  { %5543 = vmatprep.subr.bf16.mxu0 %v5064_v25  ;;  %5584 = vmatprep.subr.bf16.mxu1 %v5160_v30  ;;  %v4958_v25 = vld [vmem:[#allocation2 + $0xa8] sm:$0xff]  ;;  %v5243_v30 = vld [vmem:[#allocation2 + $0x990] sm:$0xff] }
 0xc48   :  { %5544 = vmatpush1.bf16.msra.mxu0 %v5063_v36  ;;  %5585 = vmatpush1.bf16.msra.mxu1 %v5159_v60  ;;  %v4957_v36 = vld [vmem:[#allocation2 + $0xa0] sm:$0xff]  ;;  %v5250_v60 = vld [vmem:[#allocation2 + $0x9c8] sm:$0xff] }
 0xc49   :  { %5545 = vmatprep.subr.bf16.mxu0 %v5070_v48  ;;  %5586 = vmatprep.subr.bf16.mxu1 %v5166_v39  ;;  %v4964_v48 = vld [vmem:[#allocation2 + $0xd8] sm:$0xff]  ;;  %v5249_v39 = vld [vmem:[#allocation2 + $0x9c0] sm:$0xff] }
 0xc4c   :  { %5546 = vmatpush1.bf16.msra.mxu0 %v5069_v22  ;;  %5587 = vmatpush1.bf16.msra.mxu1 %v5165_v52  ;;  %v4963_v22 = vld [vmem:[#allocation2 + $0xd0] sm:$0xff]  ;;  %v5256_v52 = vld [vmem:[#allocation2 + $0x9f8] sm:$0xff] }
 0xc4d   :  { %5547 = vmatprep.subr.bf16.mxu0 %v5076_v26  ;;  %5588 = vmatprep.subr.bf16.mxu1 %v5172_v11  ;;  %v4970_v26 = vld [vmem:[#allocation2 + $0x108] sm:$0xff]  ;;  %v5255_v11 = vld [vmem:[#allocation2 + $0x9f0] sm:$0xff] }
 0xc50   :  { %5548 = vmatpush1.bf16.msra.mxu0 %v5075_v34  ;;  %5589 = vmatpush1.bf16.msra.mxu1 %v5171_v61  ;;  %v4969_v34 = vld [vmem:[#allocation2 + $0x100] sm:$0xff]  ;;  %v5262_v61 = vld [vmem:[#allocation2 + $0xa28] sm:$0xff] }
 0xc51   :  { %5549 = vmatprep.subr.bf16.mxu0 %v5082_v31  ;;  %5590 = vmatprep.subr.bf16.mxu1 %v5178_v21  ;;  %v4976_v31 = vld [vmem:[#allocation2 + $0x138] sm:$0xff]  ;;  %v5261_v21 = vld [vmem:[#allocation2 + $0xa20] sm:$0xff] }
 0xc54   :  { %5550 = vmatpush1.bf16.msra.mxu0 %v5081_v33  ;;  %5591 = vmatpush1.bf16.msra.mxu1 %v5177_v24  ;;  %v4975_v33 = vld [vmem:[#allocation2 + $0x130] sm:$0xff]  ;;  %v5268_v24 = vld [vmem:[#allocation2 + $0xa58] sm:$0xff] }
 0xc55   :  { %5551 = vmatprep.subr.bf16.mxu0 %v5088_v12  ;;  %5592 = vmatprep.subr.bf16.mxu1 %v5184_v5  ;;  %v4982_v12 = vld [vmem:[#allocation2 + $0x168] sm:$0xff]  ;;  %v5267_v5 = vld [vmem:[#allocation2 + $0xa50] sm:$0xff] }
 0xc58   :  { %5552 = vmatpush1.bf16.msra.mxu0 %v5087_v40  ;;  %5593 = vmatpush1.bf16.msra.mxu1 %v5183_v19  ;;  %v4981_v40 = vld [vmem:[#allocation2 + $0x160] sm:$0xff]  ;;  %v4988_v19 = vld [vmem:[#allocation2 + $0x198] sm:$0xff] }
 0xc59   :  { %5553 = vmatprep.subr.bf16.mxu0 %v5094_v4  ;;  %5594 = vmatprep.subr.bf16.mxu1 %v5190_v9  ;;  %v5036_v4 = vld [vmem:[#allocation2 + $0x318] sm:$0xff]  ;;  %v4987_v9 = vld [vmem:[#allocation2 + $0x190] sm:$0xff] }
 0xc5c   :  { %5554 = vmatpush1.bf16.msra.mxu0 %v5093_v8  ;;  %5595 = vmatpush1.bf16.msra.mxu1 %v5189_v43  ;;  %v5035_v8 = vld [vmem:[#allocation2 + $0x310] sm:$0xff]  ;;  %v4994_v43 = vld [vmem:[#allocation2 + $0x1c8] sm:$0xff] }
 0xc5d   :  { %5555 = vmatprep.subr.bf16.mxu0 %v5100_v42  ;;  %5596 = vmatprep.subr.bf16.mxu1 %v5196_v7  ;;  %v5042_v42 = vld [vmem:[#allocation2 + $0x348] sm:$0xff]  ;;  %v12210_v7 = vld [vmem:[#allocation45_spill] sm:$0xff] }
 0xc60   :  { %5556 = vmatpush1.bf16.msra.mxu0 %v5099_v54  ;;  %5597 = vmatpush1.bf16.msra.mxu1 %v5195_v28  ;;  %v4993_v54 = vld [vmem:[#allocation2 + $0x1c0] sm:$0xff] }
 0xc61   :  { %5557 = vmatprep.subr.bf16.mxu0 %v5106_v51  ;;  %5598 = vmatprep.subr.bf16.mxu1 %v5202_v55  ;;  %v5041_v28 = vld [vmem:[#allocation2 + $0x340] sm:$0xff]  ;;  %v5000_v51 = vld [vmem:[#allocation2 + $0x1f8] sm:$0xff] }
 0xc62   :  { %v5048_v55 = vld [vmem:[#allocation2 + $0x378] sm:$0xff] }
 0xc64   :  { %5558 = vmatpush1.bf16.msra.mxu0 %v5105_v3  ;;  %5599 = vmatpush1.bf16.msra.mxu1 %v5201_v56  ;;  %v4999_v3 = vld [vmem:[#allocation2 + $0x1f0] sm:$0xff] }
 0xc65   :  { %5559 = vmatprep.subr.bf16.mxu0 %v5112_v14  ;;  %5600 = vmatprep.subr.bf16.mxu1 %v5208_v15  ;;  %v5047_v56 = vld [vmem:[#allocation2 + $0x370] sm:$0xff]  ;;  %v5006_v14 = vld [vmem:[#allocation2 + $0x228] sm:$0xff] }
 0xc66   :  { %v5054_v15 = vld [vmem:[#allocation2 + $0x3a8] sm:$0xff] }
 0xc68   :  { %5560 = vmatpush1.bf16.msra.mxu0 %v5111_v45  ;;  %5601 = vmatpush1.bf16.msra.mxu1 %v5207_v17  ;;  %v5005_v45 = vld [vmem:[#allocation2 + $0x220] sm:$0xff] }
 0xc69   :  { %5561 = vmatprep.subr.bf16.mxu0 %v5118_v32  ;;  %5602 = vmatprep.subr.bf16.mxu1 %v5214_v50  ;;  %v5053_v17 = vld [vmem:[#allocation2 + $0x3a0] sm:$0xff]  ;;  %v5012_v32 = vld [vmem:[#allocation2 + $0x258] sm:$0xff] }
 0xc6a   :  { %v5060_v50 = vld [vmem:[#allocation2 + $0x3d8] sm:$0xff] }
 0xc6c   :  { %5562 = vmatpush1.bf16.msra.mxu0 %v5117_v20  ;;  %5603 = vmatpush1.bf16.msra.mxu1 %v5213_v47  ;;  %v5011_v20 = vld [vmem:[#allocation2 + $0x250] sm:$0xff] }
 0xc6d   :  { %5563 = vmatprep.subr.bf16.mxu0 %v5124_v0  ;;  %5604 = vmatprep.subr.bf16.mxu1 %v5220_v37  ;;  %v5059_v47 = vld [vmem:[#allocation2 + $0x3d0] sm:$0xff]  ;;  %v5018_v0 = vld [vmem:[#allocation2 + $0x288] sm:$0xff] }
 0xc6e   :  { %v5066_v37 = vld [vmem:[#allocation2 + $0x408] sm:$0xff] }
 0xc70   :  { %5564 = vmatpush1.bf16.msra.mxu0 %v5123_v63  ;;  %5605 = vmatpush1.bf16.msra.mxu1 %v5219_v44  ;;  %v5017_v63 = vld [vmem:[#allocation2 + $0x280] sm:$0xff] }
 0xc71   :  { %5615 = vmatprep.subr.bf16.mxu0 %v5226_v1  ;;  %5656 = vmatprep.subr.bf16.mxu1 %v4940_v38  ;;  %v5065_v44 = vld [vmem:[#allocation2 + $0x400] sm:$0xff]  ;;  %v5024_v1 = vld [vmem:[#allocation2 + $0x2b8] sm:$0xff] }
 0xc72   :  { %v5072_v38 = vld [vmem:[#allocation2 + $0x438] sm:$0xff] }
 0xc73   :  { %5566 = vmatmul.mubr.bf16.vlgmr.msra.gmra.mrb[104].mxu0 %v12207_v35  ;;  %5607 = vmatmul.mubr.bf16.vlgmr.msra.gmra.mrb[104].mxu1 %v12208_v29 }
 0xc74   :  { %5616 = vmatpush1.bf16.msra.mxu0 %v5225_v18  ;;  %5657 = vmatpush1.bf16.msra.mxu1 %v4939_v13  ;;  %v5023_v18 = vld [vmem:[#allocation2 + $0x2b0] sm:$0xff] }
 0xc75   :  { %5617 = vmatprep.subr.bf16.mxu0 %v5232_v16  ;;  %5658 = vmatprep.subr.bf16.mxu1 %v4946_v49  ;;  %v5071_v13 = vld [vmem:[#allocation2 + $0x430] sm:$0xff]  ;;  %v5030_v16 = vld [vmem:[#allocation2 + $0x2e8] sm:$0xff] }
 0xc76   :  { %5647 = vmatprep.mubr.bf16.mxu0 %v12209_v41  ;;  %5688 = vmatprep.mubr.bf16.mxu1 %v12203_v62  ;;  %v5078_v49 = vld [vmem:[#allocation2 + $0x468] sm:$0xff] }
 0xc78   :  { %5618 = vmatpush1.bf16.msra.mxu0 %v5231_v59  ;;  %5659 = vmatpush1.bf16.msra.mxu1 %v4945_v10  ;;  %v5029_v59 = vld [vmem:[#allocation2 + $0x2e0] sm:$0xff] }
 0xc79   :  { %5619 = vmatprep.subr.bf16.mxu0 %v5238_v6  ;;  %5660 = vmatprep.subr.bf16.mxu1 %v4952_v23  ;;  %v5077_v10 = vld [vmem:[#allocation2 + $0x460] sm:$0xff]  ;;  %v5084_v6 = vld [vmem:[#allocation2 + $0x498] sm:$0xff] }
 0xc7a   :  { %v5132_v23 = vld [vmem:[#allocation2 + $0x618] sm:$0xff] }
 0xc7c   :  { %5620 = vmatpush1.bf16.msra.mxu0 %v5237_v27  ;;  %5661 = vmatpush1.bf16.msra.mxu1 %v4951_v46  ;;  %v5083_v27 = vld [vmem:[#allocation2 + $0x490] sm:$0xff] }
 0xc7d   :  { %5621 = vmatprep.subr.bf16.mxu0 %v5244_v57  ;;  %5662 = vmatprep.subr.bf16.mxu1 %v4958_v25  ;;  %v5131_v46 = vld [vmem:[#allocation2 + $0x610] sm:$0xff]  ;;  %v5090_v57 = vld [vmem:[#allocation2 + $0x4c8] sm:$0xff] }
 0xc7e   :  { %v5138_v25 = vld [vmem:[#allocation2 + $0x648] sm:$0xff] }
 0xc80   :  { %5622 = vmatpush1.bf16.msra.mxu0 %v5243_v30  ;;  %5663 = vmatpush1.bf16.msra.mxu1 %v4957_v36  ;;  %v5089_v30 = vld [vmem:[#allocation2 + $0x4c0] sm:$0xff] }
 0xc81   :  { %5623 = vmatprep.subr.bf16.mxu0 %v5250_v60  ;;  %5664 = vmatprep.subr.bf16.mxu1 %v4964_v48  ;;  %v5137_v36 = vld [vmem:[#allocation2 + $0x640] sm:$0xff]  ;;  %v5096_v60 = vld [vmem:[#allocation2 + $0x4f8] sm:$0xff] }
 0xc82   :  { %v5144_v48 = vld [vmem:[#allocation2 + $0x678] sm:$0xff] }
 0xc84   :  { %5624 = vmatpush1.bf16.msra.mxu0 %v5249_v39  ;;  %5665 = vmatpush1.bf16.msra.mxu1 %v4963_v22  ;;  %v5095_v39 = vld [vmem:[#allocation2 + $0x4f0] sm:$0xff] }
 0xc85   :  { %5625 = vmatprep.subr.bf16.mxu0 %v5256_v52  ;;  %5666 = vmatprep.subr.bf16.mxu1 %v4970_v26  ;;  %v5143_v22 = vld [vmem:[#allocation2 + $0x670] sm:$0xff]  ;;  %v5102_v52 = vld [vmem:[#allocation2 + $0x528] sm:$0xff] }
 0xc86   :  { %v5150_v26 = vld [vmem:[#allocation2 + $0x6a8] sm:$0xff] }
 0xc88   :  { %5626 = vmatpush1.bf16.msra.mxu0 %v5255_v11  ;;  %5667 = vmatpush1.bf16.msra.mxu1 %v4969_v34  ;;  %v5101_v11 = vld [vmem:[#allocation2 + $0x520] sm:$0xff] }
 0xc89   :  { %5627 = vmatprep.subr.bf16.mxu0 %v5262_v61  ;;  %5668 = vmatprep.subr.bf16.mxu1 %v4976_v31  ;;  %v5149_v34 = vld [vmem:[#allocation2 + $0x6a0] sm:$0xff]  ;;  %v5108_v61 = vld [vmem:[#allocation2 + $0x558] sm:$0xff] }
 0xc8a   :  { %v5156_v31 = vld [vmem:[#allocation2 + $0x6d8] sm:$0xff] }
 0xc8c   :  { %5628 = vmatpush1.bf16.msra.mxu0 %v5261_v21  ;;  %5669 = vmatpush1.bf16.msra.mxu1 %v4975_v33  ;;  %v5107_v21 = vld [vmem:[#allocation2 + $0x550] sm:$0xff] }
 0xc8d   :  { %5629 = vmatprep.subr.bf16.mxu0 %v5268_v24  ;;  %5670 = vmatprep.subr.bf16.mxu1 %v4982_v12  ;;  %v5155_v33 = vld [vmem:[#allocation2 + $0x6d0] sm:$0xff]  ;;  %v5114_v24 = vld [vmem:[#allocation2 + $0x588] sm:$0xff] }
 0xc8e   :  { %v5162_v12 = vld [vmem:[#allocation2 + $0x708] sm:$0xff] }
 0xc90   :  { %5630 = vmatpush1.bf16.msra.mxu0 %v5267_v5  ;;  %5671 = vmatpush1.bf16.msra.mxu1 %v4981_v40  ;;  %v5113_v5 = vld [vmem:[#allocation2 + $0x580] sm:$0xff] }
 0xc91   :  { %5672 = vmatprep.subr.bf16.mxu1 %v4988_v19  ;;  %5697 = vmatprep.subr.bf16.mxu0 %v5036_v4  ;;  %v5161_v40 = vld [vmem:[#allocation2 + $0x700] sm:$0xff]  ;;  %v5120_v4 = vld [vmem:[#allocation2 + $0x5b8] sm:$0xff] }
 0xc93   :  { %5648 = vmatmul.mubr.bf16.vlgmr.msra.gmra.mrb[108].mxu0 %v12210_v7 }
 0xc94   :  { %5673 = vmatpush1.bf16.msra.mxu1 %v4987_v9  ;;  %5698 = vmatpush1.bf16.msra.mxu0 %v5035_v8  ;;  %v5168_v9 = vld [vmem:[#allocation2 + $0x738] sm:$0xff] }
 0xc95   :  { %5674 = vmatprep.subr.bf16.mxu1 %v4994_v43  ;;  %5699 = vmatprep.subr.bf16.mxu0 %v5042_v42 }
 0xc96   :  { %5729 = vmatprep.mubr.bf16.mxu0 %v12205_v2 }
 0xc98   :  { %5675 = vmatpush1.bf16.msra.mxu1 %v4993_v54  ;;  %5700 = vmatpush1.bf16.msra.mxu0 %v5041_v28 }
 0xc99   :  { %5676 = vmatprep.subr.bf16.mxu1 %v5000_v51  ;;  %5701 = vmatprep.subr.bf16.mxu0 %v5048_v55  ;;  %v5119_v55 = vld [vmem:[#allocation2 + $0x5b0] sm:$0xff] }
 0xc9c   :  { %5677 = vmatpush1.bf16.msra.mxu1 %v4999_v3  ;;  %5702 = vmatpush1.bf16.msra.mxu0 %v5047_v56  ;;  %v5167_v3 = vld [vmem:[#allocation2 + $0x730] sm:$0xff] }
 0xc9d   :  { %5678 = vmatprep.subr.bf16.mxu1 %v5006_v14  ;;  %5703 = vmatprep.subr.bf16.mxu0 %v5054_v15  ;;  %v5126_v14 = vld [vmem:[#allocation2 + $0x5e8] sm:$0xff] }
 0xc9e   :  { %v5174_v15 = vld [vmem:[#allocation2 + $0x768] sm:$0xff] }
 0xca0   :  { %5679 = vmatpush1.bf16.msra.mxu1 %v5005_v45  ;;  %5704 = vmatpush1.bf16.msra.mxu0 %v5053_v17  ;;  %v5125_v45 = vld [vmem:[#allocation2 + $0x5e0] sm:$0xff] }
 0xca1   :  { %5680 = vmatprep.subr.bf16.mxu1 %v5012_v32  ;;  %5705 = vmatprep.subr.bf16.mxu0 %v5060_v50  ;;  %v5173_v17 = vld [vmem:[#allocation2 + $0x760] sm:$0xff]  ;;  %v5180_v32 = vld [vmem:[#allocation2 + $0x798] sm:$0xff] }
 0xca2   :  { %v5228_v50 = vld [vmem:[#allocation2 + $0x918] sm:$0xff] }
 0xca4   :  { %5681 = vmatpush1.bf16.msra.mxu1 %v5011_v20  ;;  %5706 = vmatpush1.bf16.msra.mxu0 %v5059_v47  ;;  %v5179_v20 = vld [vmem:[#allocation2 + $0x790] sm:$0xff] }
 0xca5   :  { %5682 = vmatprep.subr.bf16.mxu1 %v5018_v0  ;;  %5707 = vmatprep.subr.bf16.mxu0 %v5066_v37  ;;  %v5227_v47 = vld [vmem:[#allocation2 + $0x910] sm:$0xff]  ;;  %v5186_v0 = vld [vmem:[#allocation2 + $0x7c8] sm:$0xff] }
 0xca6   :  { %v5234_v37 = vld [vmem:[#allocation2 + $0x948] sm:$0xff] }
 0xca8   :  { %5683 = vmatpush1.bf16.msra.mxu1 %v5017_v63  ;;  %5708 = vmatpush1.bf16.msra.mxu0 %v5065_v44  ;;  %v5185_v63 = vld [vmem:[#allocation2 + $0x7c0] sm:$0xff] }
 0xca9   :  { %5684 = vmatprep.subr.bf16.mxu1 %v5024_v1  ;;  %5709 = vmatprep.subr.bf16.mxu0 %v5072_v38  ;;  %v5233_v44 = vld [vmem:[#allocation2 + $0x940] sm:$0xff]  ;;  %v5192_v1 = vld [vmem:[#allocation2 + $0x7f8] sm:$0xff] }
 0xcaa   :  { %v5240_v38 = vld [vmem:[#allocation2 + $0x978] sm:$0xff] }
 0xcac   :  { %5685 = vmatpush1.bf16.msra.mxu1 %v5023_v18  ;;  %5710 = vmatpush1.bf16.msra.mxu0 %v5071_v13  ;;  %v5191_v18 = vld [vmem:[#allocation2 + $0x7f0] sm:$0xff] }
 0xcad   :  { %5686 = vmatprep.subr.bf16.mxu1 %v5030_v16  ;;  %5711 = vmatprep.subr.bf16.mxu0 %v5078_v49  ;;  %v5239_v13 = vld [vmem:[#allocation2 + $0x970] sm:$0xff]  ;;  %v5198_v16 = vld [vmem:[#allocation2 + $0x828] sm:$0xff] }
 0xcae   :  { %v5246_v49 = vld [vmem:[#allocation2 + $0x9a8] sm:$0xff] }
 0xcb0   :  { %5687 = vmatpush1.bf16.msra.mxu1 %v5029_v59  ;;  %5712 = vmatpush1.bf16.msra.mxu0 %v5077_v10  ;;  %v5197_v59 = vld [vmem:[#allocation2 + $0x820] sm:$0xff] }
 0xcb1   :  { %5713 = vmatprep.subr.bf16.mxu0 %v5084_v6  ;;  %5738 = vmatprep.subr.bf16.mxu1 %v5132_v23  ;;  %v5245_v10 = vld [vmem:[#allocation2 + $0x9a0] sm:$0xff]  ;;  %v5204_v6 = vld [vmem:[#allocation2 + $0x858] sm:$0xff] }
 0xcb2   :  { %v5252_v23 = vld [vmem:[#allocation2 + $0x9d8] sm:$0xff] }
 0xcb3   :  { %5689 = vmatmul.mubr.bf16.vlgmr.msra.gmra.mrb[108].mxu1 %v12204_v58 }
 0xcb4   :  { %5714 = vmatpush1.bf16.msra.mxu0 %v5083_v27  ;;  %5739 = vmatpush1.bf16.msra.mxu1 %v5131_v46  ;;  %v5203_v27 = vld [vmem:[#allocation2 + $0x850] sm:$0xff] }
 0xcb5   :  { %5715 = vmatprep.subr.bf16.mxu0 %v5090_v57  ;;  %5740 = vmatprep.subr.bf16.mxu1 %v5138_v25  ;;  %v5251_v46 = vld [vmem:[#allocation2 + $0x9d0] sm:$0xff]  ;;  %v5210_v57 = vld [vmem:[#allocation2 + $0x888] sm:$0xff] }
 0xcb6   :  { %5770 = vmatprep.mubr.bf16.mxu1 %v12206_v53  ;;  %v5258_v25 = vld [vmem:[#allocation2 + $0xa08] sm:$0xff] }
 0xcb8   :  { %5716 = vmatpush1.bf16.msra.mxu0 %v5089_v30  ;;  %5741 = vmatpush1.bf16.msra.mxu1 %v5137_v36  ;;  %v5209_v30 = vld [vmem:[#allocation2 + $0x880] sm:$0xff] }
 0xcb9   :  { %5717 = vmatprep.subr.bf16.mxu0 %v5096_v60  ;;  %5742 = vmatprep.subr.bf16.mxu1 %v5144_v48  ;;  %v5257_v36 = vld [vmem:[#allocation2 + $0xa00] sm:$0xff]  ;;  %v5216_v60 = vld [vmem:[#allocation2 + $0x8b8] sm:$0xff] }
 0xcba   :  { %v5264_v48 = vld [vmem:[#allocation2 + $0xa38] sm:$0xff] }
 0xcbc   :  { %5718 = vmatpush1.bf16.msra.mxu0 %v5095_v39  ;;  %5743 = vmatpush1.bf16.msra.mxu1 %v5143_v22  ;;  %v5215_v39 = vld [vmem:[#allocation2 + $0x8b0] sm:$0xff] }
 0xcbd   :  { %5719 = vmatprep.subr.bf16.mxu0 %v5102_v52  ;;  %5744 = vmatprep.subr.bf16.mxu1 %v5150_v26  ;;  %v5263_v22 = vld [vmem:[#allocation2 + $0xa30] sm:$0xff]  ;;  %v5222_v52 = vld [vmem:[#allocation2 + $0x8e8] sm:$0xff] }
 0xcbe   :  { %v5270_v26 = vld [vmem:[#allocation2 + $0xa68] sm:$0xff] }
 0xcc0   :  { %5720 = vmatpush1.bf16.msra.mxu0 %v5101_v11  ;;  %5745 = vmatpush1.bf16.msra.mxu1 %v5149_v34  ;;  %v5221_v11 = vld [vmem:[#allocation2 + $0x8e0] sm:$0xff] }
 0xcc1   :  { %5721 = vmatprep.subr.bf16.mxu0 %v5108_v61  ;;  %5746 = vmatprep.subr.bf16.mxu1 %v5156_v31  ;;  %v5269_v34 = vld [vmem:[#allocation2 + $0xa60] sm:$0xff]  ;;  %v4942_v61 = vld [vmem:[#allocation2 + $0x28] sm:$0xff] }
 0xcc2   :  { %v5038_v31 = vld [vmem:[#allocation2 + $0x328] sm:$0xff] }
 0xcc4   :  { %5722 = vmatpush1.bf16.msra.mxu0 %v5107_v21  ;;  %5747 = vmatpush1.bf16.msra.mxu1 %v5155_v33  ;;  %v4941_v21 = vld [vmem:[#allocation2 + $0x20] sm:$0xff] }
 0xcc5   :  { %5723 = vmatprep.subr.bf16.mxu0 %v5114_v24  ;;  %5748 = vmatprep.subr.bf16.mxu1 %v5162_v12  ;;  %v5037_v33 = vld [vmem:[#allocation2 + $0x320] sm:$0xff]  ;;  %v4948_v24 = vld [vmem:[#allocation2 + $0x58] sm:$0xff] }
 0xcc6   :  { %v10898_v19 = vpop.f32.mrb[96].mxu0  ;;  %v10900_v8 = vpop.f32.mrb[96].mxu1  ;;  %v5044_v12 = vld [vmem:[#allocation2 + $0x358] sm:$0xff] }
 0xcc7   :  { %v10902_v43 = vpop.f32.mrb[97].mxu0  ;;  %v10904_v42 = vpop.f32.mrb[97].mxu1 }
 0xcc8   :  { %v5407_v54 = vpop.f32.mrb[98].mxu0  ;;  %5724 = vmatpush1.bf16.msra.mxu0 %v5113_v5  ;;  %5749 = vmatpush1.bf16.msra.mxu1 %v5161_v40  ;;  %v5448_v28 = vpop.f32.mrb[98].mxu1  ;;  %v4947_v5 = vld [vmem:[#allocation2 + $0x50] sm:$0xff] }
 0xcc9   :  { %v5408_v51 = vpop.f32.mrb[99].mxu0  ;;  %5725 = vmatprep.subr.bf16.mxu0 %v5120_v4  ;;  %5750 = vmatprep.subr.bf16.mxu1 %v5168_v9  ;;  %v5449_v56 = vpop.f32.mrb[99].mxu1  ;;  %v5043_v40 = vld [vmem:[#allocation2 + $0x350] sm:$0xff]  ;;  %v4954_v4 = vld [vmem:[#allocation2 + $0x88] sm:$0xff]  ;;  %v4953_v54 = vld [vmem:[#allocation2 + $0x80] sm:$0xff] }
 0xcca   :  { %v5050_v9 = vld [vmem:[#allocation2 + $0x388] sm:$0xff]  ;;  %v5049_v28 = vld [vmem:[#allocation2 + $0x380] sm:$0xff]  ;;  %v4960_v51 = vld [vmem:[#allocation2 + $0xb8] sm:$0xff] }
 0xccb   :  { %v5055_v56 = vld [vmem:[#allocation2 + $0x3b0] sm:$0xff] }
 0xccc   :  { %5726 = vmatpush1.bf16.msra.mxu0 %v5119_v55  ;;  %5751 = vmatpush1.bf16.msra.mxu1 %v5167_v3  ;;  %v5056_v55 = vld [vmem:[#allocation2 + $0x3b8] sm:$0xff]  ;;  %v4959_v3 = vld [vmem:[#allocation2 + $0xb0] sm:$0xff] }
 0xccd   :  { %5727 = vmatprep.subr.bf16.mxu0 %v5126_v14  ;;  %5752 = vmatprep.subr.bf16.mxu1 %v5174_v15  ;;  %v4966_v14 = vld [vmem:[#allocation2 + $0xe8] sm:$0xff] }
 0xcce   :  { %v5062_v15 = vld [vmem:[#allocation2 + $0x3e8] sm:$0xff] }
 0xcd0   :  { %5728 = vmatpush1.bf16.msra.mxu0 %v5125_v45  ;;  %5753 = vmatpush1.bf16.msra.mxu1 %v5173_v17  ;;  %v4972_v45 = vld [vmem:[#allocation2 + $0x118] sm:$0xff] }
 0xcd1   :  { %5754 = vmatprep.subr.bf16.mxu1 %v5180_v32  ;;  %5779 = vmatprep.subr.bf16.mxu0 %v5228_v50  ;;  %v5068_v17 = vld [vmem:[#allocation2 + $0x418] sm:$0xff]  ;;  %v4971_v32 = vld [vmem:[#allocation2 + $0x110] sm:$0xff] }
 0xcd2   :  { %v5067_v50 = vld [vmem:[#allocation2 + $0x410] sm:$0xff] }
 0xcd3   :  { %5730 = vmatmul.mubr.bf16.vlgmr.msra.gmra.mrb[112].mxu0 %v12207_v35 }
 0xcd4   :  { %5755 = vmatpush1.bf16.msra.mxu1 %v5179_v20  ;;  %5780 = vmatpush1.bf16.msra.mxu0 %v5227_v47 }
 0xcd5   :  { %5756 = vmatprep.subr.bf16.mxu1 %v5186_v0  ;;  %5781 = vmatprep.subr.bf16.mxu0 %v5234_v37  ;;  %v4978_v0 = vld [vmem:[#allocation2 + $0x148] sm:$0xff] }
 0xcd6   :  { %5811 = vmatprep.mubr.bf16.mxu0 %v12209_v41  ;;  %v5074_v37 = vld [vmem:[#allocation2 + $0x448] sm:$0xff] }
 0xcd8   :  { %5757 = vmatpush1.bf16.msra.mxu1 %v5185_v63  ;;  %5782 = vmatpush1.bf16.msra.mxu0 %v5233_v44 }
 0xcd9   :  { %5758 = vmatprep.subr.bf16.mxu1 %v5192_v1  ;;  %5783 = vmatprep.subr.bf16.mxu0 %v5240_v38 }
 0xcdc   :  { %5759 = vmatpush1.bf16.msra.mxu1 %v5191_v18  ;;  %5784 = vmatpush1.bf16.msra.mxu0 %v5239_v13 }
 0xcdd   :  { %5760 = vmatprep.subr.bf16.mxu1 %v5198_v16  ;;  %5785 = vmatprep.subr.bf16.mxu0 %v5246_v49  ;;  %v4977_v49 = vld [vmem:[#allocation2 + $0x140] sm:$0xff] }
 0xce0   :  { %5761 = vmatpush1.bf16.msra.mxu1 %v5197_v59  ;;  %5786 = vmatpush1.bf16.msra.mxu0 %v5245_v10  ;;  %v5073_v59 = vld [vmem:[#allocation2 + $0x440] sm:$0xff] }
 0xce1   :  { %5762 = vmatprep.subr.bf16.mxu1 %v5204_v6  ;;  %5787 = vmatprep.subr.bf16.mxu0 %v5252_v23  ;;  %v4984_v6 = vld [vmem:[#allocation2 + $0x178] sm:$0xff] }
 0xce2   :  { %v5080_v23 = vld [vmem:[#allocation2 + $0x478] sm:$0xff] }
 0xce4   :  { %5763 = vmatpush1.bf16.msra.mxu1 %v5203_v27  ;;  %5788 = vmatpush1.bf16.msra.mxu0 %v5251_v46  ;;  %v5079_v27 = vld [vmem:[#allocation2 + $0x470] sm:$0xff]  ;;  %v5086_v46 = vld [vmem:[#allocation2 + $0x4a8] sm:$0xff] }
 0xce5   :  { %5764 = vmatprep.subr.bf16.mxu1 %v5210_v57  ;;  %5789 = vmatprep.subr.bf16.mxu0 %v5258_v25  ;;  %v4989_v57 = vld [vmem:[#allocation2 + $0x1a0] sm:$0xff] }
 0xce6   :  { %v5085_v25 = vld [vmem:[#allocation2 + $0x4a0] sm:$0xff] }
 0xce8   :  { %5765 = vmatpush1.bf16.msra.mxu1 %v5209_v30  ;;  %5790 = vmatpush1.bf16.msra.mxu0 %v5257_v36  ;;  %v4996_v30 = vld [vmem:[#allocation2 + $0x1d8] sm:$0xff] }
 0xce9   :  { %5766 = vmatprep.subr.bf16.mxu1 %v5216_v60  ;;  %5791 = vmatprep.subr.bf16.mxu0 %v5264_v48  ;;  %v5092_v36 = vld [vmem:[#allocation2 + $0x4d8] sm:$0xff]  ;;  %v4995_v60 = vld [vmem:[#allocation2 + $0x1d0] sm:$0xff] }
 0xcea   :  { %v5091_v48 = vld [vmem:[#allocation2 + $0x4d0] sm:$0xff] }
 0xcec   :  { %5767 = vmatpush1.bf16.msra.mxu1 %v5215_v39  ;;  %5792 = vmatpush1.bf16.msra.mxu0 %v5263_v22  ;;  %v5002_v39 = vld [vmem:[#allocation2 + $0x208] sm:$0xff] }
 0xced   :  { %5768 = vmatprep.subr.bf16.mxu1 %v5222_v52  ;;  %5793 = vmatprep.subr.bf16.mxu0 %v5270_v26  ;;  %v5098_v22 = vld [vmem:[#allocation2 + $0x508] sm:$0xff]  ;;  %v5001_v52 = vld [vmem:[#allocation2 + $0x200] sm:$0xff] }
 0xcee   :  { %v5097_v26 = vld [vmem:[#allocation2 + $0x500] sm:$0xff] }
 0xcf0   :  { %5769 = vmatpush1.bf16.msra.mxu1 %v5221_v11  ;;  %5794 = vmatpush1.bf16.msra.mxu0 %v5269_v34  ;;  %v5008_v11 = vld [vmem:[#allocation2 + $0x238] sm:$0xff] }
 0xcf1   :  { %5820 = vmatprep.subr.bf16.mxu0 %v4942_v61  ;;  %5861 = vmatprep.subr.bf16.mxu1 %v5038_v31  ;;  %v5104_v34 = vld [vmem:[#allocation2 + $0x538] sm:$0xff]  ;;  %v5007_v61 = vld [vmem:[#allocation2 + $0x230] sm:$0xff] }
 0xcf2   :  { %v5103_v31 = vld [vmem:[#allocation2 + $0x530] sm:$0xff] }
 0xcf3   :  { %5771 = vmatmul.mubr.bf16.vlgmr.msra.gmra.mrb[112].mxu1 %v12208_v29  ;;  %5812 = vmatmul.mubr.bf16.vlgmr.msra.gmra.mrb[116].mxu0 %v12210_v7 }
 0xcf4   :  { %5821 = vmatpush1.bf16.msra.mxu0 %v4941_v21  ;;  %5862 = vmatpush1.bf16.msra.mxu1 %v5037_v33  ;;  %v5014_v21 = vld [vmem:[#allocation2 + $0x268] sm:$0xff] }
 0xcf5   :  { %5822 = vmatprep.subr.bf16.mxu0 %v4948_v24  ;;  %5863 = vmatprep.subr.bf16.mxu1 %v5044_v12  ;;  %v5110_v33 = vld [vmem:[#allocation2 + $0x568] sm:$0xff]  ;;  %v5013_v24 = vld [vmem:[#allocation2 + $0x260] sm:$0xff] }
 0xcf6   :  { %5852 = vmatprep.mubr.bf16.mxu0 %v12203_v62  ;;  %5893 = vmatprep.mubr.bf16.mxu1 %v12205_v2  ;;  %v4965_v62 = vld [vmem:[#allocation2 + $0xe0] sm:$0xff] }
 0xcf7   :  { %v5061_v2 = vld [vmem:[#allocation2 + $0x3e0] sm:$0xff] }
 0xcf8   :  { %5823 = vmatpush1.bf16.msra.mxu0 %v4947_v5  ;;  %5864 = vmatpush1.bf16.msra.mxu1 %v5043_v40  ;;  %v5109_v12 = vld [vmem:[#allocation2 + $0x560] sm:$0xff]  ;;  %v5020_v5 = vld [vmem:[#allocation2 + $0x298] sm:$0xff] }
 0xcf9   :  { %5824 = vmatprep.subr.bf16.mxu0 %v4954_v4  ;;  %5865 = vmatprep.subr.bf16.mxu1 %v5050_v9  ;;  %v5116_v40 = vld [vmem:[#allocation2 + $0x598] sm:$0xff]  ;;  %v5019_v4 = vld [vmem:[#allocation2 + $0x290] sm:$0xff] }
 0xcfa   :  { %v5115_v9 = vld [vmem:[#allocation2 + $0x590] sm:$0xff] }
 0xcfc   :  { %5825 = vmatpush1.bf16.msra.mxu0 %v4953_v54  ;;  %5866 = vmatpush1.bf16.msra.mxu1 %v5049_v28  ;;  %v5026_v54 = vld [vmem:[#allocation2 + $0x2c8] sm:$0xff] }
 0xcfd   :  { %5826 = vmatprep.subr.bf16.mxu0 %v4960_v51  ;;  %5867 = vmatprep.subr.bf16.mxu1 %v5056_v55  ;;  %v5122_v28 = vld [vmem:[#allocation2 + $0x5c8] sm:$0xff]  ;;  %v5025_v51 = vld [vmem:[#allocation2 + $0x2c0] sm:$0xff] }
 0xcfe   :  { %v5121_v55 = vld [vmem:[#allocation2 + $0x5c0] sm:$0xff] }
 0xd00   :  { %5827 = vmatpush1.bf16.msra.mxu0 %v4959_v3  ;;  %5868 = vmatpush1.bf16.msra.mxu1 %v5055_v56  ;;  %v5032_v3 = vld [vmem:[#allocation2 + $0x2f8] sm:$0xff] }
 0xd01   :  { %5828 = vmatprep.subr.bf16.mxu0 %v4966_v14  ;;  %5869 = vmatprep.subr.bf16.mxu1 %v5062_v15  ;;  %v5128_v56 = vld [vmem:[#allocation2 + $0x5f8] sm:$0xff]  ;;  %v5031_v14 = vld [vmem:[#allocation2 + $0x2f0] sm:$0xff] }
 0xd02   :  { %v5127_v15 = vld [vmem:[#allocation2 + $0x5f0] sm:$0xff] }
 0xd04   :  { %5829 = vmatpush1.bf16.msra.mxu0 %v4965_v62  ;;  %5870 = vmatpush1.bf16.msra.mxu1 %v5061_v2  ;;  %v5134_v62 = vld [vmem:[#allocation2 + $0x628] sm:$0xff] }
 0xd05   :  { %5830 = vmatprep.subr.bf16.mxu0 %v4972_v45  ;;  %5871 = vmatprep.subr.bf16.mxu1 %v5068_v17  ;;  %v5230_v2 = vld [vmem:[#allocation2 + $0x928] sm:$0xff]  ;;  %v5133_v45 = vld [vmem:[#allocation2 + $0x620] sm:$0xff] }
 0xd06   :  { %v10912_v20 = vpop.f32.mrb[100].mxu0  ;;  %v5526_v47 = vpop.f32.mrb[100].mxu1  ;;  %v5229_v17 = vld [vmem:[#allocation2 + $0x920] sm:$0xff] }
 0xd07   :  { %v10915_v63 = vadd.f32 %v5526_v47, %v10898_v19  ;;  %v10917_v44 = vpop.f32.mrb[101].mxu0  ;;  %v5528_v1 = vpop.f32.mrb[101].mxu1  ;;  %v4983_v19 = vld [vmem:[#allocation2 + $0x170] sm:$0xff] }
 0xd08   :  { %v10920_v38 = vadd.f32 %v5528_v1, %v10902_v43  ;;  %v5489_v18 = vpop.f32.mrb[102].mxu0  ;;  %5831 = vmatpush1.bf16.msra.mxu0 %v4971_v32  ;;  %5872 = vmatpush1.bf16.msra.mxu1 %v5067_v50  ;;  %v5530_v13 = vpop.f32.mrb[102].mxu1  ;;  %v4990_v43 = vld [vmem:[#allocation2 + $0x1a8] sm:$0xff]  ;;  %v5140_v32 = vld [vmem:[#allocation2 + $0x658] sm:$0xff]  ;;  %v5139_v47 = vld [vmem:[#allocation2 + $0x650] sm:$0xff] }
 0xd09   :  { %v5490_v16 = vpop.f32.mrb[103].mxu0  ;;  %5832 = vmatprep.subr.bf16.mxu0 %v4978_v0  ;;  %5873 = vmatprep.subr.bf16.mxu1 %v5074_v37  ;;  %v5531_v10 = vpop.f32.mrb[103].mxu1  ;;  %v5236_v50 = vld [vmem:[#allocation2 + $0x958] sm:$0xff]  ;;  %v5235_v0 = vld [vmem:[#allocation2 + $0x950] sm:$0xff]  ;;  %v5146_v37 = vld [vmem:[#allocation2 + $0x688] sm:$0xff] }
 0xd0a   :  { %v5242_v1 = vld [vmem:[#allocation2 + $0x988] sm:$0xff]  ;;  %v5145_v18 = vld [vmem:[#allocation2 + $0x680] sm:$0xff]  ;;  %v5152_v13 = vld [vmem:[#allocation2 + $0x6b8] sm:$0xff] }
 0xd0b   :  { %v5151_v16 = vld [vmem:[#allocation2 + $0x6b0] sm:$0xff]  ;;  %v5254_v10 = vld [vmem:[#allocation2 + $0x9e8] sm:$0xff] }
 0xd0c   :  { %5833 = vmatpush1.bf16.msra.mxu0 %v4977_v49  ;;  %5874 = vmatpush1.bf16.msra.mxu1 %v5073_v59  ;;  %v5247_v49 = vld [vmem:[#allocation2 + $0x9b0] sm:$0xff]  ;;  %v5158_v59 = vld [vmem:[#allocation2 + $0x6e8] sm:$0xff] }
 0xd0d   :  { %5834 = vmatprep.subr.bf16.mxu0 %v4984_v6  ;;  %5875 = vmatprep.subr.bf16.mxu1 %v5080_v23  ;;  %v5164_v6 = vld [vmem:[#allocation2 + $0x718] sm:$0xff] }
 0xd0e   :  { %v5260_v23 = vld [vmem:[#allocation2 + $0xa18] sm:$0xff] }
 0xd10   :  { %5835 = vmatpush1.bf16.msra.mxu0 %v4983_v19  ;;  %5876 = vmatpush1.bf16.msra.mxu1 %v5079_v27  ;;  %v5163_v19 = vld [vmem:[#allocation2 + $0x710] sm:$0xff] }
 0xd11   :  { %5836 = vmatprep.subr.bf16.mxu0 %v4990_v43  ;;  %5877 = vmatprep.subr.bf16.mxu1 %v5086_v46  ;;  %v5259_v27 = vld [vmem:[#allocation2 + $0xa10] sm:$0xff] }
 0xd14   :  { %5837 = vmatpush1.bf16.msra.mxu0 %v4989_v57  ;;  %5878 = vmatpush1.bf16.msra.mxu1 %v5085_v25  ;;  %v5170_v57 = vld [vmem:[#allocation2 + $0x748] sm:$0xff] }
 0xd15   :  { %5838 = vmatprep.subr.bf16.mxu0 %v4996_v30  ;;  %5879 = vmatprep.subr.bf16.mxu1 %v5092_v36  ;;  %v5266_v25 = vld [vmem:[#allocation2 + $0xa48] sm:$0xff] }
 0xd18   :  { %5839 = vmatpush1.bf16.msra.mxu0 %v4995_v60  ;;  %5880 = vmatpush1.bf16.msra.mxu1 %v5091_v48 }
 0xd19   :  { %5840 = vmatprep.subr.bf16.mxu0 %v5002_v39  ;;  %5881 = vmatprep.subr.bf16.mxu1 %v5098_v22 }
 0xd1c   :  { %5841 = vmatpush1.bf16.msra.mxu0 %v5001_v52  ;;  %5882 = vmatpush1.bf16.msra.mxu1 %v5097_v26 }
 0xd1d   :  { %5842 = vmatprep.subr.bf16.mxu0 %v5008_v11  ;;  %5883 = vmatprep.subr.bf16.mxu1 %v5104_v34  ;;  %v5169_v11 = vld [vmem:[#allocation2 + $0x740] sm:$0xff] }
 0xd20   :  { %5843 = vmatpush1.bf16.msra.mxu0 %v5007_v61  ;;  %5884 = vmatpush1.bf16.msra.mxu1 %v5103_v31  ;;  %v5265_v61 = vld [vmem:[#allocation2 + $0xa40] sm:$0xff] }
 0xd21   :  { %5844 = vmatprep.subr.bf16.mxu0 %v5014_v21  ;;  %5885 = vmatprep.subr.bf16.mxu1 %v5110_v33  ;;  %v5176_v21 = vld [vmem:[#allocation2 + $0x778] sm:$0xff] }
 0xd22   :  { %v5272_v33 = vld [vmem:[#allocation2 + $0xa78] sm:$0xff] }
 0xd24   :  { %5845 = vmatpush1.bf16.msra.mxu0 %v5013_v24  ;;  %5886 = vmatpush1.bf16.msra.mxu1 %v5109_v12  ;;  %v5182_v24 = vld [vmem:[#allocation2 + $0x7a8] sm:$0xff]  ;;  %v5181_v12 = vld [vmem:[#allocation2 + $0x7a0] sm:$0xff] }
 0xd25   :  { %5846 = vmatprep.subr.bf16.mxu0 %v5020_v5  ;;  %5887 = vmatprep.subr.bf16.mxu1 %v5116_v40  ;;  %v5188_v5 = vld [vmem:[#allocation2 + $0x7d8] sm:$0xff]  ;;  %v5187_v40 = vld [vmem:[#allocation2 + $0x7d0] sm:$0xff] }
 0xd28   :  { %5847 = vmatpush1.bf16.msra.mxu0 %v5019_v4  ;;  %5888 = vmatpush1.bf16.msra.mxu1 %v5115_v9  ;;  %v5194_v4 = vld [vmem:[#allocation2 + $0x808] sm:$0xff]  ;;  %v5193_v9 = vld [vmem:[#allocation2 + $0x800] sm:$0xff] }
 0xd29   :  { %5848 = vmatprep.subr.bf16.mxu0 %v5026_v54  ;;  %5889 = vmatprep.subr.bf16.mxu1 %v5122_v28  ;;  %v5200_v54 = vld [vmem:[#allocation2 + $0x838] sm:$0xff]  ;;  %v5199_v28 = vld [vmem:[#allocation2 + $0x830] sm:$0xff] }
 0xd2c   :  { %5849 = vmatpush1.bf16.msra.mxu0 %v5025_v51  ;;  %5890 = vmatpush1.bf16.msra.mxu1 %v5121_v55  ;;  %v5206_v51 = vld [vmem:[#allocation2 + $0x868] sm:$0xff]  ;;  %v5205_v55 = vld [vmem:[#allocation2 + $0x860] sm:$0xff] }
 0xd2d   :  { %5850 = vmatprep.subr.bf16.mxu0 %v5032_v3  ;;  %5891 = vmatprep.subr.bf16.mxu1 %v5128_v56  ;;  %v10929_v3 = vld [vmem:[#allocation13] sm:$0x3f]  ;;  %v5212_v56 = vld [vmem:[#allocation2 + $0x898] sm:$0xff] }
 0xd30   :  { %5851 = vmatpush1.bf16.msra.mxu0 %v5031_v14  ;;  %5892 = vmatpush1.bf16.msra.mxu1 %v5127_v15  ;;  %v5211_v15 = vld [vmem:[#allocation2 + $0x890] sm:$0xff] }
 0xd31   :  { %5902 = vmatprep.subr.bf16.mxu0 %v5134_v62  ;;  %5943 = vmatprep.subr.bf16.mxu1 %v5230_v2  ;;  %v12212_v2 = vld [vmem:[#allocation152_spill] sm:$0xff] }
 0xd33   :  { %5853 = vmatmul.mubr.bf16.vlgmr.msra.gmra.mrb[120].mxu0 %v12204_v58  ;;  %5894 = vmatmul.mubr.bf16.vlgmr.msra.gmra.mrb[116].mxu1 %v12207_v35  ;;  %v5241_v58 = vld [vmem:[#allocation2 + $0x980] sm:$0xff]  ;;  %v5248_v35 = vld [vmem:[#allocation2 + $0x9b8] sm:$0xff] }
 0xd34   :  { %5903 = vmatpush1.bf16.msra.mxu0 %v5133_v45  ;;  %5944 = vmatpush1.bf16.msra.mxu1 %v5229_v17  ;;  %v5993_v45 = vrot.slane %v10929_v3, %v12212_v2  ;;  %v5218_v17 = vld [vmem:[#allocation2 + $0x8c8] sm:$0xff] }
 0xd35   :  { %5904 = vmatprep.subr.bf16.mxu0 %v5140_v32  ;;  %5945 = vmatprep.subr.bf16.mxu1 %v5236_v50 }
 0xd36   :  { %5975 = vmatprep.mubr.bf16.mxu1 %v12209_v41  ;;  %5934 = vmatprep.mubr.bf16.mxu0 %v12206_v53  ;;  %v5157_v53 = vld [vmem:[#allocation2 + $0x6e0] sm:$0xff] }
 0xd37   :  { %v5253_v41 = vld [vmem:[#allocation2 + $0x9e0] sm:$0xff] }
 0xd38   :  { %5905 = vmatpush1.bf16.msra.mxu0 %v5139_v47  ;;  %5946 = vmatpush1.bf16.msra.mxu1 %v5235_v0 }
 0xd39   :  { %5906 = vmatprep.subr.bf16.mxu0 %v5146_v37  ;;  %5947 = vmatprep.subr.bf16.mxu1 %v5242_v1 }
 0xd3c   :  { %5907 = vmatpush1.bf16.msra.mxu0 %v5145_v18  ;;  %5948 = vmatpush1.bf16.msra.mxu1 %v5241_v58  ;;  %v5217_v18 = vld [vmem:[#allocation2 + $0x8c0] sm:$0xff] }
 0xd3d   :  { %5908 = vmatprep.subr.bf16.mxu0 %v5152_v13  ;;  %5949 = vmatprep.subr.bf16.mxu1 %v5248_v35  ;;  %v5224_v13 = vld [vmem:[#allocation2 + $0x8f8] sm:$0xff] }
 0xd40   :  { %5909 = vmatpush1.bf16.msra.mxu0 %v5151_v16  ;;  %5950 = vmatpush1.bf16.msra.mxu1 %v5247_v49  ;;  %v5223_v49 = vld [vmem:[#allocation2 + $0x8f0] sm:$0xff] }
 0xd41   :  { %5910 = vmatprep.subr.bf16.mxu0 %v5158_v59  ;;  %5951 = vmatprep.subr.bf16.mxu1 %v5254_v10 }
 0xd44   :  { %5911 = vmatpush1.bf16.msra.mxu0 %v5157_v53  ;;  %5952 = vmatpush1.bf16.msra.mxu1 %v5253_v41 }
 0xd45   :  { %5912 = vmatprep.subr.bf16.mxu0 %v5164_v6  ;;  %5953 = vmatprep.subr.bf16.mxu1 %v5260_v23 }
 0xd46   :  { %v5567_v43 = vpop.f32.mrb[104].mxu0  ;;  %v5608_v46 = vpop.f32.mrb[104].mxu1 }
 0xd47   :  { %v5568_v30 = vadd.f32 %v5567_v43, %v10915_v63  ;;  %v5569_v36 = vpop.f32.mrb[105].mxu0  ;;  %v5610_v60 = vpop.f32.mrb[105].mxu1  ;;  %v5175_v63 = vld [vmem:[#allocation2 + $0x770] sm:$0xff] }
 0xd48   :  { %v5570_v48 = vadd.f32 %v5569_v36, %v10920_v38  ;;  %v5571_v39 = vpop.f32.mrb[106].mxu0  ;;  %5913 = vmatpush1.bf16.msra.mxu0 %v5163_v19  ;;  %5954 = vmatpush1.bf16.msra.mxu1 %v5259_v27  ;;  %v5612_v22 = vpop.f32.mrb[106].mxu1  ;;  %v5271_v38 = vld [vmem:[#allocation2 + $0xa70] sm:$0xff] }
 0xd49   :  { %v5609_v52 = vadd.f32 %v5608_v46, %v5568_v30  ;;  %v5572_v26 = vpop.f32.mrb[107].mxu0  ;;  %5914 = vmatprep.subr.bf16.mxu0 %v5170_v57  ;;  %v5613_v34 = vpop.f32.mrb[107].mxu1  ;;  %5955 = vmatprep.subr.bf16.mxu1 %v5266_v25 }
 0xd4a   :  { %v5611_v31 = vadd.f32 %v5610_v60, %v5570_v48  ;;  %v12213_v48 = vld [vmem:[#allocation151_spill] sm:$0xff] }
 0xd4c   :  { %5915 = vmatpush1.bf16.msra.mxu0 %v5169_v11  ;;  %5956 = vmatpush1.bf16.msra.mxu1 %v5265_v61 }
 0xd4d   :  { %5916 = vmatprep.subr.bf16.mxu0 %v5176_v21  ;;  %5957 = vmatprep.subr.bf16.mxu1 %v5272_v33 }
 0xd50   :  { %5917 = vmatpush1.bf16.msra.mxu0 %v5175_v63  ;;  %5958 = vmatpush1.bf16.msra.mxu1 %v5271_v38 }
 0xd51   :  { %5918 = vmatprep.subr.bf16.mxu0 %v5182_v24 }
 0xd53   :  { %5976 = vmatmul.mubr.bf16.vlgmr.msra.gmra.mrb[120].mxu1 %v12210_v7  ;;  %v12211_v7 = vld [vmem:[#allocation149_spill] sm:$0xff] }
 0xd54   :  { %5919 = vmatpush1.bf16.msra.mxu0 %v5181_v12  ;;  %v5989_v14 = vrot.slane %v10929_v3, %v12211_v7 }
 0xd55   :  { %5920 = vmatprep.subr.bf16.mxu0 %v5188_v5 }
 0xd58   :  { %5921 = vmatpush1.bf16.msra.mxu0 %v5187_v40 }
 0xd59   :  { %5922 = vmatprep.subr.bf16.mxu0 %v5194_v4 }
 0xd5c   :  { %5923 = vmatpush1.bf16.msra.mxu0 %v5193_v9 }
 0xd5d   :  { %5924 = vmatprep.subr.bf16.mxu0 %v5200_v54 }
 0xd60   :  { %5925 = vmatpush1.bf16.msra.mxu0 %v5199_v28 }
 0xd61   :  { %5926 = vmatprep.subr.bf16.mxu0 %v5206_v51 }
 0xd64   :  { %5927 = vmatpush1.bf16.msra.mxu0 %v5205_v55 }
 0xd65   :  { %5928 = vmatprep.subr.bf16.mxu0 %v5212_v56 }
 0xd66   :  { %v5649_v62 = vpop.f32.mrb[108].mxu0 }
 0xd67   :  { %v5650_v32 = vadd.f32 %v5649_v62, %v5609_v52  ;;  %v5651_v50 = vpop.f32.mrb[109].mxu0  ;;  %v12214_v52 = vld [vmem:[#allocation153_spill] sm:$0xff] }
 0xd68   :  { %v5652_v47 = vadd.f32 %v5651_v50, %v5611_v31  ;;  %v5653_v0 = vpop.f32.mrb[110].mxu0  ;;  %5929 = vmatpush1.bf16.msra.mxu0 %v5211_v15 }
 0xd69   :  { %v10935_v37 = vadd.f32 %v5989_v14, %v5650_v32  ;;  %v5654_v1 = vpop.f32.mrb[111].mxu0  ;;  %5930 = vmatprep.subr.bf16.mxu0 %v5218_v17  ;;  %v12215_v0 = vld [vmem:[#allocation144_spill] sm:$0xff] }
 0xd6a   :  { %v10937_v58 = vadd.f32 %v5993_v45, %v5652_v47  ;;  %v12216_v1 = vsub.s32 4, %v12215_v0 }
 0xd6b   :  { %v6022_v35 = vmax.f32 %v10935_v37, 0.0 }
 0xd6c   :  { %v6023_v16 = vmax.f32 %v10937_v58, 0.0  ;;  %5931 = vmatpush1.bf16.msra.mxu0 %v5217_v18 }
 0xd6d   :  { %5932 = vmatprep.subr.bf16.mxu0 %v5224_v13 }
 0xd70   :  { %5933 = vmatpush1.bf16.msra.mxu0 %v5223_v49 }
 0xd73   :  { %5935 = vmatmul.mubr.bf16.vlgmr.msra.gmra.mrb[124].mxu0 %v12208_v29  ;;  %v5997_v29 = vrot.slane %v10929_v3, %v12213_v48 }
 0xd86   :  { %v5690_v59 = vpop.f32.mrb[108].mxu1 }
 0xd87   :  { %v5691_v10 = vadd.f32 %v5690_v59, %v10900_v8  ;;  %v5692_v53 = vpop.f32.mrb[109].mxu1 }
 0xd88   :  { %v5693_v41 = vadd.f32 %v5692_v53, %v10904_v42  ;;  %v5694_v6 = vpop.f32.mrb[110].mxu1  ;;  %v6001_v42 = vrot.slane %v10929_v3, %v12214_v52 }
 0xd89   :  { %v5695_v23 = vpop.f32.mrb[111].mxu1 }
 0xda6   :  { %v5731_v19 = vpop.f32.mrb[112].mxu0 }
 0xda7   :  { %v5732_v27 = vadd.f32 %v5731_v19, %v5691_v10  ;;  %v5733_v43 = vpop.f32.mrb[113].mxu0 }
 0xda8   :  { %v5734_v46 = vadd.f32 %v5733_v43, %v5693_v41  ;;  %v5735_v57 = vpop.f32.mrb[114].mxu0 }
 0xda9   :  { %v5736_v25 = vpop.f32.mrb[115].mxu0 }
 0xdc6   :  { %v5772_v30 = vpop.f32.mrb[112].mxu1  ;;  %v5813_v36 = vpop.f32.mrb[116].mxu0 }
 0xdc7   :  { %v5773_v60 = vadd.f32 %v5772_v30, %v5732_v27  ;;  %v5774_v39 = vpop.f32.mrb[113].mxu1  ;;  %v5815_v22 = vpop.f32.mrb[117].mxu0 }
 0xdc8   :  { %v5775_v8 = vadd.f32 %v5774_v39, %v5734_v46  ;;  %v5817_v26 = vpop.f32.mrb[118].mxu0  ;;  %v5776_v11 = vpop.f32.mrb[114].mxu1 }
 0xdc9   :  { %v5814_v34 = vadd.f32 %v5813_v36, %v5773_v60  ;;  %v5818_v61 = vpop.f32.mrb[119].mxu0  ;;  %v5777_v31 = vpop.f32.mrb[115].mxu1 }
 0xdca   :  { %v5816_v21 = vadd.f32 %v5815_v22, %v5775_v8 }
 0xdcb   :  { %v10948_v33 = vadd.f32 %v5997_v29, %v5814_v34 }
 0xdcc   :  { %v10950_v63 = vadd.f32 %v6001_v42, %v5816_v21 }
 0xdcd   :  { %v6024_v38 = vmax.f32 %v10948_v33, 0.0 }
 0xdce   :  { %v6025_v24 = vmax.f32 %v10950_v63, 0.0 }
 0xe06   :  { %v5854_v12 = vpop.f32.mrb[120].mxu0  ;;  %v5895_v5 = vpop.f32.mrb[116].mxu1 }
 0xe07   :  { %v5855_v40 = vadd.f32 %v5854_v12, %v10912_v20  ;;  %v5856_v4 = vpop.f32.mrb[121].mxu0  ;;  %v5897_v9 = vpop.f32.mrb[117].mxu1  ;;  %v6005_v20 = vrot.slane %v10929_v3, %v12216_v1 }
 0xe08   :  { %v5857_v54 = vadd.f32 %v5856_v4, %v10917_v44  ;;  %v5858_v28 = vpop.f32.mrb[122].mxu0  ;;  %v5899_v51 = vpop.f32.mrb[118].mxu1  ;;  %v12217_v44 = vsub.s32 5, %v12215_v0 }
 0xe09   :  { %v5896_v55 = vadd.f32 %v5895_v5, %v5855_v40  ;;  %v5859_v56 = vpop.f32.mrb[123].mxu0  ;;  %v5900_v14 = vpop.f32.mrb[119].mxu1 }
 0xe0a   :  { %v5898_v15 = vadd.f32 %v5897_v9, %v5857_v54  ;;  %v6009_v49 = vrot.slane %v10929_v3, %v12217_v44 }
 0xe26   :  { %v5977_v62 = vpop.f32.mrb[120].mxu1 }
 0xe27   :  { %v5979_v45 = vpop.f32.mrb[121].mxu1 }
 0xe28   :  { %v5981_v17 = vpop.f32.mrb[122].mxu1 }
 0xe29   :  { %v5982_v32 = vpop.f32.mrb[123].mxu1 }
 0xe46   :  { %v5936_v50 = vpop.f32.mrb[124].mxu0 }
 0xe47   :  { %v5937_v47 = vadd.f32 %v5936_v50, %v5896_v55  ;;  %v5938_v18 = vpop.f32.mrb[125].mxu0 }
 0xe48   :  { %v5939_v13 = vadd.f32 %v5938_v18, %v5898_v15  ;;  %v5940_v59 = vpop.f32.mrb[126].mxu0 }
 0xe49   :  { %v5978_v10 = vadd.f32 %v5977_v62, %v5937_v47  ;;  %v5941_v53 = vpop.f32.mrb[127].mxu0 }
 0xe4a   :  { %v5980_v41 = vadd.f32 %v5979_v45, %v5939_v13 }
 0xe4b   :  { %v10962_v6 = vadd.f32 %v6005_v20, %v5978_v10 }
 0xe4c   :  { %v10964_v23 = vadd.f32 %v6009_v49, %v5980_v41 }
 0xe4d   :  { %v6026_v19 = vmax.f32 %v10962_v6, 0.0 }
 0xe4e   :  { %v6027_v27 = vmax.f32 %v10964_v23, 0.0 }
 0xe4f   :  { %8705 = dma.done.wait [#allocation6 + $0x2], 24576 }
 0xe50   :  { %8706 = vsyncadd [#allocation6 + $0x2], 4294942720  ;;  %v6033_v43 = vpack.c.bf16 %v6023_v16, %v6023_v16  ;;  %v6039_v3 = vld [vmem:[#allocation4 + $0x8] sm:$0xff]  ;;  %v6041_v46 = vld [vmem:[#allocation4 + $0x18] sm:$0xff] }
 0xe51   :  { %v6038_v57 = vld [vmem:[#allocation4] sm:$0xff]  ;;  %6252 = vmatprep.subr.bf16.mxu1 %v6039_v3  ;;  %6375 = vmatprep.subr.bf16.mxu0 %v6041_v46  ;;  %v6040_v25 = vld [vmem:[#allocation4 + $0x10] sm:$0xff]  ;;  %v6043_v30 = vld [vmem:[#allocation4 + $0x28] sm:$0xff] }
 0xe52   :  { %6284 = vmatprep.mubr.bf16.mxu1 %v6033_v43  ;;  %6407 = vmatprep.mubr.bf16.mxu0 %v6033_v43  ;;  %v6045_v36 = vld [vmem:[#allocation4 + $0x38] sm:$0xff]  ;;  %v6042_v60 = vld [vmem:[#allocation4 + $0x20] sm:$0xff]  ;;  %v6044_v29 = vld [vmem:[#allocation4 + $0x30] sm:$0xff] }
 0xe53   :  { %6253 = vmatpush1.bf16.msra.mxu1 %v6038_v57  ;;  %6376 = vmatpush1.bf16.msra.mxu0 %v6040_v25  ;;  %v6047_v39 = vld [vmem:[#allocation4 + $0x48] sm:$0xff]  ;;  %v6049_v58 = vld [vmem:[#allocation4 + $0x58] sm:$0xff]  ;;  %v6046_v16 = vld [vmem:[#allocation4 + $0x40] sm:$0xff] }
 0xe54   :  { %6254 = vmatprep.subr.bf16.mxu1 %v6043_v30  ;;  %6377 = vmatprep.subr.bf16.mxu0 %v6045_v36  ;;  %v6048_v22 = vld [vmem:[#allocation4 + $0x50] sm:$0xff]  ;;  %v6051_v8 = vld [vmem:[#allocation4 + $0x68] sm:$0xff]  ;;  %v6053_v42 = vld [vmem:[#allocation4 + $0x78] sm:$0xff] }
 0xe55   :  { %v6050_v26 = vld [vmem:[#allocation4 + $0x60] sm:$0xff]  ;;  %v6052_v11 = vld [vmem:[#allocation4 + $0x70] sm:$0xff]  ;;  %v6055_v34 = vld [vmem:[#allocation4 + $0x88] sm:$0xff] }
 0xe56   :  { %v6057_v61 = vld [vmem:[#allocation4 + $0x98] sm:$0xff]  ;;  %v6054_v31 = vld [vmem:[#allocation4 + $0x80] sm:$0xff]  ;;  %v6056_v21 = vld [vmem:[#allocation4 + $0x90] sm:$0xff] }
 0xe57   :  { %6255 = vmatpush1.bf16.msra.mxu1 %v6042_v60  ;;  %6378 = vmatpush1.bf16.msra.mxu0 %v6044_v29  ;;  %v6059_v12 = vld [vmem:[#allocation4 + $0xa8] sm:$0xff]  ;;  %v6061_v5 = vld [vmem:[#allocation4 + $0xb8] sm:$0xff]  ;;  %v6058_v40 = vld [vmem:[#allocation4 + $0xa0] sm:$0xff] }
 0xe58   :  { %6256 = vmatprep.subr.bf16.mxu1 %v6047_v39  ;;  %6379 = vmatprep.subr.bf16.mxu0 %v6049_v58  ;;  %v6060_v4 = vld [vmem:[#allocation4 + $0xb0] sm:$0xff]  ;;  %v6063_v9 = vld [vmem:[#allocation4 + $0xc8] sm:$0xff]  ;;  %v6065_v54 = vld [vmem:[#allocation4 + $0xd8] sm:$0xff] }
 0xe59   :  { %v6062_v28 = vld [vmem:[#allocation4 + $0xc0] sm:$0xff]  ;;  %v6064_v51 = vld [vmem:[#allocation4 + $0xd0] sm:$0xff]  ;;  %v6067_v55 = vld [vmem:[#allocation4 + $0xe8] sm:$0xff] }
 0xe5a   :  { %v6069_v56 = vld [vmem:[#allocation4 + $0xf8] sm:$0xff]  ;;  %v6066_v14 = vld [vmem:[#allocation4 + $0xe0] sm:$0xff]  ;;  %v6068_v15 = vld [vmem:[#allocation4 + $0xf0] sm:$0xff] }
 0xe5b   :  { %6257 = vmatpush1.bf16.msra.mxu1 %v6046_v16  ;;  %6380 = vmatpush1.bf16.msra.mxu0 %v6048_v22  ;;  %v6071_v62 = vld [vmem:[#allocation4 + $0x108] sm:$0xff]  ;;  %v6073_v45 = vld [vmem:[#allocation4 + $0x118] sm:$0xff]  ;;  %v6070_v17 = vld [vmem:[#allocation4 + $0x100] sm:$0xff] }
 0xe5c   :  { %6258 = vmatprep.subr.bf16.mxu1 %v6051_v8  ;;  %6381 = vmatprep.subr.bf16.mxu0 %v6053_v42  ;;  %v6072_v32 = vld [vmem:[#allocation4 + $0x110] sm:$0xff]  ;;  %v6075_v50 = vld [vmem:[#allocation4 + $0x128] sm:$0xff]  ;;  %v6077_v47 = vld [vmem:[#allocation4 + $0x138] sm:$0xff] }
 0xe5d   :  { %v6074_v0 = vld [vmem:[#allocation4 + $0x120] sm:$0xff]  ;;  %v6076_v1 = vld [vmem:[#allocation4 + $0x130] sm:$0xff]  ;;  %v6079_v20 = vld [vmem:[#allocation4 + $0x148] sm:$0xff] }
 0xe5e   :  { %v6081_v18 = vld [vmem:[#allocation4 + $0x158] sm:$0xff]  ;;  %v6078_v13 = vld [vmem:[#allocation4 + $0x140] sm:$0xff]  ;;  %v6080_v44 = vld [vmem:[#allocation4 + $0x150] sm:$0xff] }
 0xe5f   :  { %6259 = vmatpush1.bf16.msra.mxu1 %v6050_v26  ;;  %6382 = vmatpush1.bf16.msra.mxu0 %v6052_v11  ;;  %v6083_v49 = vld [vmem:[#allocation4 + $0x168] sm:$0xff]  ;;  %v6085_v59 = vld [vmem:[#allocation4 + $0x178] sm:$0xff]  ;;  %v6082_v10 = vld [vmem:[#allocation4 + $0x160] sm:$0xff] }
 0xe60   :  { %6260 = vmatprep.subr.bf16.mxu1 %v6055_v34  ;;  %6383 = vmatprep.subr.bf16.mxu0 %v6057_v61  ;;  %v6084_v53 = vld [vmem:[#allocation4 + $0x170] sm:$0xff]  ;;  %v6087_v41 = vld [vmem:[#allocation4 + $0x188] sm:$0xff]  ;;  %v6089_v43 = vld [vmem:[#allocation4 + $0x198] sm:$0xff]  ;;  %v6032_v34 = vpack.c.bf16 %v6022_v35, %v6022_v35 }
 0xe61   :  { %v6086_v3 = vld [vmem:[#allocation4 + $0x180] sm:$0xff]  ;;  %v6088_v46 = vld [vmem:[#allocation4 + $0x190] sm:$0xff]  ;;  %v6091_v57 = vld [vmem:[#allocation4 + $0x1a8] sm:$0xff] }
 0xe62   :  { %v6093_v25 = vld [vmem:[#allocation4 + $0x1b8] sm:$0xff]  ;;  %v6090_v30 = vld [vmem:[#allocation4 + $0x1a0] sm:$0xff]  ;;  %v6092_v36 = vld [vmem:[#allocation4 + $0x1b0] sm:$0xff] }
 0xe63   :  { %6261 = vmatpush1.bf16.msra.mxu1 %v6054_v31  ;;  %6384 = vmatpush1.bf16.msra.mxu0 %v6056_v21  ;;  %v6095_v60 = vld [vmem:[#allocation4 + $0x1c8] sm:$0xff]  ;;  %v6097_v29 = vld [vmem:[#allocation4 + $0x1d8] sm:$0xff]  ;;  %v6094_v39 = vld [vmem:[#allocation4 + $0x1c0] sm:$0xff] }
 0xe64   :  { %6262 = vmatprep.subr.bf16.mxu1 %v6059_v12  ;;  %6385 = vmatprep.subr.bf16.mxu0 %v6061_v5  ;;  %v6096_v58 = vld [vmem:[#allocation4 + $0x1d0] sm:$0xff]  ;;  %v6099_v16 = vld [vmem:[#allocation4 + $0x1e8] sm:$0xff]  ;;  %v6101_v22 = vld [vmem:[#allocation4 + $0x1f8] sm:$0xff]  ;;  %v6035_v5 = vpack.c.bf16 %v6025_v24, %v6025_v24 }
 0xe65   :  { %v6098_v8 = vld [vmem:[#allocation4 + $0x1e0] sm:$0xff]  ;;  %v6100_v42 = vld [vmem:[#allocation4 + $0x1f0] sm:$0xff]  ;;  %v6103_v26 = vld [vmem:[#allocation4 + $0x208] sm:$0xff] }
 0xe66   :  { %v6105_v11 = vld [vmem:[#allocation4 + $0x218] sm:$0xff]  ;;  %v6102_v61 = vld [vmem:[#allocation4 + $0x200] sm:$0xff]  ;;  %v6104_v31 = vld [vmem:[#allocation4 + $0x210] sm:$0xff] }
 0xe67   :  { %6263 = vmatpush1.bf16.msra.mxu1 %v6058_v40  ;;  %6386 = vmatpush1.bf16.msra.mxu0 %v6060_v4  ;;  %v6107_v21 = vld [vmem:[#allocation4 + $0x228] sm:$0xff]  ;;  %v6109_v12 = vld [vmem:[#allocation4 + $0x238] sm:$0xff]  ;;  %v6106_v37 = vld [vmem:[#allocation4 + $0x220] sm:$0xff] }
 0xe68   :  { %6264 = vmatprep.subr.bf16.mxu1 %v6063_v9  ;;  %6387 = vmatprep.subr.bf16.mxu0 %v6065_v54  ;;  %v6108_v35 = vld [vmem:[#allocation4 + $0x230] sm:$0xff]  ;;  %v6111_v40 = vld [vmem:[#allocation4 + $0x248] sm:$0xff]  ;;  %v6113_v4 = vld [vmem:[#allocation4 + $0x258] sm:$0xff] }
 0xe69   :  { %v6110_v9 = vld [vmem:[#allocation4 + $0x240] sm:$0xff]  ;;  %v6112_v63 = vld [vmem:[#allocation4 + $0x250] sm:$0xff]  ;;  %v6115_v54 = vld [vmem:[#allocation4 + $0x268] sm:$0xff] }
 0xe6a   :  { %v6117_v24 = vld [vmem:[#allocation4 + $0x278] sm:$0xff]  ;;  %v6170_v33 = vld [vmem:[#allocation4 + $0x420] sm:$0xff]  ;;  %v6176_v23 = vld [vmem:[#allocation4 + $0x450] sm:$0xff] }
 0xe6b   :  { %6265 = vmatpush1.bf16.msra.mxu1 %v6062_v28  ;;  %6388 = vmatpush1.bf16.msra.mxu0 %v6064_v51  ;;  %v6114_v28 = vld [vmem:[#allocation4 + $0x260] sm:$0xff]  ;;  %v6116_v51 = vld [vmem:[#allocation4 + $0x270] sm:$0xff] }
 0xe6c   :  { %6266 = vmatprep.subr.bf16.mxu1 %v6067_v55  ;;  %6389 = vmatprep.subr.bf16.mxu0 %v6069_v56  ;;  %v6119_v55 = vld [vmem:[#allocation4 + $0x288] sm:$0xff]  ;;  %v6121_v56 = vld [vmem:[#allocation4 + $0x298] sm:$0xff] }
 0xe6f   :  { %6267 = vmatpush1.bf16.msra.mxu1 %v6066_v14  ;;  %6390 = vmatpush1.bf16.msra.mxu0 %v6068_v15  ;;  %v6118_v14 = vld [vmem:[#allocation4 + $0x280] sm:$0xff]  ;;  %v6120_v15 = vld [vmem:[#allocation4 + $0x290] sm:$0xff] }
 0xe70   :  { %6268 = vmatprep.subr.bf16.mxu1 %v6071_v62  ;;  %6391 = vmatprep.subr.bf16.mxu0 %v6073_v45  ;;  %v6123_v62 = vld [vmem:[#allocation4 + $0x2a8] sm:$0xff]  ;;  %v6125_v45 = vld [vmem:[#allocation4 + $0x2b8] sm:$0xff] }
 0xe73   :  { %6269 = vmatpush1.bf16.msra.mxu1 %v6070_v17  ;;  %6392 = vmatpush1.bf16.msra.mxu0 %v6072_v32  ;;  %v6122_v17 = vld [vmem:[#allocation4 + $0x2a0] sm:$0xff]  ;;  %v6124_v32 = vld [vmem:[#allocation4 + $0x2b0] sm:$0xff] }
 0xe74   :  { %6270 = vmatprep.subr.bf16.mxu1 %v6075_v50  ;;  %6393 = vmatprep.subr.bf16.mxu0 %v6077_v47  ;;  %v6127_v50 = vld [vmem:[#allocation4 + $0x2c8] sm:$0xff]  ;;  %v6129_v47 = vld [vmem:[#allocation4 + $0x2d8] sm:$0xff] }
 0xe77   :  { %6271 = vmatpush1.bf16.msra.mxu1 %v6074_v0  ;;  %6394 = vmatpush1.bf16.msra.mxu0 %v6076_v1  ;;  %v6126_v0 = vld [vmem:[#allocation4 + $0x2c0] sm:$0xff]  ;;  %v6128_v1 = vld [vmem:[#allocation4 + $0x2d0] sm:$0xff] }
 0xe78   :  { %6272 = vmatprep.subr.bf16.mxu1 %v6079_v20  ;;  %6395 = vmatprep.subr.bf16.mxu0 %v6081_v18  ;;  %v6131_v20 = vld [vmem:[#allocation4 + $0x2e8] sm:$0xff]  ;;  %v6133_v18 = vld [vmem:[#allocation4 + $0x2f8] sm:$0xff] }
 0xe7b   :  { %6273 = vmatpush1.bf16.msra.mxu1 %v6078_v13  ;;  %6396 = vmatpush1.bf16.msra.mxu0 %v6080_v44  ;;  %v6130_v13 = vld [vmem:[#allocation4 + $0x2e0] sm:$0xff]  ;;  %v6132_v44 = vld [vmem:[#allocation4 + $0x2f0] sm:$0xff] }
 0xe7c   :  { %6274 = vmatprep.subr.bf16.mxu1 %v6083_v49  ;;  %6397 = vmatprep.subr.bf16.mxu0 %v6085_v59  ;;  %v6135_v49 = vld [vmem:[#allocation4 + $0x308] sm:$0xff]  ;;  %v6137_v59 = vld [vmem:[#allocation4 + $0x318] sm:$0xff] }
 0xe7f   :  { %6275 = vmatpush1.bf16.msra.mxu1 %v6082_v10  ;;  %6398 = vmatpush1.bf16.msra.mxu0 %v6084_v53  ;;  %v6134_v10 = vld [vmem:[#allocation4 + $0x300] sm:$0xff]  ;;  %v6136_v53 = vld [vmem:[#allocation4 + $0x310] sm:$0xff] }
 0xe80   :  { %6276 = vmatprep.subr.bf16.mxu1 %v6087_v41  ;;  %6399 = vmatprep.subr.bf16.mxu0 %v6089_v43  ;;  %v6139_v41 = vld [vmem:[#allocation4 + $0x328] sm:$0xff]  ;;  %v6141_v43 = vld [vmem:[#allocation4 + $0x338] sm:$0xff] }
 0xe83   :  { %6277 = vmatpush1.bf16.msra.mxu1 %v6086_v3  ;;  %6400 = vmatpush1.bf16.msra.mxu0 %v6088_v46  ;;  %v6138_v3 = vld [vmem:[#allocation4 + $0x320] sm:$0xff]  ;;  %v6140_v46 = vld [vmem:[#allocation4 + $0x330] sm:$0xff] }
 0xe84   :  { %6278 = vmatprep.subr.bf16.mxu1 %v6091_v57  ;;  %6401 = vmatprep.subr.bf16.mxu0 %v6093_v25  ;;  %v6143_v57 = vld [vmem:[#allocation4 + $0x348] sm:$0xff]  ;;  %v6145_v25 = vld [vmem:[#allocation4 + $0x358] sm:$0xff] }
 0xe87   :  { %6279 = vmatpush1.bf16.msra.mxu1 %v6090_v30  ;;  %6402 = vmatpush1.bf16.msra.mxu0 %v6092_v36  ;;  %v6142_v30 = vld [vmem:[#allocation4 + $0x340] sm:$0xff]  ;;  %v6144_v36 = vld [vmem:[#allocation4 + $0x350] sm:$0xff] }
 0xe88   :  { %6280 = vmatprep.subr.bf16.mxu1 %v6095_v60  ;;  %6403 = vmatprep.subr.bf16.mxu0 %v6097_v29  ;;  %v6147_v60 = vld [vmem:[#allocation4 + $0x368] sm:$0xff]  ;;  %v6149_v29 = vld [vmem:[#allocation4 + $0x378] sm:$0xff] }
 0xe8b   :  { %6281 = vmatpush1.bf16.msra.mxu1 %v6094_v39  ;;  %6404 = vmatpush1.bf16.msra.mxu0 %v6096_v58  ;;  %v6146_v39 = vld [vmem:[#allocation4 + $0x360] sm:$0xff]  ;;  %v6148_v58 = vld [vmem:[#allocation4 + $0x370] sm:$0xff] }
 0xe8c   :  { %6282 = vmatprep.subr.bf16.mxu1 %v6099_v16  ;;  %6405 = vmatprep.subr.bf16.mxu0 %v6101_v22  ;;  %v6151_v16 = vld [vmem:[#allocation4 + $0x388] sm:$0xff]  ;;  %v6153_v22 = vld [vmem:[#allocation4 + $0x398] sm:$0xff] }
 0xe8f   :  { %6283 = vmatpush1.bf16.msra.mxu1 %v6098_v8  ;;  %6406 = vmatpush1.bf16.msra.mxu0 %v6100_v42  ;;  %v6150_v8 = vld [vmem:[#allocation4 + $0x380] sm:$0xff]  ;;  %v6152_v42 = vld [vmem:[#allocation4 + $0x390] sm:$0xff] }
 0xe90   :  { %6293 = vmatprep.subr.bf16.mxu1 %v6103_v26  ;;  %6416 = vmatprep.subr.bf16.mxu0 %v6105_v11  ;;  %v6155_v26 = vld [vmem:[#allocation4 + $0x3a8] sm:$0xff]  ;;  %v6157_v11 = vld [vmem:[#allocation4 + $0x3b8] sm:$0xff] }
 0xe92   :  { %6285 = vmatmul.mubr.bf16.vlgmr.msra.gmra.mrb[124].mxu1 %v6032_v34  ;;  %6408 = vmatmul.mubr.bf16.vlgmr.msra.gmra.mrb[128].mxu0 %v6032_v34  ;;  %v6154_v34 = vld [vmem:[#allocation4 + $0x3a0] sm:$0xff] }
 0xe93   :  { %6294 = vmatpush1.bf16.msra.mxu1 %v6102_v61  ;;  %6417 = vmatpush1.bf16.msra.mxu0 %v6104_v31  ;;  %v6156_v61 = vld [vmem:[#allocation4 + $0x3b0] sm:$0xff]  ;;  %v6159_v31 = vld [vmem:[#allocation4 + $0x3c8] sm:$0xff] }
 0xe94   :  { %6295 = vmatprep.subr.bf16.mxu1 %v6107_v21  ;;  %6418 = vmatprep.subr.bf16.mxu0 %v6109_v12  ;;  %v6161_v21 = vld [vmem:[#allocation4 + $0x3d8] sm:$0xff]  ;;  %v6158_v12 = vld [vmem:[#allocation4 + $0x3c0] sm:$0xff] }
 0xe95   :  { %6325 = vmatprep.mubr.bf16.mxu1 %v6035_v5  ;;  %6448 = vmatprep.mubr.bf16.mxu0 %v6035_v5  ;;  %v6160_v5 = vld [vmem:[#allocation4 + $0x3d0] sm:$0xff] }
 0xe97   :  { %6296 = vmatpush1.bf16.msra.mxu1 %v6106_v37  ;;  %6419 = vmatpush1.bf16.msra.mxu0 %v6108_v35  ;;  %v6163_v37 = vld [vmem:[#allocation4 + $0x3e8] sm:$0xff]  ;;  %v6165_v35 = vld [vmem:[#allocation4 + $0x3f8] sm:$0xff] }
 0xe98   :  { %6297 = vmatprep.subr.bf16.mxu1 %v6111_v40  ;;  %6420 = vmatprep.subr.bf16.mxu0 %v6113_v4  ;;  %v6162_v40 = vld [vmem:[#allocation4 + $0x3e0] sm:$0xff]  ;;  %v6164_v4 = vld [vmem:[#allocation4 + $0x3f0] sm:$0xff] }
 0xe9b   :  { %6298 = vmatpush1.bf16.msra.mxu1 %v6110_v9  ;;  %6421 = vmatpush1.bf16.msra.mxu0 %v6112_v63  ;;  %v6167_v9 = vld [vmem:[#allocation4 + $0x408] sm:$0xff]  ;;  %v6169_v63 = vld [vmem:[#allocation4 + $0x418] sm:$0xff] }
 0xe9c   :  { %6299 = vmatprep.subr.bf16.mxu1 %v6115_v54  ;;  %6422 = vmatprep.subr.bf16.mxu0 %v6117_v24  ;;  %v6034_v54 = vpack.c.bf16 %v6024_v38, %v6024_v38  ;;  %v6166_v24 = vld [vmem:[#allocation4 + $0x400] sm:$0xff]  ;;  %v6172_v38 = vld [vmem:[#allocation4 + $0x430] sm:$0xff] }
 0xe9f   :  { %6300 = vmatpush1.bf16.msra.mxu1 %v6114_v28  ;;  %6423 = vmatpush1.bf16.msra.mxu0 %v6116_v51  ;;  %v6168_v28 = vld [vmem:[#allocation4 + $0x410] sm:$0xff]  ;;  %v6171_v51 = vld [vmem:[#allocation4 + $0x428] sm:$0xff] }
 0xea0   :  { %6301 = vmatprep.subr.bf16.mxu1 %v6119_v55  ;;  %6424 = vmatprep.subr.bf16.mxu0 %v6121_v56  ;;  %v6173_v55 = vld [vmem:[#allocation4 + $0x438] sm:$0xff]  ;;  %v6037_v56 = vpack.c.bf16 %v6027_v27, %v6027_v27 }
 0xea1   :  { %v6181_v27 = vld [vmem:[#allocation4 + $0x478] sm:$0xff] }
 0xea3   :  { %6302 = vmatpush1.bf16.msra.mxu1 %v6118_v14  ;;  %6425 = vmatpush1.bf16.msra.mxu0 %v6120_v15  ;;  %v6175_v14 = vld [vmem:[#allocation4 + $0x448] sm:$0xff]  ;;  %v6177_v15 = vld [vmem:[#allocation4 + $0x458] sm:$0xff] }
 0xea4   :  { %6303 = vmatprep.subr.bf16.mxu1 %v6123_v62  ;;  %6426 = vmatprep.subr.bf16.mxu0 %v6125_v45  ;;  %v6174_v62 = vld [vmem:[#allocation4 + $0x440] sm:$0xff]  ;;  %v6179_v45 = vld [vmem:[#allocation4 + $0x468] sm:$0xff] }
 0xea7   :  { %6304 = vmatpush1.bf16.msra.mxu1 %v6122_v17  ;;  %6427 = vmatpush1.bf16.msra.mxu0 %v6124_v32  ;;  %v6178_v17 = vld [vmem:[#allocation4 + $0x460] sm:$0xff]  ;;  %v6180_v32 = vld [vmem:[#allocation4 + $0x470] sm:$0xff] }
 0xea8   :  { %6305 = vmatprep.subr.bf16.mxu1 %v6127_v50  ;;  %6428 = vmatprep.subr.bf16.mxu0 %v6129_v47  ;;  %v6183_v50 = vld [vmem:[#allocation4 + $0x488] sm:$0xff]  ;;  %v6185_v47 = vld [vmem:[#allocation4 + $0x498] sm:$0xff] }
 0xeab   :  { %6306 = vmatpush1.bf16.msra.mxu1 %v6126_v0  ;;  %6429 = vmatpush1.bf16.msra.mxu0 %v6128_v1  ;;  %v6182_v0 = vld [vmem:[#allocation4 + $0x480] sm:$0xff]  ;;  %v6184_v1 = vld [vmem:[#allocation4 + $0x490] sm:$0xff] }
 0xeac   :  { %6307 = vmatprep.subr.bf16.mxu1 %v6131_v20  ;;  %6430 = vmatprep.subr.bf16.mxu0 %v6133_v18  ;;  %v6187_v20 = vld [vmem:[#allocation4 + $0x4a8] sm:$0xff]  ;;  %v6189_v18 = vld [vmem:[#allocation4 + $0x4b8] sm:$0xff] }
 0xeaf   :  { %6308 = vmatpush1.bf16.msra.mxu1 %v6130_v13  ;;  %6431 = vmatpush1.bf16.msra.mxu0 %v6132_v44  ;;  %v6186_v13 = vld [vmem:[#allocation4 + $0x4a0] sm:$0xff]  ;;  %v6188_v44 = vld [vmem:[#allocation4 + $0x4b0] sm:$0xff] }
 0xeb0   :  { %6309 = vmatprep.subr.bf16.mxu1 %v6135_v49  ;;  %6432 = vmatprep.subr.bf16.mxu0 %v6137_v59  ;;  %v6191_v49 = vld [vmem:[#allocation4 + $0x4c8] sm:$0xff]  ;;  %v6193_v59 = vld [vmem:[#allocation4 + $0x4d8] sm:$0xff] }
 0xeb3   :  { %6310 = vmatpush1.bf16.msra.mxu1 %v6134_v10  ;;  %6433 = vmatpush1.bf16.msra.mxu0 %v6136_v53  ;;  %v6190_v10 = vld [vmem:[#allocation4 + $0x4c0] sm:$0xff]  ;;  %v6192_v53 = vld [vmem:[#allocation4 + $0x4d0] sm:$0xff] }
 0xeb4   :  { %6311 = vmatprep.subr.bf16.mxu1 %v6139_v41  ;;  %6434 = vmatprep.subr.bf16.mxu0 %v6141_v43  ;;  %v6195_v41 = vld [vmem:[#allocation4 + $0x4e8] sm:$0xff]  ;;  %v6197_v43 = vld [vmem:[#allocation4 + $0x4f8] sm:$0xff] }
 0xeb7   :  { %6312 = vmatpush1.bf16.msra.mxu1 %v6138_v3  ;;  %6435 = vmatpush1.bf16.msra.mxu0 %v6140_v46  ;;  %v6194_v3 = vld [vmem:[#allocation4 + $0x4e0] sm:$0xff]  ;;  %v6196_v46 = vld [vmem:[#allocation4 + $0x4f0] sm:$0xff] }
 0xeb8   :  { %6313 = vmatprep.subr.bf16.mxu1 %v6143_v57  ;;  %6436 = vmatprep.subr.bf16.mxu0 %v6145_v25  ;;  %v6199_v57 = vld [vmem:[#allocation4 + $0x508] sm:$0xff]  ;;  %v6201_v25 = vld [vmem:[#allocation4 + $0x518] sm:$0xff] }
 0xebb   :  { %6314 = vmatpush1.bf16.msra.mxu1 %v6142_v30  ;;  %6437 = vmatpush1.bf16.msra.mxu0 %v6144_v36  ;;  %v6198_v30 = vld [vmem:[#allocation4 + $0x500] sm:$0xff]  ;;  %v6200_v36 = vld [vmem:[#allocation4 + $0x510] sm:$0xff] }
 0xebc   :  { %6315 = vmatprep.subr.bf16.mxu1 %v6147_v60  ;;  %6438 = vmatprep.subr.bf16.mxu0 %v6149_v29  ;;  %v6203_v60 = vld [vmem:[#allocation4 + $0x528] sm:$0xff]  ;;  %v6205_v29 = vld [vmem:[#allocation4 + $0x538] sm:$0xff] }
 0xebf   :  { %6316 = vmatpush1.bf16.msra.mxu1 %v6146_v39  ;;  %6439 = vmatpush1.bf16.msra.mxu0 %v6148_v58  ;;  %v6202_v39 = vld [vmem:[#allocation4 + $0x520] sm:$0xff]  ;;  %v6204_v58 = vld [vmem:[#allocation4 + $0x530] sm:$0xff] }
 0xec0   :  { %6317 = vmatprep.subr.bf16.mxu1 %v6151_v16  ;;  %6440 = vmatprep.subr.bf16.mxu0 %v6153_v22  ;;  %v6207_v16 = vld [vmem:[#allocation4 + $0x548] sm:$0xff]  ;;  %v6209_v22 = vld [vmem:[#allocation4 + $0x558] sm:$0xff] }
 0xec3   :  { %6318 = vmatpush1.bf16.msra.mxu1 %v6150_v8  ;;  %6441 = vmatpush1.bf16.msra.mxu0 %v6152_v42  ;;  %v6206_v8 = vld [vmem:[#allocation4 + $0x540] sm:$0xff]  ;;  %v6208_v42 = vld [vmem:[#allocation4 + $0x550] sm:$0xff] }
 0xec4   :  { %6319 = vmatprep.subr.bf16.mxu1 %v6155_v26  ;;  %6442 = vmatprep.subr.bf16.mxu0 %v6157_v11  ;;  %v6211_v26 = vld [vmem:[#allocation4 + $0x568] sm:$0xff]  ;;  %v6213_v11 = vld [vmem:[#allocation4 + $0x578] sm:$0xff] }
 0xec7   :  { %6320 = vmatpush1.bf16.msra.mxu1 %v6154_v34  ;;  %6443 = vmatpush1.bf16.msra.mxu0 %v6156_v61  ;;  %v6210_v34 = vld [vmem:[#allocation4 + $0x560] sm:$0xff]  ;;  %v6212_v61 = vld [vmem:[#allocation4 + $0x570] sm:$0xff] }
 0xec8   :  { %6321 = vmatprep.subr.bf16.mxu1 %v6159_v31  ;;  %6444 = vmatprep.subr.bf16.mxu0 %v6161_v21  ;;  %v6215_v31 = vld [vmem:[#allocation4 + $0x588] sm:$0xff]  ;;  %v6217_v21 = vld [vmem:[#allocation4 + $0x598] sm:$0xff] }
 0xecb   :  { %6322 = vmatpush1.bf16.msra.mxu1 %v6158_v12  ;;  %6445 = vmatpush1.bf16.msra.mxu0 %v6160_v5  ;;  %v6214_v12 = vld [vmem:[#allocation4 + $0x580] sm:$0xff]  ;;  %v6216_v5 = vld [vmem:[#allocation4 + $0x590] sm:$0xff] }
 0xecc   :  { %6323 = vmatprep.subr.bf16.mxu1 %v6163_v37  ;;  %6446 = vmatprep.subr.bf16.mxu0 %v6165_v35  ;;  %v6219_v37 = vld [vmem:[#allocation4 + $0x5a8] sm:$0xff]  ;;  %v6221_v35 = vld [vmem:[#allocation4 + $0x5b8] sm:$0xff] }
 0xecf   :  { %6324 = vmatpush1.bf16.msra.mxu1 %v6162_v40  ;;  %6447 = vmatpush1.bf16.msra.mxu0 %v6164_v4  ;;  %v6218_v40 = vld [vmem:[#allocation4 + $0x5a0] sm:$0xff]  ;;  %v6220_v4 = vld [vmem:[#allocation4 + $0x5b0] sm:$0xff] }
 0xed0   :  { %6334 = vmatprep.subr.bf16.mxu1 %v6167_v9  ;;  %6457 = vmatprep.subr.bf16.mxu0 %v6169_v63  ;;  %v6223_v9 = vld [vmem:[#allocation4 + $0x5c8] sm:$0xff]  ;;  %v6225_v63 = vld [vmem:[#allocation4 + $0x5d8] sm:$0xff] }
 0xed2   :  { %6326 = vmatmul.mubr.bf16.vlgmr.msra.gmra.mrb[124].mxu1 %v6034_v54  ;;  %6449 = vmatmul.mubr.bf16.vlgmr.msra.gmra.mrb[128].mxu0 %v6034_v54  ;;  %v6222_v54 = vld [vmem:[#allocation4 + $0x5c0] sm:$0xff] }
 0xed3   :  { %6335 = vmatpush1.bf16.msra.mxu1 %v6166_v24  ;;  %6458 = vmatpush1.bf16.msra.mxu0 %v6168_v28  ;;  %v6224_v24 = vld [vmem:[#allocation4 + $0x5d0] sm:$0xff]  ;;  %v6227_v28 = vld [vmem:[#allocation4 + $0x5e8] sm:$0xff] }
 0xed4   :  { %6336 = vmatprep.subr.bf16.mxu1 %v6171_v51  ;;  %6459 = vmatprep.subr.bf16.mxu0 %v6173_v55  ;;  %v6229_v51 = vld [vmem:[#allocation4 + $0x5f8] sm:$0xff]  ;;  %v6226_v55 = vld [vmem:[#allocation4 + $0x5e0] sm:$0xff] }
 0xed5   :  { %6366 = vmatprep.mubr.bf16.mxu1 %v6037_v56  ;;  %6489 = vmatprep.mubr.bf16.mxu0 %v6037_v56  ;;  %v6228_v56 = vld [vmem:[#allocation4 + $0x5f0] sm:$0xff] }
 0xed7   :  { %6337 = vmatpush1.bf16.msra.mxu1 %v6170_v33  ;;  %6460 = vmatpush1.bf16.msra.mxu0 %v6172_v38  ;;  %v6036_v33 = vpack.c.bf16 %v6026_v19, %v6026_v19  ;;  %v6230_v38 = vld [vmem:[#allocation15] sm:$0xf] }
 0xed8   :  { %6338 = vmatprep.subr.bf16.mxu1 %v6175_v14  ;;  %6461 = vmatprep.subr.bf16.mxu0 %v6177_v15  ;;  %v6235_v14 = vrot.slane %v6230_v38, %v12211_v7  ;;  %v6243_v15 = vrot.slane %v6230_v38, %v12213_v48 }
 0xedb   :  { %6339 = vmatpush1.bf16.msra.mxu1 %v6174_v62  ;;  %6462 = vmatpush1.bf16.msra.mxu0 %v6176_v23  ;;  %v6239_v62 = vrot.slane %v6230_v38, %v12212_v2  ;;  %v6247_v23 = vrot.slane %v6230_v38, %v12214_v52 }
 0xedc   :  { %6340 = vmatprep.subr.bf16.mxu1 %v6179_v45  ;;  %6463 = vmatprep.subr.bf16.mxu0 %v6181_v27 }
 0xedf   :  { %6341 = vmatpush1.bf16.msra.mxu1 %v6178_v17  ;;  %6464 = vmatpush1.bf16.msra.mxu0 %v6180_v32 }
 0xee0   :  { %6342 = vmatprep.subr.bf16.mxu1 %v6183_v50  ;;  %6465 = vmatprep.subr.bf16.mxu0 %v6185_v47 }
 0xee3   :  { %6343 = vmatpush1.bf16.msra.mxu1 %v6182_v0  ;;  %6466 = vmatpush1.bf16.msra.mxu0 %v6184_v1 }
 0xee4   :  { %6344 = vmatprep.subr.bf16.mxu1 %v6187_v20  ;;  %6467 = vmatprep.subr.bf16.mxu0 %v6189_v18 }
 0xee7   :  { %6345 = vmatpush1.bf16.msra.mxu1 %v6186_v13  ;;  %6468 = vmatpush1.bf16.msra.mxu0 %v6188_v44 }
 0xee8   :  { %6346 = vmatprep.subr.bf16.mxu1 %v6191_v49  ;;  %6469 = vmatprep.subr.bf16.mxu0 %v6193_v59 }
 0xeeb   :  { %6347 = vmatpush1.bf16.msra.mxu1 %v6190_v10  ;;  %6470 = vmatpush1.bf16.msra.mxu0 %v6192_v53 }
 0xeec   :  { %6348 = vmatprep.subr.bf16.mxu1 %v6195_v41  ;;  %6471 = vmatprep.subr.bf16.mxu0 %v6197_v43 }
 0xeef   :  { %6349 = vmatpush1.bf16.msra.mxu1 %v6194_v3  ;;  %6472 = vmatpush1.bf16.msra.mxu0 %v6196_v46 }
 0xef0   :  { %6350 = vmatprep.subr.bf16.mxu1 %v6199_v57  ;;  %6473 = vmatprep.subr.bf16.mxu0 %v6201_v25 }
 0xef3   :  { %6351 = vmatpush1.bf16.msra.mxu1 %v6198_v30  ;;  %6474 = vmatpush1.bf16.msra.mxu0 %v6200_v36 }
 0xef4   :  { %6352 = vmatprep.subr.bf16.mxu1 %v6203_v60  ;;  %6475 = vmatprep.subr.bf16.mxu0 %v6205_v29 }
 0xef7   :  { %6353 = vmatpush1.bf16.msra.mxu1 %v6202_v39  ;;  %6476 = vmatpush1.bf16.msra.mxu0 %v6204_v58 }
 0xef8   :  { %6354 = vmatprep.subr.bf16.mxu1 %v6207_v16  ;;  %6477 = vmatprep.subr.bf16.mxu0 %v6209_v22 }
 0xefb   :  { %6355 = vmatpush1.bf16.msra.mxu1 %v6206_v8  ;;  %6478 = vmatpush1.bf16.msra.mxu0 %v6208_v42 }
 0xefc   :  { %6356 = vmatprep.subr.bf16.mxu1 %v6211_v26  ;;  %6479 = vmatprep.subr.bf16.mxu0 %v6213_v11 }
 0xeff   :  { %6357 = vmatpush1.bf16.msra.mxu1 %v6210_v34  ;;  %6480 = vmatpush1.bf16.msra.mxu0 %v6212_v61 }
 0xf00   :  { %6358 = vmatprep.subr.bf16.mxu1 %v6215_v31  ;;  %6481 = vmatprep.subr.bf16.mxu0 %v6217_v21 }
 0xf03   :  { %6359 = vmatpush1.bf16.msra.mxu1 %v6214_v12  ;;  %6482 = vmatpush1.bf16.msra.mxu0 %v6216_v5 }
 0xf04   :  { %6360 = vmatprep.subr.bf16.mxu1 %v6219_v37  ;;  %6483 = vmatprep.subr.bf16.mxu0 %v6221_v35 }
 0xf07   :  { %6361 = vmatpush1.bf16.msra.mxu1 %v6218_v40  ;;  %6484 = vmatpush1.bf16.msra.mxu0 %v6220_v4 }
 0xf08   :  { %6362 = vmatprep.subr.bf16.mxu1 %v6223_v9  ;;  %6485 = vmatprep.subr.bf16.mxu0 %v6225_v63 }
 0xf0b   :  { %6363 = vmatpush1.bf16.msra.mxu1 %v6222_v54  ;;  %6486 = vmatpush1.bf16.msra.mxu0 %v6224_v24 }
 0xf0c   :  { %6364 = vmatprep.subr.bf16.mxu1 %v6227_v28  ;;  %6487 = vmatprep.subr.bf16.mxu0 %v6229_v51 }
 0xf0f   :  { %6365 = vmatpush1.bf16.msra.mxu1 %v6226_v55  ;;  %6488 = vmatpush1.bf16.msra.mxu0 %v6228_v56 }
 0xf12   :  { %6367 = vmatmul.mubr.bf16.vlgmr.msra.gmra.mrb[124].mxu1 %v6036_v33  ;;  %6490 = vmatmul.mubr.bf16.vlgmr.msra.gmra.mrb[128].mxu0 %v6036_v33 }
 0xfe5   :  { %v6368_v45 = vpop.f32.mrb[124].mxu1  ;;  %v6491_v27 = vpop.f32.mrb[128].mxu0 }
 0xfe6   :  { %v10990_v17 = vadd.f32 %v6368_v45, %v6235_v14  ;;  %v10992_v6 = vadd.f32 %v6491_v27, %v6243_v15  ;;  %v6370_v19 = vpop.f32.mrb[125].mxu1  ;;  %v6493_v32 = vpop.f32.mrb[129].mxu0 }
 0xfe7   :  { %v8062_v50 = vadd.f32 %v6370_v19, %v6239_v62  ;;  %v10994_v47 = vadd.f32 %v6493_v32, %v6247_v23  ;;  %v6372_v0 = vpop.f32.mrb[126].mxu1  ;;  %v6495_v1 = vpop.f32.mrb[130].mxu0 }
 0xfe8   :  { %v6498_v20 = vmax.f32 %v10990_v17, 0.0  ;;  %v6500_v18 = vmax.f32 %v10992_v6, 0.0  ;;  %v6373_v13 = vpop.f32.mrb[127].mxu1  ;;  %v6496_v44 = vpop.f32.mrb[131].mxu0 }
 0xfe9   :  { %v6499_v49 = vmax.f32 %v8062_v50, 0.0  ;;  %v6501_v59 = vmax.f32 %v10994_v47, 0.0 }
 0xfea   :  { %8707 = dma.done.wait [#allocation6 + $0x3], 49152 }
 0xfeb   :  { %8708 = vsyncadd [#allocation6 + $0x3], 4294918144  ;;  %v6508_v10 = vpack.c.bf16 %v6499_v49, %v6499_v49  ;;  %v6512_v53 = vld [vmem:[#allocation5 + $0x8] sm:$0xff]  ;;  %v6514_v41 = vld [vmem:[#allocation5 + $0x18] sm:$0xff]  ;;  %vm7514_vm1 = vcmask 7168  }
 0xfec   :  { %v6511_v43 = vld [vmem:[#allocation5] sm:$0xff]  ;;  %6661 = vmatprep.subr.bf16.mxu1 %v6512_v53  ;;  %6743 = vmatprep.subr.bf16.mxu0 %v6514_v41  ;;  %v6513_v3 = vld [vmem:[#allocation5 + $0x10] sm:$0xff]  ;;  %v6516_v46 = vld [vmem:[#allocation5 + $0x28] sm:$0xff] }
 0xfed   :  { %6693 = vmatprep.mubr.bf16.mxu1 %v6508_v10  ;;  %6775 = vmatprep.mubr.bf16.mxu0 %v6508_v10  ;;  %v6518_v57 = vld [vmem:[#allocation5 + $0x38] sm:$0xff]  ;;  %v6515_v25 = vld [vmem:[#allocation5 + $0x20] sm:$0xff]  ;;  %v6517_v30 = vld [vmem:[#allocation5 + $0x30] sm:$0xff] }
 0xfee   :  { %6662 = vmatpush1.bf16.msra.mxu1 %v6511_v43  ;;  %6744 = vmatpush1.bf16.msra.mxu0 %v6513_v3  ;;  %v6520_v36 = vld [vmem:[#allocation5 + $0x48] sm:$0xff]  ;;  %v6522_v60 = vld [vmem:[#allocation5 + $0x58] sm:$0xff]  ;;  %v6519_v29 = vld [vmem:[#allocation5 + $0x40] sm:$0xff] }
 0xfef   :  { %6663 = vmatprep.subr.bf16.mxu1 %v6516_v46  ;;  %6745 = vmatprep.subr.bf16.mxu0 %v6518_v57  ;;  %v6521_v39 = vld [vmem:[#allocation5 + $0x50] sm:$0xff]  ;;  %v6524_v58 = vld [vmem:[#allocation5 + $0x68] sm:$0xff]  ;;  %v6526_v16 = vld [vmem:[#allocation5 + $0x78] sm:$0xff] }
 0xff0   :  { %v6523_v22 = vld [vmem:[#allocation5 + $0x60] sm:$0xff]  ;;  %v6525_v8 = vld [vmem:[#allocation5 + $0x70] sm:$0xff]  ;;  %v6528_v42 = vld [vmem:[#allocation5 + $0x88] sm:$0xff] }
 0xff1   :  { %v6530_v26 = vld [vmem:[#allocation5 + $0x98] sm:$0xff]  ;;  %v6527_v11 = vld [vmem:[#allocation5 + $0x80] sm:$0xff]  ;;  %v6529_v34 = vld [vmem:[#allocation5 + $0x90] sm:$0xff] }
 0xff2   :  { %6664 = vmatpush1.bf16.msra.mxu1 %v6515_v25  ;;  %6746 = vmatpush1.bf16.msra.mxu0 %v6517_v30  ;;  %v6532_v61 = vld [vmem:[#allocation5 + $0xa8] sm:$0xff]  ;;  %v6534_v31 = vld [vmem:[#allocation5 + $0xb8] sm:$0xff]  ;;  %v6531_v21 = vld [vmem:[#allocation5 + $0xa0] sm:$0xff] }
 0xff3   :  { %6665 = vmatprep.subr.bf16.mxu1 %v6520_v36  ;;  %6747 = vmatprep.subr.bf16.mxu0 %v6522_v60  ;;  %v6533_v12 = vld [vmem:[#allocation5 + $0xb0] sm:$0xff]  ;;  %v6536_v5 = vld [vmem:[#allocation5 + $0xc8] sm:$0xff]  ;;  %v6538_v37 = vld [vmem:[#allocation5 + $0xd8] sm:$0xff] }
 0xff4   :  { %v6535_v35 = vld [vmem:[#allocation5 + $0xc0] sm:$0xff]  ;;  %v6537_v40 = vld [vmem:[#allocation5 + $0xd0] sm:$0xff]  ;;  %v6540_v4 = vld [vmem:[#allocation5 + $0xe8] sm:$0xff] }
 0xff5   :  { %v6542_v9 = vld [vmem:[#allocation5 + $0xf8] sm:$0xff]  ;;  %v6539_v63 = vld [vmem:[#allocation5 + $0xe0] sm:$0xff]  ;;  %v6541_v54 = vld [vmem:[#allocation5 + $0xf0] sm:$0xff] }
 0xff6   :  { %6666 = vmatpush1.bf16.msra.mxu1 %v6519_v29  ;;  %6748 = vmatpush1.bf16.msra.mxu0 %v6521_v39  ;;  %v6544_v24 = vld [vmem:[#allocation5 + $0x108] sm:$0xff]  ;;  %v6546_v28 = vld [vmem:[#allocation5 + $0x118] sm:$0xff]  ;;  %v6543_v51 = vld [vmem:[#allocation5 + $0x100] sm:$0xff] }
 0xff7   :  { %6667 = vmatprep.subr.bf16.mxu1 %v6524_v58  ;;  %6749 = vmatprep.subr.bf16.mxu0 %v6526_v16  ;;  %v6545_v55 = vld [vmem:[#allocation5 + $0x110] sm:$0xff]  ;;  %v6548_v56 = vld [vmem:[#allocation5 + $0x128] sm:$0xff]  ;;  %v6550_v33 = vld [vmem:[#allocation5 + $0x138] sm:$0xff]  ;;  %v6507_v58 = vpack.c.bf16 %v6498_v20, %v6498_v20 }
 0xff8   :  { %v6547_v38 = vld [vmem:[#allocation5 + $0x120] sm:$0xff]  ;;  %v6549_v14 = vld [vmem:[#allocation5 + $0x130] sm:$0xff]  ;;  %v6552_v15 = vld [vmem:[#allocation5 + $0x148] sm:$0xff] }
 0xff9   :  { %v6554_v62 = vld [vmem:[#allocation5 + $0x158] sm:$0xff]  ;;  %v6551_v23 = vld [vmem:[#allocation5 + $0x140] sm:$0xff]  ;;  %v6553_v45 = vld [vmem:[#allocation5 + $0x150] sm:$0xff] }
 0xffa   :  { %6668 = vmatpush1.bf16.msra.mxu1 %v6523_v22  ;;  %6750 = vmatpush1.bf16.msra.mxu0 %v6525_v8  ;;  %v6556_v27 = vld [vmem:[#allocation5 + $0x168] sm:$0xff]  ;;  %v6558_v19 = vld [vmem:[#allocation5 + $0x178] sm:$0xff]  ;;  %v6555_v32 = vld [vmem:[#allocation5 + $0x160] sm:$0xff] }
 0xffb   :  { %6669 = vmatprep.subr.bf16.mxu1 %v6528_v42  ;;  %6751 = vmatprep.subr.bf16.mxu0 %v6530_v26  ;;  %v6557_v50 = vld [vmem:[#allocation5 + $0x170] sm:$0xff]  ;;  %v6560_v0 = vld [vmem:[#allocation5 + $0x188] sm:$0xff]  ;;  %v6562_v1 = vld [vmem:[#allocation5 + $0x198] sm:$0xff]  ;;  %v6510_v26 = vpack.c.bf16 %v6501_v59, %v6501_v59 }
 0xffc   :  { %v6559_v13 = vld [vmem:[#allocation5 + $0x180] sm:$0xff]  ;;  %v6561_v44 = vld [vmem:[#allocation5 + $0x190] sm:$0xff]  ;;  %v6564_v49 = vld [vmem:[#allocation5 + $0x1a8] sm:$0xff] }
 0xffd   :  { %v6566_v10 = vld [vmem:[#allocation5 + $0x1b8] sm:$0xff]  ;;  %v6563_v53 = vld [vmem:[#allocation5 + $0x1a0] sm:$0xff]  ;;  %v6565_v41 = vld [vmem:[#allocation5 + $0x1b0] sm:$0xff] }
 0xffe   :  { %6670 = vmatpush1.bf16.msra.mxu1 %v6527_v11  ;;  %6752 = vmatpush1.bf16.msra.mxu0 %v6529_v34  ;;  %v6568_v43 = vld [vmem:[#allocation5 + $0x1c8] sm:$0xff]  ;;  %v6570_v3 = vld [vmem:[#allocation5 + $0x1d8] sm:$0xff]  ;;  %v6567_v46 = vld [vmem:[#allocation5 + $0x1c0] sm:$0xff] }
 0xfff   :  { %6671 = vmatprep.subr.bf16.mxu1 %v6532_v61  ;;  %6753 = vmatprep.subr.bf16.mxu0 %v6534_v31  ;;  %v6569_v57 = vld [vmem:[#allocation5 + $0x1d0] sm:$0xff]  ;;  %v6572_v25 = vld [vmem:[#allocation5 + $0x1e8] sm:$0xff]  ;;  %v6574_v30 = vld [vmem:[#allocation5 + $0x1f8] sm:$0xff] }
0x1000   :  { %v6571_v36 = vld [vmem:[#allocation5 + $0x1e0] sm:$0xff]  ;;  %v6573_v60 = vld [vmem:[#allocation5 + $0x1f0] sm:$0xff]  ;;  %v6576_v29 = vld [vmem:[#allocation5 + $0x208] sm:$0xff] }
0x1001   :  { %v6578_v39 = vld [vmem:[#allocation5 + $0x218] sm:$0xff]  ;;  %v6575_v16 = vld [vmem:[#allocation5 + $0x200] sm:$0xff]  ;;  %v6577_v22 = vld [vmem:[#allocation5 + $0x210] sm:$0xff] }
0x1002   :  { %6672 = vmatpush1.bf16.msra.mxu1 %v6531_v21  ;;  %6754 = vmatpush1.bf16.msra.mxu0 %v6533_v12  ;;  %v6580_v8 = vld [vmem:[#allocation5 + $0x228] sm:$0xff]  ;;  %v6582_v42 = vld [vmem:[#allocation5 + $0x238] sm:$0xff]  ;;  %v6579_v17 = vld [vmem:[#allocation5 + $0x220] sm:$0xff] }
0x1003   :  { %6673 = vmatprep.subr.bf16.mxu1 %v6536_v5  ;;  %6755 = vmatprep.subr.bf16.mxu0 %v6538_v37  ;;  %v6581_v20 = vld [vmem:[#allocation5 + $0x230] sm:$0xff]  ;;  %v6584_v11 = vld [vmem:[#allocation5 + $0x248] sm:$0xff]  ;;  %v6586_v34 = vld [vmem:[#allocation5 + $0x258] sm:$0xff] }
0x1004   :  { %v6583_v61 = vld [vmem:[#allocation5 + $0x240] sm:$0xff]  ;;  %v6585_v47 = vld [vmem:[#allocation5 + $0x250] sm:$0xff]  ;;  %v6588_v31 = vld [vmem:[#allocation5 + $0x268] sm:$0xff] }
0x1005   :  { %v6590_v59 = vld [vmem:[#allocation5 + $0x278] sm:$0xff]  ;;  %v6587_v21 = vld [vmem:[#allocation5 + $0x260] sm:$0xff]  ;;  %v6589_v12 = vld [vmem:[#allocation5 + $0x270] sm:$0xff] }
0x1006   :  { %6674 = vmatpush1.bf16.msra.mxu1 %v6535_v35  ;;  %6756 = vmatpush1.bf16.msra.mxu0 %v6537_v40  ;;  %v6592_v5 = vld [vmem:[#allocation5 + $0x288] sm:$0xff]  ;;  %v6594_v37 = vld [vmem:[#allocation5 + $0x298] sm:$0xff]  ;;  %v6591_v35 = vld [vmem:[#allocation5 + $0x280] sm:$0xff] }
0x1007   :  { %6675 = vmatprep.subr.bf16.mxu1 %v6540_v4  ;;  %6757 = vmatprep.subr.bf16.mxu0 %v6542_v9  ;;  %v6593_v40 = vld [vmem:[#allocation5 + $0x290] sm:$0xff]  ;;  %v6596_v4 = vld [vmem:[#allocation5 + $0x2a8] sm:$0xff]  ;;  %v6598_v9 = vld [vmem:[#allocation5 + $0x2b8] sm:$0xff] }
0x1008   :  { %v6845_v6 = vld [vmem:[#allocation5 + $0x458] sm:$0xff] }
0x100a   :  { %6676 = vmatpush1.bf16.msra.mxu1 %v6539_v63  ;;  %6758 = vmatpush1.bf16.msra.mxu0 %v6541_v54  ;;  %v6595_v63 = vld [vmem:[#allocation5 + $0x2a0] sm:$0xff]  ;;  %v6597_v54 = vld [vmem:[#allocation5 + $0x2b0] sm:$0xff] }
0x100b   :  { %6677 = vmatprep.subr.bf16.mxu1 %v6544_v24  ;;  %6759 = vmatprep.subr.bf16.mxu0 %v6546_v28  ;;  %v6600_v24 = vld [vmem:[#allocation5 + $0x2c8] sm:$0xff]  ;;  %v6602_v28 = vld [vmem:[#allocation5 + $0x2d8] sm:$0xff] }
0x100e   :  { %6678 = vmatpush1.bf16.msra.mxu1 %v6543_v51  ;;  %6760 = vmatpush1.bf16.msra.mxu0 %v6545_v55  ;;  %v6599_v51 = vld [vmem:[#allocation5 + $0x2c0] sm:$0xff]  ;;  %v6601_v55 = vld [vmem:[#allocation5 + $0x2d0] sm:$0xff] }
0x100f   :  { %6679 = vmatprep.subr.bf16.mxu1 %v6548_v56  ;;  %6761 = vmatprep.subr.bf16.mxu0 %v6550_v33  ;;  %v6604_v56 = vld [vmem:[#allocation5 + $0x2e8] sm:$0xff]  ;;  %v6606_v33 = vld [vmem:[#allocation5 + $0x2f8] sm:$0xff] }
0x1012   :  { %6680 = vmatpush1.bf16.msra.mxu1 %v6547_v38  ;;  %6762 = vmatpush1.bf16.msra.mxu0 %v6549_v14  ;;  %v6603_v38 = vld [vmem:[#allocation5 + $0x2e0] sm:$0xff]  ;;  %v6605_v14 = vld [vmem:[#allocation5 + $0x2f0] sm:$0xff] }
0x1013   :  { %6681 = vmatprep.subr.bf16.mxu1 %v6552_v15  ;;  %6763 = vmatprep.subr.bf16.mxu0 %v6554_v62  ;;  %v6608_v15 = vld [vmem:[#allocation5 + $0x308] sm:$0xff]  ;;  %v6610_v62 = vld [vmem:[#allocation5 + $0x318] sm:$0xff] }
0x1016   :  { %6682 = vmatpush1.bf16.msra.mxu1 %v6551_v23  ;;  %6764 = vmatpush1.bf16.msra.mxu0 %v6553_v45  ;;  %v6607_v23 = vld [vmem:[#allocation5 + $0x300] sm:$0xff]  ;;  %v6609_v45 = vld [vmem:[#allocation5 + $0x310] sm:$0xff] }
0x1017   :  { %6683 = vmatprep.subr.bf16.mxu1 %v6556_v27  ;;  %6765 = vmatprep.subr.bf16.mxu0 %v6558_v19  ;;  %v6612_v27 = vld [vmem:[#allocation5 + $0x328] sm:$0xff]  ;;  %v6614_v19 = vld [vmem:[#allocation5 + $0x338] sm:$0xff] }
0x101a   :  { %6684 = vmatpush1.bf16.msra.mxu1 %v6555_v32  ;;  %6766 = vmatpush1.bf16.msra.mxu0 %v6557_v50  ;;  %v6611_v32 = vld [vmem:[#allocation5 + $0x320] sm:$0xff]  ;;  %v6613_v50 = vld [vmem:[#allocation5 + $0x330] sm:$0xff] }
0x101b   :  { %6685 = vmatprep.subr.bf16.mxu1 %v6560_v0  ;;  %6767 = vmatprep.subr.bf16.mxu0 %v6562_v1  ;;  %v6616_v0 = vld [vmem:[#allocation5 + $0x348] sm:$0xff]  ;;  %v6618_v1 = vld [vmem:[#allocation5 + $0x358] sm:$0xff] }
0x101e   :  { %6686 = vmatpush1.bf16.msra.mxu1 %v6559_v13  ;;  %6768 = vmatpush1.bf16.msra.mxu0 %v6561_v44  ;;  %v6615_v13 = vld [vmem:[#allocation5 + $0x340] sm:$0xff]  ;;  %v6617_v44 = vld [vmem:[#allocation5 + $0x350] sm:$0xff] }
0x101f   :  { %6687 = vmatprep.subr.bf16.mxu1 %v6564_v49  ;;  %6769 = vmatprep.subr.bf16.mxu0 %v6566_v10  ;;  %v6620_v49 = vld [vmem:[#allocation5 + $0x368] sm:$0xff]  ;;  %v6622_v10 = vld [vmem:[#allocation5 + $0x378] sm:$0xff] }
0x1022   :  { %6688 = vmatpush1.bf16.msra.mxu1 %v6563_v53  ;;  %6770 = vmatpush1.bf16.msra.mxu0 %v6565_v41  ;;  %v6619_v53 = vld [vmem:[#allocation5 + $0x360] sm:$0xff]  ;;  %v6621_v41 = vld [vmem:[#allocation5 + $0x370] sm:$0xff] }
0x1023   :  { %6689 = vmatprep.subr.bf16.mxu1 %v6568_v43  ;;  %6771 = vmatprep.subr.bf16.mxu0 %v6570_v3  ;;  %v6624_v43 = vld [vmem:[#allocation5 + $0x388] sm:$0xff]  ;;  %v6626_v3 = vld [vmem:[#allocation5 + $0x398] sm:$0xff] }
0x1026   :  { %6690 = vmatpush1.bf16.msra.mxu1 %v6567_v46  ;;  %6772 = vmatpush1.bf16.msra.mxu0 %v6569_v57  ;;  %v6623_v46 = vld [vmem:[#allocation5 + $0x380] sm:$0xff]  ;;  %v6625_v57 = vld [vmem:[#allocation5 + $0x390] sm:$0xff] }
0x1027   :  { %6691 = vmatprep.subr.bf16.mxu1 %v6572_v25  ;;  %6773 = vmatprep.subr.bf16.mxu0 %v6574_v30  ;;  %v6628_v25 = vld [vmem:[#allocation5 + $0x3a8] sm:$0xff]  ;;  %v6630_v30 = vld [vmem:[#allocation5 + $0x3b8] sm:$0xff] }
0x102a   :  { %6692 = vmatpush1.bf16.msra.mxu1 %v6571_v36  ;;  %6774 = vmatpush1.bf16.msra.mxu0 %v6573_v60  ;;  %v6627_v36 = vld [vmem:[#allocation5 + $0x3a0] sm:$0xff]  ;;  %v6629_v60 = vld [vmem:[#allocation5 + $0x3b0] sm:$0xff] }
0x102b   :  { %6702 = vmatprep.subr.bf16.mxu1 %v6576_v29  ;;  %6784 = vmatprep.subr.bf16.mxu0 %v6578_v39  ;;  %v6632_v29 = vld [vmem:[#allocation5 + $0x3c8] sm:$0xff]  ;;  %v6634_v39 = vld [vmem:[#allocation5 + $0x3d8] sm:$0xff] }
0x102d   :  { %6694 = vmatmul.mubr.bf16.vlgmr.msra.gmra.mrb[128].mxu1 %v6507_v58  ;;  %6776 = vmatmul.mubr.bf16.vlgmr.msra.gmra.mrb[132].mxu0 %v6507_v58  ;;  %v6631_v58 = vld [vmem:[#allocation5 + $0x3c0] sm:$0xff] }
0x102e   :  { %6703 = vmatpush1.bf16.msra.mxu1 %v6575_v16  ;;  %6785 = vmatpush1.bf16.msra.mxu0 %v6577_v22  ;;  %v6633_v16 = vld [vmem:[#allocation5 + $0x3d0] sm:$0xff]  ;;  %v6636_v22 = vld [vmem:[#allocation5 + $0x3e8] sm:$0xff] }
0x102f   :  { %6704 = vmatprep.subr.bf16.mxu1 %v6580_v8  ;;  %6786 = vmatprep.subr.bf16.mxu0 %v6582_v42  ;;  %v6638_v8 = vld [vmem:[#allocation5 + $0x3f8] sm:$0xff]  ;;  %v6635_v42 = vld [vmem:[#allocation5 + $0x3e0] sm:$0xff] }
0x1030   :  { %6734 = vmatprep.mubr.bf16.mxu1 %v6510_v26  ;;  %6816 = vmatprep.mubr.bf16.mxu0 %v6510_v26  ;;  %v6637_v26 = vld [vmem:[#allocation5 + $0x3f0] sm:$0xff] }
0x1032   :  { %6705 = vmatpush1.bf16.msra.mxu1 %v6579_v17  ;;  %6787 = vmatpush1.bf16.msra.mxu0 %v6581_v20  ;;  %v6835_v17 = vld [vmem:[#allocation5 + $0x408] sm:$0xff]  ;;  %v6837_v20 = vld [vmem:[#allocation5 + $0x418] sm:$0xff] }
0x1033   :  { %6706 = vmatprep.subr.bf16.mxu1 %v6584_v11  ;;  %6788 = vmatprep.subr.bf16.mxu0 %v6586_v34  ;;  %v6509_v11 = vpack.c.bf16 %v6500_v18, %v6500_v18  ;;  %v6834_v34 = vld [vmem:[#allocation5 + $0x400] sm:$0xff] }
0x1034   :  { %v6842_v18 = vld [vmem:[#allocation5 + $0x440] sm:$0xff] }
0x1036   :  { %6707 = vmatpush1.bf16.msra.mxu1 %v6583_v61  ;;  %6789 = vmatpush1.bf16.msra.mxu0 %v6585_v47  ;;  %v6836_v61 = vld [vmem:[#allocation5 + $0x410] sm:$0xff]  ;;  %v6839_v47 = vld [vmem:[#allocation5 + $0x428] sm:$0xff] }
0x1037   :  { %6708 = vmatprep.subr.bf16.mxu1 %v6588_v31  ;;  %6790 = vmatprep.subr.bf16.mxu0 %v6590_v59  ;;  %v6841_v31 = vld [vmem:[#allocation5 + $0x438] sm:$0xff]  ;;  %v6838_v59 = vld [vmem:[#allocation5 + $0x420] sm:$0xff] }
0x103a   :  { %6709 = vmatpush1.bf16.msra.mxu1 %v6587_v21  ;;  %6791 = vmatpush1.bf16.msra.mxu0 %v6589_v12  ;;  %v6840_v21 = vld [vmem:[#allocation5 + $0x430] sm:$0xff]  ;;  %v6843_v12 = vld [vmem:[#allocation5 + $0x448] sm:$0xff] }
0x103b   :  { %6710 = vmatprep.subr.bf16.mxu1 %v6592_v5  ;;  %6792 = vmatprep.subr.bf16.mxu0 %v6594_v37  ;;  %v6844_v5 = vld [vmem:[#allocation5 + $0x450] sm:$0xff]  ;;  %v6847_v37 = vld [vmem:[#allocation5 + $0x468] sm:$0xff] }
0x103e   :  { %6711 = vmatpush1.bf16.msra.mxu1 %v6591_v35  ;;  %6793 = vmatpush1.bf16.msra.mxu0 %v6593_v40  ;;  %v6849_v35 = vld [vmem:[#allocation5 + $0x478] sm:$0xff]  ;;  %v6846_v40 = vld [vmem:[#allocation5 + $0x460] sm:$0xff] }
0x103f   :  { %6712 = vmatprep.subr.bf16.mxu1 %v6596_v4  ;;  %6794 = vmatprep.subr.bf16.mxu0 %v6598_v9  ;;  %v6848_v4 = vld [vmem:[#allocation5 + $0x470] sm:$0xff]  ;;  %v6851_v9 = vld [vmem:[#allocation5 + $0x488] sm:$0xff] }
0x1042   :  { %6713 = vmatpush1.bf16.msra.mxu1 %v6595_v63  ;;  %6795 = vmatpush1.bf16.msra.mxu0 %v6597_v54  ;;  %v6853_v63 = vld [vmem:[#allocation5 + $0x498] sm:$0xff]  ;;  %v6850_v54 = vld [vmem:[#allocation5 + $0x480] sm:$0xff] }
0x1043   :  { %6714 = vmatprep.subr.bf16.mxu1 %v6600_v24  ;;  %6796 = vmatprep.subr.bf16.mxu0 %v6602_v28  ;;  %v6852_v24 = vld [vmem:[#allocation5 + $0x490] sm:$0xff]  ;;  %v6855_v28 = vld [vmem:[#allocation5 + $0x4a8] sm:$0xff] }
0x1046   :  { %6715 = vmatpush1.bf16.msra.mxu1 %v6599_v51  ;;  %6797 = vmatpush1.bf16.msra.mxu0 %v6601_v55  ;;  %v6857_v51 = vld [vmem:[#allocation5 + $0x4b8] sm:$0xff]  ;;  %v6854_v55 = vld [vmem:[#allocation5 + $0x4a0] sm:$0xff] }
0x1047   :  { %6716 = vmatprep.subr.bf16.mxu1 %v6604_v56  ;;  %6798 = vmatprep.subr.bf16.mxu0 %v6606_v33  ;;  %v6856_v56 = vld [vmem:[#allocation5 + $0x4b0] sm:$0xff]  ;;  %v6859_v33 = vld [vmem:[#allocation5 + $0x4c8] sm:$0xff] }
0x104a   :  { %6717 = vmatpush1.bf16.msra.mxu1 %v6603_v38  ;;  %6799 = vmatpush1.bf16.msra.mxu0 %v6605_v14  ;;  %v6861_v38 = vld [vmem:[#allocation5 + $0x4d8] sm:$0xff]  ;;  %v6858_v14 = vld [vmem:[#allocation5 + $0x4c0] sm:$0xff] }
0x104b   :  { %6718 = vmatprep.subr.bf16.mxu1 %v6608_v15  ;;  %6800 = vmatprep.subr.bf16.mxu0 %v6610_v62  ;;  %v6860_v15 = vld [vmem:[#allocation5 + $0x4d0] sm:$0xff]  ;;  %v6863_v62 = vld [vmem:[#allocation5 + $0x4e8] sm:$0xff] }
0x104e   :  { %6719 = vmatpush1.bf16.msra.mxu1 %v6607_v23  ;;  %6801 = vmatpush1.bf16.msra.mxu0 %v6609_v45  ;;  %v6865_v23 = vld [vmem:[#allocation5 + $0x4f8] sm:$0xff]  ;;  %v6862_v45 = vld [vmem:[#allocation5 + $0x4e0] sm:$0xff] }
0x104f   :  { %6720 = vmatprep.subr.bf16.mxu1 %v6612_v27  ;;  %6802 = vmatprep.subr.bf16.mxu0 %v6614_v19  ;;  %v6864_v27 = vld [vmem:[#allocation5 + $0x4f0] sm:$0xff]  ;;  %v6867_v19 = vld [vmem:[#allocation5 + $0x508] sm:$0xff] }
0x1052   :  { %6721 = vmatpush1.bf16.msra.mxu1 %v6611_v32  ;;  %6803 = vmatpush1.bf16.msra.mxu0 %v6613_v50  ;;  %v6869_v32 = vld [vmem:[#allocation5 + $0x518] sm:$0xff]  ;;  %v6866_v50 = vld [vmem:[#allocation5 + $0x500] sm:$0xff] }
0x1053   :  { %6722 = vmatprep.subr.bf16.mxu1 %v6616_v0  ;;  %6804 = vmatprep.subr.bf16.mxu0 %v6618_v1  ;;  %v6868_v0 = vld [vmem:[#allocation5 + $0x510] sm:$0xff]  ;;  %v6871_v1 = vld [vmem:[#allocation5 + $0x528] sm:$0xff] }
0x1056   :  { %6723 = vmatpush1.bf16.msra.mxu1 %v6615_v13  ;;  %6805 = vmatpush1.bf16.msra.mxu0 %v6617_v44  ;;  %v6873_v13 = vld [vmem:[#allocation5 + $0x538] sm:$0xff]  ;;  %v6870_v44 = vld [vmem:[#allocation5 + $0x520] sm:$0xff] }
0x1057   :  { %6724 = vmatprep.subr.bf16.mxu1 %v6620_v49  ;;  %6806 = vmatprep.subr.bf16.mxu0 %v6622_v10  ;;  %v6872_v49 = vld [vmem:[#allocation5 + $0x530] sm:$0xff]  ;;  %v6875_v10 = vld [vmem:[#allocation5 + $0x548] sm:$0xff] }
0x105a   :  { %6725 = vmatpush1.bf16.msra.mxu1 %v6619_v53  ;;  %6807 = vmatpush1.bf16.msra.mxu0 %v6621_v41  ;;  %v6877_v53 = vld [vmem:[#allocation5 + $0x558] sm:$0xff]  ;;  %v6874_v41 = vld [vmem:[#allocation5 + $0x540] sm:$0xff] }
0x105b   :  { %6726 = vmatprep.subr.bf16.mxu1 %v6624_v43  ;;  %6808 = vmatprep.subr.bf16.mxu0 %v6626_v3  ;;  %v6876_v43 = vld [vmem:[#allocation5 + $0x550] sm:$0xff]  ;;  %v6879_v3 = vld [vmem:[#allocation5 + $0x568] sm:$0xff] }
0x105e   :  { %6727 = vmatpush1.bf16.msra.mxu1 %v6623_v46  ;;  %6809 = vmatpush1.bf16.msra.mxu0 %v6625_v57  ;;  %v6881_v46 = vld [vmem:[#allocation5 + $0x578] sm:$0xff]  ;;  %v6878_v57 = vld [vmem:[#allocation5 + $0x560] sm:$0xff] }
0x105f   :  { %6728 = vmatprep.subr.bf16.mxu1 %v6628_v25  ;;  %6810 = vmatprep.subr.bf16.mxu0 %v6630_v30  ;;  %v6880_v25 = vld [vmem:[#allocation5 + $0x570] sm:$0xff]  ;;  %v6883_v30 = vld [vmem:[#allocation5 + $0x588] sm:$0xff] }
0x1062   :  { %6729 = vmatpush1.bf16.msra.mxu1 %v6627_v36  ;;  %6811 = vmatpush1.bf16.msra.mxu0 %v6629_v60  ;;  %v6885_v36 = vld [vmem:[#allocation5 + $0x598] sm:$0xff]  ;;  %v6882_v60 = vld [vmem:[#allocation5 + $0x580] sm:$0xff] }
0x1063   :  { %6730 = vmatprep.subr.bf16.mxu1 %v6632_v29  ;;  %6812 = vmatprep.subr.bf16.mxu0 %v6634_v39  ;;  %v6884_v29 = vld [vmem:[#allocation5 + $0x590] sm:$0xff]  ;;  %v6887_v39 = vld [vmem:[#allocation5 + $0x5a8] sm:$0xff] }
0x1066   :  { %6731 = vmatpush1.bf16.msra.mxu1 %v6631_v58  ;;  %6813 = vmatpush1.bf16.msra.mxu0 %v6633_v16  ;;  %v6889_v58 = vld [vmem:[#allocation5 + $0x5b8] sm:$0xff]  ;;  %v6886_v16 = vld [vmem:[#allocation5 + $0x5a0] sm:$0xff] }
0x1067   :  { %6732 = vmatprep.subr.bf16.mxu1 %v6636_v22  ;;  %6814 = vmatprep.subr.bf16.mxu0 %v6638_v8  ;;  %v6888_v22 = vld [vmem:[#allocation5 + $0x5b0] sm:$0xff]  ;;  %v6891_v8 = vld [vmem:[#allocation5 + $0x5c8] sm:$0xff] }
0x106a   :  { %6733 = vmatpush1.bf16.msra.mxu1 %v6635_v42  ;;  %6815 = vmatpush1.bf16.msra.mxu0 %v6637_v26  ;;  %v6893_v42 = vld [vmem:[#allocation5 + $0x5d8] sm:$0xff]  ;;  %v6890_v26 = vld [vmem:[#allocation5 + $0x5c0] sm:$0xff] }
0x106b   :  { %6984 = vmatprep.subr.bf16.mxu1 %v6835_v17  ;;  %7066 = vmatprep.subr.bf16.mxu0 %v6837_v20  ;;  %v6892_v17 = vld [vmem:[#allocation5 + $0x5d0] sm:$0xff]  ;;  %v6895_v20 = vld [vmem:[#allocation5 + $0x5e8] sm:$0xff] }
0x106d   :  { %6735 = vmatmul.mubr.bf16.vlgmr.msra.gmra.mrb[128].mxu1 %v6509_v11  ;;  %6817 = vmatmul.mubr.bf16.vlgmr.msra.gmra.mrb[132].mxu0 %v6509_v11  ;;  %v6897_v11 = vld [vmem:[#allocation5 + $0x5f8] sm:$0xff] }
0x106e   :  { %6985 = vmatpush1.bf16.msra.mxu1 %v6834_v34  ;;  %7067 = vmatpush1.bf16.msra.mxu0 %v6836_v61  ;;  %v6894_v34 = vld [vmem:[#allocation5 + $0x5e0] sm:$0xff]  ;;  %v6896_v61 = vld [vmem:[#allocation5 + $0x5f0] sm:$0xff] }
0x106f   :  { %6986 = vmatprep.subr.bf16.mxu1 %v6839_v47  ;;  %7068 = vmatprep.subr.bf16.mxu0 %v6841_v31  ;;  %v6899_v47 = vld [vmem:[#allocation5 + $0x608] sm:$0xff]  ;;  %v6901_v31 = vld [vmem:[#allocation5 + $0x618] sm:$0xff] }
0x1072   :  { %6987 = vmatpush1.bf16.msra.mxu1 %v6838_v59  ;;  %7069 = vmatpush1.bf16.msra.mxu0 %v6840_v21  ;;  %v11008_v59 = vld [vmem:[#allocation16] sm:$0xf] }
0x1073   :  { %6988 = vmatprep.subr.bf16.mxu1 %v6843_v12  ;;  %7070 = vmatprep.subr.bf16.mxu0 %v6845_v6  ;;  %v6644_v21 = vrot.slane %v11008_v59, %v12211_v7  ;;  %v6648_v12 = vrot.slane %v11008_v59, %v12212_v2  ;;  %v6656_v6 = vrot.slane %v11008_v59, %v12214_v52 }
0x1076   :  { %6989 = vmatpush1.bf16.msra.mxu1 %v6842_v18  ;;  %7071 = vmatpush1.bf16.msra.mxu0 %v6844_v5 }
0x1077   :  { %6990 = vmatprep.subr.bf16.mxu1 %v6847_v37  ;;  %7072 = vmatprep.subr.bf16.mxu0 %v6849_v35 }
0x107a   :  { %6991 = vmatpush1.bf16.msra.mxu1 %v6846_v40  ;;  %7073 = vmatpush1.bf16.msra.mxu0 %v6848_v4 }
0x107b   :  { %6992 = vmatprep.subr.bf16.mxu1 %v6851_v9  ;;  %7074 = vmatprep.subr.bf16.mxu0 %v6853_v63 }
0x107e   :  { %6993 = vmatpush1.bf16.msra.mxu1 %v6850_v54  ;;  %7075 = vmatpush1.bf16.msra.mxu0 %v6852_v24 }
0x107f   :  { %6994 = vmatprep.subr.bf16.mxu1 %v6855_v28  ;;  %7076 = vmatprep.subr.bf16.mxu0 %v6857_v51 }
0x1082   :  { %6995 = vmatpush1.bf16.msra.mxu1 %v6854_v55  ;;  %7077 = vmatpush1.bf16.msra.mxu0 %v6856_v56 }
0x1083   :  { %6996 = vmatprep.subr.bf16.mxu1 %v6859_v33  ;;  %7078 = vmatprep.subr.bf16.mxu0 %v6861_v38 }
0x1086   :  { %6997 = vmatpush1.bf16.msra.mxu1 %v6858_v14  ;;  %7079 = vmatpush1.bf16.msra.mxu0 %v6860_v15  ;;  %v6898_v14 = vld [vmem:[#allocation5 + $0x600] sm:$0xff]  ;;  %v6900_v15 = vld [vmem:[#allocation5 + $0x610] sm:$0xff] }
0x1087   :  { %6998 = vmatprep.subr.bf16.mxu1 %v6863_v62  ;;  %7080 = vmatprep.subr.bf16.mxu0 %v6865_v23  ;;  %v6903_v23 = vld [vmem:[#allocation5 + $0x628] sm:$0xff] }
0x108a   :  { %6999 = vmatpush1.bf16.msra.mxu1 %v6862_v45  ;;  %7081 = vmatpush1.bf16.msra.mxu0 %v6864_v27  ;;  %v6905_v45 = vld [vmem:[#allocation5 + $0x638] sm:$0xff]  ;;  %v6902_v27 = vld [vmem:[#allocation5 + $0x620] sm:$0xff] }
0x108b   :  { %7000 = vmatprep.subr.bf16.mxu1 %v6867_v19  ;;  %7082 = vmatprep.subr.bf16.mxu0 %v6869_v32  ;;  %v6904_v19 = vld [vmem:[#allocation5 + $0x630] sm:$0xff]  ;;  %v6907_v32 = vld [vmem:[#allocation5 + $0x648] sm:$0xff] }
0x108e   :  { %7001 = vmatpush1.bf16.msra.mxu1 %v6866_v50  ;;  %7083 = vmatpush1.bf16.msra.mxu0 %v6868_v0  ;;  %v6909_v50 = vld [vmem:[#allocation5 + $0x658] sm:$0xff]  ;;  %v6906_v0 = vld [vmem:[#allocation5 + $0x640] sm:$0xff] }
0x108f   :  { %7002 = vmatprep.subr.bf16.mxu1 %v6871_v1  ;;  %7084 = vmatprep.subr.bf16.mxu0 %v6873_v13  ;;  %v6908_v1 = vld [vmem:[#allocation5 + $0x650] sm:$0xff]  ;;  %v6911_v13 = vld [vmem:[#allocation5 + $0x668] sm:$0xff] }
0x1092   :  { %7003 = vmatpush1.bf16.msra.mxu1 %v6870_v44  ;;  %7085 = vmatpush1.bf16.msra.mxu0 %v6872_v49  ;;  %v6913_v44 = vld [vmem:[#allocation5 + $0x678] sm:$0xff]  ;;  %v6910_v49 = vld [vmem:[#allocation5 + $0x660] sm:$0xff] }
0x1093   :  { %7004 = vmatprep.subr.bf16.mxu1 %v6875_v10  ;;  %7086 = vmatprep.subr.bf16.mxu0 %v6877_v53  ;;  %v6912_v10 = vld [vmem:[#allocation5 + $0x670] sm:$0xff]  ;;  %v6915_v53 = vld [vmem:[#allocation5 + $0x688] sm:$0xff] }
0x1096   :  { %7005 = vmatpush1.bf16.msra.mxu1 %v6874_v41  ;;  %7087 = vmatpush1.bf16.msra.mxu0 %v6876_v43  ;;  %v6917_v41 = vld [vmem:[#allocation5 + $0x698] sm:$0xff]  ;;  %v6914_v43 = vld [vmem:[#allocation5 + $0x680] sm:$0xff] }
0x1097   :  { %7006 = vmatprep.subr.bf16.mxu1 %v6879_v3  ;;  %7088 = vmatprep.subr.bf16.mxu0 %v6881_v46  ;;  %v6916_v3 = vld [vmem:[#allocation5 + $0x690] sm:$0xff]  ;;  %v6919_v46 = vld [vmem:[#allocation5 + $0x6a8] sm:$0xff] }
0x109a   :  { %7007 = vmatpush1.bf16.msra.mxu1 %v6878_v57  ;;  %7089 = vmatpush1.bf16.msra.mxu0 %v6880_v25  ;;  %v6921_v57 = vld [vmem:[#allocation5 + $0x6b8] sm:$0xff]  ;;  %v6918_v25 = vld [vmem:[#allocation5 + $0x6a0] sm:$0xff] }
0x109b   :  { %7008 = vmatprep.subr.bf16.mxu1 %v6883_v30  ;;  %7090 = vmatprep.subr.bf16.mxu0 %v6885_v36  ;;  %v6920_v30 = vld [vmem:[#allocation5 + $0x6b0] sm:$0xff]  ;;  %v6923_v36 = vld [vmem:[#allocation5 + $0x6c8] sm:$0xff] }
0x109e   :  { %7009 = vmatpush1.bf16.msra.mxu1 %v6882_v60  ;;  %7091 = vmatpush1.bf16.msra.mxu0 %v6884_v29  ;;  %v6925_v60 = vld [vmem:[#allocation5 + $0x6d8] sm:$0xff]  ;;  %v6922_v29 = vld [vmem:[#allocation5 + $0x6c0] sm:$0xff] }
0x109f   :  { %7010 = vmatprep.subr.bf16.mxu1 %v6887_v39  ;;  %7092 = vmatprep.subr.bf16.mxu0 %v6889_v58  ;;  %v6924_v39 = vld [vmem:[#allocation5 + $0x6d0] sm:$0xff]  ;;  %v6927_v58 = vld [vmem:[#allocation5 + $0x6e8] sm:$0xff] }
0x10a2   :  { %7011 = vmatpush1.bf16.msra.mxu1 %v6886_v16  ;;  %7093 = vmatpush1.bf16.msra.mxu0 %v6888_v22  ;;  %v6929_v16 = vld [vmem:[#allocation5 + $0x6f8] sm:$0xff]  ;;  %v6926_v22 = vld [vmem:[#allocation5 + $0x6e0] sm:$0xff] }
0x10a3   :  { %7012 = vmatprep.subr.bf16.mxu1 %v6891_v8  ;;  %7094 = vmatprep.subr.bf16.mxu0 %v6893_v42  ;;  %v6928_v8 = vld [vmem:[#allocation5 + $0x6f0] sm:$0xff]  ;;  %v6931_v42 = vld [vmem:[#allocation5 + $0x708] sm:$0xff] }
0x10a6   :  { %7013 = vmatpush1.bf16.msra.mxu1 %v6890_v26  ;;  %7095 = vmatpush1.bf16.msra.mxu0 %v6892_v17  ;;  %v6933_v26 = vld [vmem:[#allocation5 + $0x718] sm:$0xff]  ;;  %v6930_v17 = vld [vmem:[#allocation5 + $0x700] sm:$0xff] }
0x10a7   :  { %7014 = vmatprep.subr.bf16.mxu1 %v6895_v20  ;;  %7096 = vmatprep.subr.bf16.mxu0 %v6897_v11  ;;  %v6932_v20 = vld [vmem:[#allocation5 + $0x710] sm:$0xff]  ;;  %v6935_v11 = vld [vmem:[#allocation5 + $0x728] sm:$0xff] }
0x10aa   :  { %7015 = vmatpush1.bf16.msra.mxu1 %v6894_v34  ;;  %7097 = vmatpush1.bf16.msra.mxu0 %v6896_v61  ;;  %v6937_v34 = vld [vmem:[#allocation5 + $0x738] sm:$0xff]  ;;  %v6934_v61 = vld [vmem:[#allocation5 + $0x720] sm:$0xff] }
0x10ab   :  { %7025 = vmatprep.subr.bf16.mxu1 %v6899_v47  ;;  %7107 = vmatprep.subr.bf16.mxu0 %v6901_v31  ;;  %v6936_v47 = vld [vmem:[#allocation5 + $0x730] sm:$0xff]  ;;  %v6939_v31 = vld [vmem:[#allocation5 + $0x748] sm:$0xff] }
0x1140   :  { %v6736_v18 = vpop.f32.mrb[128].mxu1  ;;  %v11016_v5 = vpop.f32.mrb[132].mxu0 }
0x1141   :  { %v8065_v37 = vadd.f32 %v6736_v18, %v6644_v21  ;;  %v6738_v35 = vpop.f32.mrb[129].mxu1  ;;  %v6820_v40 = vpop.f32.mrb[133].mxu0  ;;  %v6941_v21 = vld [vmem:[#allocation5 + $0x758] sm:$0xff]  ;;  %v6943_v18 = vld [vmem:[#allocation5 + $0x768] sm:$0xff] }
0x1142   :  { %v8066_v4 = vadd.f32 %v6738_v35, %v6648_v12  ;;  %v8068_v9 = vadd.f32 %v6820_v40, %v6656_v6  ;;  %v6740_v63 = vpop.f32.mrb[130].mxu1  ;;  %v6822_v54 = vpop.f32.mrb[134].mxu0  ;;  %v6938_v12 = vld [vmem:[#allocation5 + $0x740] sm:$0xff]  ;;  %v6940_v6 = vld [vmem:[#allocation5 + $0x750] sm:$0xff] }
0x1143   :  { %v6825_v24 = vmax.f32 %v8065_v37, 0.0  ;;  %v6741_v28 = vpop.f32.mrb[131].mxu1  ;;  %v6823_v51 = vpop.f32.mrb[135].mxu0  ;;  %v6945_v37 = vld [vmem:[#allocation5 + $0x778] sm:$0xff]  ;;  %v6942_v35 = vld [vmem:[#allocation5 + $0x760] sm:$0xff]  ;;  %v6944_v40 = vld [vmem:[#allocation5 + $0x770] sm:$0xff] }
0x1144   :  { %v6826_v55 = vmax.f32 %v8066_v4, 0.0  ;;  %v6828_v56 = vmax.f32 %v8068_v9, 0.0  ;;  %v6947_v4 = vld [vmem:[#allocation5 + $0x788] sm:$0xff]  ;;  %v6949_v9 = vld [vmem:[#allocation5 + $0x798] sm:$0xff]  ;;  %v6946_v63 = vld [vmem:[#allocation5 + $0x780] sm:$0xff]  ;;  %v6652_v51 = vrot.slane %v11008_v59, %v12213_v48 }
0x1145   :  { %v6829_v38 = vpack.c.bf16 %v6825_v24, %v6825_v24  ;;  %v6948_v54 = vld [vmem:[#allocation5 + $0x790] sm:$0xff]  ;;  %v6951_v24 = vld [vmem:[#allocation5 + $0x7a8] sm:$0xff]  ;;  %v6953_v28 = vld [vmem:[#allocation5 + $0x7b8] sm:$0xff] }
0x1146   :  { %v6830_v33 = vpack.c.bf16 %v6826_v55, %v6826_v55  ;;  %v6832_v62 = vpack.c.bf16 %v6828_v56, %v6828_v56  ;;  %v6950_v55 = vld [vmem:[#allocation5 + $0x7a0] sm:$0xff]  ;;  %v6952_v56 = vld [vmem:[#allocation5 + $0x7b0] sm:$0xff] }
0x1147   :  { %v6958_v59 = vld [vmem:[#allocation5 + $0x7e0] sm:$0xff] }
0x1148   :  { %7016 = vmatprep.mubr.bf16.mxu1 %v6830_v33  ;;  %7098 = vmatprep.mubr.bf16.mxu0 %v6830_v33  ;;  %v6955_v33 = vld [vmem:[#allocation5 + $0x7c8] sm:$0xff] }
0x1149   :  { %7017 = vmatmul.mubr.bf16.vlgmr.msra.gmra.mrb[132].mxu1 %v6829_v38  ;;  %7099 = vmatmul.mubr.bf16.vlgmr.msra.gmra.mrb[136].mxu0 %v6829_v38  ;;  %v6957_v38 = vld [vmem:[#allocation5 + $0x7d8] sm:$0xff] }
0x114a   :  { %7026 = vmatpush1.bf16.msra.mxu1 %v6898_v14  ;;  %7108 = vmatpush1.bf16.msra.mxu0 %v6900_v15  ;;  %v8067_v14 = vadd.f32 %v11016_v5, %v6652_v51  ;;  %v6954_v15 = vld [vmem:[#allocation5 + $0x7c0] sm:$0xff] }
0x114b   :  { %7057 = vmatprep.mubr.bf16.mxu1 %v6832_v62  ;;  %7139 = vmatprep.mubr.bf16.mxu0 %v6832_v62  ;;  %v6956_v62 = vld [vmem:[#allocation5 + $0x7d0] sm:$0xff]  ;;  %v7157_v5 = vld [vmem:[#allocation5 + $0x800] sm:$0xff] }
0x114c   :  { %7027 = vmatprep.subr.bf16.mxu1 %v6903_v23  ;;  %7109 = vmatprep.subr.bf16.mxu0 %v6905_v45  ;;  %v6959_v23 = vld [vmem:[#allocation5 + $0x7e8] sm:$0xff]  ;;  %v6961_v45 = vld [vmem:[#allocation5 + $0x7f8] sm:$0xff]  ;;  %v7201_v51 = vld [vmem:[#allocation5 + $0x960] sm:$0xff] }
0x114e   :  { %7028 = vmatpush1.bf16.msra.mxu1 %v6902_v27  ;;  %7110 = vmatpush1.bf16.msra.mxu0 %v6904_v19  ;;  %v6827_v27 = vmax.f32 %v8067_v14, 0.0  ;;  %v6960_v19 = vld [vmem:[#allocation5 + $0x7f0] sm:$0xff] }
0x114f   :  { %7029 = vmatprep.subr.bf16.mxu1 %v6907_v32  ;;  %7111 = vmatprep.subr.bf16.mxu0 %v6909_v50  ;;  %v7158_v32 = vld [vmem:[#allocation5 + $0x808] sm:$0xff]  ;;  %v7160_v50 = vld [vmem:[#allocation5 + $0x818] sm:$0xff]  ;;  %v7207_v14 = vld [vmem:[#allocation5 + $0x990] sm:$0xff] }
0x1152   :  { %7030 = vmatpush1.bf16.msra.mxu1 %v6906_v0  ;;  %7112 = vmatpush1.bf16.msra.mxu0 %v6908_v1  ;;  %v6831_v0 = vpack.c.bf16 %v6827_v27, %v6827_v27  ;;  %v7159_v1 = vld [vmem:[#allocation5 + $0x810] sm:$0xff]  ;;  %v7214_v27 = vld [vmem:[#allocation5 + $0x9c8] sm:$0xff] }
0x1153   :  { %7031 = vmatprep.subr.bf16.mxu1 %v6911_v13  ;;  %7113 = vmatprep.subr.bf16.mxu0 %v6913_v44  ;;  %v7162_v13 = vld [vmem:[#allocation5 + $0x828] sm:$0xff]  ;;  %v7164_v44 = vld [vmem:[#allocation5 + $0x838] sm:$0xff] }
0x1156   :  { %7032 = vmatpush1.bf16.msra.mxu1 %v6910_v49  ;;  %7114 = vmatpush1.bf16.msra.mxu0 %v6912_v10  ;;  %v7161_v49 = vld [vmem:[#allocation5 + $0x820] sm:$0xff]  ;;  %v7163_v10 = vld [vmem:[#allocation5 + $0x830] sm:$0xff] }
0x1157   :  { %7033 = vmatprep.subr.bf16.mxu1 %v6915_v53  ;;  %7115 = vmatprep.subr.bf16.mxu0 %v6917_v41  ;;  %v7166_v53 = vld [vmem:[#allocation5 + $0x848] sm:$0xff]  ;;  %v7168_v41 = vld [vmem:[#allocation5 + $0x858] sm:$0xff] }
0x115a   :  { %7034 = vmatpush1.bf16.msra.mxu1 %v6914_v43  ;;  %7116 = vmatpush1.bf16.msra.mxu0 %v6916_v3  ;;  %v7165_v43 = vld [vmem:[#allocation5 + $0x840] sm:$0xff]  ;;  %v7167_v3 = vld [vmem:[#allocation5 + $0x850] sm:$0xff] }
0x115b   :  { %7035 = vmatprep.subr.bf16.mxu1 %v6919_v46  ;;  %7117 = vmatprep.subr.bf16.mxu0 %v6921_v57  ;;  %v7170_v46 = vld [vmem:[#allocation5 + $0x868] sm:$0xff]  ;;  %v7172_v57 = vld [vmem:[#allocation5 + $0x878] sm:$0xff] }
0x115e   :  { %7036 = vmatpush1.bf16.msra.mxu1 %v6918_v25  ;;  %7118 = vmatpush1.bf16.msra.mxu0 %v6920_v30  ;;  %v7169_v25 = vld [vmem:[#allocation5 + $0x860] sm:$0xff]  ;;  %v7171_v30 = vld [vmem:[#allocation5 + $0x870] sm:$0xff] }
0x115f   :  { %7037 = vmatprep.subr.bf16.mxu1 %v6923_v36  ;;  %7119 = vmatprep.subr.bf16.mxu0 %v6925_v60  ;;  %v7174_v36 = vld [vmem:[#allocation5 + $0x888] sm:$0xff]  ;;  %v7176_v60 = vld [vmem:[#allocation5 + $0x898] sm:$0xff] }
0x1162   :  { %7038 = vmatpush1.bf16.msra.mxu1 %v6922_v29  ;;  %7120 = vmatpush1.bf16.msra.mxu0 %v6924_v39  ;;  %v7173_v29 = vld [vmem:[#allocation5 + $0x880] sm:$0xff]  ;;  %v7175_v39 = vld [vmem:[#allocation5 + $0x890] sm:$0xff] }
0x1163   :  { %7039 = vmatprep.subr.bf16.mxu1 %v6927_v58  ;;  %7121 = vmatprep.subr.bf16.mxu0 %v6929_v16  ;;  %v7178_v58 = vld [vmem:[#allocation5 + $0x8a8] sm:$0xff]  ;;  %v7180_v16 = vld [vmem:[#allocation5 + $0x8b8] sm:$0xff] }
0x1166   :  { %7040 = vmatpush1.bf16.msra.mxu1 %v6926_v22  ;;  %7122 = vmatpush1.bf16.msra.mxu0 %v6928_v8  ;;  %v7177_v22 = vld [vmem:[#allocation5 + $0x8a0] sm:$0xff]  ;;  %v7179_v8 = vld [vmem:[#allocation5 + $0x8b0] sm:$0xff] }
0x1167   :  { %7041 = vmatprep.subr.bf16.mxu1 %v6931_v42  ;;  %7123 = vmatprep.subr.bf16.mxu0 %v6933_v26  ;;  %v7182_v42 = vld [vmem:[#allocation5 + $0x8c8] sm:$0xff]  ;;  %v7184_v26 = vld [vmem:[#allocation5 + $0x8d8] sm:$0xff] }
0x116a   :  { %7042 = vmatpush1.bf16.msra.mxu1 %v6930_v17  ;;  %7124 = vmatpush1.bf16.msra.mxu0 %v6932_v20  ;;  %v7181_v17 = vld [vmem:[#allocation5 + $0x8c0] sm:$0xff]  ;;  %v7183_v20 = vld [vmem:[#allocation5 + $0x8d0] sm:$0xff] }
0x116b   :  { %7043 = vmatprep.subr.bf16.mxu1 %v6935_v11  ;;  %7125 = vmatprep.subr.bf16.mxu0 %v6937_v34  ;;  %v7186_v11 = vld [vmem:[#allocation5 + $0x8e8] sm:$0xff]  ;;  %v7188_v34 = vld [vmem:[#allocation5 + $0x8f8] sm:$0xff] }
0x116e   :  { %7044 = vmatpush1.bf16.msra.mxu1 %v6934_v61  ;;  %7126 = vmatpush1.bf16.msra.mxu0 %v6936_v47  ;;  %v7185_v61 = vld [vmem:[#allocation5 + $0x8e0] sm:$0xff]  ;;  %v7187_v47 = vld [vmem:[#allocation5 + $0x8f0] sm:$0xff] }
0x116f   :  { %7045 = vmatprep.subr.bf16.mxu1 %v6939_v31  ;;  %7127 = vmatprep.subr.bf16.mxu0 %v6941_v21  ;;  %v7190_v31 = vld [vmem:[#allocation5 + $0x908] sm:$0xff]  ;;  %v7192_v21 = vld [vmem:[#allocation5 + $0x918] sm:$0xff] }
0x1172   :  { %7046 = vmatpush1.bf16.msra.mxu1 %v6938_v12  ;;  %7128 = vmatpush1.bf16.msra.mxu0 %v6940_v6  ;;  %v7189_v12 = vld [vmem:[#allocation5 + $0x900] sm:$0xff]  ;;  %v7191_v6 = vld [vmem:[#allocation5 + $0x910] sm:$0xff] }
0x1173   :  { %7047 = vmatprep.subr.bf16.mxu1 %v6943_v18  ;;  %7129 = vmatprep.subr.bf16.mxu0 %v6945_v37  ;;  %v7194_v18 = vld [vmem:[#allocation5 + $0x928] sm:$0xff]  ;;  %v7196_v37 = vld [vmem:[#allocation5 + $0x938] sm:$0xff] }
0x1176   :  { %7048 = vmatpush1.bf16.msra.mxu1 %v6942_v35  ;;  %7130 = vmatpush1.bf16.msra.mxu0 %v6944_v40  ;;  %v7193_v35 = vld [vmem:[#allocation5 + $0x920] sm:$0xff]  ;;  %v7195_v40 = vld [vmem:[#allocation5 + $0x930] sm:$0xff] }
0x1177   :  { %7049 = vmatprep.subr.bf16.mxu1 %v6947_v4  ;;  %7131 = vmatprep.subr.bf16.mxu0 %v6949_v9  ;;  %v7198_v4 = vld [vmem:[#allocation5 + $0x948] sm:$0xff]  ;;  %v7200_v9 = vld [vmem:[#allocation5 + $0x958] sm:$0xff] }
0x117a   :  { %7050 = vmatpush1.bf16.msra.mxu1 %v6946_v63  ;;  %7132 = vmatpush1.bf16.msra.mxu0 %v6948_v54  ;;  %v7197_v63 = vld [vmem:[#allocation5 + $0x940] sm:$0xff]  ;;  %v7199_v54 = vld [vmem:[#allocation5 + $0x950] sm:$0xff] }
0x117b   :  { %7051 = vmatprep.subr.bf16.mxu1 %v6951_v24  ;;  %7133 = vmatprep.subr.bf16.mxu0 %v6953_v28  ;;  %v7202_v24 = vld [vmem:[#allocation5 + $0x968] sm:$0xff]  ;;  %v7204_v28 = vld [vmem:[#allocation5 + $0x978] sm:$0xff] }
0x117e   :  { %7052 = vmatpush1.bf16.msra.mxu1 %v6950_v55  ;;  %7134 = vmatpush1.bf16.msra.mxu0 %v6952_v56  ;;  %v7203_v55 = vld [vmem:[#allocation5 + $0x970] sm:$0xff]  ;;  %v7206_v56 = vld [vmem:[#allocation5 + $0x988] sm:$0xff] }
0x117f   :  { %7053 = vmatprep.subr.bf16.mxu1 %v6955_v33  ;;  %7135 = vmatprep.subr.bf16.mxu0 %v6957_v38  ;;  %v7208_v33 = vld [vmem:[#allocation5 + $0x998] sm:$0xff]  ;;  %v7205_v38 = vld [vmem:[#allocation5 + $0x980] sm:$0xff] }
0x1182   :  { %7054 = vmatpush1.bf16.msra.mxu1 %v6954_v15  ;;  %7136 = vmatpush1.bf16.msra.mxu0 %v6956_v62  ;;  %v7210_v15 = vld [vmem:[#allocation5 + $0x9a8] sm:$0xff]  ;;  %v7212_v62 = vld [vmem:[#allocation5 + $0x9b8] sm:$0xff] }
0x1183   :  { %7055 = vmatprep.subr.bf16.mxu1 %v6959_v23  ;;  %7137 = vmatprep.subr.bf16.mxu0 %v6961_v45  ;;  %v7209_v23 = vld [vmem:[#allocation5 + $0x9a0] sm:$0xff]  ;;  %v7211_v45 = vld [vmem:[#allocation5 + $0x9b0] sm:$0xff] }
0x1186   :  { %7056 = vmatpush1.bf16.msra.mxu1 %v6958_v59  ;;  %7138 = vmatpush1.bf16.msra.mxu0 %v6960_v19  ;;  %v7216_v59 = vld [vmem:[#allocation5 + $0x9d8] sm:$0xff]  ;;  %v7213_v19 = vld [vmem:[#allocation5 + $0x9c0] sm:$0xff] }
0x1187   :  { %7307 = vmatprep.subr.bf16.mxu1 %v7158_v32  ;;  %7389 = vmatprep.subr.bf16.mxu0 %v7160_v50  ;;  %v7215_v32 = vld [vmem:[#allocation5 + $0x9d0] sm:$0xff]  ;;  %v7218_v50 = vld [vmem:[#allocation5 + $0x9e8] sm:$0xff] }
0x1189   :  { %7058 = vmatmul.mubr.bf16.vlgmr.msra.gmra.mrb[132].mxu1 %v6831_v0  ;;  %7140 = vmatmul.mubr.bf16.vlgmr.msra.gmra.mrb[136].mxu0 %v6831_v0  ;;  %v7220_v0 = vld [vmem:[#allocation5 + $0x9f8] sm:$0xff] }
0x118a   :  { %7308 = vmatpush1.bf16.msra.mxu1 %v7157_v5  ;;  %7390 = vmatpush1.bf16.msra.mxu0 %v7159_v1  ;;  %v7217_v5 = vld [vmem:[#allocation5 + $0x9e0] sm:$0xff]  ;;  %v7219_v1 = vld [vmem:[#allocation5 + $0x9f0] sm:$0xff] }
0x118b   :  { %7309 = vmatprep.subr.bf16.mxu1 %v7162_v13  ;;  %7391 = vmatprep.subr.bf16.mxu0 %v7164_v44  ;;  %v7222_v13 = vld [vmem:[#allocation5 + $0xa08] sm:$0xff]  ;;  %v7224_v44 = vld [vmem:[#allocation5 + $0xa18] sm:$0xff] }
0x118e   :  { %7310 = vmatpush1.bf16.msra.mxu1 %v7161_v49  ;;  %7392 = vmatpush1.bf16.msra.mxu0 %v7163_v10  ;;  %v11021_v49 = vld [vmem:[#allocation18] sm:$0xf] }
0x118f   :  { %7311 = vmatprep.subr.bf16.mxu1 %v7166_v53  ;;  %7393 = vmatprep.subr.bf16.mxu0 %v7168_v41  ;;  %v6967_v10 = vrot.slane %v11021_v49, %v12211_v7  ;;  %v6971_v53 = vrot.slane %v11021_v49, %v12212_v2  ;;  %v6979_v41 = vrot.slane %v11021_v49, %v12214_v52 }
0x1192   :  { %7312 = vmatpush1.bf16.msra.mxu1 %v7165_v43  ;;  %7394 = vmatpush1.bf16.msra.mxu0 %v7167_v3 }
0x1193   :  { %7313 = vmatprep.subr.bf16.mxu1 %v7170_v46  ;;  %7395 = vmatprep.subr.bf16.mxu0 %v7172_v57 }
0x1196   :  { %7314 = vmatpush1.bf16.msra.mxu1 %v7169_v25  ;;  %7396 = vmatpush1.bf16.msra.mxu0 %v7171_v30 }
0x1197   :  { %7315 = vmatprep.subr.bf16.mxu1 %v7174_v36  ;;  %7397 = vmatprep.subr.bf16.mxu0 %v7176_v60 }
0x119a   :  { %7316 = vmatpush1.bf16.msra.mxu1 %v7173_v29  ;;  %7398 = vmatpush1.bf16.msra.mxu0 %v7175_v39 }
0x119b   :  { %7317 = vmatprep.subr.bf16.mxu1 %v7178_v58  ;;  %7399 = vmatprep.subr.bf16.mxu0 %v7180_v16 }
0x119e   :  { %7318 = vmatpush1.bf16.msra.mxu1 %v7177_v22  ;;  %7400 = vmatpush1.bf16.msra.mxu0 %v7179_v8 }
0x119f   :  { %7319 = vmatprep.subr.bf16.mxu1 %v7182_v42  ;;  %7401 = vmatprep.subr.bf16.mxu0 %v7184_v26 }
0x11a2   :  { %7320 = vmatpush1.bf16.msra.mxu1 %v7181_v17  ;;  %7402 = vmatpush1.bf16.msra.mxu0 %v7183_v20  ;;  %v7221_v17 = vld [vmem:[#allocation5 + $0xa00] sm:$0xff]  ;;  %v7223_v20 = vld [vmem:[#allocation5 + $0xa10] sm:$0xff] }
0x11a3   :  { %7321 = vmatprep.subr.bf16.mxu1 %v7186_v11  ;;  %7403 = vmatprep.subr.bf16.mxu0 %v7188_v34  ;;  %v7226_v34 = vld [vmem:[#allocation5 + $0xa28] sm:$0xff] }
0x11a6   :  { %7322 = vmatpush1.bf16.msra.mxu1 %v7185_v61  ;;  %7404 = vmatpush1.bf16.msra.mxu0 %v7187_v47  ;;  %v7228_v61 = vld [vmem:[#allocation5 + $0xa38] sm:$0xff]  ;;  %v7225_v47 = vld [vmem:[#allocation5 + $0xa20] sm:$0xff] }
0x11a7   :  { %7323 = vmatprep.subr.bf16.mxu1 %v7190_v31  ;;  %7405 = vmatprep.subr.bf16.mxu0 %v7192_v21  ;;  %v7227_v31 = vld [vmem:[#allocation5 + $0xa30] sm:$0xff]  ;;  %v7230_v21 = vld [vmem:[#allocation5 + $0xa48] sm:$0xff] }
0x11aa   :  { %7324 = vmatpush1.bf16.msra.mxu1 %v7189_v12  ;;  %7406 = vmatpush1.bf16.msra.mxu0 %v7191_v6  ;;  %v7232_v12 = vld [vmem:[#allocation5 + $0xa58] sm:$0xff]  ;;  %v7229_v6 = vld [vmem:[#allocation5 + $0xa40] sm:$0xff] }
0x11ab   :  { %7325 = vmatprep.subr.bf16.mxu1 %v7194_v18  ;;  %7407 = vmatprep.subr.bf16.mxu0 %v7196_v37  ;;  %v7231_v18 = vld [vmem:[#allocation5 + $0xa50] sm:$0xff]  ;;  %v7234_v37 = vld [vmem:[#allocation5 + $0xa68] sm:$0xff] }
0x11ae   :  { %7326 = vmatpush1.bf16.msra.mxu1 %v7193_v35  ;;  %7408 = vmatpush1.bf16.msra.mxu0 %v7195_v40  ;;  %v7236_v35 = vld [vmem:[#allocation5 + $0xa78] sm:$0xff]  ;;  %v7233_v40 = vld [vmem:[#allocation5 + $0xa60] sm:$0xff] }
0x11af   :  { %7327 = vmatprep.subr.bf16.mxu1 %v7198_v4  ;;  %7409 = vmatprep.subr.bf16.mxu0 %v7200_v9  ;;  %v7235_v4 = vld [vmem:[#allocation5 + $0xa70] sm:$0xff]  ;;  %v7238_v9 = vld [vmem:[#allocation5 + $0xa88] sm:$0xff] }
0x11b2   :  { %7328 = vmatpush1.bf16.msra.mxu1 %v7197_v63  ;;  %7410 = vmatpush1.bf16.msra.mxu0 %v7199_v54  ;;  %v7240_v63 = vld [vmem:[#allocation5 + $0xa98] sm:$0xff]  ;;  %v7237_v54 = vld [vmem:[#allocation5 + $0xa80] sm:$0xff] }
0x11b3   :  { %7329 = vmatprep.subr.bf16.mxu1 %v7202_v24  ;;  %7411 = vmatprep.subr.bf16.mxu0 %v7204_v28  ;;  %v7239_v24 = vld [vmem:[#allocation5 + $0xa90] sm:$0xff]  ;;  %v7242_v28 = vld [vmem:[#allocation5 + $0xaa8] sm:$0xff] }
0x11b6   :  { %7330 = vmatpush1.bf16.msra.mxu1 %v7201_v51  ;;  %7412 = vmatpush1.bf16.msra.mxu0 %v7203_v55  ;;  %v7244_v51 = vld [vmem:[#allocation5 + $0xab8] sm:$0xff]  ;;  %v7241_v55 = vld [vmem:[#allocation5 + $0xaa0] sm:$0xff] }
0x11b7   :  { %7331 = vmatprep.subr.bf16.mxu1 %v7206_v56  ;;  %7413 = vmatprep.subr.bf16.mxu0 %v7208_v33  ;;  %v7243_v56 = vld [vmem:[#allocation5 + $0xab0] sm:$0xff]  ;;  %v7246_v33 = vld [vmem:[#allocation5 + $0xac8] sm:$0xff] }
0x11ba   :  { %7332 = vmatpush1.bf16.msra.mxu1 %v7205_v38  ;;  %7414 = vmatpush1.bf16.msra.mxu0 %v7207_v14  ;;  %v7248_v38 = vld [vmem:[#allocation5 + $0xad8] sm:$0xff]  ;;  %v7245_v14 = vld [vmem:[#allocation5 + $0xac0] sm:$0xff] }
0x11bb   :  { %7333 = vmatprep.subr.bf16.mxu1 %v7210_v15  ;;  %7415 = vmatprep.subr.bf16.mxu0 %v7212_v62  ;;  %v7247_v15 = vld [vmem:[#allocation5 + $0xad0] sm:$0xff]  ;;  %v7250_v62 = vld [vmem:[#allocation5 + $0xae8] sm:$0xff] }
0x11be   :  { %7334 = vmatpush1.bf16.msra.mxu1 %v7209_v23  ;;  %7416 = vmatpush1.bf16.msra.mxu0 %v7211_v45  ;;  %v7252_v23 = vld [vmem:[#allocation5 + $0xaf8] sm:$0xff]  ;;  %v7249_v45 = vld [vmem:[#allocation5 + $0xae0] sm:$0xff] }
0x11bf   :  { %7335 = vmatprep.subr.bf16.mxu1 %v7214_v27  ;;  %7417 = vmatprep.subr.bf16.mxu0 %v7216_v59  ;;  %v7251_v27 = vld [vmem:[#allocation5 + $0xaf0] sm:$0xff]  ;;  %v7254_v59 = vld [vmem:[#allocation5 + $0xb08] sm:$0xff] }
0x11c2   :  { %7336 = vmatpush1.bf16.msra.mxu1 %v7213_v19  ;;  %7418 = vmatpush1.bf16.msra.mxu0 %v7215_v32  ;;  %v7256_v19 = vld [vmem:[#allocation5 + $0xb18] sm:$0xff]  ;;  %v7253_v32 = vld [vmem:[#allocation5 + $0xb00] sm:$0xff] }
0x11c3   :  { %7337 = vmatprep.subr.bf16.mxu1 %v7218_v50  ;;  %7419 = vmatprep.subr.bf16.mxu0 %v7220_v0  ;;  %v7255_v50 = vld [vmem:[#allocation5 + $0xb10] sm:$0xff]  ;;  %v7258_v0 = vld [vmem:[#allocation5 + $0xb28] sm:$0xff] }
0x11c6   :  { %7338 = vmatpush1.bf16.msra.mxu1 %v7217_v5  ;;  %7420 = vmatpush1.bf16.msra.mxu0 %v7219_v1  ;;  %v7260_v5 = vld [vmem:[#allocation5 + $0xb38] sm:$0xff]  ;;  %v7257_v1 = vld [vmem:[#allocation5 + $0xb20] sm:$0xff] }
0x11c7   :  { %7348 = vmatprep.subr.bf16.mxu1 %v7222_v13  ;;  %7430 = vmatprep.subr.bf16.mxu0 %v7224_v44  ;;  %v7259_v13 = vld [vmem:[#allocation5 + $0xb30] sm:$0xff]  ;;  %v7262_v44 = vld [vmem:[#allocation5 + $0xb48] sm:$0xff] }
0x125c   :  { %v7059_v43 = vpop.f32.mrb[132].mxu1  ;;  %v11029_v3 = vpop.f32.mrb[136].mxu0 }
0x125d   :  { %v8069_v46 = vadd.f32 %v7059_v43, %v6967_v10  ;;  %v7061_v57 = vpop.f32.mrb[133].mxu1  ;;  %v7143_v25 = vpop.f32.mrb[137].mxu0  ;;  %v7264_v10 = vld [vmem:[#allocation5 + $0xb58] sm:$0xff]  ;;  %v7266_v43 = vld [vmem:[#allocation5 + $0xb68] sm:$0xff] }
0x125e   :  { %v8070_v30 = vadd.f32 %v7061_v57, %v6971_v53  ;;  %v8072_v36 = vadd.f32 %v7143_v25, %v6979_v41  ;;  %v7063_v60 = vpop.f32.mrb[134].mxu1  ;;  %v7145_v29 = vpop.f32.mrb[138].mxu0  ;;  %v7261_v53 = vld [vmem:[#allocation5 + $0xb40] sm:$0xff]  ;;  %v7263_v41 = vld [vmem:[#allocation5 + $0xb50] sm:$0xff] }
0x125f   :  { %v7148_v39 = vmax.f32 %v8069_v46, 0.0  ;;  %v7064_v58 = vpop.f32.mrb[135].mxu1  ;;  %v7146_v16 = vpop.f32.mrb[139].mxu0  ;;  %v7268_v46 = vld [vmem:[#allocation5 + $0xb78] sm:$0xff]  ;;  %v7265_v57 = vld [vmem:[#allocation5 + $0xb60] sm:$0xff]  ;;  %v7267_v25 = vld [vmem:[#allocation5 + $0xb70] sm:$0xff] }
0x1260   :  { %v7149_v22 = vmax.f32 %v8070_v30, 0.0  ;;  %v7151_v8 = vmax.f32 %v8072_v36, 0.0  ;;  %v7270_v30 = vld [vmem:[#allocation5 + $0xb88] sm:$0xff]  ;;  %v7272_v36 = vld [vmem:[#allocation5 + $0xb98] sm:$0xff]  ;;  %v7269_v60 = vld [vmem:[#allocation5 + $0xb80] sm:$0xff]  ;;  %v6975_v16 = vrot.slane %v11021_v49, %v12213_v48 }
0x1261   :  { %v7152_v26 = vpack.c.bf16 %v7148_v39, %v7148_v39  ;;  %v7271_v29 = vld [vmem:[#allocation5 + $0xb90] sm:$0xff]  ;;  %v7274_v39 = vld [vmem:[#allocation5 + $0xba8] sm:$0xff]  ;;  %v7276_v58 = vld [vmem:[#allocation5 + $0xbb8] sm:$0xff] }
0x1262   :  { %v7153_v42 = vpack.c.bf16 %v7149_v22, %v7149_v22  ;;  %v7155_v11 = vpack.c.bf16 %v7151_v8, %v7151_v8  ;;  %v7273_v22 = vld [vmem:[#allocation5 + $0xba0] sm:$0xff]  ;;  %v7275_v8 = vld [vmem:[#allocation5 + $0xbb0] sm:$0xff] }
0x1263   :  { %v7281_v49 = vld [vmem:[#allocation5 + $0xbe0] sm:$0xff] }
0x1264   :  { %7339 = vmatprep.mubr.bf16.mxu1 %v7153_v42  ;;  %7421 = vmatprep.mubr.bf16.mxu0 %v7153_v42  ;;  %v7278_v42 = vld [vmem:[#allocation5 + $0xbc8] sm:$0xff] }
0x1265   :  { %7340 = vmatmul.mubr.bf16.vlgmr.msra.gmra.mrb[136].mxu1 %v7152_v26  ;;  %7422 = vmatmul.mubr.bf16.vlgmr.msra.gmra.mrb[140].mxu0 %v7152_v26  ;;  %v7280_v26 = vld [vmem:[#allocation5 + $0xbd8] sm:$0xff] }
0x1266   :  { %7349 = vmatpush1.bf16.msra.mxu1 %v7221_v17  ;;  %7431 = vmatpush1.bf16.msra.mxu0 %v7223_v20  ;;  %v8071_v17 = vadd.f32 %v11029_v3, %v6975_v16  ;;  %v7277_v20 = vld [vmem:[#allocation5 + $0xbc0] sm:$0xff] }
0x1267   :  { %7380 = vmatprep.mubr.bf16.mxu1 %v7155_v11  ;;  %7462 = vmatprep.mubr.bf16.mxu0 %v7155_v11  ;;  %v7279_v11 = vld [vmem:[#allocation5 + $0xbd0] sm:$0xff] }
0x1268   :  { %7350 = vmatprep.subr.bf16.mxu1 %v7226_v34  ;;  %7432 = vmatprep.subr.bf16.mxu0 %v7228_v61  ;;  %v7282_v34 = vld [vmem:[#allocation5 + $0xbe8] sm:$0xff]  ;;  %v7284_v61 = vld [vmem:[#allocation5 + $0xbf8] sm:$0xff] }
0x126a   :  { %7351 = vmatpush1.bf16.msra.mxu1 %v7225_v47  ;;  %7433 = vmatpush1.bf16.msra.mxu0 %v7227_v31  ;;  %v7150_v47 = vmax.f32 %v8071_v17, 0.0  ;;  %v7283_v31 = vld [vmem:[#allocation5 + $0xbf0] sm:$0xff] }
0x126b   :  { %7352 = vmatprep.subr.bf16.mxu1 %v7230_v21  ;;  %7434 = vmatprep.subr.bf16.mxu0 %v7232_v12  ;;  %v7285_v12 = vld [vmem:[#allocation19] sm:$0xf] }
0x126c   :  { %v7154_v21 = vpack.c.bf16 %v7150_v47, %v7150_v47  ;;  %v7290_v3 = vrot.slane %v7285_v12, %v12211_v7 }
0x126e   :  { %7353 = vmatpush1.bf16.msra.mxu1 %v7229_v6  ;;  %7435 = vmatpush1.bf16.msra.mxu0 %v7231_v18  ;;  %v7298_v6 = vrot.slane %v7285_v12, %v12213_v48  ;;  %v7475_v18 = vld [vmem:[#allocation21] sm:$0xf] }
0x126f   :  { %7354 = vmatprep.subr.bf16.mxu1 %v7234_v37  ;;  %7436 = vmatprep.subr.bf16.mxu0 %v7236_v35  ;;  %v7294_v37 = vrot.slane %v7285_v12, %v12212_v2  ;;  %v7302_v35 = vrot.slane %v7285_v12, %v12214_v52 }
0x1272   :  { %7355 = vmatpush1.bf16.msra.mxu1 %v7233_v40  ;;  %7437 = vmatpush1.bf16.msra.mxu0 %v7235_v4 }
0x1273   :  { %7356 = vmatprep.subr.bf16.mxu1 %v7238_v9  ;;  %7438 = vmatprep.subr.bf16.mxu0 %v7240_v63  ;;  %v7480_v63 = vrot.slane %v7475_v18, %v12211_v7  ;;  %v7492_v7 = vrot.slane %v7475_v18, %v12214_v52 }
0x1276   :  { %7357 = vmatpush1.bf16.msra.mxu1 %v7237_v54  ;;  %7439 = vmatpush1.bf16.msra.mxu0 %v7239_v24 }
0x1277   :  { %7358 = vmatprep.subr.bf16.mxu1 %v7242_v28  ;;  %7440 = vmatprep.subr.bf16.mxu0 %v7244_v51 }
0x127a   :  { %7359 = vmatpush1.bf16.msra.mxu1 %v7241_v55  ;;  %7441 = vmatpush1.bf16.msra.mxu0 %v7243_v56  ;;  %v7484_v55 = vrot.slane %v7475_v18, %v12212_v2 }
0x127b   :  { %7360 = vmatprep.subr.bf16.mxu1 %v7246_v33  ;;  %7442 = vmatprep.subr.bf16.mxu0 %v7248_v38 }
0x127e   :  { %7361 = vmatpush1.bf16.msra.mxu1 %v7245_v14  ;;  %7443 = vmatpush1.bf16.msra.mxu0 %v7247_v15 }
0x127f   :  { %7362 = vmatprep.subr.bf16.mxu1 %v7250_v62  ;;  %7444 = vmatprep.subr.bf16.mxu0 %v7252_v23 }
0x1282   :  { %7363 = vmatpush1.bf16.msra.mxu1 %v7249_v45  ;;  %7445 = vmatpush1.bf16.msra.mxu0 %v7251_v27  ;;  %v7488_v45 = vrot.slane %v7475_v18, %v12213_v48 }
0x1283   :  { %7364 = vmatprep.subr.bf16.mxu1 %v7254_v59  ;;  %7446 = vmatprep.subr.bf16.mxu0 %v7256_v19 }
0x1286   :  { %7365 = vmatpush1.bf16.msra.mxu1 %v7253_v32  ;;  %7447 = vmatpush1.bf16.msra.mxu0 %v7255_v50 }
0x1287   :  { %7366 = vmatprep.subr.bf16.mxu1 %v7258_v0  ;;  %7448 = vmatprep.subr.bf16.mxu0 %v7260_v5 }
0x128a   :  { %7367 = vmatpush1.bf16.msra.mxu1 %v7257_v1  ;;  %7449 = vmatpush1.bf16.msra.mxu0 %v7259_v13  ;;  %v7992_v13 = vld [vmem:[#allocation7] ss:$0 sm:$0xff] }
0x128b   :  { %7368 = vmatprep.subr.bf16.mxu1 %v7262_v44  ;;  %7450 = vmatprep.subr.bf16.mxu0 %v7264_v10 }
0x128e   :  { %7369 = vmatpush1.bf16.msra.mxu1 %v7261_v53  ;;  %7451 = vmatpush1.bf16.msra.mxu0 %v7263_v41 }
0x128f   :  { %7370 = vmatprep.subr.bf16.mxu1 %v7266_v43  ;;  %7452 = vmatprep.subr.bf16.mxu0 %v7268_v46 }
0x1292   :  { %7371 = vmatpush1.bf16.msra.mxu1 %v7265_v57  ;;  %7453 = vmatpush1.bf16.msra.mxu0 %v7267_v25 }
0x1293   :  { %7372 = vmatprep.subr.bf16.mxu1 %v7270_v30  ;;  %7454 = vmatprep.subr.bf16.mxu0 %v7272_v36 }
0x1296   :  { %7373 = vmatpush1.bf16.msra.mxu1 %v7269_v60  ;;  %7455 = vmatpush1.bf16.msra.mxu0 %v7271_v29 }
0x1297   :  { %7374 = vmatprep.subr.bf16.mxu1 %v7274_v39  ;;  %7456 = vmatprep.subr.bf16.mxu0 %v7276_v58 }
0x129a   :  { %7375 = vmatpush1.bf16.msra.mxu1 %v7273_v22  ;;  %7457 = vmatpush1.bf16.msra.mxu0 %v7275_v8 }
0x129b   :  { %7376 = vmatprep.subr.bf16.mxu1 %v7278_v42  ;;  %7458 = vmatprep.subr.bf16.mxu0 %v7280_v26 }
0x129e   :  { %7377 = vmatpush1.bf16.msra.mxu1 %v7277_v20  ;;  %7459 = vmatpush1.bf16.msra.mxu0 %v7279_v11 }
0x129f   :  { %7378 = vmatprep.subr.bf16.mxu1 %v7282_v34  ;;  %7460 = vmatprep.subr.bf16.mxu0 %v7284_v61 }
0x12a2   :  { %7379 = vmatpush1.bf16.msra.mxu1 %v7281_v49  ;;  %7461 = vmatpush1.bf16.msra.mxu0 %v7283_v31 }
0x12a5   :  { %7381 = vmatmul.mubr.bf16.vlgmr.msra.gmra.mrb[136].mxu1 %v7154_v21  ;;  %7463 = vmatmul.mubr.bf16.vlgmr.msra.gmra.mrb[140].mxu0 %v7154_v21 }
0x1378   :  { %v7382_v40 = vpop.f32.mrb[136].mxu1  ;;  %v7464_v4 = vpop.f32.mrb[140].mxu0 }
0x1379   :  { %v8073_v9 = vadd.f32 %v7382_v40, %v7290_v3  ;;  %v8075_v54 = vadd.f32 %v7464_v4, %v7298_v6  ;;  %v7384_v24 = vpop.f32.mrb[137].mxu1  ;;  %v7466_v28 = vpop.f32.mrb[141].mxu0 }
0x137a   :  { %v8074_v51 = vadd.f32 %v7384_v24, %v7294_v37  ;;  %v8076_v56 = vadd.f32 %v7466_v28, %v7302_v35  ;;  %v7386_v33 = vpop.f32.mrb[138].mxu1  ;;  %v7468_v38 = vpop.f32.mrb[142].mxu0 }
0x137b   :  { %v7471_v14 = vmax.f32 %v8073_v9, 0.0  ;;  %v7387_v15 = vpop.f32.mrb[139].mxu1  ;;  %v7469_v62 = vpop.f32.mrb[143].mxu0  ;;  %v7473_v23 = vmax.f32 %v8075_v54, 0.0 }
0x137c   :  { %v7472_v27 = vmax.f32 %v8074_v51, 0.0  ;;  %v7474_v32 = vmax.f32 %v8076_v56, 0.0 }
0x137d   :  { %v7497_v59 = vmul.f32 %v7480_v63, %v7471_v14  ;;  %v7499_v50 = vmul.f32 %v7488_v45, %v7473_v23 }
0x137e   :  { %v7498_v19 = vmul.f32 %v7484_v55, %v7472_v27  ;;  %v7500_v5 = vmul.f32 %v7492_v7, %v7474_v32 }
0x1380   :  { %v7501_v0 = vadd.f32 %v7498_v19, %v7497_v59 }
0x1382   :  { %v7502_v1 = vadd.f32 %v7501_v0, %v7499_v50 }
0x1384   :  { %v7503_v2 = vadd.f32 %v7502_v1, %v7500_v5 }
0x1386   :  { %7504 = vadd.xlane.f32.xlu0 %v7503_v2 }
0x1413   :  { %v7505_v44 = vpop.xlane.xlu0 %7504 }
0x1414   :  { %v7513_v10 = vadd.f32 %v7992_v13, %v7505_v44 }
0x1416   :  { %7515 = vst.msk [vmem:[%s11061_s16] sm:$0xff] %vm7514_vm1, %v7513_v10 }
0x1417   :  { %7520 = vsyncpa [#allocation9], 1 }
0x1418   :  { %7521 = vsyncpa [#allocation11], 1 }
0x1419   :  { %7522 = vsyncpa [#allocation14], 1 }
0x141a   :  { %7523 = vsyncpa [#allocation17], 1 }
0x141b   :  { %7524 = vsyncpa [#allocation20], 1 }
0x141c   :  { %7525 = vsyncmov [#allocation6] }
0x141f   :  { %s7526_s13 = vpop.sfrf %7525 }
0x1420   :  { %p7993_p2 = scmp.ne.s32.totalorder %s7526_s13, 0 }
0x1422   :  { %7530 = shalt.err (%p7993_p2)  }
0x1423   :  { %7532 = vsyncmov [#allocation6 + $0x1] }
0x1426   :  { %s7533_s7 = vpop.sfrf %7532 }
0x1427   :  { %p7994_p3 = scmp.ne.s32.totalorder %s7533_s7, 0 }
0x1429   :  { %7537 = shalt.err (%p7994_p3)  }
0x142a   :  { %7539 = vsyncmov [#allocation6 + $0x2] }
0x142d   :  { %s7540_s10 = vpop.sfrf %7539 }
0x142e   :  { %p7995_p4 = scmp.ne.s32.totalorder %s7540_s10, 0 }
0x1430   :  { %7544 = shalt.err (%p7995_p4)  }
0x1431   :  { %7546 = vsyncmov [#allocation6 + $0x3] }
0x1434   :  { %s7547_s0 = vpop.sfrf %7546 }
0x1435   :  { %p7996_p5 = scmp.ne.s32.totalorder %s7547_s0, 0 }
0x1437   :  { %7551 = shalt.err (%p7996_p5)  }

</bundles_post_ra>
